<compile_context>
chip_gen: v7x
topology: tpu7x:2x2x1
jax: 0.10.0
libtpu: 0.0.40
codegen_flags: <defaults>
</compile_context>

<pallas_src>
import numpy as np
import jax
import jax.numpy as jnp
from jax.experimental import pallas as pl
from jax.experimental.pallas import tpu as pltpu

# ---------------- configuration (matches module defaults) -------------------
N_HARM_XYZ = 6
N_HARM_DIR = 4
H_XYZ = 256            # n_hidden_neurons_xyz
H_DIR = 128            # n_hidden_neurons_dir
N_LAYERS_XYZ = 8
SKIP_LAYER = 5         # append_xyz = (5,)
EMB_XYZ = N_HARM_XYZ * 2 * 3 + 3   # 39
EMB_DIR = N_HARM_DIR * 2 * 3 + 3   # 27


# ---------------- plain-JAX glue --------------------------------------------
def harmonic_embedding(x, n_harmonics):
    """Same ordering as HarmonicEmbedding: [sin(x*f interleaved per coord), cos(...), x]."""
    freqs = 2.0 ** jnp.arange(n_harmonics, dtype=jnp.float32)
    embed = (x[..., None] * freqs).reshape(*x.shape[:-1], -1)
    return jnp.concatenate([jnp.sin(embed), jnp.cos(embed), x], axis=-1)


# ---------------- Pallas kernel ----------------------------------------------
def nerf_kernel(xe_ref, db_ref, dl_ref,
                w0sk_ref, b0_ref, wh_ref, bh_ref,
                wsk_y_ref, bsk_ref,
                wint_ref, bint_ref, wd_ref,
                wc1_f_ref, wc2_ref, bc2_ref,
                dens_ref, col_ref):
    f32 = jnp.float32

    def mm(x, w):
        # bf16 MXU matmul with f32 accumulation (weights already bf16).
        return jnp.dot(x.astype(jnp.bfloat16), w, preferred_element_type=f32)

    xe = xe_ref[...]                                    # (TM, 39) f32 harmonic xyz embedding

    # --- MLPWithInputSkips: 8 layers, ReLU, skip-concat at layer 5 ---
    # Fused K=39 pass: columns [:256] = layer-0, columns [256:] = skip-layer xe-branch.
    t = mm(xe, w0sk_ref[...])                           # (TM, 512) f32
    y = jax.nn.relu(t[:, :H_XYZ] + b0_ref[...])
    for j in range(4):                                  # layers 1..4
        y = jax.nn.relu(mm(y, wh_ref[j]) + bh_ref[j])
    # layer 5: concat((y, xe)) @ Wsk == y @ Wsk_y + xe @ Wsk_x   (exact split)
    y = jax.nn.relu(mm(y, wsk_y_ref[...]) + t[:, H_XYZ:] + bsk_ref[...])
    for j in (4, 5):                                    # layers 6, 7
        y = jax.nn.relu(mm(y, wh_ref[j]) + bh_ref[j])
    features = y                                        # (TM, 256) f32

    # --- density head: 256->1 on VPU/XLU (row-reduce), bias is hard-zero; ---
    # --- the 1 - exp(-delta * relu(raw)) transform runs on the idle EUP.   ---
    # TODO(synk): density_noise_std > 0 noise injection not implemented (module default is 0.0).
    sigma = jax.nn.relu(
        jnp.sum(features * wd_ref[...], axis=-1, keepdims=True))     # (TM, 1)
    dens_ref[...] = 1.0 - jnp.exp(-dl_ref[...] * sigma)

    # --- color head: intermediate_linear -> LinearWithRepeat -> ReLU -> Linear -> sigmoid ---
    # The direction half of LinearWithRepeat (de @ Wc1_dir + b_c1) is per-ray and
    # precomputed in the wrapper; db_ref holds it broadcast per point (bf16 stream).
    inter = mm(features, wint_ref[...]) + bint_ref[...]
    h = jax.nn.relu(mm(inter, wc1_f_ref[...]) + db_ref[...])
    col_ref[...] = jax.nn.sigmoid(mm(h, wc2_ref[...]) + bc2_ref[...])


def nerf_pallas(params, xe, dir_bias, deltas, *, tm=512):
    """Returns (densities, rgb): densities = 1 - exp(-delta * relu(density_layer(features)))."""
    M = xe.shape[0]
    Mp = pl.cdiv(M, tm) * tm
    if Mp != M:                                          # zero-pad the tail tile
        pad = Mp - M
        xe = jnp.pad(xe, ((0, pad), (0, 0)))
        dir_bias = jnp.pad(dir_bias, ((0, pad), (0, 0)))
        deltas = jnp.pad(deltas, ((0, pad), (0, 0)))
    grid = (Mp // tm,)

    bf = jnp.bfloat16
    # Matmul weights in bf16; biases and the density row-vector stay f32
    # (element-wise path is kept f32 — friendly to v5e's f32-only VPU/EUP).
    w0sk = jnp.concatenate([params["w0"], params["wsk_x"]], axis=1).astype(bf)   # (39, 512)
    weights = [
        w0sk, params["b0"],
        params["wh"].astype(bf), params["bh"],
        params["wsk_y"].astype(bf), params["bsk"],
        params["wint"].astype(bf), params["bint"],
        params["wd"].reshape(1, H_XYZ),                  # f32 row vector for VPU dot
        params["wc1_f"].astype(bf),
        params["wc2"].astype(bf), params["bc2"],
    ]

    def pt_spec(c):
        return pl.BlockSpec((tm, c), lambda i: (i, 0))

    def full_spec(arr):
        nd = arr.ndim
        return pl.BlockSpec(arr.shape, lambda i, nd=nd: (0,) * nd)

    in_specs = [pt_spec(EMB_XYZ), pt_spec(H_DIR), pt_spec(1)] + [full_spec(w) for w in weights]
    out_specs = (pt_spec(1), pt_spec(3))
    out_shape = (jax.ShapeDtypeStruct((Mp, 1), jnp.float32),
                 jax.ShapeDtypeStruct((Mp, 3), jnp.float32))

    flops_per_pt = 2 * (EMB_XYZ * 2 * H_XYZ              # fused layer 0 + skip xe-branch
                        + 6 * H_XYZ * H_XYZ              # layers 1-4, 6, 7
                        + H_XYZ * H_XYZ                  # skip layer (y branch)
                        + H_XYZ * H_XYZ                  # intermediate_linear
                        + H_XYZ * H_DIR                  # color layer 1 (feature half)
                        + H_DIR * 3                      # color layer 2
                        + H_XYZ)                         # density row-dot
    weight_bytes = sum(int(w.size) * w.dtype.itemsize for w in weights)
    cost = pl.CostEstimate(
        flops=int(flops_per_pt) * Mp,
        transcendentals=4 * Mp,                          # 3 sigmoid exps + 1 density exp
        bytes_accessed=Mp * (EMB_XYZ * 4 + H_DIR * 2 + 4 + 16) + weight_bytes,
    )

    dens, col = pl.pallas_call(
        nerf_kernel,
        grid=grid,
        in_specs=in_specs,
        out_specs=out_specs,
        out_shape=out_shape,
        compiler_params=pltpu.CompilerParams(
            dimension_semantics=("parallel",)),
        cost_estimate=cost,
    )(xe, dir_bias.astype(bf), deltas, *weights)
    return dens[:M], col[:M]


# ---------------- deterministic parameter init (xavier uniform) --------------
def init_params(key):
    ks = jax.random.split(key, 24)

    def xavier(k, fan_in, fan_out):
        bound = float(np.sqrt(6.0 / (fan_in + fan_out)))
        return jax.random.uniform(k, (fan_in, fan_out), jnp.float32, -bound, bound)

    def bias(k, fan_in, fan_out):
        bnd = float(1.0 / np.sqrt(fan_in))
        return jax.random.uniform(k, (1, fan_out), jnp.float32, -bnd, bnd)

    p = {}
    # mlp_xyz layer 0
    p["w0"] = xavier(ks[0], EMB_XYZ, H_XYZ)
    p["b0"] = bias(ks[1], EMB_XYZ, H_XYZ)
    # mlp_xyz layers 1..4, 6, 7 (all 256->256) stacked
    p["wh"] = jnp.stack([xavier(ks[2 + j], H_XYZ, H_XYZ) for j in range(6)])        # (6,256,256)
    p["bh"] = jnp.stack([bias(ks[8 + j], H_XYZ, H_XYZ) for j in range(6)])          # (6,1,256)
    # mlp_xyz layer 5 (skip layer: (256+39) -> 256), stored split
    wsk = xavier(ks[14], H_XYZ + EMB_XYZ, H_XYZ)
    p["wsk_y"] = wsk[:H_XYZ]
    p["wsk_x"] = wsk[H_XYZ:]
    p["bsk"] = bias(ks[15], H_XYZ + EMB_XYZ, H_XYZ)
    # intermediate_linear 256 -> 256
    p["wint"] = xavier(ks[16], H_XYZ, H_XYZ)
    p["bint"] = bias(ks[17], H_XYZ, H_XYZ)
    # density_layer 256 -> 1, bias forced to 0 (as in the module) -> bias dropped in kernel
    p["wd"] = xavier(ks[18], H_XYZ, 1)
    # color layer 0: LinearWithRepeat (256 + 27) -> 128, stored split
    wc1 = xavier(ks[19], H_XYZ + EMB_DIR, H_DIR)
    p["wc1_f"] = wc1[:H_XYZ]
    p["wc1_d"] = wc1[H_XYZ:]
    p["bc1"] = bias(ks[20], H_XYZ + EMB_DIR, H_DIR)
    # color layer 2: Linear 128 -> 3
    p["wc2"] = xavier(ks[21], H_DIR, 3)
    p["bc2"] = bias(ks[22], H_DIR, 3)
    return p


# ---------------- pure-JAX references ----------------------------------------
def reference_forward_f32(params, xe, de, deltas):
    """Exact f32 mirror of the PyTorch forward (with noise_std=0)."""
    y = jax.nn.relu(xe @ params["w0"] + params["b0"])
    for j in range(4):
        y = jax.nn.relu(y @ params["wh"][j] + params["bh"][j])
    y = jax.nn.relu(y @ params["wsk_y"] + xe @ params["wsk_x"] + params["bsk"])
    for j in (4, 5):
        y = jax.nn.relu(y @ params["wh"][j] + params["bh"][j])
    feats = y
    raw = feats @ params["wd"]                                    # density bias is zero
    dens = 1.0 - jnp.exp(-deltas * jax.nn.relu(raw))
    inter = feats @ params["wint"] + params["bint"]
    h = jax.nn.relu(inter @ params["wc1_f"] + de @ params["wc1_d"] + params["bc1"])
    col = jax.nn.sigmoid(h @ params["wc2"] + params["bc2"])
    return dens, col


def reference_forward_bf16(params, xe, dir_bias, deltas):
    """Same math as the kernel (bf16 matmul inputs, f32 accumulation, fused K=39 pass)."""
    bf = jnp.bfloat16

    def mm(x, w):
        return jnp.dot(x.astype(bf), w.astype(bf), preferred_element_type=jnp.float32)

    w0sk = jnp.concatenate([params["w0"], params["wsk_x"]], axis=1)
    t = mm(xe, w0sk)
    y = jax.nn.relu(t[:, :H_XYZ] + params["b0"])
    for j in range(4):
        y = jax.nn.relu(mm(y, params["wh"][j]) + params["bh"][j])
    y = jax.nn.relu(mm(y, params["wsk_y"]) + t[:, H_XYZ:] + params["bsk"])
    for j in (4, 5):
        y = jax.nn.relu(mm(y, params["wh"][j]) + params["bh"][j])
    feats = y
    sigma = jax.nn.relu(jnp.sum(feats * params["wd"].reshape(1, H_XYZ), axis=-1, keepdims=True))
    dens = 1.0 - jnp.exp(-deltas * sigma)
    inter = mm(feats, params["wint"]) + params["bint"]
    h = jax.nn.relu(mm(inter, params["wc1_f"]) + dir_bias.astype(bf))
    col = jax.nn.sigmoid(mm(h, params["wc2"]) + params["bc2"])
    return dens, col


# ---------------- main --------------------------------------------------------
if __name__ == "__main__":
    key = jax.random.PRNGKey(0)
    k_par, k_org, k_dir, k_len = jax.random.split(key, 4)

    # Small ray bundle: (batch, rays, 3) origins/directions, (batch, rays, P) lengths.
    B, R, P = 2, 16, 64
    M = B * R * P                 # 2048 points -> 4 tiles of 512 (pipelined; 2 steps/TC on v7x)
    TM = 512

    origins = jax.random.normal(k_org, (B, R, 3), jnp.float32)
    directions = jax.random.normal(k_dir, (B, R, 3), jnp.float32)
    lengths = jnp.sort(jax.random.uniform(k_len, (B, R, P), jnp.float32, 1.0, 5.0), axis=-1)

    params = init_params(k_par)

    # --- glue: ray_bundle_to_ray_points + embeddings (plain JAX) ---
    points = origins[..., None, :] + lengths[..., :, None] * directions[..., None, :]  # (B,R,P,3)
    xe = harmonic_embedding(points, N_HARM_XYZ).reshape(M, EMB_XYZ)                    # (M,39)

    dir_norm = directions / jnp.maximum(
        jnp.linalg.norm(directions, axis=-1, keepdims=True), 1e-12)
    de_ray = harmonic_embedding(dir_norm, N_HARM_DIR)                                  # (B,R,27)

    # Hoisted direction branch of LinearWithRepeat: per-ray bias, broadcast per point.
    dir_bias_ray = de_ray @ params["wc1_d"] + params["bc1"]                            # (B,R,128)
    dir_bias = jnp.broadcast_to(
        dir_bias_ray[:, :, None, :], (B, R, P, H_DIR)).reshape(M, H_DIR)

    # de only needed for the f32 reference
    de = jnp.broadcast_to(de_ray[:, :, None, :], (B, R, P, EMB_DIR)).reshape(M, EMB_DIR)

    deltas = jnp.concatenate(
        [lengths[..., 1:] - lengths[..., :-1],
         1e10 * jnp.ones_like(lengths[..., :1])], axis=-1).reshape(M, 1)

    # --- Pallas kernel: final densities + rgb in one pass ---
    dens_flat, col_flat = nerf_pallas(params, xe, dir_bias, deltas, tm=TM)
    dens_flat = jax.block_until_ready(dens_flat)
    col_flat = jax.block_until_ready(col_flat)

    rays_densities = dens_flat.reshape(B, R, P, 1)
    rays_colors = col_flat.reshape(B, R, P, 3)

    # --- correctness: tight check vs a bf16 reference (same math as the kernel) ---
    dens_ref_b, col_ref_b = reference_forward_bf16(params, xe, dir_bias, deltas)
    not_last = np.asarray(deltas).ravel() < 1e9         # exclude 1e10-delta points (exp step-fn)
    np.testing.assert_allclose(np.asarray(col_flat), np.asarray(col_ref_b), rtol=5e-3, atol=5e-3)
    np.testing.assert_allclose(np.asarray(dens_flat).ravel()[not_last],
                               np.asarray(dens_ref_b).ravel()[not_last], rtol=5e-3, atol=5e-3)
    d_all = np.asarray(dens_flat).ravel()
    assert np.all((d_all >= 0.0) & (d_all <= 1.0 + 1e-6))

    # --- sanity check vs the exact f32 reference (loose: bf16 matmuls) ---
    ref_dens, ref_col = reference_forward_f32(params, xe, de, deltas)
    np.testing.assert_allclose(np.asarray(col_flat), np.asarray(ref_col), rtol=5e-2, atol=5e-2)
    np.testing.assert_allclose(np.asarray(dens_flat).ravel()[not_last],
                               np.asarray(ref_dens).ravel()[not_last], rtol=1e-1, atol=1e-1)

    assert rays_densities.shape == (B, R, P, 1)
    assert rays_colors.shape == (B, R, P, 3)
    print("KERNEL_OK")
</pallas_src>

<mosaic_0001>
module attributes {stable_mosaic.version = 11 : i64} {
  func.func @nerf_kernel(%arg0: i32, %arg1: memref<512x39xf32, #tpu.memory_space<vmem>>, %arg2: memref<512x128xbf16, #tpu.memory_space<vmem>>, %arg3: memref<512x1xf32, #tpu.memory_space<vmem>>, %arg4: memref<39x512xbf16, #tpu.memory_space<vmem>>, %arg5: memref<1x256xf32, #tpu.memory_space<vmem>>, %arg6: memref<6x256x256xbf16, #tpu.memory_space<vmem>>, %arg7: memref<6x1x256xf32, #tpu.memory_space<vmem>>, %arg8: memref<256x256xbf16, #tpu.memory_space<vmem>>, %arg9: memref<1x256xf32, #tpu.memory_space<vmem>>, %arg10: memref<256x256xbf16, #tpu.memory_space<vmem>>, %arg11: memref<1x256xf32, #tpu.memory_space<vmem>>, %arg12: memref<1x256xf32, #tpu.memory_space<vmem>>, %arg13: memref<256x128xbf16, #tpu.memory_space<vmem>>, %arg14: memref<128x3xbf16, #tpu.memory_space<vmem>>, %arg15: memref<1x3xf32, #tpu.memory_space<vmem>>, %arg16: memref<512x1xf32, #tpu.memory_space<vmem>>, %arg17: memref<512x3xf32, #tpu.memory_space<vmem>>) attributes {dimension_semantics = [#tpu.dimension_semantics<parallel>], iteration_bounds = array<i64: 4>, scalar_prefetch = 0 : i64, scratch_operands = 0 : i64, tpu.core_type = #tpu.core_type<tc>, window_params = [{transform_indices = @transform_0, window_bounds = array<i64: 512, 39>}, {transform_indices = @transform_1, window_bounds = array<i64: 512, 128>}, {transform_indices = @transform_2, window_bounds = array<i64: 512, 1>}, {pipeline_mode = #tpu.pipeline_mode<synchronous>, transform_indices = @transform_3, window_bounds = array<i64: 39, 512>}, {pipeline_mode = #tpu.pipeline_mode<synchronous>, transform_indices = @transform_4, window_bounds = array<i64: 1, 256>}, {pipeline_mode = #tpu.pipeline_mode<synchronous>, transform_indices = @transform_5, window_bounds = array<i64: 6, 256, 256>}, {pipeline_mode = #tpu.pipeline_mode<synchronous>, transform_indices = @transform_6, window_bounds = array<i64: 6, 1, 256>}, {pipeline_mode = #tpu.pipeline_mode<synchronous>, transform_indices = @transform_7, window_bounds = array<i64: 256, 256>}, {pipeline_mode = #tpu.pipeline_mode<synchronous>, transform_indices = @transform_8, window_bounds = array<i64: 1, 256>}, {pipeline_mode = #tpu.pipeline_mode<synchronous>, transform_indices = @transform_9, window_bounds = array<i64: 256, 256>}, {pipeline_mode = #tpu.pipeline_mode<synchronous>, transform_indices = @transform_10, window_bounds = array<i64: 1, 256>}, {pipeline_mode = #tpu.pipeline_mode<synchronous>, transform_indices = @transform_11, window_bounds = array<i64: 1, 256>}, {pipeline_mode = #tpu.pipeline_mode<synchronous>, transform_indices = @transform_12, window_bounds = array<i64: 256, 128>}, {pipeline_mode = #tpu.pipeline_mode<synchronous>, transform_indices = @transform_13, window_bounds = array<i64: 128, 3>}, {pipeline_mode = #tpu.pipeline_mode<synchronous>, transform_indices = @transform_14, window_bounds = array<i64: 1, 3>}, {transform_indices = @transform_15, window_bounds = array<i64: 512, 1>}, {transform_indices = @transform_16, window_bounds = array<i64: 512, 3>}]} {
    %c0 = arith.constant 0 : index
    %c0_0 = arith.constant 0 : index
    %0 = vector.load %arg1[%c0, %c0_0] : memref<512x39xf32, #tpu.memory_space<vmem>>, vector<512x39xf32>
    %c0_1 = arith.constant 0 : index
    %c0_2 = arith.constant 0 : index
    %1 = vector.load %arg4[%c0_1, %c0_2] : memref<39x512xbf16, #tpu.memory_space<vmem>>, vector<39x512xbf16>
    %2 = arith.truncf %0 : vector<512x39xf32> to vector<512x39xbf16>
    %cst = arith.constant dense<0.000000e+00> : vector<512x512xf32>
    %3 = tpu.matmul %2, %1, %cst {dimension_numbers = #tpu.dot_dimension_numbers<[1], [0], [0], [1], [0, 0, 1, 1], [], []>} : vector<512x39xbf16>, vector<39x512xbf16>, vector<512x512xf32> -> vector<512x512xf32>
    %4 = vector.extract_strided_slice %3 {offsets = [0, 0], sizes = [512, 256], strides = [1, 1]} : vector<512x512xf32> to vector<512x256xf32>
    %c0_3 = arith.constant 0 : index
    %c0_4 = arith.constant 0 : index
    %5 = vector.load %arg5[%c0_3, %c0_4] : memref<1x256xf32, #tpu.memory_space<vmem>>, vector<1x256xf32>
    %6 = vector.broadcast %5 : vector<1x256xf32> to vector<512x256xf32>
    %7 = arith.addf %4, %6 : vector<512x256xf32>
    %cst_5 = arith.constant 0.000000e+00 : f32
    %8 = vector.broadcast %cst_5 : f32 to vector<512x256xf32>
    %9 = arith.maximumf %7, %8 : vector<512x256xf32>
    %c0_6 = arith.constant 0 : index
    %c0_7 = arith.constant 0 : index
    %c0_8 = arith.constant 0 : index
    %10 = vector.load %arg6[%c0_6, %c0_7, %c0_8] : memref<6x256x256xbf16, #tpu.memory_space<vmem>>, vector<1x256x256xbf16>
    %11 = vector.shape_cast %10 : vector<1x256x256xbf16> to vector<256x256xbf16>
    %12 = arith.truncf %9 : vector<512x256xf32> to vector<512x256xbf16>
    %cst_9 = arith.constant dense<0.000000e+00> : vector<512x256xf32>
    %13 = tpu.matmul %12, %11, %cst_9 {dimension_numbers = #tpu.dot_dimension_numbers<[1], [0], [0], [1], [0, 0, 1, 1], [], []>} : vector<512x256xbf16>, vector<256x256xbf16>, vector<512x256xf32> -> vector<512x256xf32>
    %c0_10 = arith.constant 0 : index
    %c0_11 = arith.constant 0 : index
    %c0_12 = arith.constant 0 : index
    %14 = vector.load %arg7[%c0_10, %c0_11, %c0_12] : memref<6x1x256xf32, #tpu.memory_space<vmem>>, vector<1x1x256xf32>
    %15 = vector.shape_cast %14 : vector<1x1x256xf32> to vector<1x256xf32>
    %16 = vector.broadcast %15 : vector<1x256xf32> to vector<512x256xf32>
    %17 = arith.addf %13, %16 : vector<512x256xf32>
    %cst_13 = arith.constant 0.000000e+00 : f32
    %18 = vector.broadcast %cst_13 : f32 to vector<512x256xf32>
    %19 = arith.maximumf %17, %18 : vector<512x256xf32>
    %c1 = arith.constant 1 : index
    %c0_14 = arith.constant 0 : index
    %c0_15 = arith.constant 0 : index
    %20 = vector.load %arg6[%c1, %c0_14, %c0_15] : memref<6x256x256xbf16, #tpu.memory_space<vmem>>, vector<1x256x256xbf16>
    %21 = vector.shape_cast %20 : vector<1x256x256xbf16> to vector<256x256xbf16>
    %22 = arith.truncf %19 : vector<512x256xf32> to vector<512x256xbf16>
    %cst_16 = arith.constant dense<0.000000e+00> : vector<512x256xf32>
    %23 = tpu.matmul %22, %21, %cst_16 {dimension_numbers = #tpu.dot_dimension_numbers<[1], [0], [0], [1], [0, 0, 1, 1], [], []>} : vector<512x256xbf16>, vector<256x256xbf16>, vector<512x256xf32> -> vector<512x256xf32>
    %c1_17 = arith.constant 1 : index
    %c0_18 = arith.constant 0 : index
    %c0_19 = arith.constant 0 : index
    %24 = vector.load %arg7[%c1_17, %c0_18, %c0_19] : memref<6x1x256xf32, #tpu.memory_space<vmem>>, vector<1x1x256xf32>
    %25 = vector.shape_cast %24 : vector<1x1x256xf32> to vector<1x256xf32>
    %26 = vector.broadcast %25 : vector<1x256xf32> to vector<512x256xf32>
    %27 = arith.addf %23, %26 : vector<512x256xf32>
    %cst_20 = arith.constant 0.000000e+00 : f32
    %28 = vector.broadcast %cst_20 : f32 to vector<512x256xf32>
    %29 = arith.maximumf %27, %28 : vector<512x256xf32>
    %c2 = arith.constant 2 : index
    %c0_21 = arith.constant 0 : index
    %c0_22 = arith.constant 0 : index
    %30 = vector.load %arg6[%c2, %c0_21, %c0_22] : memref<6x256x256xbf16, #tpu.memory_space<vmem>>, vector<1x256x256xbf16>
    %31 = vector.shape_cast %30 : vector<1x256x256xbf16> to vector<256x256xbf16>
    %32 = arith.truncf %29 : vector<512x256xf32> to vector<512x256xbf16>
    %cst_23 = arith.constant dense<0.000000e+00> : vector<512x256xf32>
    %33 = tpu.matmul %32, %31, %cst_23 {dimension_numbers = #tpu.dot_dimension_numbers<[1], [0], [0], [1], [0, 0, 1, 1], [], []>} : vector<512x256xbf16>, vector<256x256xbf16>, vector<512x256xf32> -> vector<512x256xf32>
    %c2_24 = arith.constant 2 : index
    %c0_25 = arith.constant 0 : index
    %c0_26 = arith.constant 0 : index
    %34 = vector.load %arg7[%c2_24, %c0_25, %c0_26] : memref<6x1x256xf32, #tpu.memory_space<vmem>>, vector<1x1x256xf32>
    %35 = vector.shape_cast %34 : vector<1x1x256xf32> to vector<1x256xf32>
    %36 = vector.broadcast %35 : vector<1x256xf32> to vector<512x256xf32>
    %37 = arith.addf %33, %36 : vector<512x256xf32>
    %cst_27 = arith.constant 0.000000e+00 : f32
    %38 = vector.broadcast %cst_27 : f32 to vector<512x256xf32>
    %39 = arith.maximumf %37, %38 : vector<512x256xf32>
    %c3 = arith.constant 3 : index
    %c0_28 = arith.constant 0 : index
    %c0_29 = arith.constant 0 : index
    %40 = vector.load %arg6[%c3, %c0_28, %c0_29] : memref<6x256x256xbf16, #tpu.memory_space<vmem>>, vector<1x256x256xbf16>
    %41 = vector.shape_cast %40 : vector<1x256x256xbf16> to vector<256x256xbf16>
    %42 = arith.truncf %39 : vector<512x256xf32> to vector<512x256xbf16>
    %cst_30 = arith.constant dense<0.000000e+00> : vector<512x256xf32>
    %43 = tpu.matmul %42, %41, %cst_30 {dimension_numbers = #tpu.dot_dimension_numbers<[1], [0], [0], [1], [0, 0, 1, 1], [], []>} : vector<512x256xbf16>, vector<256x256xbf16>, vector<512x256xf32> -> vector<512x256xf32>
    %c3_31 = arith.constant 3 : index
    %c0_32 = arith.constant 0 : index
    %c0_33 = arith.constant 0 : index
    %44 = vector.load %arg7[%c3_31, %c0_32, %c0_33] : memref<6x1x256xf32, #tpu.memory_space<vmem>>, vector<1x1x256xf32>
    %45 = vector.shape_cast %44 : vector<1x1x256xf32> to vector<1x256xf32>
    %46 = vector.broadcast %45 : vector<1x256xf32> to vector<512x256xf32>
    %47 = arith.addf %43, %46 : vector<512x256xf32>
    %cst_34 = arith.constant 0.000000e+00 : f32
    %48 = vector.broadcast %cst_34 : f32 to vector<512x256xf32>
    %49 = arith.maximumf %47, %48 : vector<512x256xf32>
    %c0_35 = arith.constant 0 : index
    %c0_36 = arith.constant 0 : index
    %50 = vector.load %arg8[%c0_35, %c0_36] : memref<256x256xbf16, #tpu.memory_space<vmem>>, vector<256x256xbf16>
    %51 = arith.truncf %49 : vector<512x256xf32> to vector<512x256xbf16>
    %cst_37 = arith.constant dense<0.000000e+00> : vector<512x256xf32>
    %52 = tpu.matmul %51, %50, %cst_37 {dimension_numbers = #tpu.dot_dimension_numbers<[1], [0], [0], [1], [0, 0, 1, 1], [], []>} : vector<512x256xbf16>, vector<256x256xbf16>, vector<512x256xf32> -> vector<512x256xf32>
    %53 = vector.extract_strided_slice %3 {offsets = [0, 256], sizes = [512, 256], strides = [1, 1]} : vector<512x512xf32> to vector<512x256xf32>
    %54 = arith.addf %52, %53 : vector<512x256xf32>
    %c0_38 = arith.constant 0 : index
    %c0_39 = arith.constant 0 : index
    %55 = vector.load %arg9[%c0_38, %c0_39] : memref<1x256xf32, #tpu.memory_space<vmem>>, vector<1x256xf32>
    %56 = vector.broadcast %55 : vector<1x256xf32> to vector<512x256xf32>
    %57 = arith.addf %54, %56 : vector<512x256xf32>
    %cst_40 = arith.constant 0.000000e+00 : f32
    %58 = vector.broadcast %cst_40 : f32 to vector<512x256xf32>
    %59 = arith.maximumf %57, %58 : vector<512x256xf32>
    %c4 = arith.constant 4 : index
    %c0_41 = arith.constant 0 : index
    %c0_42 = arith.constant 0 : index
    %60 = vector.load %arg6[%c4, %c0_41, %c0_42] : memref<6x256x256xbf16, #tpu.memory_space<vmem>>, vector<1x256x256xbf16>
    %61 = vector.shape_cast %60 : vector<1x256x256xbf16> to vector<256x256xbf16>
    %62 = arith.truncf %59 : vector<512x256xf32> to vector<512x256xbf16>
    %cst_43 = arith.constant dense<0.000000e+00> : vector<512x256xf32>
    %63 = tpu.matmul %62, %61, %cst_43 {dimension_numbers = #tpu.dot_dimension_numbers<[1], [0], [0], [1], [0, 0, 1, 1], [], []>} : vector<512x256xbf16>, vector<256x256xbf16>, vector<512x256xf32> -> vector<512x256xf32>
    %c4_44 = arith.constant 4 : index
    %c0_45 = arith.constant 0 : index
    %c0_46 = arith.constant 0 : index
    %64 = vector.load %arg7[%c4_44, %c0_45, %c0_46] : memref<6x1x256xf32, #tpu.memory_space<vmem>>, vector<1x1x256xf32>
    %65 = vector.shape_cast %64 : vector<1x1x256xf32> to vector<1x256xf32>
    %66 = vector.broadcast %65 : vector<1x256xf32> to vector<512x256xf32>
    %67 = arith.addf %63, %66 : vector<512x256xf32>
    %cst_47 = arith.constant 0.000000e+00 : f32
    %68 = vector.broadcast %cst_47 : f32 to vector<512x256xf32>
    %69 = arith.maximumf %67, %68 : vector<512x256xf32>
    %c5 = arith.constant 5 : index
    %c0_48 = arith.constant 0 : index
    %c0_49 = arith.constant 0 : index
    %70 = vector.load %arg6[%c5, %c0_48, %c0_49] : memref<6x256x256xbf16, #tpu.memory_space<vmem>>, vector<1x256x256xbf16>
    %71 = vector.shape_cast %70 : vector<1x256x256xbf16> to vector<256x256xbf16>
    %72 = arith.truncf %69 : vector<512x256xf32> to vector<512x256xbf16>
    %cst_50 = arith.constant dense<0.000000e+00> : vector<512x256xf32>
    %73 = tpu.matmul %72, %71, %cst_50 {dimension_numbers = #tpu.dot_dimension_numbers<[1], [0], [0], [1], [0, 0, 1, 1], [], []>} : vector<512x256xbf16>, vector<256x256xbf16>, vector<512x256xf32> -> vector<512x256xf32>
    %c5_51 = arith.constant 5 : index
    %c0_52 = arith.constant 0 : index
    %c0_53 = arith.constant 0 : index
    %74 = vector.load %arg7[%c5_51, %c0_52, %c0_53] : memref<6x1x256xf32, #tpu.memory_space<vmem>>, vector<1x1x256xf32>
    %75 = vector.shape_cast %74 : vector<1x1x256xf32> to vector<1x256xf32>
    %76 = vector.broadcast %75 : vector<1x256xf32> to vector<512x256xf32>
    %77 = arith.addf %73, %76 : vector<512x256xf32>
    %cst_54 = arith.constant 0.000000e+00 : f32
    %78 = vector.broadcast %cst_54 : f32 to vector<512x256xf32>
    %79 = arith.maximumf %77, %78 : vector<512x256xf32>
    %c0_55 = arith.constant 0 : index
    %c0_56 = arith.constant 0 : index
    %80 = vector.load %arg12[%c0_55, %c0_56] : memref<1x256xf32, #tpu.memory_space<vmem>>, vector<1x256xf32>
    %81 = vector.broadcast %80 : vector<1x256xf32> to vector<512x256xf32>
    %82 = arith.mulf %79, %81 : vector<512x256xf32>
    %cst_57 = arith.constant dense<0.000000e+00> : vector<512xf32>
    %83 = vector.multi_reduction <add>, %82, %cst_57 [1] : vector<512x256xf32> to vector<512xf32>
    %84 = vector.shape_cast %83 : vector<512xf32> to vector<512x1xf32>
    %cst_58 = arith.constant 0.000000e+00 : f32
    %85 = vector.broadcast %cst_58 : f32 to vector<512x1xf32>
    %86 = arith.maximumf %84, %85 : vector<512x1xf32>
    %c0_59 = arith.constant 0 : index
    %c0_60 = arith.constant 0 : index
    %87 = vector.load %arg3[%c0_59, %c0_60] : memref<512x1xf32, #tpu.memory_space<vmem>>, vector<512x1xf32>
    %cst_61 = arith.constant 0.000000e+00 : f32
    %88 = vector.broadcast %cst_61 : f32 to vector<512x1xf32>
    %89 = arith.subf %88, %87 : vector<512x1xf32>
    %90 = arith.mulf %89, %86 : vector<512x1xf32>
    %91 = math.exp %90 : vector<512x1xf32>
    %cst_62 = arith.constant 1.000000e+00 : f32
    %92 = vector.broadcast %cst_62 : f32 to vector<512x1xf32>
    %93 = arith.subf %92, %91 : vector<512x1xf32>
    %c0_63 = arith.constant 0 : index
    %c0_64 = arith.constant 0 : index
    %94 = vector.load %arg16[%c0_63, %c0_64] : memref<512x1xf32, #tpu.memory_space<vmem>>, vector<512x1xf32>
    tpu.vector_store %arg16[%c0_63, %c0_64], %93 {strides = array<i32>} : memref<512x1xf32, #tpu.memory_space<vmem>>, vector<512x1xf32>,
    %c0_65 = arith.constant 0 : index
    %c0_66 = arith.constant 0 : index
    %95 = vector.load %arg10[%c0_65, %c0_66] : memref<256x256xbf16, #tpu.memory_space<vmem>>, vector<256x256xbf16>
    %96 = arith.truncf %79 : vector<512x256xf32> to vector<512x256xbf16>
    %cst_67 = arith.constant dense<0.000000e+00> : vector<512x256xf32>
    %97 = tpu.matmul %96, %95, %cst_67 {dimension_numbers = #tpu.dot_dimension_numbers<[1], [0], [0], [1], [0, 0, 1, 1], [], []>} : vector<512x256xbf16>, vector<256x256xbf16>, vector<512x256xf32> -> vector<512x256xf32>
    %c0_68 = arith.constant 0 : index
    %c0_69 = arith.constant 0 : index
    %98 = vector.load %arg11[%c0_68, %c0_69] : memref<1x256xf32, #tpu.memory_space<vmem>>, vector<1x256xf32>
    %99 = vector.broadcast %98 : vector<1x256xf32> to vector<512x256xf32>
    %100 = arith.addf %97, %99 : vector<512x256xf32>
    %c0_70 = arith.constant 0 : index
    %c0_71 = arith.constant 0 : index
    %101 = vector.load %arg13[%c0_70, %c0_71] : memref<256x128xbf16, #tpu.memory_space<vmem>>, vector<256x128xbf16>
    %102 = arith.truncf %100 : vector<512x256xf32> to vector<512x256xbf16>
    %cst_72 = arith.constant dense<0.000000e+00> : vector<512x128xf32>
    %103 = tpu.matmul %102, %101, %cst_72 {dimension_numbers = #tpu.dot_dimension_numbers<[1], [0], [0], [1], [0, 0, 1, 1], [], []>} : vector<512x256xbf16>, vector<256x128xbf16>, vector<512x128xf32> -> vector<512x128xf32>
    %c0_73 = arith.constant 0 : index
    %c0_74 = arith.constant 0 : index
    %104 = vector.load %arg2[%c0_73, %c0_74] : memref<512x128xbf16, #tpu.memory_space<vmem>>, vector<512x128xbf16>
    %105 = arith.extf %104 : vector<512x128xbf16> to vector<512x128xf32>
    %106 = arith.addf %103, %105 : vector<512x128xf32>
    %cst_75 = arith.constant 0.000000e+00 : f32
    %107 = vector.broadcast %cst_75 : f32 to vector<512x128xf32>
    %108 = arith.maximumf %106, %107 : vector<512x128xf32>
    %c0_76 = arith.constant 0 : index
    %c0_77 = arith.constant 0 : index
    %109 = vector.load %arg14[%c0_76, %c0_77] : memref<128x3xbf16, #tpu.memory_space<vmem>>, vector<128x3xbf16>
    %110 = arith.truncf %108 : vector<512x128xf32> to vector<512x128xbf16>
    %cst_78 = arith.constant dense<0.000000e+00> : vector<512x3xf32>
    %111 = tpu.matmul %110, %109, %cst_78 {dimension_numbers = #tpu.dot_dimension_numbers<[1], [0], [0], [1], [0, 0, 1, 1], [], []>} : vector<512x128xbf16>, vector<128x3xbf16>, vector<512x3xf32> -> vector<512x3xf32>
    %c0_79 = arith.constant 0 : index
    %c0_80 = arith.constant 0 : index
    %112 = vector.load %arg15[%c0_79, %c0_80] : memref<1x3xf32, #tpu.memory_space<vmem>>, vector<1x3xf32>
    %113 = vector.broadcast %112 : vector<1x3xf32> to vector<512x3xf32>
    %114 = arith.addf %111, %113 : vector<512x3xf32>
    %115 = arith.negf %114 : vector<512x3xf32>
    %116 = math.exp %115 : vector<512x3xf32>
    %cst_81 = arith.constant 1.000000e+00 : f32
    %117 = vector.broadcast %cst_81 : f32 to vector<512x3xf32>
    %118 = arith.addf %117, %116 : vector<512x3xf32>
    %119 = arith.divf %117, %118 : vector<512x3xf32>
    %c0_82 = arith.constant 0 : index
    %c0_83 = arith.constant 0 : index
    %120 = vector.load %arg17[%c0_82, %c0_83] : memref<512x3xf32, #tpu.memory_space<vmem>>, vector<512x3xf32>
    tpu.vector_store %arg17[%c0_82, %c0_83], %119 {strides = array<i32>} : memref<512x3xf32, #tpu.memory_space<vmem>>, vector<512x3xf32>,
    return
  }
  func.func @transform_0(%arg0: i32) -> (i32, i32) {
    %c0_i32 = arith.constant 0 : i32
    %c0_i32_0 = arith.constant 0 : i32
    return %arg0, %c0_i32 : i32, i32
  }
  func.func @transform_1(%arg0: i32) -> (i32, i32) {
    %c0_i32 = arith.constant 0 : i32
    %c0_i32_0 = arith.constant 0 : i32
    return %arg0, %c0_i32 : i32, i32
  }
  func.func @transform_2(%arg0: i32) -> (i32, i32) {
    %c0_i32 = arith.constant 0 : i32
    %c0_i32_0 = arith.constant 0 : i32
    return %arg0, %c0_i32 : i32, i32
  }
  func.func @transform_3(%arg0: i32) -> (i32, i32) {
    %c0_i32 = arith.constant 0 : i32
    %c0_i32_0 = arith.constant 0 : i32
    %c0_i32_1 = arith.constant 0 : i32
    return %c0_i32, %c0_i32_0 : i32, i32
  }
  func.func @transform_4(%arg0: i32) -> (i32, i32) {
    %c0_i32 = arith.constant 0 : i32
    %c0_i32_0 = arith.constant 0 : i32
    %c0_i32_1 = arith.constant 0 : i32
    return %c0_i32, %c0_i32_0 : i32, i32
  }
  func.func @transform_5(%arg0: i32) -> (i32, i32, i32) {
    %c0_i32 = arith.constant 0 : i32
    %c0_i32_0 = arith.constant 0 : i32
    %c0_i32_1 = arith.constant 0 : i32
    %c0_i32_2 = arith.constant 0 : i32
    return %c0_i32, %c0_i32_0, %c0_i32_1 : i32, i32, i32
  }
  func.func @transform_6(%arg0: i32) -> (i32, i32, i32) {
    %c0_i32 = arith.constant 0 : i32
    %c0_i32_0 = arith.constant 0 : i32
    %c0_i32_1 = arith.constant 0 : i32
    %c0_i32_2 = arith.constant 0 : i32
    return %c0_i32, %c0_i32_0, %c0_i32_1 : i32, i32, i32
  }
  func.func @transform_7(%arg0: i32) -> (i32, i32) {
    %c0_i32 = arith.constant 0 : i32
    %c0_i32_0 = arith.constant 0 : i32
    %c0_i32_1 = arith.constant 0 : i32
    return %c0_i32, %c0_i32_0 : i32, i32
  }
  func.func @transform_8(%arg0: i32) -> (i32, i32) {
    %c0_i32 = arith.constant 0 : i32
    %c0_i32_0 = arith.constant 0 : i32
    %c0_i32_1 = arith.constant 0 : i32
    return %c0_i32, %c0_i32_0 : i32, i32
  }
  func.func @transform_9(%arg0: i32) -> (i32, i32) {
    %c0_i32 = arith.constant 0 : i32
    %c0_i32_0 = arith.constant 0 : i32
    %c0_i32_1 = arith.constant 0 : i32
    return %c0_i32, %c0_i32_0 : i32, i32
  }
  func.func @transform_10(%arg0: i32) -> (i32, i32) {
    %c0_i32 = arith.constant 0 : i32
    %c0_i32_0 = arith.constant 0 : i32
    %c0_i32_1 = arith.constant 0 : i32
    return %c0_i32, %c0_i32_0 : i32, i32
  }
  func.func @transform_11(%arg0: i32) -> (i32, i32) {
    %c0_i32 = arith.constant 0 : i32
    %c0_i32_0 = arith.constant 0 : i32
    %c0_i32_1 = arith.constant 0 : i32
    return %c0_i32, %c0_i32_0 : i32, i32
  }
  func.func @transform_12(%arg0: i32) -> (i32, i32) {
    %c0_i32 = arith.constant 0 : i32
    %c0_i32_0 = arith.constant 0 : i32
    %c0_i32_1 = arith.constant 0 : i32
    return %c0_i32, %c0_i32_0 : i32, i32
  }
  func.func @transform_13(%arg0: i32) -> (i32, i32) {
    %c0_i32 = arith.constant 0 : i32
    %c0_i32_0 = arith.constant 0 : i32
    %c0_i32_1 = arith.constant 0 : i32
    return %c0_i32, %c0_i32_0 : i32, i32
  }
  func.func @transform_14(%arg0: i32) -> (i32, i32) {
    %c0_i32 = arith.constant 0 : i32
    %c0_i32_0 = arith.constant 0 : i32
    %c0_i32_1 = arith.constant 0 : i32
    return %c0_i32, %c0_i32_0 : i32, i32
  }
  func.func @transform_15(%arg0: i32) -> (i32, i32) {
    %c0_i32 = arith.constant 0 : i32
    %c0_i32_0 = arith.constant 0 : i32
    return %arg0, %c0_i32 : i32, i32
  }
  func.func @transform_16(%arg0: i32) -> (i32, i32) {
    %c0_i32 = arith.constant 0 : i32
    %c0_i32_0 = arith.constant 0 : i32
    return %arg0, %c0_i32 : i32, i32
  }
}

</mosaic_0001>

<bundles_post_ra>
// kernel: tpu_custom_call.1
= control target key start
LH: loop header
LB: loop body
LE: loop exit
PB: predicated region body
PF: predicated region fallthrough
CT: control target
= control target key end

     0   :  { %s12232_s21 = smov 0   ;;  %s15746_s0 = inlined_call_operand.vmem [shape: f32[2048,39], index: 0, kind: input, shape index: {}]   ;;  %s15747_s1 = inlined_call_operand.vmem [shape: bf16[2048,128], index: 1, kind: input, shape index: {}]   ;;  %s15748_s2 = inlined_call_operand.vmem [shape: f32[2048,1], index: 2, kind: input, shape index: {}]   ;;  %s15749_s3 = inlined_call_operand.vmem [shape: bf16[39,512], index: 3, kind: input, shape index: {}]   ;;  %s15750_s4 = inlined_call_operand.vmem [shape: f32[1,256], index: 4, kind: input, shape index: {}]   ;;  %s15751_s5 = inlined_call_operand.vmem [shape: bf16[6,256,256], index: 5, kind: input, shape index: {}]   ;;  %s15752_s6 = inlined_call_operand.vmem [shape: f32[6,1,256], index: 6, kind: input, shape index: {}]   ;;  %s15753_s7 = inlined_call_operand.vmem [shape: bf16[256,256], index: 7, kind: input, shape index: {}]   ;;  %s15754_s8 = inlined_call_operand.vmem [shape: f32[1,256], index: 8, kind: input, shape index: {}]   ;;  %s15755_s9 = inlined_call_operand.vmem [shape: bf16[256,256], index: 9, kind: input, shape index: {}]   ;;  %s15756_s10 = inlined_call_operand.vmem [shape: f32[1,256], index: 10, kind: input, shape index: {}]   ;;  %s15757_s11 = inlined_call_operand.vmem [shape: f32[1,256], index: 11, kind: input, shape index: {}]   ;;  %s15758_s12 = inlined_call_operand.vmem [shape: bf16[256,128], index: 12, kind: input, shape index: {}]   ;;  %s15759_s13 = inlined_call_operand.vmem [shape: bf16[128,3], index: 13, kind: input, shape index: {}]   ;;  %s15760_s14 = inlined_call_operand.vmem [shape: f32[1,3], index: 14, kind: input, shape index: {}]   ;;  %s15761_s15 = inlined_call_operand.vmem [shape: f32[2048,1], index: 15, kind: output, shape index: {0}]   ;;  %s15762_s16 = inlined_call_operand.vmem [shape: f32[2048,3], index: 16, kind: output, shape index: {1}]  }
   0x1   :  { %15763 = sst [smem:[#allocation2_spill]] %s15746_s0 }
   0x2 LB: > { %s10302_s22 = sadd.s32 4294967295, %s12143_s21   ;;  %p10306_p0 = scmp.ge.s32.totalorder %s12143_s21, 1  ;;  %s12143_s21 = sphi %s12232_s21, %s27_s21  }
   0x3   : > { %p488_p1 = scmp.lt.s32.totalorder %s12143_s21, 5 }
   0x5   : > { %p489_p2 = pnand %p10306_p0, %p488_p1 }
   0x6   : > { %v11328_v0 = vld [vmem:[%s15749_s3 + $0x4] ss:$16 sps:$4 sm:$0xff] (!%p489_p2)   ;;  %vm837_vm0 = vcmask (!%p489_p2), 1042432   ;;  %vm838_vm1 = vcmask (!%p489_p2), 1043456   ;;  %v11330_v1 = vld [vmem:[%s15749_s3] ss:$16 sps:$4 sm:$0xff] (!%p489_p2)  }
   0x7   : > { %492 = sbr.rel (%p489_p2) target bundleno = 2801 (0xaf1), region = 80  ;;  %853 = vmatprep.subr.bf16.mxu0 (!%p489_p2), %v11328_v0  ;;  %v11331_v2 = vld [vmem:[%s15749_s3 + $0x24] ss:$16 sps:$4 sm:$0xff] (!%p489_p2)   ;;  %v11333_v3 = vld [vmem:[%s15749_s3 + $0x20] ss:$16 sps:$4 sm:$0xff] (!%p489_p2)   ;;  %v12145_v5 = vmov (!%p489_p2), 65535   ;;  %11184 = vmatprep.subr.bf16.mxu1 (!%p489_p2), %v11328_v0 }
   0x8   : > { %v656_v4 = vld [vmem:[%s15749_s3 + $0x40] sm:$0xff] (!%p489_p2)  ;;  %v839_v6 = vsel (!%p489_p2), %vm837_vm0, 4294967295, %v12145_v5  ;;  %v12146_v7 = vmov (!%p489_p2), 0   ;;  %854 = vmatpush1.bf16.msra.mxu0 (!%p489_p2), %v11330_v1  ;;  %s10307_s18 = sshll.u32 (!%p489_p2), %s10302_s22, 6  ;;  %11187 = vmatpush1.bf16.msra.mxu1 (!%p489_p2), %v11330_v1  ;;  %s15764_s25 = sld [smem:[#allocation2_spill]] (!%p489_p2)  ;;  %vm740_vm2 = vcmask (!%p489_p2), 318464  }
   0x9   : > { %885 = vmatprep.mubr.bf16.mxu0 (!%p489_p2), %v12146_v7  ;;  %v10326_v8 = vcombine.high (!%p489_p2), %v656_v4, %v656_v4  ;;  %v12256_v9 = vsel (!%p489_p2), %vm838_vm1, %v839_v6, 0  ;;  %v10325_v10 = vcombine.low (!%p489_p2), %v656_v4, %v656_v4  ;;  %855 = vmatprep.subr.bf16.mxu0 (!%p489_p2), %v11331_v2  ;;  %p554_p3 = scmp.lt.s32.totalorder (!%p489_p2), %s10307_s18, 255  ;;  %v11338_v13 = vld [vmem:[%s15751_s5 + $0x4] ss:$8 sps:$4 sm:$0xff] (!%p489_p2)   ;;  %v11336_v17 = vld [vmem:[%s15751_s5] ss:$8 sps:$4 sm:$0xff] (!%p489_p2)  }
   0xa   : > { %11185 = vmatprep.subr.bf16.mxu1 (!%p489_p2), %v11331_v2  ;;  %1125 = vmatprep.mubr.bf16.mxu1 (!%p489_p2), %v12146_v7  ;;  %v11341_v18 = vld [vmem:[%s15751_s5 + $0x14] ss:$8 sps:$4 sm:$0xff] (!%p489_p2)   ;;  %v11339_v21 = vld [vmem:[%s15751_s5 + $0x10] ss:$8 sps:$4 sm:$0xff] (!%p489_p2)   ;;  %v11344_v22 = vld [vmem:[%s15751_s5 + $0x24] ss:$8 sps:$4 sm:$0xff] (!%p489_p2)  }
   0xb   : > { %v845_v11 = vand.u32 (!%p489_p2), %v10326_v8, %v12256_v9  ;;  %v842_v12 = vand.u32 (!%p489_p2), %v10325_v10, %v12256_v9  ;;  %v11342_v24 = vld [vmem:[%s15751_s5 + $0x20] ss:$8 sps:$4 sm:$0xff] (!%p489_p2)   ;;  %v11347_v25 = vld [vmem:[%s15751_s5 + $0x34] ss:$8 sps:$4 sm:$0xff] (!%p489_p2)   ;;  %v11345_v28 = vld [vmem:[%s15751_s5 + $0x30] ss:$8 sps:$4 sm:$0xff] (!%p489_p2)  }
   0xc   : > { %856 = vmatpush1.bf16.msra.mxu0 (!%p489_p2), %v11333_v3  ;;  %11188 = vmatpush1.bf16.msra.mxu1 (!%p489_p2), %v11333_v3  ;;  %v11350_v29 = vld [vmem:[%s15751_s5 + $0x44] ss:$8 sps:$4 sm:$0xff] (!%p489_p2)   ;;  %v11360_v33 = vld [vmem:[%s15749_s3 + $0x8] ss:$16 sps:$4 sm:$0xff] (!%p489_p2)   ;;  %v11353_v37 = vld [vmem:[%s15751_s5 + $0x54] ss:$8 sps:$4 sm:$0xff] (!%p489_p2)  }
   0xd   : > { %857 = vmatprep.subr.bf16.mxu0 (!%p489_p2), %v845_v11  ;;  %11186 = vmatprep.subr.bf16.mxu1 (!%p489_p2), %v845_v11  ;;  %v11362_v35 = vld [vmem:[%s15749_s3 + $0xc] ss:$16 sps:$4 sm:$0xff] (!%p489_p2)   ;;  %v11348_v36 = vld [vmem:[%s15751_s5 + $0x40] ss:$8 sps:$4 sm:$0xff] (!%p489_p2)   ;;  %v11351_v42 = vld [vmem:[%s15751_s5 + $0x50] ss:$8 sps:$4 sm:$0xff] (!%p489_p2)  }
   0xe   : > { %s15766_s18 = smov (!%p554_p3, %s10307_s18), 255  ;;  %v11356_v44 = vld [vmem:[%s15751_s5 + $0x64] ss:$8 sps:$4 sm:$0xff]   ;;  %v11369_v45 = vld [vmem:[%s15749_s3 + $0x28] ss:$16 sps:$4 sm:$0xff]   ;;  %vm7988_vm3 = vcmask 7168  }
   0xf   : > { %s12264_s19 = sshll.u32 %s15766_s18, 3  ;;  %v11371_v47 = vld [vmem:[%s15749_s3 + $0x2c] ss:$16 sps:$4 sm:$0xff]   ;;  %v11354_v48 = vld [vmem:[%s15751_s5 + $0x60] ss:$8 sps:$4 sm:$0xff]   ;;  %vm10123_vm4 = vcmask 23552  }
  0x10   : > { %s12273_s26 = scalar_lea.vmem %s15764_s25, %s12264_s19  ;;  %858 = vmatpush1.bf16.msra.mxu0 %v842_v12  ;;  %11189 = vmatpush1.bf16.msra.mxu1 %v842_v12  ;;  %v11359_v49 = vld [vmem:[%s15751_s5 + $0x74] ss:$8 sps:$4 sm:$0xff]   ;;  %v11357_v54 = vld [vmem:[%s15751_s5 + $0x70] ss:$8 sps:$4 sm:$0xff]   ;;  %v11365_v55 = vld [vmem:[%s15751_s5 + $0x84] ss:$8 sps:$4 sm:$0xff]   ;;  %s14964_s17 = scalar_lea.vmem %s15748_s2, %s12264_s19 }
  0x11   : > { %v584_v14 = vld [vmem:[%s12273_s26] sm:$0xff]  ;;  %v585_v15 = vld [vmem:[%s12273_s26 + $0x8] sm:$0xff]  ;;  %2095 = vmatprep.subr.bf16.mxu0 %v11338_v13  ;;  %v586_v19 = vld [vmem:[%s12273_s26 + $0x10] sm:$0xff]  ;;  %1206 = vmatprep.subr.bf16.mxu1 %v11362_v35  ;;  %s14999_s22 = scalar_lea.vmem %s15761_s15, %s12264_s19  ;;  %s15552_s27 = scalar_lea.vmem %s15762_s16, %s12264_s19 }
  0x12   : > { %v12277_v16 = vpack.c.bf16 %v585_v15, %v584_v14  ;;  %v587_v20 = vld [vmem:[%s12273_s26 + $0x18] sm:$0xff]  ;;  %v588_v26 = vld [vmem:[%s12273_s26 + $0x20] sm:$0xff]  ;;  %v589_v27 = vld [vmem:[%s12273_s26 + $0x28] sm:$0xff] }
  0x13   : > { %v12296_v23 = vpack.c.bf16 %v587_v20, %v586_v19  ;;  %v632_v30 = vld [vmem:[%s12273_s26 + $0x180] sm:$0xff]  ;;  %v633_v31 = vld [vmem:[%s12273_s26 + $0x188] sm:$0xff]  ;;  %v12322_v34 = vpack.c.bf16 %v589_v27, %v588_v26  ;;  %v634_v38 = vld [vmem:[%s12273_s26 + $0x190] sm:$0xff] }
  0x14   : > { %10329 = vmatmul.mubr.msk.bf16.vlgmr.msra.gmra.mrb[0].mxu0 %vm740_vm2, %v12277_v16  ;;  %v12317_v32 = vpack.c.bf16 %v633_v31, %v632_v30  ;;  %v635_v39 = vld [vmem:[%s12273_s26 + $0x198] sm:$0xff]  ;;  %v590_v40 = vld [vmem:[%s12273_s26 + $0x30] sm:$0xff]  ;;  %v636_v50 = vld [vmem:[%s12273_s26 + $0x1a0] sm:$0xff] }
  0x15   : > { %895 = vmatprep.mubr.bf16.mxu0 %v12146_v7  ;;  %2096 = vmatpush1.bf16.msra.mxu0 %v11336_v17  ;;  %v591_v41 = vld [vmem:[%s12273_s26 + $0x38] sm:$0xff]  ;;  %v12346_v43 = vpack.c.bf16 %v635_v39, %v634_v38  ;;  %v637_v51 = vld [vmem:[%s12273_s26 + $0x1a8] sm:$0xff]  ;;  %v592_v52 = vld [vmem:[%s12273_s26 + $0x40] sm:$0xff] }
  0x16   : > { %2097 = vmatprep.subr.bf16.mxu0 %v11341_v18  ;;  %10353 = vmatmul.mubr.msk.bf16.vlgmr.msra.gmra.mrb[0].mxu1 %vm740_vm2, %v12317_v32  ;;  %v12354_v46 = vpack.c.bf16 %v591_v41, %v590_v40  ;;  %v593_v53 = vld [vmem:[%s12273_s26 + $0x48] sm:$0xff]  ;;  %v12381_v56 = vpack.c.bf16 %v637_v51, %v636_v50  ;;  %v11368_v59 = vld [vmem:[%s15751_s5 + $0x94] ss:$8 sps:$4 sm:$0xff]   ;;  %v11366_v1 = vld [vmem:[%s15751_s5 + $0x90] ss:$8 sps:$4 sm:$0xff]  }
  0x17   : > { %1207 = vmatpush1.bf16.msra.mxu1 %v11360_v33  ;;  %1135 = vmatprep.mubr.bf16.mxu1 %v12146_v7  ;;  %v11363_v57 = vld [vmem:[%s15751_s5 + $0x80] ss:$8 sps:$4 sm:$0xff]   ;;  %v12386_v58 = vpack.c.bf16 %v593_v53, %v592_v52  ;;  %v638_v60 = vld [vmem:[%s12273_s26 + $0x1b0] sm:$0xff]  ;;  %v639_v61 = vld [vmem:[%s12273_s26 + $0x1b8] sm:$0xff] }
  0x18   : > { %1208 = vmatprep.subr.bf16.mxu1 %v11371_v47  ;;  %v594_v62 = vld [vmem:[%s12273_s26 + $0x50] sm:$0xff]  ;;  %v595_v63 = vld [vmem:[%s12273_s26 + $0x58] sm:$0xff]  ;;  %v657_v0 = vld [vmem:[%s15749_s3 + $0x48] sm:$0xff]  ;;  %v12407_v2 = vpack.c.bf16 %v639_v61, %v638_v60 }
  0x19   : > { %2098 = vmatpush1.bf16.msra.mxu0 %v11339_v21  ;;  %v11374_v3 = vld [vmem:[%s15751_s5 + $0xa4] ss:$8 sps:$4 sm:$0xff]   ;;  %v10327_v4 = vcombine.low %v657_v0, %v657_v0  ;;  %v10328_v5 = vcombine.high %v657_v0, %v657_v0  ;;  %v11372_v6 = vld [vmem:[%s15751_s5 + $0xa0] ss:$8 sps:$4 sm:$0xff]   ;;  %v12416_v10 = vpack.c.bf16 %v595_v63, %v594_v62  ;;  %v11377_v14 = vld [vmem:[%s15751_s5 + $0xb4] ss:$8 sps:$4 sm:$0xff]  }
  0x1a   : > { %2099 = vmatprep.subr.bf16.mxu0 %v11344_v22  ;;  %v640_v11 = vld [vmem:[%s12273_s26 + $0x1c0] sm:$0xff]  ;;  %v641_v13 = vld [vmem:[%s12273_s26 + $0x1c8] sm:$0xff]  ;;  %v11375_v18 = vld [vmem:[%s15751_s5 + $0xb0] ss:$8 sps:$4 sm:$0xff]  }
  0x1b   : > { %1209 = vmatpush1.bf16.msra.mxu1 %v11369_v45  ;;  %v851_v8 = vand.u32 %v10328_v5, %v12256_v9  ;;  %v848_v12 = vand.u32 %v10327_v4, %v12256_v9  ;;  %v596_v15 = vld [vmem:[%s12273_s26 + $0x60] sm:$0xff]  ;;  %v597_v9 = vld [vmem:[%s12273_s26 + $0x68] sm:$0xff]  ;;  %v12432_v17 = vpack.c.bf16 %v641_v13, %v640_v11  ;;  %v642_v22 = vld [vmem:[%s12273_s26 + $0x1d0] sm:$0xff] }
  0x1c   : > { %10330 = vmatmul.mubr.msk.bf16.gmra.mrb[4].mxu0 %vm740_vm2, %v12296_v23  ;;  %v11382_v19 = vld [vmem:[%s15751_s5 + $0xc4] ss:$8 sps:$4 sm:$0xff]   ;;  %v11380_v20 = vld [vmem:[%s15751_s5 + $0xc0] ss:$8 sps:$4 sm:$0xff]   ;;  %v12443_v21 = vpack.c.bf16 %v597_v9, %v596_v15  ;;  %v599_v26 = vld [vmem:[%s12273_s26 + $0x78] sm:$0xff] }
  0x1d   : > { %905 = vmatprep.mubr.bf16.mxu0 %v12146_v7  ;;  %2100 = vmatpush1.bf16.msra.mxu0 %v11342_v24  ;;  %v643_v24 = vld [vmem:[%s12273_s26 + $0x1d8] sm:$0xff]  ;;  %v645_v30 = vld [vmem:[%s12273_s26 + $0x1e8] sm:$0xff]  ;;  %v600_v31 = vld [vmem:[%s12273_s26 + $0x80] sm:$0xff] }
  0x1e   : > { %2101 = vmatprep.subr.bf16.mxu0 %v11347_v25  ;;  %10354 = vmatmul.mubr.msk.bf16.gmra.mrb[4].mxu1 %vm740_vm2, %v12346_v43  ;;  %v598_v25 = vld [vmem:[%s12273_s26 + $0x70] sm:$0xff]  ;;  %v12455_v27 = vpack.c.bf16 %v643_v24, %v642_v22  ;;  %v11388_v38 = vld [vmem:[%s15751_s5 + $0x104] ss:$8 sps:$4 sm:$0xff]   ;;  %v11389_v40 = vld [vmem:[%s15751_s5 + $0xe0] ss:$8 sps:$4 sm:$0xff]  }
  0x1f   : > { %1145 = vmatprep.mubr.bf16.mxu1 %v12146_v7  ;;  %1210 = vmatprep.subr.bf16.mxu1 %v851_v8  ;;  %v11383_v33 = vld [vmem:[%s15751_s5 + $0xd0] ss:$8 sps:$4 sm:$0xff]   ;;  %v11385_v35 = vld [vmem:[%s15751_s5 + $0xd4] ss:$8 sps:$4 sm:$0xff]   ;;  %v11391_v39 = vld [vmem:[%s15751_s5 + $0xe4] ss:$8 sps:$4 sm:$0xff]  }
  0x20   : > { %1211 = vmatpush1.bf16.msra.mxu1 %v848_v12  ;;  %v11397_v41 = vld [vmem:[%s15751_s5 + $0xf4] ss:$8 sps:$4 sm:$0xff]   ;;  %v11395_v47 = vld [vmem:[%s15751_s5 + $0xf0] ss:$8 sps:$4 sm:$0xff]   ;;  %v604_v52 = vld [vmem:[%s12273_s26 + $0xa0] sm:$0xff] }
  0x21   : > { %2102 = vmatpush1.bf16.msra.mxu0 %v11345_v28  ;;  %v12457_v28 = vpack.c.bf16 %v599_v26, %v598_v25  ;;  %2846 = vmatprep.subr.bf16.mxu1 %v11388_v38  ;;  %v647_v45 = vld [vmem:[%s12273_s26 + $0x1f8] sm:$0xff]  ;;  %v605_v53 = vld [vmem:[%s12273_s26 + $0xa8] sm:$0xff]  ;;  %v606_v60 = vld [vmem:[%s12273_s26 + $0xb0] sm:$0xff] }
  0x22   : > { %2103 = vmatprep.subr.bf16.mxu0 %v11350_v29  ;;  %v644_v29 = vld [vmem:[%s12273_s26 + $0x1e0] sm:$0xff]  ;;  %v607_v61 = vld [vmem:[%s12273_s26 + $0xb8] sm:$0xff]  ;;  %v609_v63 = vld [vmem:[%s12273_s26 + $0xc8] sm:$0xff] }
  0x23   : > { %v12535_v62 = vpack.c.bf16 %v607_v61, %v606_v60  ;;  %v611_v4 = vld [vmem:[%s12273_s26 + $0xd8] sm:$0xff]  ;;  %v612_v5 = vld [vmem:[%s12273_s26 + $0xe0] sm:$0xff]  ;;  %v614_v12 = vld [vmem:[%s12273_s26 + $0xf0] sm:$0xff] }
  0x24   : > { %10331 = vmatmul.mubr.msk.bf16.gmra.mrb[8].mxu0 %vm740_vm2, %v12322_v34  ;;  %v11403_v11 = vld [vmem:[%s15751_s5 + $0x134] ss:$8 sps:$4 sm:$0xff]   ;;  %v617_v15 = vld [vmem:[%s12273_s26 + $0x108] sm:$0xff]  ;;  %v620_v22 = vld [vmem:[%s12273_s26 + $0x120] sm:$0xff] }
  0x25   : > { %915 = vmatprep.mubr.bf16.mxu0 %v12146_v7  ;;  %2104 = vmatpush1.bf16.msra.mxu0 %v11348_v36  ;;  %v601_v36 = vld [vmem:[%s12273_s26 + $0x88] sm:$0xff]  ;;  %v615_v13 = vld [vmem:[%s12273_s26 + $0xf8] sm:$0xff]  ;;  %v1559_v61 = vld [vmem:[%s15750_s4] sm:$0x3] }
  0x26   : > { %2105 = vmatprep.subr.bf16.mxu0 %v11353_v37  ;;  %10355 = vmatmul.mubr.msk.bf16.gmra.mrb[8].mxu1 %vm740_vm2, %v12381_v56  ;;  %v12475_v37 = vpack.c.bf16 %v645_v30, %v644_v29  ;;  %v621_v24 = vld [vmem:[%s12273_s26 + $0x128] sm:$0xff]  ;;  %v11407_v26 = vld [vmem:[%s15751_s5 + $0x150] ss:$8 sps:$4 sm:$0xff]  }
  0x27   : > { %1155 = vmatprep.mubr.bf16.mxu1 %v12146_v7  ;;  %v12623_v25 = vpack.c.bf16 %v621_v24, %v620_v22  ;;  %v622_v29 = vld [vmem:[%s12273_s26 + $0x130] sm:$0xff]  ;;  %v623_v30 = vld [vmem:[%s12273_s26 + $0x138] sm:$0xff]  ;;  %v11410_v38 = vld [vmem:[%s15751_s5 + $0x160] ss:$8 sps:$4 sm:$0xff]  }
  0x28   : > { %v11422_v24 = vld [vmem:[%s15751_s5 + $0x1a0] ss:$8 sps:$4 sm:$0xff]  }
  0x29   : > { %2106 = vmatpush1.bf16.msra.mxu0 %v11351_v42  ;;  %v12489_v42 = vpack.c.bf16 %v601_v36, %v600_v31  ;;  %v12639_v31 = vpack.c.bf16 %v623_v30, %v622_v29 }
  0x2a   : > { %2107 = vmatprep.subr.bf16.mxu0 %v11356_v44  ;;  %v646_v44 = vld [vmem:[%s12273_s26 + $0x1f0] sm:$0xff] }
  0x2b   : > { %v12504_v50 = vpack.c.bf16 %v647_v45, %v646_v44  ;;  %v628_v44 = vld [vmem:[%s12273_s26 + $0x160] sm:$0xff]  ;;  %v629_v45 = vld [vmem:[%s12273_s26 + $0x168] sm:$0xff] }
  0x2c   : > { %10332 = vmatmul.mubr.msk.bf16.gmra.mrb[12].mxu0 %vm740_vm2, %v12354_v46 }
  0x2d   : > { %925 = vmatprep.mubr.bf16.mxu0 %v12146_v7  ;;  %2108 = vmatpush1.bf16.msra.mxu0 %v11354_v48  ;;  %v602_v48 = vld [vmem:[%s12273_s26 + $0x90] sm:$0xff] }
  0x2e   : > { %2109 = vmatprep.subr.bf16.mxu0 %v11359_v49  ;;  %10356 = vmatmul.mubr.msk.bf16.gmra.mrb[12].mxu1 %vm740_vm2, %v12407_v2  ;;  %v603_v49 = vld [vmem:[%s12273_s26 + $0x98] sm:$0xff] }
  0x2f   : > { %1165 = vmatprep.mubr.bf16.mxu1 %v12146_v7  ;;  %v12506_v51 = vpack.c.bf16 %v603_v49, %v602_v48  ;;  %v11413_v48 = vld [vmem:[%s15751_s5 + $0x170] ss:$8 sps:$4 sm:$0xff]   ;;  %v11415_v49 = vld [vmem:[%s15751_s5 + $0x174] ss:$8 sps:$4 sm:$0xff]  }
  0x31   : > { %2110 = vmatpush1.bf16.msra.mxu0 %v11357_v54  ;;  %v11386_v54 = vld [vmem:[%s15751_s5 + $0x100] ss:$8 sps:$4 sm:$0xff]  }
  0x32   : > { %2111 = vmatprep.subr.bf16.mxu0 %v11365_v55  ;;  %v11394_v55 = vld [vmem:[%s15751_s5 + $0x114] ss:$8 sps:$4 sm:$0xff]  }
  0x34   : > { %10333 = vmatmul.mubr.msk.bf16.gmra.mrb[16].mxu0 %vm740_vm2, %v12386_v58 }
  0x35   : > { %935 = vmatprep.mubr.bf16.mxu0 %v12146_v7  ;;  %2112 = vmatpush1.bf16.msra.mxu0 %v11363_v57  ;;  %v12522_v57 = vpack.c.bf16 %v605_v53, %v604_v52  ;;  %v631_v52 = vld [vmem:[%s12273_s26 + $0x178] sm:$0xff] }
  0x36   : > { %2113 = vmatprep.subr.bf16.mxu0 %v11368_v59  ;;  %10357 = vmatmul.mubr.msk.bf16.gmra.mrb[16].mxu1 %vm740_vm2, %v12432_v17  ;;  %v11392_v59 = vld [vmem:[%s15751_s5 + $0x110] ss:$8 sps:$4 sm:$0xff]  }
  0x37   : > { %1175 = vmatprep.mubr.bf16.mxu1 %v12146_v7 }
  0x39   : > { %2114 = vmatpush1.bf16.msra.mxu0 %v11366_v1  ;;  %v11400_v1 = vld [vmem:[%s15751_s5 + $0x124] ss:$8 sps:$4 sm:$0xff]  }
  0x3a   : > { %2115 = vmatprep.subr.bf16.mxu0 %v11374_v3  ;;  %v610_v3 = vld [vmem:[%s12273_s26 + $0xd0] sm:$0xff] }
  0x3c   : > { %10334 = vmatmul.mubr.msk.bf16.gmra.mrb[20].mxu0 %vm740_vm2, %v12416_v10 }
  0x3d   : > { %945 = vmatprep.mubr.bf16.mxu0 %v12146_v7  ;;  %2116 = vmatpush1.bf16.msra.mxu0 %v11372_v6  ;;  %v613_v6 = vld [vmem:[%s12273_s26 + $0xe8] sm:$0xff] }
  0x3e   : > { %2117 = vmatprep.subr.bf16.mxu0 %v11377_v14  ;;  %10358 = vmatmul.mubr.msk.bf16.gmra.mrb[20].mxu1 %vm740_vm2, %v12455_v27  ;;  %v12571_v8 = vpack.c.bf16 %v613_v6, %v612_v5  ;;  %v616_v14 = vld [vmem:[%s12273_s26 + $0x100] sm:$0xff] }
  0x3f   : > { %1185 = vmatprep.mubr.bf16.mxu1 %v12146_v7  ;;  %v12597_v9 = vpack.c.bf16 %v617_v15, %v616_v14 }
  0x41   : > { %2118 = vmatpush1.bf16.msra.mxu0 %v11375_v18  ;;  %v11406_v18 = vld [vmem:[%s15751_s5 + $0x144] ss:$8 sps:$4 sm:$0xff]  }
  0x42   : > { %2119 = vmatprep.subr.bf16.mxu0 %v11382_v19  ;;  %v618_v19 = vld [vmem:[%s12273_s26 + $0x110] sm:$0xff] }
  0x44   : > { %10335 = vmatmul.mubr.msk.bf16.gmra.mrb[24].mxu0 %vm740_vm2, %v12443_v21 }
  0x45   : > { %955 = vmatprep.mubr.bf16.mxu0 %v12146_v7  ;;  %2120 = vmatpush1.bf16.msra.mxu0 %v11380_v20  ;;  %v619_v20 = vld [vmem:[%s12273_s26 + $0x118] sm:$0xff] }
  0x46   : > { %2121 = vmatprep.subr.bf16.mxu0 %v11385_v35  ;;  %10359 = vmatmul.mubr.msk.bf16.gmra.mrb[24].mxu1 %vm740_vm2, %v12475_v37  ;;  %v625_v35 = vld [vmem:[%s12273_s26 + $0x148] sm:$0xff] }
  0x47   : > { %1195 = vmatprep.mubr.bf16.mxu1 %v12146_v7 }
  0x49   : > { %2122 = vmatpush1.bf16.msra.mxu0 %v11383_v33  ;;  %v624_v33 = vld [vmem:[%s12273_s26 + $0x140] sm:$0xff] }
  0x4a   : > { %2123 = vmatprep.subr.bf16.mxu0 %v11391_v39  ;;  %v12649_v36 = vpack.c.bf16 %v625_v35, %v624_v33  ;;  %v11412_v39 = vld [vmem:[%s15751_s5 + $0x164] ss:$8 sps:$4 sm:$0xff]  }
  0x4c   : > { %10336 = vmatmul.mubr.msk.bf16.gmra.mrb[28].mxu0 %vm740_vm2, %v12457_v28 }
  0x4d   : > { %965 = vmatprep.mubr.bf16.mxu0 %v12146_v7  ;;  %2124 = vmatpush1.bf16.msra.mxu0 %v11389_v40  ;;  %v626_v40 = vld [vmem:[%s12273_s26 + $0x150] sm:$0xff] }
  0x4e   : > { %2125 = vmatprep.subr.bf16.mxu0 %v11397_v41  ;;  %10360 = vmatmul.mubr.msk.bf16.gmra.mrb[28].mxu1 %vm740_vm2, %v12504_v50  ;;  %v627_v41 = vld [vmem:[%s12273_s26 + $0x158] sm:$0xff] }
  0x4f   : > { %1238 = vmatprep.mubr.bf16.mxu1 %v12146_v7 }
  0x51   : > { %2126 = vmatpush1.bf16.msra.mxu0 %v11395_v47  ;;  %v12675_v47 = vpack.c.bf16 %v629_v45, %v628_v44 }
  0x54   : > { %10337 = vmatmul.mubr.msk.bf16.gmra.mrb[32].mxu0 %vm740_vm2, %v12489_v42 }
  0x55   : > { %975 = vmatprep.mubr.bf16.mxu0 %v12146_v7 }
  0x56   : > { %10361 = vmatmul.mubr.msk.bf16.vlgmr.msra.gmra.mrb[32].mxu1 %vm740_vm2, %v12277_v16  ;;  %v608_v16 = vld [vmem:[%s12273_s26 + $0xc0] sm:$0xff] }
  0x57   : > { %2847 = vmatpush1.bf16.msra.mxu1 %v11386_v54  ;;  %1248 = vmatprep.mubr.bf16.mxu1 %v12146_v7  ;;  %v12545_v0 = vpack.c.bf16 %v609_v63, %v608_v16  ;;  %v11416_v54 = vld [vmem:[%s15751_s5 + $0x180] ss:$8 sps:$4 sm:$0xff]   ;;  %v11419_v16 = vld [vmem:[%s15751_s5 + $0x190] ss:$8 sps:$4 sm:$0xff]   ;;  %v11421_v63 = vld [vmem:[%s15751_s5 + $0x194] ss:$8 sps:$4 sm:$0xff]  }
  0x58   : > { %2848 = vmatprep.subr.bf16.mxu1 %v11394_v55  ;;  %v11418_v55 = vld [vmem:[%s15751_s5 + $0x184] ss:$8 sps:$4 sm:$0xff]  }
  0x5b   : > { %2849 = vmatpush1.bf16.msra.mxu1 %v11392_v59 }
  0x5c   : > { %10338 = vmatmul.mubr.msk.bf16.gmra.mrb[36].mxu0 %vm740_vm2, %v12506_v51  ;;  %2850 = vmatprep.subr.bf16.mxu1 %v11400_v1 }
  0x5d   : > { %985 = vmatprep.mubr.bf16.mxu0 %v12146_v7 }
  0x5e   : > { %10362 = vmatmul.mubr.msk.bf16.gmra.mrb[36].mxu1 %vm740_vm2, %v12296_v23  ;;  %v11398_v23 = vld [vmem:[%s15751_s5 + $0x120] ss:$8 sps:$4 sm:$0xff]  }
  0x5f   : > { %1258 = vmatprep.mubr.bf16.mxu1 %v12146_v7  ;;  %2851 = vmatpush1.bf16.msra.mxu1 %v11398_v23 }
  0x60   : > { %2852 = vmatprep.subr.bf16.mxu1 %v11403_v11 }
  0x64   : > { %10339 = vmatmul.mubr.msk.bf16.gmra.mrb[40].mxu0 %vm740_vm2, %v12522_v57 }
  0x65   : > { %995 = vmatprep.mubr.bf16.mxu0 %v12146_v7 }
  0x66   : > { %10363 = vmatmul.mubr.msk.bf16.gmra.mrb[40].mxu1 %vm740_vm2, %v12322_v34  ;;  %v12561_v34 = vpack.c.bf16 %v611_v4, %v610_v3 }
  0x67   : > { %1268 = vmatprep.mubr.bf16.mxu1 %v12146_v7 }
  0x6c   : > { %10340 = vmatmul.mubr.msk.bf16.gmra.mrb[44].mxu0 %vm740_vm2, %v12535_v62 }
  0x6d   : > { %1005 = vmatprep.mubr.bf16.mxu0 %v12146_v7 }
  0x6e   : > { %10364 = vmatmul.mubr.msk.bf16.gmra.mrb[44].mxu1 %vm740_vm2, %v12354_v46  ;;  %v11401_v46 = vld [vmem:[%s15751_s5 + $0x130] ss:$8 sps:$4 sm:$0xff]  }
  0x6f   : > { %1278 = vmatprep.mubr.bf16.mxu1 %v12146_v7  ;;  %2853 = vmatpush1.bf16.msra.mxu1 %v11401_v46 }
  0x70   : > { %2854 = vmatprep.subr.bf16.mxu1 %v11406_v18 }
  0x74   : > { %10341 = vmatmul.mubr.msk.bf16.gmra.mrb[48].mxu0 %vm740_vm2, %v12545_v0 }
  0x75   : > { %1015 = vmatprep.mubr.bf16.mxu0 %v12146_v7 }
  0x76   : > { %10365 = vmatmul.mubr.msk.bf16.gmra.mrb[48].mxu1 %vm740_vm2, %v12386_v58  ;;  %v12587_v58 = vpack.c.bf16 %v615_v13, %v614_v12 }
  0x77   : > { %1288 = vmatprep.mubr.bf16.mxu1 %v12146_v7 }
  0x7c   : > { %10342 = vmatmul.mubr.msk.bf16.gmra.mrb[52].mxu0 %vm740_vm2, %v12561_v34 }
  0x7d   : > { %1025 = vmatprep.mubr.bf16.mxu0 %v12146_v7 }
  0x7e   : > { %10366 = vmatmul.mubr.msk.bf16.gmra.mrb[52].mxu1 %vm740_vm2, %v12416_v10  ;;  %v11404_v10 = vld [vmem:[%s15751_s5 + $0x140] ss:$8 sps:$4 sm:$0xff]  }
  0x7f   : > { %1298 = vmatprep.mubr.bf16.mxu1 %v12146_v7  ;;  %2855 = vmatpush1.bf16.msra.mxu1 %v11404_v10 }
  0x84   : > { %10343 = vmatmul.mubr.msk.bf16.gmra.mrb[56].mxu0 %vm740_vm2, %v12571_v8 }
  0x85   : > { %1035 = vmatprep.mubr.bf16.mxu0 %v12146_v7 }
  0x86   : > { %10367 = vmatmul.mubr.msk.bf16.gmra.mrb[56].mxu1 %vm740_vm2, %v12443_v21  ;;  %v12613_v21 = vpack.c.bf16 %v619_v20, %v618_v19 }
  0x87   : > { %1308 = vmatprep.mubr.bf16.mxu1 %v12146_v7 }
  0x8c   : > { %10344 = vmatmul.mubr.msk.bf16.gmra.mrb[60].mxu0 %vm740_vm2, %v12587_v58 }
  0x8d   : > { %1045 = vmatprep.mubr.bf16.mxu0 %v12146_v7 }
  0x8e   : > { %10368 = vmatmul.mubr.msk.bf16.gmra.mrb[60].mxu1 %vm740_vm2, %v12457_v28  ;;  %v11409_v28 = vld [vmem:[%s15751_s5 + $0x154] ss:$8 sps:$4 sm:$0xff]  }
  0x8f   : > { %1318 = vmatprep.mubr.bf16.mxu1 %v12146_v7  ;;  %2856 = vmatprep.subr.bf16.mxu1 %v11409_v28 }
  0x90   : > { %2857 = vmatpush1.bf16.msra.mxu1 %v11407_v26  ;;  %v11424_v26 = vld [vmem:[%s15751_s5 + $0x1a4] ss:$8 sps:$4 sm:$0xff]  }
  0x91   : > { %2858 = vmatprep.subr.bf16.mxu1 %v11412_v39 }
  0x94   : > { %10345 = vmatmul.mubr.msk.bf16.gmra.mrb[64].mxu0 %vm740_vm2, %v12597_v9  ;;  %2859 = vmatpush1.bf16.msra.mxu1 %v11410_v38 }
  0x95   : > { %1055 = vmatprep.mubr.bf16.mxu0 %v12146_v7  ;;  %2860 = vmatprep.subr.bf16.mxu1 %v11415_v49 }
  0x96   : > { %10369 = vmatmul.mubr.msk.bf16.gmra.mrb[64].mxu1 %vm740_vm2, %v12489_v42  ;;  %v12665_v42 = vpack.c.bf16 %v627_v41, %v626_v40 }
  0x97   : > { %1328 = vmatprep.mubr.bf16.mxu1 %v12146_v7 }
  0x98   : > { %2861 = vmatpush1.bf16.msra.mxu1 %v11413_v48 }
  0x99   : > { %2862 = vmatprep.subr.bf16.mxu1 %v11418_v55 }
  0x9c   : > { %10346 = vmatmul.mubr.msk.bf16.gmra.mrb[68].mxu0 %vm740_vm2, %v12613_v21  ;;  %2863 = vmatpush1.bf16.msra.mxu1 %v11416_v54 }
  0x9d   : > { %1065 = vmatprep.mubr.bf16.mxu0 %v12146_v7  ;;  %2864 = vmatprep.subr.bf16.mxu1 %v11421_v63 }
  0x9e   : > { %10370 = vmatmul.mubr.msk.bf16.gmra.mrb[68].mxu1 %vm740_vm2, %v12506_v51  ;;  %v630_v51 = vld [vmem:[%s12273_s26 + $0x170] sm:$0xff] }
  0x9f   : > { %1338 = vmatprep.mubr.bf16.mxu1 %v12146_v7  ;;  %v12691_v53 = vpack.c.bf16 %v631_v52, %v630_v51 }
  0xa0   : > { %2865 = vmatpush1.bf16.msra.mxu1 %v11419_v16 }
  0xa1   : > { %2866 = vmatprep.subr.bf16.mxu1 %v11424_v26 }
  0xa4   : > { %10347 = vmatmul.mubr.msk.bf16.gmra.mrb[72].mxu0 %vm740_vm2, %v12623_v25  ;;  %2867 = vmatpush1.bf16.msra.mxu1 %v11422_v24 }
  0xa5   : > { %1075 = vmatprep.mubr.bf16.mxu0 %v12146_v7 }
  0xa6   : > { %10371 = vmatmul.mubr.msk.bf16.gmra.mrb[72].mxu1 %vm740_vm2, %v12522_v57  ;;  %v1561_v57 = vlaneseq }
  0xa7   : > { %1348 = vmatprep.mubr.bf16.mxu1 %v12146_v7 }
  0xa8   : > { %v1562_v59 = vshrl.u32 %v1561_v57, 7 }
  0xaa   : > { %v12710_v60 = vsub.s32 0, %v1562_v59 }
  0xac   : > { %10348 = vmatmul.mubr.msk.bf16.gmra.mrb[76].mxu0 %vm740_vm2, %v12639_v31 }
  0xad   : > { %1085 = vmatprep.mubr.bf16.mxu0 %v12146_v7 }
  0xae   : > { %10372 = vmatmul.mubr.msk.bf16.gmra.mrb[76].mxu1 %vm740_vm2, %v12535_v62  ;;  %v12715_v62 = vsub.s32 1, %v1562_v59 }
  0xaf   : > { %1358 = vmatprep.mubr.bf16.mxu1 %v12146_v7 }
  0xb0   : > { %v12730_v23 = vrot.slane %v1559_v61, %v12715_v62 }
  0xb4   : > { %10349 = vmatmul.mubr.msk.bf16.gmra.mrb[80].mxu0 %vm740_vm2, %v12649_v36 }
  0xb5   : > { %1095 = vmatprep.mubr.bf16.mxu0 %v12146_v7 }
  0xb6   : > { %10373 = vmatmul.mubr.msk.bf16.gmra.mrb[80].mxu1 %vm740_vm2, %v12545_v0  ;;  %v12727_v0 = vrot.slane %v1559_v61, %v12710_v60 }
  0xb7   : > { %1368 = vmatprep.mubr.bf16.mxu1 %v12146_v7 }
  0xbc   : > { %10350 = vmatmul.mubr.msk.bf16.gmra.mrb[84].mxu0 %vm740_vm2, %v12665_v42 }
  0xbd   : > { %1105 = vmatprep.mubr.bf16.mxu0 %v12146_v7 }
  0xbe   : > { %10374 = vmatmul.mubr.msk.bf16.gmra.mrb[84].mxu1 %vm740_vm2, %v12561_v34 }
  0xbf   : > { %1378 = vmatprep.mubr.bf16.mxu1 %v12146_v7 }
  0xc4   : > { %10351 = vmatmul.mubr.msk.bf16.gmra.mrb[88].mxu0 %vm740_vm2, %v12675_v47 }
  0xc5   : > { %1115 = vmatprep.mubr.bf16.mxu0 %v12146_v7 }
  0xc6   : > { %10375 = vmatmul.mubr.msk.bf16.gmra.mrb[88].mxu1 %vm740_vm2, %v12571_v8 }
  0xc7   : > { %1388 = vmatprep.mubr.bf16.mxu1 %v12146_v7 }
  0xcc   : > { %10352 = vmatmul.mubr.msk.bf16.gmra.mrb[92].mxu0 %vm740_vm2, %v12691_v53 }
  0xce   : > { %10376 = vmatmul.mubr.msk.bf16.gmra.mrb[92].mxu1 %vm740_vm2, %v12587_v58 }
  0xcf   : > { %1398 = vmatprep.mubr.bf16.mxu1 %v12146_v7 }
  0xd6   : > { %10377 = vmatmul.mubr.msk.bf16.gmra.mrb[96].mxu1 %vm740_vm2, %v12597_v9 }
  0xd7   : > { %1408 = vmatprep.mubr.bf16.mxu1 %v12146_v7 }
  0xde   : > { %10378 = vmatmul.mubr.msk.bf16.gmra.mrb[100].mxu1 %vm740_vm2, %v12613_v21 }
  0xdf   : > { %1418 = vmatprep.mubr.bf16.mxu1 %v12146_v7 }
  0xe6   : > { %10379 = vmatmul.mubr.msk.bf16.gmra.mrb[104].mxu1 %vm740_vm2, %v12623_v25 }
  0xe7   : > { %v887_v1 = vpop.f32.mrb[0].mxu0  ;;  %1428 = vmatprep.mubr.bf16.mxu1 %v12146_v7 }
  0xe8   : > { %v1571_v3 = vadd.f32 %v12727_v0, %v887_v1  ;;  %v889_v4 = vpop.f32.mrb[1].mxu0 }
  0xe9   : > { %v1572_v34 = vadd.f32 %v12730_v23, %v889_v4  ;;  %v891_v5 = vpop.f32.mrb[2].mxu0  ;;  %v1127_v33 = vpop.f32.mrb[0].mxu1 }
  0xea   : > { %v1573_v6 = vadd.f32 %v12727_v0, %v891_v5  ;;  %v893_v8 = vpop.f32.mrb[3].mxu0  ;;  %v1699_v11 = vmax.f32 %v1571_v3, 0.0  ;;  %v1667_v38 = vadd.f32 %v12727_v0, %v1127_v33  ;;  %v1129_v39 = vpop.f32.mrb[1].mxu1 }
  0xeb   : > { %v1574_v46 = vadd.f32 %v12730_v23, %v893_v8  ;;  %v1700_v13 = vmax.f32 %v1572_v34, 0.0  ;;  %v1668_v41 = vadd.f32 %v12730_v23, %v1129_v39  ;;  %v1131_v44 = vpop.f32.mrb[2].mxu1  ;;  %v11425_v39 = vld [vmem:[%s15751_s5 + $0x1b0] ss:$8 sps:$4 sm:$0xff]  }
  0xec   : > { %v1701_v12 = vmax.f32 %v1573_v6, 0.0  ;;  %v1795_v49 = vmax.f32 %v1667_v38, 0.0  ;;  %v1669_v51 = vadd.f32 %v12727_v0, %v1131_v44  ;;  %v1133_v52 = vpop.f32.mrb[3].mxu1 }
  0xed   : > { %v1702_v58 = vmax.f32 %v1574_v46, 0.0  ;;  %v1796_v57 = vmax.f32 %v1668_v41, 0.0  ;;  %v1670_v59 = vadd.f32 %v12730_v23, %v1133_v52  ;;  %v11427_v41 = vld [vmem:[%s15751_s5 + $0x1b4] ss:$8 sps:$4 sm:$0xff]  }
  0xee   : > { %v1859_v14 = vpack.c.bf16 %v1701_v12, %v1699_v11  ;;  %v1797_v63 = vmax.f32 %v1669_v51, 0.0  ;;  %10380 = vmatmul.mubr.msk.bf16.gmra.mrb[108].mxu1 %vm740_vm2, %v12639_v31  ;;  %2868 = vmatprep.subr.bf16.mxu1 %v11427_v41 }
  0xef   : > { %v897_v15 = vpop.f32.mrb[4].mxu0  ;;  %v1860_v9 = vpack.c.bf16 %v1702_v58, %v1700_v13  ;;  %v1798_v4 = vmax.f32 %v1670_v59, 0.0  ;;  %1438 = vmatprep.mubr.bf16.mxu1 %v12146_v7  ;;  %2869 = vmatpush1.bf16.msra.mxu1 %v11425_v39 }
  0xf0   : > { %v1575_v10 = vadd.f32 %v12727_v0, %v897_v15  ;;  %v899_v18 = vpop.f32.mrb[5].mxu0  ;;  %v12763_v5 = vpack.c.bf16 %v1797_v63, %v1795_v49 }
  0xf1   : > { %v1576_v19 = vadd.f32 %v12730_v23, %v899_v18  ;;  %v901_v20 = vpop.f32.mrb[6].mxu0  ;;  %2127 = vmatprep.mubr.bf16.mxu0 %v1860_v9  ;;  %v1137_v46 = vpop.f32.mrb[4].mxu1  ;;  %v12765_v11 = vpack.c.bf16 %v1798_v4, %v1796_v57 }
  0xf2   : > { %v1577_v21 = vadd.f32 %v12727_v0, %v901_v20  ;;  %v903_v22 = vpop.f32.mrb[7].mxu0  ;;  %2128 = vmatmul.mubr.bf16.vlgmr.msra.gmra.mrb[96].mxu0 %v1859_v14  ;;  %v1703_v29 = vmax.f32 %v1575_v10, 0.0  ;;  %v1671_v31 = vadd.f32 %v12727_v0, %v1137_v46  ;;  %v1139_v58 = vpop.f32.mrb[5].mxu1 }
  0xf3   : > { %v1578_v28 = vadd.f32 %v12730_v23, %v903_v22  ;;  %v1704_v25 = vmax.f32 %v1576_v19, 0.0  ;;  %v1672_v15 = vadd.f32 %v12730_v23, %v1139_v58  ;;  %v1141_v9 = vpop.f32.mrb[6].mxu1 }
  0xf4   : > { %v1705_v30 = vmax.f32 %v1577_v21, 0.0  ;;  %v1799_v19 = vmax.f32 %v1671_v31, 0.0  ;;  %v1673_v20 = vadd.f32 %v12727_v0, %v1141_v9  ;;  %v1143_v21 = vpop.f32.mrb[7].mxu1 }
  0xf5   : > { %v1706_v35 = vmax.f32 %v1578_v28, 0.0  ;;  %v1800_v26 = vmax.f32 %v1672_v15, 0.0  ;;  %v1674_v28 = vadd.f32 %v12730_v23, %v1143_v21 }
  0xf6   : > { %v1861_v40 = vpack.c.bf16 %v1705_v30, %v1703_v29  ;;  %v1801_v33 = vmax.f32 %v1673_v20, 0.0  ;;  %10381 = vmatmul.mubr.msk.bf16.gmra.mrb[112].mxu1 %vm740_vm2, %v12649_v36 }
  0xf7   : > { %v907_v45 = vpop.f32.mrb[8].mxu0  ;;  %v1862_v48 = vpack.c.bf16 %v1706_v35, %v1704_v25  ;;  %v1802_v38 = vmax.f32 %v1674_v28, 0.0  ;;  %1448 = vmatprep.mubr.bf16.mxu1 %v12146_v7 }
  0xf8   : > { %v1579_v54 = vadd.f32 %v12727_v0, %v907_v45  ;;  %v909_v55 = vpop.f32.mrb[9].mxu0  ;;  %v12784_v44 = vpack.c.bf16 %v1801_v33, %v1799_v19 }
  0xf9   : > { %v1580_v61 = vadd.f32 %v12730_v23, %v909_v55  ;;  %v911_v16 = vpop.f32.mrb[10].mxu0  ;;  %2137 = vmatprep.mubr.bf16.mxu0 %v1862_v48  ;;  %v1147_v48 = vpop.f32.mrb[8].mxu1  ;;  %v12786_v49 = vpack.c.bf16 %v1802_v38, %v1800_v26 }
  0xfa   : > { %v1581_v1 = vadd.f32 %v12727_v0, %v911_v16  ;;  %v913_v3 = vpop.f32.mrb[11].mxu0  ;;  %2138 = vmatmul.mubr.bf16.gmra.mrb[100].mxu0 %v1861_v40  ;;  %v1707_v6 = vmax.f32 %v1579_v54, 0.0  ;;  %v1675_v54 = vadd.f32 %v12727_v0, %v1147_v48  ;;  %v1149_v55 = vpop.f32.mrb[9].mxu1 }
  0xfb   : > { %v1582_v34 = vadd.f32 %v12730_v23, %v913_v3  ;;  %v1708_v12 = vmax.f32 %v1580_v61, 0.0  ;;  %v1676_v59 = vadd.f32 %v12730_v23, %v1149_v55  ;;  %v1151_v61 = vpop.f32.mrb[10].mxu1 }
  0xfc   : > { %v1709_v8 = vmax.f32 %v1581_v1, 0.0  ;;  %v1803_v1 = vmax.f32 %v1675_v54, 0.0  ;;  %v1677_v3 = vadd.f32 %v12727_v0, %v1151_v61  ;;  %v1153_v4 = vpop.f32.mrb[11].mxu1 }
  0xfd   : > { %v1710_v13 = vmax.f32 %v1582_v34, 0.0  ;;  %v1678_v46 = vadd.f32 %v12730_v23, %v1153_v4 }
  0xfe   : > { %v1863_v14 = vpack.c.bf16 %v1709_v8, %v1707_v6  ;;  %v1804_v8 = vmax.f32 %v1676_v59, 0.0  ;;  %v1805_v31 = vmax.f32 %v1677_v3, 0.0  ;;  %10382 = vmatmul.mubr.msk.bf16.gmra.mrb[116].mxu1 %vm740_vm2, %v12665_v42  ;;  %v11428_v59 = vld [vmem:[%s15751_s5 + $0x1c0] ss:$8 sps:$4 sm:$0xff]  }
  0xff   : > { %v917_v10 = vpop.f32.mrb[12].mxu0  ;;  %v1864_v18 = vpack.c.bf16 %v1710_v13, %v1708_v12  ;;  %v1806_v15 = vmax.f32 %v1678_v46, 0.0  ;;  %1458 = vmatprep.mubr.bf16.mxu1 %v12146_v7 }
 0x100   : > { %v1583_v22 = vadd.f32 %v12727_v0, %v917_v10  ;;  %v919_v24 = vpop.f32.mrb[13].mxu0  ;;  %v12799_v10 = vpack.c.bf16 %v1805_v31, %v1803_v1 }
 0x101   : > { %v1584_v29 = vadd.f32 %v12730_v23, %v919_v24  ;;  %v921_v30 = vpop.f32.mrb[14].mxu0  ;;  %2147 = vmatprep.mubr.bf16.mxu0 %v1864_v18  ;;  %v1157_v20 = vpop.f32.mrb[12].mxu1  ;;  %v12801_v21 = vpack.c.bf16 %v1806_v15, %v1804_v8 }
 0x102   : > { %v1585_v25 = vadd.f32 %v12727_v0, %v921_v30  ;;  %v923_v35 = vpop.f32.mrb[15].mxu0  ;;  %2148 = vmatmul.mubr.bf16.gmra.mrb[104].mxu0 %v1863_v14  ;;  %v1711_v36 = vmax.f32 %v1583_v22, 0.0  ;;  %v1679_v42 = vadd.f32 %v12727_v0, %v1157_v20  ;;  %v1159_v26 = vpop.f32.mrb[13].mxu1 }
 0x103   : > { %v1586_v40 = vadd.f32 %v12730_v23, %v923_v35  ;;  %v1712_v51 = vmax.f32 %v1584_v29, 0.0  ;;  %v1680_v29 = vadd.f32 %v12730_v23, %v1159_v26  ;;  %v1161_v30 = vpop.f32.mrb[14].mxu1 }
 0x104   : > { %v1713_v45 = vmax.f32 %v1585_v25, 0.0  ;;  %v1807_v35 = vmax.f32 %v1679_v42, 0.0  ;;  %v1681_v38 = vadd.f32 %v12727_v0, %v1161_v30  ;;  %v1163_v39 = vpop.f32.mrb[15].mxu1 }
 0x105   : > { %v1714_v52 = vmax.f32 %v1586_v40, 0.0 }
 0x106   : > { %v1865_v57 = vpack.c.bf16 %v1713_v45, %v1711_v36  ;;  %v1808_v36 = vmax.f32 %v1680_v29, 0.0  ;;  %v1682_v45 = vadd.f32 %v12730_v23, %v1163_v39  ;;  %10383 = vmatmul.mubr.msk.bf16.gmra.mrb[120].mxu1 %vm740_vm2, %v12675_v47 }
 0x107   : > { %v927_v16 = vpop.f32.mrb[16].mxu0  ;;  %v1866_v63 = vpack.c.bf16 %v1714_v52, %v1712_v51  ;;  %v1809_v52 = vmax.f32 %v1681_v38, 0.0  ;;  %1468 = vmatprep.mubr.bf16.mxu1 %v12146_v7 }
 0x108   : > { %v1587_v34 = vadd.f32 %v12727_v0, %v927_v16  ;;  %v929_v6 = vpop.f32.mrb[17].mxu0  ;;  %v11430_v16 = vld [vmem:[%s15751_s5 + $0x1c4] ss:$8 sps:$4 sm:$0xff]  }
 0x109   : > { %v1588_v12 = vadd.f32 %v12730_v23, %v929_v6  ;;  %v931_v13 = vpop.f32.mrb[18].mxu0  ;;  %2157 = vmatprep.mubr.bf16.mxu0 %v1866_v63  ;;  %v12820_v63 = vpack.c.bf16 %v1809_v52, %v1807_v35  ;;  %v1167_v3 = vpop.f32.mrb[16].mxu1  ;;  %2870 = vmatprep.subr.bf16.mxu1 %v11430_v16 }
 0x10a   : > { %v1589_v58 = vadd.f32 %v12727_v0, %v931_v13  ;;  %v933_v14 = vpop.f32.mrb[19].mxu0  ;;  %2158 = vmatmul.mubr.bf16.gmra.mrb[108].mxu0 %v1865_v57  ;;  %v1715_v18 = vmax.f32 %v1587_v34, 0.0  ;;  %v1810_v57 = vmax.f32 %v1682_v45, 0.0  ;;  %v1683_v8 = vadd.f32 %v12727_v0, %v1167_v3  ;;  %v1169_v46 = vpop.f32.mrb[17].mxu1  ;;  %2871 = vmatpush1.bf16.msra.mxu1 %v11428_v59 }
 0x10b   : > { %v1590_v9 = vadd.f32 %v12730_v23, %v933_v14  ;;  %v1716_v22 = vmax.f32 %v1588_v12, 0.0  ;;  %v1684_v13 = vadd.f32 %v12730_v23, %v1169_v46  ;;  %v1171_v31 = vpop.f32.mrb[18].mxu1 }
 0x10c   : > { %v1717_v19 = vmax.f32 %v1589_v58, 0.0  ;;  %v12822_v4 = vpack.c.bf16 %v1810_v57, %v1808_v36  ;;  %v1811_v15 = vmax.f32 %v1683_v8, 0.0 }
 0x10d   : > { %v1718_v24 = vmax.f32 %v1590_v9, 0.0  ;;  %v1685_v9 = vadd.f32 %v12727_v0, %v1171_v31 }
 0x10e   : > { %v1867_v28 = vpack.c.bf16 %v1717_v19, %v1715_v18  ;;  %v1173_v18 = vpop.f32.mrb[19].mxu1  ;;  %10384 = vmatmul.mubr.msk.bf16.gmra.mrb[124].mxu1 %vm740_vm2, %v12691_v53 }
 0x10f   : > { %v937_v33 = vpop.f32.mrb[20].mxu0  ;;  %v1868_v25 = vpack.c.bf16 %v1718_v24, %v1716_v22  ;;  %v1812_v22 = vmax.f32 %v1684_v13, 0.0  ;;  %v1686_v24 = vadd.f32 %v12730_v23, %v1173_v18  ;;  %1478 = vmatprep.mubr.bf16.mxu1 %v12146_v7 }
 0x110   : > { %v1591_v40 = vadd.f32 %v12727_v0, %v937_v33  ;;  %v939_v41 = vpop.f32.mrb[21].mxu0 }
 0x111   : > { %v1592_v48 = vadd.f32 %v12730_v23, %v939_v41  ;;  %v941_v51 = vpop.f32.mrb[22].mxu0  ;;  %2167 = vmatprep.mubr.bf16.mxu0 %v1868_v25  ;;  %v1814_v33 = vmax.f32 %v1686_v24, 0.0 }
 0x112   : > { %v1593_v54 = vadd.f32 %v12727_v0, %v941_v51  ;;  %v943_v55 = vpop.f32.mrb[23].mxu0  ;;  %2168 = vmatmul.mubr.bf16.gmra.mrb[112].mxu0 %v1867_v28  ;;  %v1719_v47 = vmax.f32 %v1591_v40, 0.0  ;;  %v1813_v28 = vmax.f32 %v1685_v9, 0.0  ;;  %v1177_v40 = vpop.f32.mrb[20].mxu1 }
 0x113   : > { %v1594_v61 = vadd.f32 %v12730_v23, %v943_v55  ;;  %v1720_v34 = vmax.f32 %v1592_v48, 0.0  ;;  %v12837_v41 = vpack.c.bf16 %v1814_v33, %v1812_v22  ;;  %v1687_v53 = vadd.f32 %v12727_v0, %v1177_v40  ;;  %v1179_v48 = vpop.f32.mrb[21].mxu1 }
 0x114   : > { %v1721_v1 = vmax.f32 %v1593_v54, 0.0  ;;  %v12835_v35 = vpack.c.bf16 %v1813_v28, %v1811_v15  ;;  %v1688_v52 = vadd.f32 %v12730_v23, %v1179_v48  ;;  %v1181_v54 = vpop.f32.mrb[22].mxu1  ;;  %v11433_v15 = vld [vmem:[%s15751_s5 + $0x1d4] ss:$8 sps:$4 sm:$0xff]  }
 0x115   : > { %v1722_v6 = vmax.f32 %v1594_v61, 0.0  ;;  %v1815_v59 = vmax.f32 %v1687_v53, 0.0  ;;  %v1689_v61 = vadd.f32 %v12727_v0, %v1181_v54  ;;  %v1183_v16 = vpop.f32.mrb[23].mxu1  ;;  %2872 = vmatprep.subr.bf16.mxu1 %v11433_v15 }
 0x116   : > { %v1869_v12 = vpack.c.bf16 %v1721_v1, %v1719_v47  ;;  %v1816_v3 = vmax.f32 %v1688_v52, 0.0  ;;  %10385 = vmatmul.mubr.msk.bf16.gmra.mrb[128].mxu1 %vm740_vm2, %v12317_v32 }
 0x117   : > { %v947_v58 = vpop.f32.mrb[24].mxu0  ;;  %v1870_v14 = vpack.c.bf16 %v1722_v6, %v1720_v34  ;;  %v1690_v34 = vadd.f32 %v12730_v23, %v1183_v16  ;;  %v1817_v46 = vmax.f32 %v1689_v61, 0.0  ;;  %1488 = vmatprep.mubr.bf16.mxu1 %v12146_v7 }
 0x118   : > { %v1595_v19 = vadd.f32 %v12727_v0, %v947_v58  ;;  %v949_v20 = vpop.f32.mrb[25].mxu0  ;;  %v11431_v58 = vld [vmem:[%s15751_s5 + $0x1d0] ss:$8 sps:$4 sm:$0xff]  }
 0x119   : > { %v1596_v42 = vadd.f32 %v12730_v23, %v949_v20  ;;  %v951_v26 = vpop.f32.mrb[26].mxu0  ;;  %2177 = vmatprep.mubr.bf16.mxu0 %v1870_v14  ;;  %v1818_v31 = vmax.f32 %v1690_v34, 0.0  ;;  %v12856_v9 = vpack.c.bf16 %v1817_v46, %v1815_v59  ;;  %2873 = vmatpush1.bf16.msra.mxu1 %v11431_v58 }
 0x11a   : > { %v1597_v29 = vadd.f32 %v12727_v0, %v951_v26  ;;  %v953_v30 = vpop.f32.mrb[27].mxu0  ;;  %2178 = vmatmul.mubr.bf16.gmra.mrb[116].mxu0 %v1869_v12  ;;  %v1723_v38 = vmax.f32 %v1595_v19, 0.0  ;;  %v1187_v19 = vpop.f32.mrb[24].mxu1 }
 0x11b   : > { %v1598_v25 = vadd.f32 %v12730_v23, %v953_v30  ;;  %v1724_v36 = vmax.f32 %v1596_v42, 0.0  ;;  %v12858_v20 = vpack.c.bf16 %v1818_v31, %v1816_v3  ;;  %v1691_v42 = vadd.f32 %v12727_v0, %v1187_v19  ;;  %v1189_v26 = vpop.f32.mrb[25].mxu1 }
 0x11c   : > { %v1725_v39 = vmax.f32 %v1597_v29, 0.0  ;;  %v1692_v29 = vadd.f32 %v12730_v23, %v1189_v26  ;;  %v1191_v30 = vpop.f32.mrb[26].mxu1 }
 0x11d   : > { %v1726_v45 = vmax.f32 %v1598_v25, 0.0  ;;  %v1193_v40 = vpop.f32.mrb[27].mxu1 }
 0x11e   : > { %v1871_v51 = vpack.c.bf16 %v1725_v39, %v1723_v38  ;;  %v1819_v38 = vmax.f32 %v1691_v42, 0.0  ;;  %v1693_v39 = vadd.f32 %v12727_v0, %v1191_v30  ;;  %v1820_v53 = vmax.f32 %v1692_v29, 0.0  ;;  %10386 = vmatmul.mubr.msk.bf16.gmra.mrb[132].mxu1 %vm740_vm2, %v12346_v43 }
 0x11f   : > { %v957_v55 = vpop.f32.mrb[28].mxu0  ;;  %v1872_v57 = vpack.c.bf16 %v1726_v45, %v1724_v36  ;;  %v1694_v48 = vadd.f32 %v12730_v23, %v1193_v40  ;;  %1498 = vmatprep.mubr.bf16.mxu1 %v12146_v7 }
 0x120   : > { %v1599_v47 = vadd.f32 %v12727_v0, %v957_v55  ;;  %v959_v1 = vpop.f32.mrb[29].mxu0  ;;  %v1821_v54 = vmax.f32 %v1693_v39, 0.0 }
 0x121   : > { %v1600_v6 = vadd.f32 %v12730_v23, %v959_v1  ;;  %v961_v8 = vpop.f32.mrb[30].mxu0  ;;  %2187 = vmatprep.mubr.bf16.mxu0 %v1872_v57  ;;  %v1822_v59 = vmax.f32 %v1694_v48, 0.0  ;;  %v11436_v1 = vld [vmem:[%s15751_s5 + $0x204] ss:$8 sps:$4 sm:$0xff]   ;;  %v1197_v34 = vpop.f32.mrb[28].mxu1 }
 0x122   : > { %v1601_v12 = vadd.f32 %v12727_v0, %v961_v8  ;;  %v963_v13 = vpop.f32.mrb[31].mxu0  ;;  %2188 = vmatmul.mubr.bf16.gmra.mrb[120].mxu0 %v1871_v51  ;;  %v1727_v32 = vmax.f32 %v1599_v47, 0.0  ;;  %v11434_v47 = vld [vmem:[%s15751_s5 + $0x200] ss:$8 sps:$4 sm:$0xff]   ;;  %v12877_v3 = vpack.c.bf16 %v1821_v54, %v1819_v38  ;;  %v11439_v8 = vld [vmem:[%s15751_s5 + $0x1e4] ss:$8 sps:$4 sm:$0xff]   ;;  %v1695_v31 = vadd.f32 %v12727_v0, %v1197_v34  ;;  %3597 = vmatprep.subr.bf16.mxu0 %v11436_v1 }
 0x123   : > { %v1602_v14 = vadd.f32 %v12730_v23, %v963_v13  ;;  %v1728_v22 = vmax.f32 %v1600_v6, 0.0  ;;  %v11437_v6 = vld [vmem:[%s15751_s5 + $0x1e0] ss:$8 sps:$4 sm:$0xff]   ;;  %v12885_v46 = vpack.c.bf16 %v1822_v59, %v1820_v53  ;;  %v1199_v58 = vpop.f32.mrb[29].mxu1  ;;  %3598 = vmatpush1.bf16.msra.mxu0 %v11434_v47  ;;  %2874 = vmatprep.subr.bf16.mxu1 %v11439_v8  ;;  %v11440_v8 = vld [vmem:[%s15751_s5 + $0x210] ss:$8 sps:$4 sm:$0xff]  }
 0x124   : > { %v1729_v18 = vmax.f32 %v1601_v12, 0.0  ;;  %v1696_v15 = vadd.f32 %v12730_v23, %v1199_v58  ;;  %2875 = vmatpush1.bf16.msra.mxu1 %v11437_v6  ;;  %v11445_v58 = vld [vmem:[%s15751_s5 + $0x1f4] ss:$8 sps:$4 sm:$0xff]  }
 0x125   : > { %v1730_v24 = vmax.f32 %v1602_v14, 0.0  ;;  %2876 = vmatprep.subr.bf16.mxu1 %v11445_v58 }
 0x126   : > { %v1873_v28 = vpack.c.bf16 %v1729_v18, %v1727_v32  ;;  %v1201_v32 = vpop.f32.mrb[30].mxu1  ;;  %v1824_v29 = vmax.f32 %v1696_v15, 0.0  ;;  %10387 = vmatmul.mubr.msk.bf16.gmra.mrb[136].mxu1 %vm740_vm2, %v12381_v56 }
 0x127   : > { %v967_v33 = vpop.f32.mrb[32].mxu0  ;;  %v1874_v25 = vpack.c.bf16 %v1730_v24, %v1728_v22  ;;  %v1823_v22 = vmax.f32 %v1695_v31, 0.0  ;;  %v1697_v24 = vadd.f32 %v12727_v0, %v1201_v32  ;;  %v1203_v42 = vpop.f32.mrb[31].mxu1  ;;  %1508 = vmatprep.mubr.bf16.mxu1 %v12146_v7 }
 0x128   : > { %v1603_v36 = vadd.f32 %v12727_v0, %v967_v33  ;;  %v969_v45 = vpop.f32.mrb[33].mxu0  ;;  %v1698_v30 = vadd.f32 %v12730_v23, %v1203_v42 }
 0x129   : > { %v1604_v51 = vadd.f32 %v12730_v23, %v969_v45  ;;  %v971_v52 = vpop.f32.mrb[34].mxu0  ;;  %2197 = vmatprep.mubr.bf16.mxu0 %v1874_v25  ;;  %v1825_v38 = vmax.f32 %v1697_v24, 0.0 }
 0x12a   : > { %v1605_v55 = vadd.f32 %v12727_v0, %v971_v52  ;;  %v973_v57 = vpop.f32.mrb[35].mxu0  ;;  %2198 = vmatmul.mubr.bf16.gmra.mrb[124].mxu0 %v1873_v28  ;;  %v1731_v61 = vmax.f32 %v1603_v36, 0.0  ;;  %v1826_v36 = vmax.f32 %v1698_v30, 0.0 }
 0x12b   : > { %v1606_v16 = vadd.f32 %v12730_v23, %v973_v57  ;;  %v1732_v12 = vmax.f32 %v1604_v51, 0.0  ;;  %v12898_v53 = vpack.c.bf16 %v1825_v38, %v1823_v22 }
 0x12c   : > { %v1733_v43 = vmax.f32 %v1605_v55, 0.0  ;;  %v12900_v52 = vpack.c.bf16 %v1826_v36, %v1824_v29 }
 0x12d   : > { %v1734_v13 = vmax.f32 %v1606_v16, 0.0 }
 0x12e   : > { %v1875_v14 = vpack.c.bf16 %v1733_v43, %v1731_v61  ;;  %10388 = vmatmul.mubr.msk.bf16.gmra.mrb[140].mxu1 %vm740_vm2, %v12407_v2  ;;  %v11443_v2 = vld [vmem:[%s15751_s5 + $0x1f0] ss:$8 sps:$4 sm:$0xff]  }
 0x12f   : > { %v977_v18 = vpop.f32.mrb[36].mxu0  ;;  %v1876_v19 = vpack.c.bf16 %v1734_v13, %v1732_v12  ;;  %1518 = vmatprep.mubr.bf16.mxu1 %v12146_v7  ;;  %v11442_v12 = vld [vmem:[%s15751_s5 + $0x214] ss:$8 sps:$4 sm:$0xff]   ;;  %2877 = vmatpush1.bf16.msra.mxu1 %v11443_v2 }
 0x130   : > { %v1607_v26 = vadd.f32 %v12727_v0, %v977_v18  ;;  %v979_v28 = vpop.f32.mrb[37].mxu0  ;;  %3599 = vmatprep.subr.bf16.mxu0 %v11442_v12  ;;  %v11448_v12 = vld [vmem:[%s15751_s5 + $0x224] ss:$8 sps:$4 sm:$0xff]  }
 0x131   : > { %v1608_v33 = vadd.f32 %v12730_v23, %v979_v28  ;;  %v981_v25 = vpop.f32.mrb[38].mxu0  ;;  %2207 = vmatprep.mubr.bf16.mxu0 %v1876_v19  ;;  %3600 = vmatpush1.bf16.msra.mxu0 %v11440_v8 }
 0x132   : > { %v1609_v39 = vadd.f32 %v12727_v0, %v981_v25  ;;  %v983_v40 = vpop.f32.mrb[39].mxu0  ;;  %2208 = vmatmul.mubr.bf16.gmra.mrb[128].mxu0 %v1875_v14  ;;  %v1735_v48 = vmax.f32 %v1607_v26, 0.0  ;;  %3601 = vmatprep.subr.bf16.mxu0 %v11448_v12 }
 0x133   : > { %v1610_v45 = vadd.f32 %v12730_v23, %v983_v40  ;;  %v1736_v54 = vmax.f32 %v1608_v33, 0.0 }
 0x134   : > { %v1737_v51 = vmax.f32 %v1609_v39, 0.0 }
 0x135   : > { %v1738_v55 = vmax.f32 %v1610_v45, 0.0 }
 0x136   : > { %v1877_v57 = vpack.c.bf16 %v1737_v51, %v1735_v48  ;;  %10389 = vmatmul.mubr.msk.bf16.gmra.mrb[144].mxu1 %vm740_vm2, %v12432_v17 }
 0x137   : > { %v987_v59 = vpop.f32.mrb[40].mxu0  ;;  %v1878_v56 = vpack.c.bf16 %v1738_v55, %v1736_v54  ;;  %1528 = vmatprep.mubr.bf16.mxu1 %v12146_v7 }
 0x138   : > { %v1611_v61 = vadd.f32 %v12727_v0, %v987_v59  ;;  %v989_v16 = vpop.f32.mrb[41].mxu0 }
 0x139   : > { %v1612_v47 = vadd.f32 %v12730_v23, %v989_v16  ;;  %v991_v1 = vpop.f32.mrb[42].mxu0  ;;  %2217 = vmatprep.mubr.bf16.mxu0 %v1878_v56 }
 0x13a   : > { %v1613_v43 = vadd.f32 %v12727_v0, %v991_v1  ;;  %v993_v34 = vpop.f32.mrb[43].mxu0  ;;  %2218 = vmatmul.mubr.bf16.gmra.mrb[132].mxu0 %v1877_v57  ;;  %v1739_v13 = vmax.f32 %v1611_v61, 0.0 }
 0x13b   : > { %v1614_v6 = vadd.f32 %v12730_v23, %v993_v34  ;;  %v1740_v14 = vmax.f32 %v1612_v47, 0.0 }
 0x13c   : > { %v1741_v31 = vmax.f32 %v1613_v43, 0.0 }
 0x13d   : > { %v1742_v15 = vmax.f32 %v1614_v6, 0.0 }
 0x13e   : > { %v1879_v32 = vpack.c.bf16 %v1741_v31, %v1739_v13  ;;  %10390 = vmatmul.mubr.msk.bf16.gmra.mrb[148].mxu1 %vm740_vm2, %v12455_v27  ;;  %v11446_v27 = vld [vmem:[%s15751_s5 + $0x220] ss:$8 sps:$4 sm:$0xff]  }
 0x13f   : > { %v997_v18 = vpop.f32.mrb[44].mxu0  ;;  %v1880_v19 = vpack.c.bf16 %v1742_v15, %v1740_v14  ;;  %1538 = vmatprep.mubr.bf16.mxu1 %v12146_v7  ;;  %3602 = vmatpush1.bf16.msra.mxu0 %v11446_v27 }
 0x140   : > { %v1615_v22 = vadd.f32 %v12727_v0, %v997_v18  ;;  %v999_v24 = vpop.f32.mrb[45].mxu0 }
 0x141   : > { %v1616_v42 = vadd.f32 %v12730_v23, %v999_v24  ;;  %v1001_v26 = vpop.f32.mrb[46].mxu0  ;;  %2227 = vmatprep.mubr.bf16.mxu0 %v1880_v19 }
 0x142   : > { %v1617_v28 = vadd.f32 %v12727_v0, %v1001_v26  ;;  %v1003_v29 = vpop.f32.mrb[47].mxu0  ;;  %2228 = vmatmul.mubr.bf16.gmra.mrb[136].mxu0 %v1879_v32  ;;  %v1743_v33 = vmax.f32 %v1615_v22, 0.0 }
 0x143   : > { %v1618_v30 = vadd.f32 %v12730_v23, %v1003_v29  ;;  %v1744_v38 = vmax.f32 %v1616_v42, 0.0 }
 0x144   : > { %v1745_v25 = vmax.f32 %v1617_v28, 0.0 }
 0x145   : > { %v1746_v39 = vmax.f32 %v1618_v30, 0.0 }
 0x146   : > { %v1881_v40 = vpack.c.bf16 %v1745_v25, %v1743_v33  ;;  %10391 = vmatmul.mubr.msk.bf16.gmra.mrb[152].mxu1 %vm740_vm2, %v12475_v37 }
 0x147   : > { %v1007_v36 = vpop.f32.mrb[48].mxu0  ;;  %v1882_v45 = vpack.c.bf16 %v1746_v39, %v1744_v38  ;;  %1548 = vmatprep.mubr.bf16.mxu1 %v12146_v7 }
 0x148   : > { %v1619_v48 = vadd.f32 %v12727_v0, %v1007_v36  ;;  %v1009_v51 = vpop.f32.mrb[49].mxu0 }
 0x149   : > { %v1620_v17 = vadd.f32 %v12730_v23, %v1009_v51  ;;  %v1011_v54 = vpop.f32.mrb[50].mxu0  ;;  %2237 = vmatprep.mubr.bf16.mxu0 %v1882_v45 }
 0x14a   : > { %v1621_v55 = vadd.f32 %v12727_v0, %v1011_v54  ;;  %v1013_v57 = vpop.f32.mrb[51].mxu0  ;;  %2238 = vmatmul.mubr.bf16.gmra.mrb[140].mxu0 %v1881_v40  ;;  %v1747_v56 = vmax.f32 %v1619_v48, 0.0 }
 0x14b   : > { %v1622_v59 = vadd.f32 %v12730_v23, %v1013_v57  ;;  %v1748_v16 = vmax.f32 %v1620_v17, 0.0 }
 0x14c   : > { %v1749_v61 = vmax.f32 %v1621_v55, 0.0  ;;  %v11451_v55 = vld [vmem:[%s15751_s5 + $0x234] ss:$8 sps:$4 sm:$0xff]  }
 0x14d   : > { %v1750_v47 = vmax.f32 %v1622_v59, 0.0  ;;  %3603 = vmatprep.subr.bf16.mxu0 %v11451_v55 }
 0x14e   : > { %v1883_v1 = vpack.c.bf16 %v1749_v61, %v1747_v56  ;;  %10392 = vmatmul.mubr.msk.bf16.gmra.mrb[156].mxu1 %vm740_vm2, %v12504_v50  ;;  %v11449_v50 = vld [vmem:[%s15751_s5 + $0x230] ss:$8 sps:$4 sm:$0xff]  }
 0x14f   : > { %v1017_v43 = vpop.f32.mrb[52].mxu0  ;;  %v1884_v34 = vpack.c.bf16 %v1750_v47, %v1748_v16  ;;  %3604 = vmatpush1.bf16.msra.mxu0 %v11449_v50 }
 0x150   : > { %v1623_v6 = vadd.f32 %v12727_v0, %v1017_v43  ;;  %v1019_v8 = vpop.f32.mrb[53].mxu0 }
 0x151   : > { %v1624_v13 = vadd.f32 %v12730_v23, %v1019_v8  ;;  %v1021_v31 = vpop.f32.mrb[54].mxu0  ;;  %2247 = vmatprep.mubr.bf16.mxu0 %v1884_v34 }
 0x152   : > { %v1625_v2 = vadd.f32 %v12727_v0, %v1021_v31  ;;  %v1023_v58 = vpop.f32.mrb[55].mxu0  ;;  %2248 = vmatmul.mubr.bf16.gmra.mrb[144].mxu0 %v1883_v1  ;;  %v1751_v15 = vmax.f32 %v1623_v6, 0.0 }
 0x153   : > { %v1626_v14 = vadd.f32 %v12730_v23, %v1023_v58  ;;  %v1752_v18 = vmax.f32 %v1624_v13, 0.0 }
 0x154   : > { %v1753_v32 = vmax.f32 %v1625_v2, 0.0 }
 0x155   : > { %v1754_v19 = vmax.f32 %v1626_v14, 0.0 }
 0x156   : > { %v1885_v22 = vpack.c.bf16 %v1753_v32, %v1751_v15 }
 0x157   : > { %v1027_v24 = vpop.f32.mrb[56].mxu0  ;;  %v1886_v42 = vpack.c.bf16 %v1754_v19, %v1752_v18 }
 0x158   : > { %v1627_v26 = vadd.f32 %v12727_v0, %v1027_v24  ;;  %v1029_v37 = vpop.f32.mrb[57].mxu0 }
 0x159   : > { %v1628_v28 = vadd.f32 %v12730_v23, %v1029_v37  ;;  %v1031_v29 = vpop.f32.mrb[58].mxu0  ;;  %2257 = vmatprep.mubr.bf16.mxu0 %v1886_v42 }
 0x15a   : > { %v1629_v30 = vadd.f32 %v12727_v0, %v1031_v29  ;;  %v1033_v33 = vpop.f32.mrb[59].mxu0  ;;  %2258 = vmatmul.mubr.bf16.gmra.mrb[148].mxu0 %v1885_v22  ;;  %v1755_v38 = vmax.f32 %v1627_v26, 0.0  ;;  %v11452_v29 = vld [vmem:[%s15751_s5 + $0x240] ss:$8 sps:$4 sm:$0xff]  }
 0x15b   : > { %v1630_v25 = vadd.f32 %v12730_v23, %v1033_v33  ;;  %v1756_v40 = vmax.f32 %v1628_v28, 0.0 }
 0x15c   : > { %v1757_v39 = vmax.f32 %v1629_v30, 0.0  ;;  %v11454_v30 = vld [vmem:[%s15751_s5 + $0x244] ss:$8 sps:$4 sm:$0xff]  }
 0x15d   : > { %v1758_v36 = vmax.f32 %v1630_v25, 0.0  ;;  %3605 = vmatprep.subr.bf16.mxu0 %v11454_v30 }
 0x15e   : > { %v1887_v45 = vpack.c.bf16 %v1757_v39, %v1755_v38  ;;  %3606 = vmatpush1.bf16.msra.mxu0 %v11452_v29 }
 0x15f   : > { %v1037_v48 = vpop.f32.mrb[60].mxu0  ;;  %v1888_v51 = vpack.c.bf16 %v1758_v36, %v1756_v40 }
 0x160   : > { %v1631_v17 = vadd.f32 %v12727_v0, %v1037_v48  ;;  %v1039_v54 = vpop.f32.mrb[61].mxu0 }
 0x161   : > { %v1632_v57 = vadd.f32 %v12730_v23, %v1039_v54  ;;  %v1041_v59 = vpop.f32.mrb[62].mxu0  ;;  %2267 = vmatprep.mubr.bf16.mxu0 %v1888_v51 }
 0x162   : > { %v1633_v56 = vadd.f32 %v12727_v0, %v1041_v59  ;;  %v1043_v61 = vpop.f32.mrb[63].mxu0  ;;  %2268 = vmatmul.mubr.bf16.gmra.mrb[152].mxu0 %v1887_v45  ;;  %v1759_v47 = vmax.f32 %v1631_v17, 0.0 }
 0x163   : > { %v1634_v16 = vadd.f32 %v12730_v23, %v1043_v61  ;;  %v1760_v43 = vmax.f32 %v1632_v57, 0.0 }
 0x164   : > { %v1761_v1 = vmax.f32 %v1633_v56, 0.0 }
 0x165   : > { %v1762_v34 = vmax.f32 %v1634_v16, 0.0 }
 0x166   : > { %v1889_v6 = vpack.c.bf16 %v1761_v1, %v1759_v47 }
 0x167   : > { %v1047_v8 = vpop.f32.mrb[64].mxu0  ;;  %v1890_v27 = vpack.c.bf16 %v1762_v34, %v1760_v43 }
 0x168   : > { %v1635_v12 = vadd.f32 %v12727_v0, %v1047_v8  ;;  %v1049_v13 = vpop.f32.mrb[65].mxu0 }
 0x169   : > { %v1636_v31 = vadd.f32 %v12730_v23, %v1049_v13  ;;  %v1051_v2 = vpop.f32.mrb[66].mxu0  ;;  %2277 = vmatprep.mubr.bf16.mxu0 %v1890_v27 }
 0x16a   : > { %v1637_v58 = vadd.f32 %v12727_v0, %v1051_v2  ;;  %v1053_v14 = vpop.f32.mrb[67].mxu0  ;;  %2278 = vmatmul.mubr.bf16.gmra.mrb[156].mxu0 %v1889_v6  ;;  %v1763_v32 = vmax.f32 %v1635_v12, 0.0  ;;  %v11455_v2 = vld [vmem:[%s15751_s5 + $0x250] ss:$8 sps:$4 sm:$0xff]  }
 0x16b   : > { %v1638_v15 = vadd.f32 %v12730_v23, %v1053_v14  ;;  %v1764_v19 = vmax.f32 %v1636_v31, 0.0 }
 0x16c   : > { %v1765_v18 = vmax.f32 %v1637_v58, 0.0  ;;  %v11457_v58 = vld [vmem:[%s15751_s5 + $0x254] ss:$8 sps:$4 sm:$0xff]  }
 0x16d   : > { %v1766_v22 = vmax.f32 %v1638_v15, 0.0  ;;  %3607 = vmatprep.subr.bf16.mxu0 %v11457_v58 }
 0x16e   : > { %v1891_v24 = vpack.c.bf16 %v1765_v18, %v1763_v32  ;;  %3608 = vmatpush1.bf16.msra.mxu0 %v11455_v2 }
 0x16f   : > { %v1057_v42 = vpop.f32.mrb[68].mxu0  ;;  %v1892_v26 = vpack.c.bf16 %v1766_v22, %v1764_v19 }
 0x170   : > { %v1639_v37 = vadd.f32 %v12727_v0, %v1057_v42  ;;  %v1059_v28 = vpop.f32.mrb[69].mxu0 }
 0x171   : > { %v1640_v33 = vadd.f32 %v12730_v23, %v1059_v28  ;;  %v1061_v25 = vpop.f32.mrb[70].mxu0  ;;  %2287 = vmatprep.mubr.bf16.mxu0 %v1892_v26 }
 0x172   : > { %v1641_v38 = vadd.f32 %v12727_v0, %v1061_v25  ;;  %v1063_v39 = vpop.f32.mrb[71].mxu0  ;;  %2288 = vmatmul.mubr.bf16.gmra.mrb[160].mxu0 %v1891_v24  ;;  %v1767_v36 = vmax.f32 %v1639_v37, 0.0 }
 0x173   : > { %v1642_v40 = vadd.f32 %v12730_v23, %v1063_v39  ;;  %v1768_v48 = vmax.f32 %v1640_v33, 0.0 }
 0x174   : > { %v1769_v45 = vmax.f32 %v1641_v38, 0.0 }
 0x175   : > { %v1770_v51 = vmax.f32 %v1642_v40, 0.0 }
 0x176   : > { %v1893_v17 = vpack.c.bf16 %v1769_v45, %v1767_v36 }
 0x177   : > { %v1067_v54 = vpop.f32.mrb[72].mxu0  ;;  %v1894_v50 = vpack.c.bf16 %v1770_v51, %v1768_v48 }
 0x178   : > { %v1643_v55 = vadd.f32 %v12727_v0, %v1067_v54  ;;  %v1069_v57 = vpop.f32.mrb[73].mxu0 }
 0x179   : > { %v1644_v59 = vadd.f32 %v12730_v23, %v1069_v57  ;;  %v1071_v56 = vpop.f32.mrb[74].mxu0  ;;  %2297 = vmatprep.mubr.bf16.mxu0 %v1894_v50 }
 0x17a   : > { %v1645_v61 = vadd.f32 %v12727_v0, %v1071_v56  ;;  %v1073_v16 = vpop.f32.mrb[75].mxu0  ;;  %2298 = vmatmul.mubr.bf16.gmra.mrb[164].mxu0 %v1893_v17  ;;  %v1771_v1 = vmax.f32 %v1643_v55, 0.0  ;;  %v11458_v56 = vld [vmem:[%s15751_s5 + $0x260] ss:$8 sps:$4 sm:$0xff]  }
 0x17b   : > { %v1646_v47 = vadd.f32 %v12730_v23, %v1073_v16  ;;  %v1772_v34 = vmax.f32 %v1644_v59, 0.0 }
 0x17c   : > { %v1773_v43 = vmax.f32 %v1645_v61, 0.0  ;;  %v11460_v61 = vld [vmem:[%s15751_s5 + $0x264] ss:$8 sps:$4 sm:$0xff]  }
 0x17d   : > { %v1774_v6 = vmax.f32 %v1646_v47, 0.0  ;;  %3609 = vmatprep.subr.bf16.mxu0 %v11460_v61 }
 0x17e   : > { %v1895_v8 = vpack.c.bf16 %v1773_v43, %v1771_v1  ;;  %3610 = vmatpush1.bf16.msra.mxu0 %v11458_v56  ;;  %v11466_v56 = vld [vmem:[%s15751_s5 + $0x284] ss:$8 sps:$4 sm:$0xff]  }
 0x17f   : > { %v1077_v27 = vpop.f32.mrb[76].mxu0  ;;  %v1896_v12 = vpack.c.bf16 %v1774_v6, %v1772_v34 }
 0x180   : > { %v1647_v13 = vadd.f32 %v12727_v0, %v1077_v27  ;;  %v1079_v31 = vpop.f32.mrb[77].mxu0 }
 0x181   : > { %v1648_v14 = vadd.f32 %v12730_v23, %v1079_v31  ;;  %v1081_v15 = vpop.f32.mrb[78].mxu0  ;;  %2307 = vmatprep.mubr.bf16.mxu0 %v1896_v12 }
 0x182   : > { %v1649_v32 = vadd.f32 %v12727_v0, %v1081_v15  ;;  %v1083_v18 = vpop.f32.mrb[79].mxu0  ;;  %2308 = vmatmul.mubr.bf16.gmra.mrb[168].mxu0 %v1895_v8  ;;  %v1775_v22 = vmax.f32 %v1647_v13, 0.0 }
 0x183   : > { %v1650_v19 = vadd.f32 %v12730_v23, %v1083_v18  ;;  %v1776_v42 = vmax.f32 %v1648_v14, 0.0 }
 0x184   : > { %v1777_v24 = vmax.f32 %v1649_v32, 0.0 }
 0x185   : > { %v1778_v26 = vmax.f32 %v1650_v19, 0.0 }
 0x186   : > { %v1897_v37 = vpack.c.bf16 %v1777_v24, %v1775_v22 }
 0x187   : > { %v1087_v28 = vpop.f32.mrb[80].mxu0  ;;  %v1898_v29 = vpack.c.bf16 %v1778_v26, %v1776_v42 }
 0x188   : > { %v1651_v30 = vadd.f32 %v12727_v0, %v1087_v28  ;;  %v1089_v33 = vpop.f32.mrb[81].mxu0 }
 0x189   : > { %v1652_v25 = vadd.f32 %v12730_v23, %v1089_v33  ;;  %v1091_v38 = vpop.f32.mrb[82].mxu0  ;;  %2317 = vmatprep.mubr.bf16.mxu0 %v1898_v29 }
 0x18a   : > { %v1653_v39 = vadd.f32 %v12727_v0, %v1091_v38  ;;  %v1093_v40 = vpop.f32.mrb[83].mxu0  ;;  %2318 = vmatmul.mubr.bf16.gmra.mrb[172].mxu0 %v1897_v37  ;;  %v1779_v45 = vmax.f32 %v1651_v30, 0.0  ;;  %v11461_v38 = vld [vmem:[%s15751_s5 + $0x270] ss:$8 sps:$4 sm:$0xff]  }
 0x18b   : > { %v1654_v36 = vadd.f32 %v12730_v23, %v1093_v40  ;;  %v1780_v51 = vmax.f32 %v1652_v25, 0.0 }
 0x18c   : > { %v1781_v48 = vmax.f32 %v1653_v39, 0.0  ;;  %v11463_v39 = vld [vmem:[%s15751_s5 + $0x274] ss:$8 sps:$4 sm:$0xff]  }
 0x18d   : > { %v1782_v17 = vmax.f32 %v1654_v36, 0.0  ;;  %3611 = vmatprep.subr.bf16.mxu0 %v11463_v39 }
 0x18e   : > { %v1899_v54 = vpack.c.bf16 %v1781_v48, %v1779_v45  ;;  %3612 = vmatpush1.bf16.msra.mxu0 %v11461_v38 }
 0x18f   : > { %v1097_v50 = vpop.f32.mrb[84].mxu0  ;;  %v1900_v55 = vpack.c.bf16 %v1782_v17, %v1780_v51  ;;  %3613 = vmatprep.subr.bf16.mxu0 %v11466_v56 }
 0x190   : > { %v1655_v57 = vadd.f32 %v12727_v0, %v1097_v50  ;;  %v1099_v59 = vpop.f32.mrb[85].mxu0 }
 0x191   : > { %v1656_v16 = vadd.f32 %v12730_v23, %v1099_v59  ;;  %v1101_v47 = vpop.f32.mrb[86].mxu0  ;;  %2327 = vmatprep.mubr.bf16.mxu0 %v1900_v55 }
 0x192   : > { %v1657_v1 = vadd.f32 %v12727_v0, %v1101_v47  ;;  %v1103_v43 = vpop.f32.mrb[87].mxu0  ;;  %2328 = vmatmul.mubr.bf16.gmra.mrb[176].mxu0 %v1899_v54  ;;  %v1783_v6 = vmax.f32 %v1655_v57, 0.0 }
 0x193   : > { %v1658_v34 = vadd.f32 %v12730_v23, %v1103_v43  ;;  %v1784_v27 = vmax.f32 %v1656_v16, 0.0 }
 0x194   : > { %v1785_v8 = vmax.f32 %v1657_v1, 0.0 }
 0x195   : > { %v1786_v12 = vmax.f32 %v1658_v34, 0.0 }
 0x196   : > { %v1901_v13 = vpack.c.bf16 %v1785_v8, %v1783_v6 }
 0x197   : > { %v1107_v31 = vpop.f32.mrb[88].mxu0  ;;  %v1902_v2 = vpack.c.bf16 %v1786_v12, %v1784_v27 }
 0x198   : > { %v1659_v58 = vadd.f32 %v12727_v0, %v1107_v31  ;;  %v1109_v14 = vpop.f32.mrb[89].mxu0 }
 0x199   : > { %v1660_v15 = vadd.f32 %v12730_v23, %v1109_v14  ;;  %v1111_v32 = vpop.f32.mrb[90].mxu0  ;;  %2337 = vmatprep.mubr.bf16.mxu0 %v1902_v2 }
 0x19a   : > { %v1661_v18 = vadd.f32 %v12727_v0, %v1111_v32  ;;  %v1113_v19 = vpop.f32.mrb[91].mxu0  ;;  %2338 = vmatmul.mubr.bf16.gmra.mrb[180].mxu0 %v1901_v13  ;;  %v1787_v24 = vmax.f32 %v1659_v58, 0.0 }
 0x19b   : > { %v1662_v22 = vadd.f32 %v12730_v23, %v1113_v19  ;;  %v1788_v26 = vmax.f32 %v1660_v15, 0.0 }
 0x19c   : > { %v1789_v42 = vmax.f32 %v1661_v18, 0.0 }
 0x19d   : > { %v1790_v37 = vmax.f32 %v1662_v22, 0.0 }
 0x19e   : > { %v1903_v28 = vpack.c.bf16 %v1789_v42, %v1787_v24 }
 0x19f   : > { %v1117_v29 = vpop.f32.mrb[92].mxu0  ;;  %v1904_v30 = vpack.c.bf16 %v1790_v37, %v1788_v26 }
 0x1a0   : > { %v1663_v33 = vadd.f32 %v12727_v0, %v1117_v29  ;;  %v1119_v25 = vpop.f32.mrb[93].mxu0 }
 0x1a1   : > { %v1664_v40 = vadd.f32 %v12730_v23, %v1119_v25  ;;  %v1121_v36 = vpop.f32.mrb[94].mxu0  ;;  %2347 = vmatprep.mubr.bf16.mxu0 %v1904_v30 }
 0x1a2   : > { %v1665_v45 = vadd.f32 %v12727_v0, %v1121_v36  ;;  %v1123_v48 = vpop.f32.mrb[95].mxu0  ;;  %2348 = vmatmul.mubr.bf16.gmra.mrb[184].mxu0 %v1903_v28  ;;  %v1791_v17 = vmax.f32 %v1663_v33, 0.0  ;;  %v11464_v0 = vld [vmem:[%s15751_s5 + $0x280] ss:$8 sps:$4 sm:$0xff]  }
 0x1a3   : > { %v1666_v51 = vadd.f32 %v12730_v23, %v1123_v48  ;;  %v1792_v50 = vmax.f32 %v1664_v40, 0.0  ;;  %3614 = vmatpush1.bf16.msra.mxu0 %v11464_v0  ;;  %v1923_v23 = vld [vmem:[%s15752_s6] sm:$0x3] }
 0x1a4   : > { %v1793_v54 = vmax.f32 %v1665_v45, 0.0 }
 0x1a5   : > { %v1794_v55 = vmax.f32 %v1666_v51, 0.0 }
 0x1a6   : > { %v1905_v57 = vpack.c.bf16 %v1793_v54, %v1791_v17 }
 0x1a7   : > { %v1906_v59 = vpack.c.bf16 %v1794_v55, %v1792_v50 }
 0x1a9   : > { %2357 = vmatprep.mubr.bf16.mxu0 %v1906_v59 }
 0x1aa   : > { %2358 = vmatmul.mubr.bf16.gmra.mrb[188].mxu0 %v1905_v57 }
 0x1ab   : > { %2367 = vmatprep.mubr.bf16.mxu0 %v12765_v11  ;;  %v11467_v11 = vld [vmem:[%s15751_s5 + $0x290] ss:$8 sps:$4 sm:$0xff]  }
 0x1b2   : > { %2368 = vmatmul.mubr.bf16.gmra.mrb[192].mxu0 %v12763_v5  ;;  %v11469_v5 = vld [vmem:[%s15751_s5 + $0x294] ss:$8 sps:$4 sm:$0xff]  }
 0x1b3   : > { %2377 = vmatprep.mubr.bf16.mxu0 %v12786_v49  ;;  %v13042_v49 = vrot.slane %v1923_v23, %v12710_v60  ;;  %3615 = vmatprep.subr.bf16.mxu0 %v11469_v5 }
 0x1b4   : > { %3616 = vmatpush1.bf16.msra.mxu0 %v11467_v11 }
 0x1ba   : > { %2378 = vmatmul.mubr.bf16.gmra.mrb[196].mxu0 %v12784_v44  ;;  %v13046_v44 = vrot.slane %v1923_v23, %v12715_v62 }
 0x1bb   : > { %2387 = vmatprep.mubr.bf16.mxu0 %v12801_v21 }
 0x1c2   : > { %2388 = vmatmul.mubr.bf16.gmra.mrb[200].mxu0 %v12799_v10 }
 0x1c3   : > { %2397 = vmatprep.mubr.bf16.mxu0 %v12822_v4 }
 0x1c5   : > { %v2129_v21 = vpop.f32.mrb[96].mxu0 }
 0x1c6   : > { %v2130_v61 = vadd.f32 %v2129_v21, %v13042_v49  ;;  %v2131_v16 = vpop.f32.mrb[97].mxu0 }
 0x1c7   : > { %v2132_v47 = vadd.f32 %v2131_v16, %v13046_v44  ;;  %v2133_v1 = vpop.f32.mrb[98].mxu0 }
 0x1c8   : > { %v2134_v43 = vadd.f32 %v2133_v1, %v13042_v49  ;;  %v2135_v10 = vpop.f32.mrb[99].mxu0  ;;  %v2448_v6 = vmax.f32 %v2130_v61, 0.0 }
 0x1c9   : > { %v2136_v34 = vadd.f32 %v2135_v10, %v13046_v44  ;;  %v2449_v4 = vmax.f32 %v2132_v47, 0.0 }
 0x1ca   : > { %v2450_v8 = vmax.f32 %v2134_v43, 0.0  ;;  %2398 = vmatmul.mubr.bf16.gmra.mrb[204].mxu0 %v12820_v63  ;;  %v11470_v63 = vld [vmem:[%s15751_s5 + $0x2a0] ss:$8 sps:$4 sm:$0xff]  }
 0x1cb   : > { %v2451_v27 = vmax.f32 %v2136_v34, 0.0  ;;  %2407 = vmatprep.mubr.bf16.mxu0 %v12837_v41  ;;  %v11472_v41 = vld [vmem:[%s15751_s5 + $0x2a4] ss:$8 sps:$4 sm:$0xff]  }
 0x1cc   : > { %v2609_v12 = vpack.c.bf16 %v2450_v8, %v2448_v6  ;;  %3617 = vmatprep.subr.bf16.mxu0 %v11472_v41 }
 0x1cd   : > { %v2139_v13 = vpop.f32.mrb[100].mxu0  ;;  %v2610_v31 = vpack.c.bf16 %v2451_v27, %v2449_v4  ;;  %3618 = vmatpush1.bf16.msra.mxu0 %v11470_v63 }
 0x1ce   : > { %v2140_v2 = vadd.f32 %v2139_v13, %v13042_v49  ;;  %v2141_v58 = vpop.f32.mrb[101].mxu0 }
 0x1cf   : > { %v2142_v14 = vadd.f32 %v2141_v58, %v13046_v44  ;;  %v2143_v15 = vpop.f32.mrb[102].mxu0  ;;  %2878 = vmatprep.mubr.bf16.mxu1 %v2610_v31 }
 0x1d0   : > { %v2144_v32 = vadd.f32 %v2143_v15, %v13042_v49  ;;  %v2145_v18 = vpop.f32.mrb[103].mxu0  ;;  %2879 = vmatmul.mubr.bf16.vlgmr.msra.gmra.mrb[160].mxu1 %v2609_v12  ;;  %v2452_v22 = vmax.f32 %v2140_v2, 0.0 }
 0x1d1   : > { %v2146_v19 = vadd.f32 %v2145_v18, %v13046_v44  ;;  %v2453_v42 = vmax.f32 %v2142_v14, 0.0 }
 0x1d2   : > { %v2454_v24 = vmax.f32 %v2144_v32, 0.0  ;;  %2408 = vmatmul.mubr.bf16.gmra.mrb[208].mxu0 %v12835_v35 }
 0x1d3   : > { %v2455_v26 = vmax.f32 %v2146_v19, 0.0  ;;  %2417 = vmatprep.mubr.bf16.mxu0 %v12858_v20  ;;  %v11478_v19 = vld [vmem:[%s15751_s5 + $0x2c4] ss:$8 sps:$4 sm:$0xff]  }
 0x1d4   : > { %v2611_v37 = vpack.c.bf16 %v2454_v24, %v2452_v22 }
 0x1d5   : > { %v2149_v28 = vpop.f32.mrb[104].mxu0  ;;  %v2612_v29 = vpack.c.bf16 %v2455_v26, %v2453_v42 }
 0x1d6   : > { %v2150_v30 = vadd.f32 %v2149_v28, %v13042_v49  ;;  %v2151_v33 = vpop.f32.mrb[105].mxu0 }
 0x1d7   : > { %v2152_v25 = vadd.f32 %v2151_v33, %v13046_v44  ;;  %v2153_v38 = vpop.f32.mrb[106].mxu0  ;;  %2888 = vmatprep.mubr.bf16.mxu1 %v2612_v29 }
 0x1d8   : > { %v2154_v39 = vadd.f32 %v2153_v38, %v13042_v49  ;;  %v2155_v40 = vpop.f32.mrb[107].mxu0  ;;  %2889 = vmatmul.mubr.bf16.gmra.mrb[164].mxu1 %v2611_v37  ;;  %v2456_v36 = vmax.f32 %v2150_v30, 0.0 }
 0x1d9   : > { %v2156_v35 = vadd.f32 %v2155_v40, %v13046_v44  ;;  %v2457_v20 = vmax.f32 %v2152_v25, 0.0 }
 0x1da   : > { %v2458_v45 = vmax.f32 %v2154_v39, 0.0  ;;  %2418 = vmatmul.mubr.bf16.gmra.mrb[212].mxu0 %v12856_v9  ;;  %v11473_v9 = vld [vmem:[%s15751_s5 + $0x2b0] ss:$8 sps:$4 sm:$0xff]  }
 0x1db   : > { %v2459_v48 = vmax.f32 %v2156_v35, 0.0  ;;  %2427 = vmatprep.mubr.bf16.mxu0 %v12885_v46  ;;  %v11475_v46 = vld [vmem:[%s15751_s5 + $0x2b4] ss:$8 sps:$4 sm:$0xff]  }
 0x1dc   : > { %v2613_v51 = vpack.c.bf16 %v2458_v45, %v2456_v36  ;;  %3619 = vmatprep.subr.bf16.mxu0 %v11475_v46  ;;  %v11479_v46 = vld [vmem:[%s15751_s5 + $0x2d0] ss:$8 sps:$4 sm:$0xff]  }
 0x1dd   : > { %v2159_v17 = vpop.f32.mrb[108].mxu0  ;;  %v2614_v54 = vpack.c.bf16 %v2459_v48, %v2457_v20  ;;  %3620 = vmatpush1.bf16.msra.mxu0 %v11473_v9 }
 0x1de   : > { %v2160_v50 = vadd.f32 %v2159_v17, %v13042_v49  ;;  %v2161_v55 = vpop.f32.mrb[109].mxu0  ;;  %3621 = vmatprep.subr.bf16.mxu0 %v11478_v19 }
 0x1df   : > { %v2162_v57 = vadd.f32 %v2161_v55, %v13046_v44  ;;  %v2163_v59 = vpop.f32.mrb[110].mxu0  ;;  %2898 = vmatprep.mubr.bf16.mxu1 %v2614_v54 }
 0x1e0   : > { %v2164_v0 = vadd.f32 %v2163_v59, %v13042_v49  ;;  %v2165_v56 = vpop.f32.mrb[111].mxu0  ;;  %2899 = vmatmul.mubr.bf16.gmra.mrb[168].mxu1 %v2613_v51  ;;  %v2460_v11 = vmax.f32 %v2160_v50, 0.0 }
 0x1e1   : > { %v2166_v23 = vadd.f32 %v2165_v56, %v13046_v44  ;;  %v2461_v21 = vmax.f32 %v2162_v57, 0.0 }
 0x1e2   : > { %v2462_v5 = vmax.f32 %v2164_v0, 0.0  ;;  %2428 = vmatmul.mubr.bf16.gmra.mrb[216].mxu0 %v12877_v3 }
 0x1e3   : > { %v2463_v61 = vmax.f32 %v2166_v23, 0.0  ;;  %2437 = vmatprep.mubr.bf16.mxu0 %v12900_v52  ;;  %v11481_v23 = vld [vmem:[%s15751_s5 + $0x2d4] ss:$8 sps:$4 sm:$0xff]  }
 0x1e4   : > { %v2615_v16 = vpack.c.bf16 %v2462_v5, %v2460_v11 }
 0x1e5   : > { %v2169_v47 = vpop.f32.mrb[112].mxu0  ;;  %v2616_v1 = vpack.c.bf16 %v2463_v61, %v2461_v21 }
 0x1e6   : > { %v2170_v43 = vadd.f32 %v2169_v47, %v13042_v49  ;;  %v2171_v10 = vpop.f32.mrb[113].mxu0 }
 0x1e7   : > { %v2172_v34 = vadd.f32 %v2171_v10, %v13046_v44  ;;  %v2173_v6 = vpop.f32.mrb[114].mxu0  ;;  %2908 = vmatprep.mubr.bf16.mxu1 %v2616_v1 }
 0x1e8   : > { %v2174_v8 = vadd.f32 %v2173_v6, %v13042_v49  ;;  %v2175_v4 = vpop.f32.mrb[115].mxu0  ;;  %2909 = vmatmul.mubr.bf16.gmra.mrb[172].mxu1 %v2615_v16  ;;  %v2464_v27 = vmax.f32 %v2170_v43, 0.0 }
 0x1e9   : > { %v2176_v3 = vadd.f32 %v2175_v4, %v13046_v44  ;;  %v2465_v52 = vmax.f32 %v2172_v34, 0.0 }
 0x1ea   : > { %v2466_v12 = vmax.f32 %v2174_v8, 0.0  ;;  %2438 = vmatmul.mubr.bf16.gmra.mrb[220].mxu0 %v12898_v53  ;;  %v11476_v53 = vld [vmem:[%s15751_s5 + $0x2c0] ss:$8 sps:$4 sm:$0xff]  }
 0x1eb   : > { %v2467_v13 = vmax.f32 %v2176_v3, 0.0  ;;  %3622 = vmatpush1.bf16.msra.mxu0 %v11476_v53 }
 0x1ec   : > { %v2617_v31 = vpack.c.bf16 %v2466_v12, %v2464_v27  ;;  %3623 = vmatprep.subr.bf16.mxu0 %v11481_v23 }
 0x1ed   : > { %v2179_v2 = vpop.f32.mrb[116].mxu0  ;;  %v2618_v58 = vpack.c.bf16 %v2467_v13, %v2465_v52 }
 0x1ee   : > { %v2180_v14 = vadd.f32 %v2179_v2, %v13042_v49  ;;  %v2181_v15 = vpop.f32.mrb[117].mxu0 }
 0x1ef   : > { %v2182_v32 = vadd.f32 %v2181_v15, %v13046_v44  ;;  %v2183_v18 = vpop.f32.mrb[118].mxu0  ;;  %2918 = vmatprep.mubr.bf16.mxu1 %v2618_v58  ;;  %3624 = vmatpush1.bf16.msra.mxu0 %v11479_v46  ;;  %v11482_v58 = vld [vmem:[%s15751_s5 + $0x300] ss:$8 sps:$4 sm:$0xff]  }
 0x1f0   : > { %v2184_v63 = vadd.f32 %v2183_v18, %v13042_v49  ;;  %v2185_v41 = vpop.f32.mrb[119].mxu0  ;;  %2919 = vmatmul.mubr.bf16.gmra.mrb[176].mxu1 %v2617_v31  ;;  %v2468_v24 = vmax.f32 %v2180_v14, 0.0  ;;  %v11484_v14 = vld [vmem:[%s15751_s5 + $0x304] ss:$8 sps:$4 sm:$0xff]  }
 0x1f1   : > { %v2186_v22 = vadd.f32 %v2185_v41, %v13046_v44  ;;  %v2469_v26 = vmax.f32 %v2182_v32, 0.0  ;;  %4348 = vmatprep.subr.bf16.mxu1 %v11484_v14 }
 0x1f2   : > { %v2470_v42 = vmax.f32 %v2184_v63, 0.0  ;;  %4349 = vmatpush1.bf16.msra.mxu1 %v11482_v58 }
 0x1f3   : > { %v2471_v37 = vmax.f32 %v2186_v22, 0.0 }
 0x1f4   : > { %v2619_v28 = vpack.c.bf16 %v2470_v42, %v2468_v24  ;;  %v11485_v24 = vld [vmem:[%s15751_s5 + $0x2e0] ss:$8 sps:$4 sm:$0xff]   ;;  %v11487_v42 = vld [vmem:[%s15751_s5 + $0x2e4] ss:$8 sps:$4 sm:$0xff]  }
 0x1f5   : > { %v2189_v29 = vpop.f32.mrb[120].mxu0  ;;  %v2620_v30 = vpack.c.bf16 %v2471_v37, %v2469_v26  ;;  %3625 = vmatprep.subr.bf16.mxu0 %v11487_v42 }
 0x1f6   : > { %v2190_v33 = vadd.f32 %v2189_v29, %v13042_v49  ;;  %v2191_v25 = vpop.f32.mrb[121].mxu0  ;;  %3626 = vmatpush1.bf16.msra.mxu0 %v11485_v24  ;;  %v11496_v24 = vld [vmem:[%s15751_s5 + $0x324] ss:$8 sps:$4 sm:$0xff]  }
 0x1f7   : > { %v2192_v38 = vadd.f32 %v2191_v25, %v13046_v44  ;;  %v2193_v39 = vpop.f32.mrb[122].mxu0  ;;  %2928 = vmatprep.mubr.bf16.mxu1 %v2620_v30 }
 0x1f8   : > { %v2194_v40 = vadd.f32 %v2193_v39, %v13042_v49  ;;  %v2195_v35 = vpop.f32.mrb[123].mxu0  ;;  %2929 = vmatmul.mubr.bf16.gmra.mrb[180].mxu1 %v2619_v28  ;;  %v2472_v45 = vmax.f32 %v2190_v33, 0.0 }
 0x1f9   : > { %v2196_v36 = vadd.f32 %v2195_v35, %v13046_v44  ;;  %v2473_v48 = vmax.f32 %v2192_v38, 0.0 }
 0x1fa   : > { %v2474_v20 = vmax.f32 %v2194_v40, 0.0 }
 0x1fb   : > { %v2475_v51 = vmax.f32 %v2196_v36, 0.0 }
 0x1fc   : > { %v2621_v17 = vpack.c.bf16 %v2474_v20, %v2472_v45 }
 0x1fd   : > { %v2199_v54 = vpop.f32.mrb[124].mxu0  ;;  %v2622_v50 = vpack.c.bf16 %v2475_v51, %v2473_v48 }
 0x1fe   : > { %v2200_v55 = vadd.f32 %v2199_v54, %v13042_v49  ;;  %v2201_v57 = vpop.f32.mrb[125].mxu0 }
 0x1ff   : > { %v2202_v59 = vadd.f32 %v2201_v57, %v13046_v44  ;;  %v2203_v0 = vpop.f32.mrb[126].mxu0  ;;  %2938 = vmatprep.mubr.bf16.mxu1 %v2622_v50  ;;  %v11488_v57 = vld [vmem:[%s15751_s5 + $0x310] ss:$8 sps:$4 sm:$0xff]  }
 0x200   : > { %v2204_v56 = vadd.f32 %v2203_v0, %v13042_v49  ;;  %v2205_v9 = vpop.f32.mrb[127].mxu0  ;;  %2939 = vmatmul.mubr.bf16.gmra.mrb[184].mxu1 %v2621_v17  ;;  %v2476_v5 = vmax.f32 %v2200_v55, 0.0 }
 0x201   : > { %v2206_v11 = vadd.f32 %v2205_v9, %v13046_v44  ;;  %v2477_v61 = vmax.f32 %v2202_v59, 0.0  ;;  %v11490_v59 = vld [vmem:[%s15751_s5 + $0x314] ss:$8 sps:$4 sm:$0xff]  }
 0x202   : > { %v2478_v21 = vmax.f32 %v2204_v56, 0.0  ;;  %4350 = vmatprep.subr.bf16.mxu1 %v11490_v59 }
 0x203   : > { %v2479_v16 = vmax.f32 %v2206_v11, 0.0  ;;  %4351 = vmatpush1.bf16.msra.mxu1 %v11488_v57 }
 0x204   : > { %v2623_v47 = vpack.c.bf16 %v2478_v21, %v2476_v5  ;;  %4352 = vmatprep.subr.bf16.mxu1 %v11496_v24  ;;  %v11500_v24 = vld [vmem:[%s15751_s5 + $0x340] ss:$8 sps:$4 sm:$0xff]  }
 0x205   : > { %v2209_v1 = vpop.f32.mrb[128].mxu0  ;;  %v2624_v43 = vpack.c.bf16 %v2479_v16, %v2477_v61  ;;  %v11491_v61 = vld [vmem:[%s15751_s5 + $0x2f0] ss:$8 sps:$4 sm:$0xff]   ;;  %v11493_v16 = vld [vmem:[%s15751_s5 + $0x2f4] ss:$8 sps:$4 sm:$0xff]  }
 0x206   : > { %v2210_v10 = vadd.f32 %v2209_v1, %v13042_v49  ;;  %v2211_v34 = vpop.f32.mrb[129].mxu0  ;;  %3627 = vmatprep.subr.bf16.mxu0 %v11493_v16 }
 0x207   : > { %v2212_v6 = vadd.f32 %v2211_v34, %v13046_v44  ;;  %v2213_v8 = vpop.f32.mrb[130].mxu0  ;;  %2948 = vmatprep.mubr.bf16.mxu1 %v2624_v43  ;;  %3628 = vmatpush1.bf16.msra.mxu0 %v11491_v61 }
 0x208   : > { %v2214_v4 = vadd.f32 %v2213_v8, %v13042_v49  ;;  %v2215_v3 = vpop.f32.mrb[131].mxu0  ;;  %2949 = vmatmul.mubr.bf16.gmra.mrb[188].mxu1 %v2623_v47  ;;  %v2480_v12 = vmax.f32 %v2210_v10, 0.0 }
 0x209   : > { %v2216_v27 = vadd.f32 %v2215_v3, %v13046_v44  ;;  %v2481_v13 = vmax.f32 %v2212_v6, 0.0 }
 0x20a   : > { %v2482_v52 = vmax.f32 %v2214_v4, 0.0 }
 0x20b   : > { %v2483_v31 = vmax.f32 %v2216_v27, 0.0 }
 0x20c   : > { %v2625_v2 = vpack.c.bf16 %v2482_v52, %v2480_v12 }
 0x20d   : > { %v2219_v15 = vpop.f32.mrb[132].mxu0  ;;  %v2626_v32 = vpack.c.bf16 %v2483_v31, %v2481_v13 }
 0x20e   : > { %v2220_v18 = vadd.f32 %v2219_v15, %v13042_v49  ;;  %v2221_v63 = vpop.f32.mrb[133].mxu0 }
 0x20f   : > { %v2222_v41 = vadd.f32 %v2221_v63, %v13046_v44  ;;  %v2223_v53 = vpop.f32.mrb[134].mxu0  ;;  %2958 = vmatprep.mubr.bf16.mxu1 %v2626_v32 }
 0x210   : > { %v2224_v19 = vadd.f32 %v2223_v53, %v13042_v49  ;;  %v2225_v22 = vpop.f32.mrb[135].mxu0  ;;  %2959 = vmatmul.mubr.bf16.gmra.mrb[192].mxu1 %v2625_v2  ;;  %v2484_v37 = vmax.f32 %v2220_v18, 0.0 }
 0x211   : > { %v2226_v26 = vadd.f32 %v2225_v22, %v13046_v44  ;;  %v2485_v29 = vmax.f32 %v2222_v41, 0.0  ;;  %v11494_v22 = vld [vmem:[%s15751_s5 + $0x320] ss:$8 sps:$4 sm:$0xff]  }
 0x212   : > { %v2486_v28 = vmax.f32 %v2224_v19, 0.0  ;;  %4353 = vmatpush1.bf16.msra.mxu1 %v11494_v22 }
 0x213   : > { %v2487_v30 = vmax.f32 %v2226_v26, 0.0 }
 0x214   : > { %v2627_v33 = vpack.c.bf16 %v2486_v28, %v2484_v37 }
 0x215   : > { %v2229_v25 = vpop.f32.mrb[136].mxu0  ;;  %v2628_v38 = vpack.c.bf16 %v2487_v30, %v2485_v29 }
 0x216   : > { %v2230_v39 = vadd.f32 %v2229_v25, %v13042_v49  ;;  %v2231_v40 = vpop.f32.mrb[137].mxu0 }
 0x217   : > { %v2232_v35 = vadd.f32 %v2231_v40, %v13046_v44  ;;  %v2233_v36 = vpop.f32.mrb[138].mxu0  ;;  %2968 = vmatprep.mubr.bf16.mxu1 %v2628_v38 }
 0x218   : > { %v2234_v45 = vadd.f32 %v2233_v36, %v13042_v49  ;;  %v2235_v20 = vpop.f32.mrb[139].mxu0  ;;  %2969 = vmatmul.mubr.bf16.gmra.mrb[196].mxu1 %v2627_v33  ;;  %v2488_v51 = vmax.f32 %v2230_v39, 0.0 }
 0x219   : > { %v2236_v48 = vadd.f32 %v2235_v20, %v13046_v44  ;;  %v2489_v54 = vmax.f32 %v2232_v35, 0.0 }
 0x21a   : > { %v2490_v17 = vmax.f32 %v2234_v45, 0.0 }
 0x21b   : > { %v2491_v50 = vmax.f32 %v2236_v48, 0.0 }
 0x21c   : > { %v2629_v55 = vpack.c.bf16 %v2490_v17, %v2488_v51 }
 0x21d   : > { %v2239_v0 = vpop.f32.mrb[140].mxu0  ;;  %v2630_v56 = vpack.c.bf16 %v2491_v50, %v2489_v54 }
 0x21e   : > { %v2240_v9 = vadd.f32 %v2239_v0, %v13042_v49  ;;  %v2241_v46 = vpop.f32.mrb[141].mxu0 }
 0x21f   : > { %v2242_v23 = vadd.f32 %v2241_v46, %v13046_v44  ;;  %v2243_v11 = vpop.f32.mrb[142].mxu0  ;;  %2978 = vmatprep.mubr.bf16.mxu1 %v2630_v56 }
 0x220   : > { %v2244_v5 = vadd.f32 %v2243_v11, %v13042_v49  ;;  %v2245_v21 = vpop.f32.mrb[143].mxu0  ;;  %2979 = vmatmul.mubr.bf16.gmra.mrb[200].mxu1 %v2629_v55  ;;  %v2492_v1 = vmax.f32 %v2240_v9, 0.0  ;;  %v11497_v11 = vld [vmem:[%s15751_s5 + $0x330] ss:$8 sps:$4 sm:$0xff]  }
 0x221   : > { %v2246_v47 = vadd.f32 %v2245_v21, %v13046_v44  ;;  %v2493_v10 = vmax.f32 %v2242_v23, 0.0 }
 0x222   : > { %v2494_v43 = vmax.f32 %v2244_v5, 0.0  ;;  %v11499_v5 = vld [vmem:[%s15751_s5 + $0x334] ss:$8 sps:$4 sm:$0xff]  }
 0x223   : > { %v2495_v34 = vmax.f32 %v2246_v47, 0.0  ;;  %4354 = vmatprep.subr.bf16.mxu1 %v11499_v5  ;;  %v11503_v5 = vld [vmem:[%s15751_s5 + $0x350] ss:$8 sps:$4 sm:$0xff]  }
 0x224   : > { %v2631_v6 = vpack.c.bf16 %v2494_v43, %v2492_v1  ;;  %4355 = vmatpush1.bf16.msra.mxu1 %v11497_v11 }
 0x225   : > { %v2249_v8 = vpop.f32.mrb[144].mxu0  ;;  %v2632_v4 = vpack.c.bf16 %v2495_v34, %v2493_v10 }
 0x226   : > { %v2250_v3 = vadd.f32 %v2249_v8, %v13042_v49  ;;  %v2251_v27 = vpop.f32.mrb[145].mxu0 }
 0x227   : > { %v2252_v12 = vadd.f32 %v2251_v27, %v13046_v44  ;;  %v2253_v52 = vpop.f32.mrb[146].mxu0  ;;  %2988 = vmatprep.mubr.bf16.mxu1 %v2632_v4 }
 0x228   : > { %v2254_v13 = vadd.f32 %v2253_v52, %v13042_v49  ;;  %v2255_v31 = vpop.f32.mrb[147].mxu0  ;;  %2989 = vmatmul.mubr.bf16.gmra.mrb[204].mxu1 %v2631_v6  ;;  %v2496_v58 = vmax.f32 %v2250_v3, 0.0 }
 0x229   : > { %v2256_v2 = vadd.f32 %v2255_v31, %v13046_v44  ;;  %v2497_v15 = vmax.f32 %v2252_v12, 0.0 }
 0x22a   : > { %v2498_v14 = vmax.f32 %v2254_v13, 0.0 }
 0x22b   : > { %v2499_v32 = vmax.f32 %v2256_v2, 0.0 }
 0x22c   : > { %v2633_v18 = vpack.c.bf16 %v2498_v14, %v2496_v58 }
 0x22d   : > { %v2259_v63 = vpop.f32.mrb[148].mxu0  ;;  %v2634_v41 = vpack.c.bf16 %v2499_v32, %v2497_v15 }
 0x22e   : > { %v2260_v53 = vadd.f32 %v2259_v63, %v13042_v49  ;;  %v2261_v19 = vpop.f32.mrb[149].mxu0 }
 0x22f   : > { %v2262_v42 = vadd.f32 %v2261_v19, %v13046_v44  ;;  %v2263_v26 = vpop.f32.mrb[150].mxu0  ;;  %2998 = vmatprep.mubr.bf16.mxu1 %v2634_v41 }
 0x230   : > { %v2264_v37 = vadd.f32 %v2263_v26, %v13042_v49  ;;  %v2265_v28 = vpop.f32.mrb[151].mxu0  ;;  %2999 = vmatmul.mubr.bf16.gmra.mrb[208].mxu1 %v2633_v18  ;;  %v2500_v30 = vmax.f32 %v2260_v53, 0.0 }
 0x231   : > { %v2266_v29 = vadd.f32 %v2265_v28, %v13046_v44  ;;  %v2501_v25 = vmax.f32 %v2262_v42, 0.0  ;;  %v11502_v42 = vld [vmem:[%s15751_s5 + $0x344] ss:$8 sps:$4 sm:$0xff]  }
 0x232   : > { %v2502_v33 = vmax.f32 %v2264_v37, 0.0  ;;  %4356 = vmatprep.subr.bf16.mxu1 %v11502_v42  ;;  %v11506_v42 = vld [vmem:[%s15751_s5 + $0x360] ss:$8 sps:$4 sm:$0xff]  }
 0x233   : > { %v2503_v38 = vmax.f32 %v2266_v29, 0.0  ;;  %4357 = vmatpush1.bf16.msra.mxu1 %v11500_v24 }
 0x234   : > { %v2635_v39 = vpack.c.bf16 %v2502_v33, %v2500_v30 }
 0x235   : > { %v2269_v40 = vpop.f32.mrb[152].mxu0  ;;  %v2636_v35 = vpack.c.bf16 %v2503_v38, %v2501_v25 }
 0x236   : > { %v2270_v36 = vadd.f32 %v2269_v40, %v13042_v49  ;;  %v2271_v45 = vpop.f32.mrb[153].mxu0 }
 0x237   : > { %v2272_v20 = vadd.f32 %v2271_v45, %v13046_v44  ;;  %v2273_v48 = vpop.f32.mrb[154].mxu0  ;;  %3008 = vmatprep.mubr.bf16.mxu1 %v2636_v35 }
 0x238   : > { %v2274_v51 = vadd.f32 %v2273_v48, %v13042_v49  ;;  %v2275_v17 = vpop.f32.mrb[155].mxu0  ;;  %3009 = vmatmul.mubr.bf16.gmra.mrb[212].mxu1 %v2635_v39  ;;  %v2504_v50 = vmax.f32 %v2270_v36, 0.0 }
 0x239   : > { %v2276_v54 = vadd.f32 %v2275_v17, %v13046_v44  ;;  %v2505_v57 = vmax.f32 %v2272_v20, 0.0 }
 0x23a   : > { %v2506_v55 = vmax.f32 %v2274_v51, 0.0 }
 0x23b   : > { %v2507_v59 = vmax.f32 %v2276_v54, 0.0 }
 0x23c   : > { %v2637_v0 = vpack.c.bf16 %v2506_v55, %v2504_v50 }
 0x23d   : > { %v2279_v56 = vpop.f32.mrb[156].mxu0  ;;  %v2638_v9 = vpack.c.bf16 %v2507_v59, %v2505_v57 }
 0x23e   : > { %v2280_v46 = vadd.f32 %v2279_v56, %v13042_v49  ;;  %v2281_v23 = vpop.f32.mrb[157].mxu0 }
 0x23f   : > { %v2282_v21 = vadd.f32 %v2281_v23, %v13046_v44  ;;  %v2283_v61 = vpop.f32.mrb[158].mxu0  ;;  %3018 = vmatprep.mubr.bf16.mxu1 %v2638_v9 }
 0x240   : > { %v2284_v16 = vadd.f32 %v2283_v61, %v13042_v49  ;;  %v2285_v47 = vpop.f32.mrb[159].mxu0  ;;  %3019 = vmatmul.mubr.bf16.gmra.mrb[216].mxu1 %v2637_v0  ;;  %v2508_v43 = vmax.f32 %v2280_v46, 0.0 }
 0x241   : > { %v2286_v1 = vadd.f32 %v2285_v47, %v13046_v44  ;;  %v2509_v34 = vmax.f32 %v2282_v21, 0.0  ;;  %v11505_v21 = vld [vmem:[%s15751_s5 + $0x354] ss:$8 sps:$4 sm:$0xff]  }
 0x242   : > { %v2510_v10 = vmax.f32 %v2284_v16, 0.0  ;;  %4358 = vmatprep.subr.bf16.mxu1 %v11505_v21  ;;  %v11509_v21 = vld [vmem:[%s15751_s5 + $0x370] ss:$8 sps:$4 sm:$0xff]  }
 0x243   : > { %v2511_v6 = vmax.f32 %v2286_v1, 0.0  ;;  %4359 = vmatpush1.bf16.msra.mxu1 %v11503_v5 }
 0x244   : > { %v2639_v8 = vpack.c.bf16 %v2510_v10, %v2508_v43 }
 0x245   : > { %v2289_v4 = vpop.f32.mrb[160].mxu0  ;;  %v2640_v3 = vpack.c.bf16 %v2511_v6, %v2509_v34 }
 0x246   : > { %v2290_v27 = vadd.f32 %v2289_v4, %v13042_v49  ;;  %v2291_v12 = vpop.f32.mrb[161].mxu0 }
 0x247   : > { %v2292_v52 = vadd.f32 %v2291_v12, %v13046_v44  ;;  %v2293_v13 = vpop.f32.mrb[162].mxu0  ;;  %3028 = vmatprep.mubr.bf16.mxu1 %v2640_v3 }
 0x248   : > { %v2294_v31 = vadd.f32 %v2293_v13, %v13042_v49  ;;  %v2295_v2 = vpop.f32.mrb[163].mxu0  ;;  %3029 = vmatmul.mubr.bf16.gmra.mrb[220].mxu1 %v2639_v8  ;;  %v2512_v14 = vmax.f32 %v2290_v27, 0.0 }
 0x249   : > { %v2296_v58 = vadd.f32 %v2295_v2, %v13046_v44  ;;  %v2513_v32 = vmax.f32 %v2292_v52, 0.0 }
 0x24a   : > { %v2514_v15 = vmax.f32 %v2294_v31, 0.0 }
 0x24b   : > { %v2515_v18 = vmax.f32 %v2296_v58, 0.0 }
 0x24c   : > { %v2641_v63 = vpack.c.bf16 %v2514_v15, %v2512_v14 }
 0x24d   : > { %v2299_v41 = vpop.f32.mrb[164].mxu0  ;;  %v2642_v53 = vpack.c.bf16 %v2515_v18, %v2513_v32 }
 0x24e   : > { %v2300_v19 = vadd.f32 %v2299_v41, %v13042_v49  ;;  %v2301_v22 = vpop.f32.mrb[165].mxu0 }
 0x24f   : > { %v2302_v26 = vadd.f32 %v2301_v22, %v13046_v44  ;;  %v2303_v37 = vpop.f32.mrb[166].mxu0  ;;  %3038 = vmatprep.mubr.bf16.mxu1 %v2642_v53 }
 0x250   : > { %v2304_v28 = vadd.f32 %v2303_v37, %v13042_v49  ;;  %v2305_v29 = vpop.f32.mrb[167].mxu0  ;;  %3039 = vmatmul.mubr.bf16.gmra.mrb[224].mxu1 %v2641_v63  ;;  %v2516_v33 = vmax.f32 %v2300_v19, 0.0 }
 0x251   : > { %v2306_v30 = vadd.f32 %v2305_v29, %v13046_v44  ;;  %v2517_v38 = vmax.f32 %v2302_v26, 0.0  ;;  %v11508_v26 = vld [vmem:[%s15751_s5 + $0x364] ss:$8 sps:$4 sm:$0xff]  }
 0x252   : > { %v2518_v25 = vmax.f32 %v2304_v28, 0.0  ;;  %4360 = vmatprep.subr.bf16.mxu1 %v11508_v26  ;;  %v11512_v26 = vld [vmem:[%s15751_s5 + $0x380] ss:$8 sps:$4 sm:$0xff]  }
 0x253   : > { %v2519_v39 = vmax.f32 %v2306_v30, 0.0  ;;  %4361 = vmatpush1.bf16.msra.mxu1 %v11506_v42 }
 0x254   : > { %v2643_v40 = vpack.c.bf16 %v2518_v25, %v2516_v33 }
 0x255   : > { %v2309_v35 = vpop.f32.mrb[168].mxu0  ;;  %v2644_v36 = vpack.c.bf16 %v2519_v39, %v2517_v38 }
 0x256   : > { %v2310_v45 = vadd.f32 %v2309_v35, %v13042_v49  ;;  %v2311_v20 = vpop.f32.mrb[169].mxu0 }
 0x257   : > { %v2312_v48 = vadd.f32 %v2311_v20, %v13046_v44  ;;  %v2313_v51 = vpop.f32.mrb[170].mxu0  ;;  %3048 = vmatprep.mubr.bf16.mxu1 %v2644_v36 }
 0x258   : > { %v2314_v17 = vadd.f32 %v2313_v51, %v13042_v49  ;;  %v2315_v54 = vpop.f32.mrb[171].mxu0  ;;  %3049 = vmatmul.mubr.bf16.gmra.mrb[228].mxu1 %v2643_v40  ;;  %v2520_v55 = vmax.f32 %v2310_v45, 0.0 }
 0x259   : > { %v2316_v50 = vadd.f32 %v2315_v54, %v13046_v44  ;;  %v2521_v59 = vmax.f32 %v2312_v48, 0.0 }
 0x25a   : > { %v2522_v57 = vmax.f32 %v2314_v17, 0.0 }
 0x25b   : > { %v2523_v0 = vmax.f32 %v2316_v50, 0.0 }
 0x25c   : > { %v2645_v56 = vpack.c.bf16 %v2522_v57, %v2520_v55 }
 0x25d   : > { %v2319_v9 = vpop.f32.mrb[172].mxu0  ;;  %v2646_v46 = vpack.c.bf16 %v2523_v0, %v2521_v59 }
 0x25e   : > { %v2320_v23 = vadd.f32 %v2319_v9, %v13042_v49  ;;  %v2321_v11 = vpop.f32.mrb[173].mxu0 }
 0x25f   : > { %v2322_v61 = vadd.f32 %v2321_v11, %v13046_v44  ;;  %v2323_v16 = vpop.f32.mrb[174].mxu0  ;;  %3058 = vmatprep.mubr.bf16.mxu1 %v2646_v46 }
 0x260   : > { %v2324_v47 = vadd.f32 %v2323_v16, %v13042_v49  ;;  %v2325_v1 = vpop.f32.mrb[175].mxu0  ;;  %3059 = vmatmul.mubr.bf16.gmra.mrb[232].mxu1 %v2645_v56  ;;  %v2524_v10 = vmax.f32 %v2320_v23, 0.0 }
 0x261   : > { %v2326_v43 = vadd.f32 %v2325_v1, %v13046_v44  ;;  %v2525_v6 = vmax.f32 %v2322_v61, 0.0  ;;  %v11511_v61 = vld [vmem:[%s15751_s5 + $0x374] ss:$8 sps:$4 sm:$0xff]  }
 0x262   : > { %v2526_v34 = vmax.f32 %v2324_v47, 0.0  ;;  %4362 = vmatprep.subr.bf16.mxu1 %v11511_v61 }
 0x263   : > { %v2527_v8 = vmax.f32 %v2326_v43, 0.0  ;;  %4363 = vmatpush1.bf16.msra.mxu1 %v11509_v21 }
 0x264   : > { %v2647_v4 = vpack.c.bf16 %v2526_v34, %v2524_v10 }
 0x265   : > { %v2329_v3 = vpop.f32.mrb[176].mxu0  ;;  %v2648_v27 = vpack.c.bf16 %v2527_v8, %v2525_v6 }
 0x266   : > { %v2330_v12 = vadd.f32 %v2329_v3, %v13042_v49  ;;  %v2331_v52 = vpop.f32.mrb[177].mxu0 }
 0x267   : > { %v2332_v13 = vadd.f32 %v2331_v52, %v13046_v44  ;;  %v2333_v31 = vpop.f32.mrb[178].mxu0  ;;  %3068 = vmatprep.mubr.bf16.mxu1 %v2648_v27 }
 0x268   : > { %v2334_v2 = vadd.f32 %v2333_v31, %v13042_v49  ;;  %v2335_v58 = vpop.f32.mrb[179].mxu0  ;;  %3069 = vmatmul.mubr.bf16.gmra.mrb[236].mxu1 %v2647_v4  ;;  %v2528_v15 = vmax.f32 %v2330_v12, 0.0 }
 0x269   : > { %v2336_v14 = vadd.f32 %v2335_v58, %v13046_v44  ;;  %v2529_v18 = vmax.f32 %v2332_v13, 0.0 }
 0x26a   : > { %v2530_v32 = vmax.f32 %v2334_v2, 0.0 }
 0x26b   : > { %v2531_v63 = vmax.f32 %v2336_v14, 0.0 }
 0x26c   : > { %v2649_v41 = vpack.c.bf16 %v2530_v32, %v2528_v15 }
 0x26d   : > { %v2339_v53 = vpop.f32.mrb[180].mxu0  ;;  %v2650_v19 = vpack.c.bf16 %v2531_v63, %v2529_v18 }
 0x26e   : > { %v2340_v22 = vadd.f32 %v2339_v53, %v13042_v49  ;;  %v2341_v24 = vpop.f32.mrb[181].mxu0 }
 0x26f   : > { %v2342_v37 = vadd.f32 %v2341_v24, %v13046_v44  ;;  %v2343_v28 = vpop.f32.mrb[182].mxu0  ;;  %3078 = vmatprep.mubr.bf16.mxu1 %v2650_v19 }
 0x270   : > { %v2344_v29 = vadd.f32 %v2343_v28, %v13042_v49  ;;  %v2345_v30 = vpop.f32.mrb[183].mxu0  ;;  %3079 = vmatmul.mubr.bf16.gmra.mrb[240].mxu1 %v2649_v41  ;;  %v2532_v25 = vmax.f32 %v2340_v22, 0.0 }
 0x271   : > { %v2346_v33 = vadd.f32 %v2345_v30, %v13046_v44  ;;  %v2533_v39 = vmax.f32 %v2342_v37, 0.0  ;;  %v11514_v37 = vld [vmem:[%s15751_s5 + $0x384] ss:$8 sps:$4 sm:$0xff]  }
 0x272   : > { %v2534_v38 = vmax.f32 %v2344_v29, 0.0  ;;  %4364 = vmatprep.subr.bf16.mxu1 %v11514_v37 }
 0x273   : > { %v2535_v40 = vmax.f32 %v2346_v33, 0.0  ;;  %4365 = vmatpush1.bf16.msra.mxu1 %v11512_v26 }
 0x274   : > { %v2651_v35 = vpack.c.bf16 %v2534_v38, %v2532_v25 }
 0x275   : > { %v2349_v36 = vpop.f32.mrb[184].mxu0  ;;  %v2652_v45 = vpack.c.bf16 %v2535_v40, %v2533_v39 }
 0x276   : > { %v2350_v20 = vadd.f32 %v2349_v36, %v13042_v49  ;;  %v2351_v48 = vpop.f32.mrb[185].mxu0 }
 0x277   : > { %v2352_v51 = vadd.f32 %v2351_v48, %v13046_v44  ;;  %v2353_v17 = vpop.f32.mrb[186].mxu0  ;;  %3088 = vmatprep.mubr.bf16.mxu1 %v2652_v45 }
 0x278   : > { %v2354_v54 = vadd.f32 %v2353_v17, %v13042_v49  ;;  %v2355_v50 = vpop.f32.mrb[187].mxu0  ;;  %3089 = vmatmul.mubr.bf16.gmra.mrb[244].mxu1 %v2651_v35  ;;  %v2536_v57 = vmax.f32 %v2350_v20, 0.0 }
 0x279   : > { %v2356_v55 = vadd.f32 %v2355_v50, %v13046_v44  ;;  %v2537_v0 = vmax.f32 %v2352_v51, 0.0 }
 0x27a   : > { %v2538_v59 = vmax.f32 %v2354_v54, 0.0 }
 0x27b   : > { %v2539_v56 = vmax.f32 %v2356_v55, 0.0 }
 0x27c   : > { %v2653_v9 = vpack.c.bf16 %v2538_v59, %v2536_v57 }
 0x27d   : > { %v2359_v46 = vpop.f32.mrb[188].mxu0  ;;  %v2654_v23 = vpack.c.bf16 %v2539_v56, %v2537_v0 }
 0x27e   : > { %v2360_v11 = vadd.f32 %v2359_v46, %v13042_v49  ;;  %v2361_v5 = vpop.f32.mrb[189].mxu0 }
 0x27f   : > { %v2362_v16 = vadd.f32 %v2361_v5, %v13046_v44  ;;  %v2363_v47 = vpop.f32.mrb[190].mxu0  ;;  %3098 = vmatprep.mubr.bf16.mxu1 %v2654_v23  ;;  %v10457_v5 = vld [vmem:[%s15752_s6 + $0x2] sm:$0x3] }
 0x280   : > { %v2364_v1 = vadd.f32 %v2363_v47, %v13042_v49  ;;  %v2365_v43 = vpop.f32.mrb[191].mxu0  ;;  %3099 = vmatmul.mubr.bf16.gmra.mrb[248].mxu1 %v2653_v9  ;;  %v2540_v34 = vmax.f32 %v2360_v11, 0.0  ;;  %v11517_v47 = vld [vmem:[%s15751_s5 + $0x394] ss:$8 sps:$4 sm:$0xff]  }
 0x281   : > { %v2366_v10 = vadd.f32 %v2365_v43, %v13046_v44  ;;  %v2541_v8 = vmax.f32 %v2362_v16, 0.0  ;;  %v11515_v16 = vld [vmem:[%s15751_s5 + $0x390] ss:$8 sps:$4 sm:$0xff]   ;;  %4366 = vmatprep.subr.bf16.mxu1 %v11517_v47 }
 0x282   : > { %v2542_v6 = vmax.f32 %v2364_v1, 0.0  ;;  %4367 = vmatpush1.bf16.msra.mxu1 %v11515_v16 }
 0x283   : > { %v2543_v4 = vmax.f32 %v2366_v10, 0.0 }
 0x284   : > { %v2655_v3 = vpack.c.bf16 %v2542_v6, %v2540_v34  ;;  %v13268_v6 = vrot.slane %v10457_v5, %v12710_v60 }
 0x285   : > { %v2369_v27 = vpop.f32.mrb[192].mxu0  ;;  %v2656_v12 = vpack.c.bf16 %v2543_v4, %v2541_v8  ;;  %v13272_v4 = vrot.slane %v10457_v5, %v12715_v62 }
 0x286   : > { %v2370_v52 = vadd.f32 %v2369_v27, %v13042_v49  ;;  %v2371_v13 = vpop.f32.mrb[193].mxu0 }
 0x287   : > { %v2372_v31 = vadd.f32 %v2371_v13, %v13046_v44  ;;  %v2373_v2 = vpop.f32.mrb[194].mxu0  ;;  %3108 = vmatprep.mubr.bf16.mxu1 %v2656_v12 }
 0x288   : > { %v2374_v58 = vadd.f32 %v2373_v2, %v13042_v49  ;;  %v2375_v14 = vpop.f32.mrb[195].mxu0  ;;  %3109 = vmatmul.mubr.bf16.gmra.mrb[252].mxu1 %v2655_v3  ;;  %v2544_v32 = vmax.f32 %v2370_v52, 0.0 }
 0x289   : > { %v2376_v15 = vadd.f32 %v2375_v14, %v13046_v44  ;;  %v2545_v63 = vmax.f32 %v2372_v31, 0.0 }
 0x28a   : > { %v2546_v18 = vmax.f32 %v2374_v58, 0.0 }
 0x28b   : > { %v2547_v41 = vmax.f32 %v2376_v15, 0.0 }
 0x28c   : > { %v2657_v53 = vpack.c.bf16 %v2546_v18, %v2544_v32 }
 0x28d   : > { %v2379_v19 = vpop.f32.mrb[196].mxu0  ;;  %v2658_v22 = vpack.c.bf16 %v2547_v41, %v2545_v63 }
 0x28e   : > { %v2380_v24 = vadd.f32 %v2379_v19, %v13042_v49  ;;  %v2381_v42 = vpop.f32.mrb[197].mxu0 }
 0x28f   : > { %v2382_v28 = vadd.f32 %v2381_v42, %v13046_v44  ;;  %v2383_v29 = vpop.f32.mrb[198].mxu0  ;;  %3118 = vmatprep.mubr.bf16.mxu1 %v2658_v22 }
 0x290   : > { %v2384_v30 = vadd.f32 %v2383_v29, %v13042_v49  ;;  %v2385_v33 = vpop.f32.mrb[199].mxu0  ;;  %3119 = vmatmul.mubr.bf16.gmra.mrb[0].mxu1 %v2657_v53  ;;  %v2548_v38 = vmax.f32 %v2380_v24, 0.0 }
 0x291   : > { %v2386_v25 = vadd.f32 %v2385_v33, %v13046_v44  ;;  %v2549_v40 = vmax.f32 %v2382_v28, 0.0 }
 0x292   : > { %v2550_v39 = vmax.f32 %v2384_v30, 0.0 }
 0x293   : > { %v2551_v35 = vmax.f32 %v2386_v25, 0.0 }
 0x294   : > { %v2659_v36 = vpack.c.bf16 %v2550_v39, %v2548_v38 }
 0x295   : > { %v2389_v45 = vpop.f32.mrb[200].mxu0  ;;  %v2660_v20 = vpack.c.bf16 %v2551_v35, %v2549_v40 }
 0x296   : > { %v2390_v48 = vadd.f32 %v2389_v45, %v13042_v49  ;;  %v2391_v51 = vpop.f32.mrb[201].mxu0 }
 0x297   : > { %v2392_v17 = vadd.f32 %v2391_v51, %v13046_v44  ;;  %v2393_v54 = vpop.f32.mrb[202].mxu0  ;;  %3128 = vmatprep.mubr.bf16.mxu1 %v2660_v20 }
 0x298   : > { %v2394_v50 = vadd.f32 %v2393_v54, %v13042_v49  ;;  %v2395_v55 = vpop.f32.mrb[203].mxu0  ;;  %3129 = vmatmul.mubr.bf16.gmra.mrb[4].mxu1 %v2659_v36  ;;  %v2552_v59 = vmax.f32 %v2390_v48, 0.0 }
 0x299   : > { %v2396_v57 = vadd.f32 %v2395_v55, %v13046_v44  ;;  %v2553_v56 = vmax.f32 %v2392_v17, 0.0 }
 0x29a   : > { %v2554_v0 = vmax.f32 %v2394_v50, 0.0 }
 0x29b   : > { %v2555_v9 = vmax.f32 %v2396_v57, 0.0 }
 0x29c   : > { %v2661_v46 = vpack.c.bf16 %v2554_v0, %v2552_v59 }
 0x29d   : > { %v2399_v23 = vpop.f32.mrb[204].mxu0  ;;  %v2662_v11 = vpack.c.bf16 %v2555_v9, %v2553_v56 }
 0x29e   : > { %v2400_v21 = vadd.f32 %v2399_v23, %v13042_v49  ;;  %v2401_v61 = vpop.f32.mrb[205].mxu0 }
 0x29f   : > { %v2402_v1 = vadd.f32 %v2401_v61, %v13046_v44  ;;  %v2403_v43 = vpop.f32.mrb[206].mxu0  ;;  %3138 = vmatprep.mubr.bf16.mxu1 %v2662_v11 }
 0x2a0   : > { %v2404_v10 = vadd.f32 %v2403_v43, %v13042_v49  ;;  %v2405_v34 = vpop.f32.mrb[207].mxu0  ;;  %3139 = vmatmul.mubr.bf16.gmra.mrb[8].mxu1 %v2661_v46  ;;  %v2556_v3 = vmax.f32 %v2400_v21, 0.0  ;;  %v11518_v46 = vld [vmem:[%s15751_s5 + $0x3a0] ss:$8 sps:$4 sm:$0xff]   ;;  %v11520_v21 = vld [vmem:[%s15751_s5 + $0x3a4] ss:$8 sps:$4 sm:$0xff]  }
 0x2a1   : > { %v2406_v8 = vadd.f32 %v2405_v34, %v13046_v44  ;;  %v2557_v12 = vmax.f32 %v2402_v1, 0.0  ;;  %4368 = vmatprep.subr.bf16.mxu1 %v11520_v21 }
 0x2a2   : > { %v2558_v27 = vmax.f32 %v2404_v10, 0.0  ;;  %4369 = vmatpush1.bf16.msra.mxu1 %v11518_v46 }
 0x2a3   : > { %v2559_v52 = vmax.f32 %v2406_v8, 0.0  ;;  %v2880_v13 = vpop.f32.mrb[160].mxu1 }
 0x2a4   : > { %v2663_v31 = vpack.c.bf16 %v2558_v27, %v2556_v3  ;;  %v2881_v2 = vadd.f32 %v2880_v13, %v13268_v6  ;;  %v2882_v58 = vpop.f32.mrb[161].mxu1 }
 0x2a5   : > { %v2883_v14 = vadd.f32 %v2882_v58, %v13272_v4  ;;  %v2409_v15 = vpop.f32.mrb[208].mxu0  ;;  %v2884_v32 = vpop.f32.mrb[162].mxu1  ;;  %v2664_v18 = vpack.c.bf16 %v2559_v52, %v2557_v12 }
 0x2a6   : > { %v2410_v63 = vadd.f32 %v2409_v15, %v13042_v49  ;;  %v2885_v41 = vadd.f32 %v2884_v32, %v13268_v6  ;;  %v2411_v53 = vpop.f32.mrb[209].mxu0  ;;  %v2886_v19 = vpop.f32.mrb[163].mxu1  ;;  %v3199_v26 = vmax.f32 %v2881_v2, 0.0 }
 0x2a7   : > { %v2412_v22 = vadd.f32 %v2411_v53, %v13046_v44  ;;  %v2887_v24 = vadd.f32 %v2886_v19, %v13272_v4  ;;  %v2413_v42 = vpop.f32.mrb[210].mxu0  ;;  %3148 = vmatprep.mubr.bf16.mxu1 %v2664_v18  ;;  %v3200_v30 = vmax.f32 %v2883_v14, 0.0 }
 0x2a8   : > { %v3201_v37 = vmax.f32 %v2885_v41, 0.0  ;;  %v2414_v28 = vadd.f32 %v2413_v42, %v13042_v49  ;;  %v2415_v29 = vpop.f32.mrb[211].mxu0  ;;  %3149 = vmatmul.mubr.bf16.gmra.mrb[12].mxu1 %v2663_v31  ;;  %v2560_v38 = vmax.f32 %v2410_v63, 0.0 }
 0x2a9   : > { %v3202_v33 = vmax.f32 %v2887_v24, 0.0  ;;  %v2416_v25 = vadd.f32 %v2415_v29, %v13046_v44  ;;  %v2561_v35 = vmax.f32 %v2412_v22, 0.0 }
 0x2aa   : > { %v3360_v39 = vpack.c.bf16 %v3201_v37, %v3199_v26  ;;  %v2562_v40 = vmax.f32 %v2414_v28, 0.0 }
 0x2ab   : > { %v2563_v36 = vmax.f32 %v2416_v25, 0.0  ;;  %v2890_v45 = vpop.f32.mrb[164].mxu1  ;;  %v3361_v20 = vpack.c.bf16 %v3202_v33, %v3200_v30 }
 0x2ac   : > { %v2665_v48 = vpack.c.bf16 %v2562_v40, %v2560_v38  ;;  %v2891_v51 = vadd.f32 %v2890_v45, %v13268_v6  ;;  %v2892_v17 = vpop.f32.mrb[165].mxu1 }
 0x2ad   : > { %v2893_v54 = vadd.f32 %v2892_v17, %v13272_v4  ;;  %v2419_v50 = vpop.f32.mrb[212].mxu0  ;;  %v2894_v55 = vpop.f32.mrb[166].mxu1  ;;  %3629 = vmatprep.mubr.bf16.mxu0 %v3361_v20  ;;  %v2666_v57 = vpack.c.bf16 %v2563_v36, %v2561_v35 }
 0x2ae   : > { %v2420_v59 = vadd.f32 %v2419_v50, %v13042_v49  ;;  %v2895_v0 = vadd.f32 %v2894_v55, %v13268_v6  ;;  %v2421_v56 = vpop.f32.mrb[213].mxu0  ;;  %v2896_v9 = vpop.f32.mrb[167].mxu1  ;;  %3630 = vmatmul.mubr.bf16.vlgmr.msra.gmra.mrb[224].mxu0 %v3360_v39  ;;  %v3203_v61 = vmax.f32 %v2891_v51, 0.0 }
 0x2af   : > { %v2422_v23 = vadd.f32 %v2421_v56, %v13046_v44  ;;  %v2897_v11 = vadd.f32 %v2896_v9, %v13272_v4  ;;  %v2423_v5 = vpop.f32.mrb[214].mxu0  ;;  %3158 = vmatprep.mubr.bf16.mxu1 %v2666_v57  ;;  %v3204_v43 = vmax.f32 %v2893_v54, 0.0 }
 0x2b0   : > { %v3205_v16 = vmax.f32 %v2895_v0, 0.0  ;;  %v2424_v47 = vadd.f32 %v2423_v5, %v13042_v49  ;;  %v2425_v1 = vpop.f32.mrb[215].mxu0  ;;  %3159 = vmatmul.mubr.bf16.gmra.mrb[16].mxu1 %v2665_v48  ;;  %v2564_v8 = vmax.f32 %v2420_v59, 0.0 }
 0x2b1   : > { %v3206_v10 = vmax.f32 %v2897_v11, 0.0  ;;  %v2426_v34 = vadd.f32 %v2425_v1, %v13046_v44  ;;  %v2565_v12 = vmax.f32 %v2422_v23, 0.0  ;;  %v11521_v23 = vld [vmem:[%s15751_s5 + $0x3b0] ss:$8 sps:$4 sm:$0xff]  }
 0x2b2   : > { %v2566_v3 = vmax.f32 %v2424_v47, 0.0  ;;  %v3362_v27 = vpack.c.bf16 %v3205_v16, %v3203_v61  ;;  %v11523_v61 = vld [vmem:[%s15751_s5 + $0x3b4] ss:$8 sps:$4 sm:$0xff]  }
 0x2b3   : > { %v2567_v52 = vmax.f32 %v2426_v34, 0.0  ;;  %v2900_v13 = vpop.f32.mrb[168].mxu1  ;;  %v3363_v31 = vpack.c.bf16 %v3206_v10, %v3204_v43  ;;  %4370 = vmatprep.subr.bf16.mxu1 %v11523_v61 }
 0x2b4   : > { %v2667_v2 = vpack.c.bf16 %v2566_v3, %v2564_v8  ;;  %v2901_v58 = vadd.f32 %v2900_v13, %v13268_v6  ;;  %v2902_v14 = vpop.f32.mrb[169].mxu1  ;;  %4371 = vmatpush1.bf16.msra.mxu1 %v11521_v23 }
 0x2b5   : > { %v2903_v15 = vadd.f32 %v2902_v14, %v13272_v4  ;;  %v2429_v32 = vpop.f32.mrb[216].mxu0  ;;  %v2904_v18 = vpop.f32.mrb[170].mxu1  ;;  %3639 = vmatprep.mubr.bf16.mxu0 %v3363_v31  ;;  %v2668_v63 = vpack.c.bf16 %v2567_v52, %v2565_v12 }
 0x2b6   : > { %v2430_v41 = vadd.f32 %v2429_v32, %v13042_v49  ;;  %v2905_v53 = vadd.f32 %v2904_v18, %v13268_v6  ;;  %v2431_v19 = vpop.f32.mrb[217].mxu0  ;;  %v2906_v22 = vpop.f32.mrb[171].mxu1  ;;  %3640 = vmatmul.mubr.bf16.gmra.mrb[228].mxu0 %v3362_v27  ;;  %v3207_v37 = vmax.f32 %v2901_v58, 0.0 }
 0x2b7   : > { %v2432_v24 = vadd.f32 %v2431_v19, %v13046_v44  ;;  %v2907_v42 = vadd.f32 %v2906_v22, %v13272_v4  ;;  %v2433_v26 = vpop.f32.mrb[218].mxu0  ;;  %3168 = vmatprep.mubr.bf16.mxu1 %v2668_v63  ;;  %v3208_v33 = vmax.f32 %v2903_v15, 0.0 }
 0x2b8   : > { %v3209_v28 = vmax.f32 %v2905_v53, 0.0  ;;  %v2434_v29 = vadd.f32 %v2433_v26, %v13042_v49  ;;  %v2435_v30 = vpop.f32.mrb[219].mxu0  ;;  %3169 = vmatmul.mubr.bf16.gmra.mrb[20].mxu1 %v2667_v2  ;;  %v2568_v39 = vmax.f32 %v2430_v41, 0.0 }
 0x2b9   : > { %v3210_v25 = vmax.f32 %v2907_v42, 0.0  ;;  %v2436_v38 = vadd.f32 %v2435_v30, %v13046_v44  ;;  %v2569_v36 = vmax.f32 %v2432_v24, 0.0 }
 0x2ba   : > { %v2570_v40 = vmax.f32 %v2434_v29, 0.0  ;;  %v3364_v35 = vpack.c.bf16 %v3209_v28, %v3207_v37 }
 0x2bb   : > { %v2571_v45 = vmax.f32 %v2436_v38, 0.0  ;;  %v2910_v20 = vpop.f32.mrb[172].mxu1  ;;  %v3365_v48 = vpack.c.bf16 %v3210_v25, %v3208_v33 }
 0x2bc   : > { %v2669_v51 = vpack.c.bf16 %v2570_v40, %v2568_v39  ;;  %v2911_v17 = vadd.f32 %v2910_v20, %v13268_v6  ;;  %v2912_v54 = vpop.f32.mrb[173].mxu1  ;;  %v11524_v39 = vld [vmem:[%s15751_s5 + $0x3c0] ss:$8 sps:$4 sm:$0xff]   ;;  %v11526_v40 = vld [vmem:[%s15751_s5 + $0x3c4] ss:$8 sps:$4 sm:$0xff]  }
 0x2bd   : > { %v2913_v50 = vadd.f32 %v2912_v54, %v13272_v4  ;;  %v2439_v55 = vpop.f32.mrb[220].mxu0  ;;  %v2914_v57 = vpop.f32.mrb[174].mxu1  ;;  %3649 = vmatprep.mubr.bf16.mxu0 %v3365_v48  ;;  %v2670_v59 = vpack.c.bf16 %v2571_v45, %v2569_v36  ;;  %4372 = vmatprep.subr.bf16.mxu1 %v11526_v40  ;;  %v11530_v40 = vld [vmem:[%s15751_s5 + $0x3e0] ss:$8 sps:$4 sm:$0xff]  }
 0x2be   : > { %v2440_v0 = vadd.f32 %v2439_v55, %v13042_v49  ;;  %v2915_v56 = vadd.f32 %v2914_v57, %v13268_v6  ;;  %v2441_v9 = vpop.f32.mrb[221].mxu0  ;;  %v2916_v46 = vpop.f32.mrb[175].mxu1  ;;  %3650 = vmatmul.mubr.bf16.gmra.mrb[232].mxu0 %v3364_v35  ;;  %v3211_v16 = vmax.f32 %v2911_v17, 0.0  ;;  %4373 = vmatpush1.bf16.msra.mxu1 %v11524_v39 }
 0x2bf   : > { %v2442_v11 = vadd.f32 %v2441_v9, %v13046_v44  ;;  %v2917_v5 = vadd.f32 %v2916_v46, %v13272_v4  ;;  %v2443_v21 = vpop.f32.mrb[222].mxu0  ;;  %3178 = vmatprep.mubr.bf16.mxu1 %v2670_v59  ;;  %v3212_v10 = vmax.f32 %v2913_v50, 0.0 }
 0x2c0   : > { %v3213_v47 = vmax.f32 %v2915_v56, 0.0  ;;  %v2444_v1 = vadd.f32 %v2443_v21, %v13042_v49  ;;  %v2445_v43 = vpop.f32.mrb[223].mxu0  ;;  %3179 = vmatmul.mubr.bf16.gmra.mrb[24].mxu1 %v2669_v51  ;;  %v2572_v3 = vmax.f32 %v2440_v0, 0.0 }
 0x2c1   : > { %v3214_v34 = vmax.f32 %v2917_v5, 0.0  ;;  %v2446_v8 = vadd.f32 %v2445_v43, %v13046_v44  ;;  %v2573_v52 = vmax.f32 %v2442_v11, 0.0 }
 0x2c2   : > { %v2574_v27 = vmax.f32 %v2444_v1, 0.0  ;;  %v3366_v12 = vpack.c.bf16 %v3213_v47, %v3211_v16 }
 0x2c3   : > { %v2575_v13 = vmax.f32 %v2446_v8, 0.0  ;;  %v2920_v31 = vpop.f32.mrb[176].mxu1  ;;  %v3367_v2 = vpack.c.bf16 %v3214_v34, %v3212_v10 }
 0x2c4   : > { %v2671_v58 = vpack.c.bf16 %v2574_v27, %v2572_v3  ;;  %v2921_v14 = vadd.f32 %v2920_v31, %v13268_v6  ;;  %v2922_v15 = vpop.f32.mrb[177].mxu1  ;;  %v11527_v3 = vld [vmem:[%s15751_s5 + $0x3d0] ss:$8 sps:$4 sm:$0xff]   ;;  %v11529_v27 = vld [vmem:[%s15751_s5 + $0x3d4] ss:$8 sps:$4 sm:$0xff]  }
 0x2c5   : > { %v2923_v49 = vadd.f32 %v2922_v15, %v13272_v4  ;;  %v2924_v32 = vpop.f32.mrb[178].mxu1  ;;  %3659 = vmatprep.mubr.bf16.mxu0 %v3367_v2  ;;  %v2672_v18 = vpack.c.bf16 %v2575_v13, %v2573_v52  ;;  %4374 = vmatprep.subr.bf16.mxu1 %v11529_v27  ;;  %v11533_v27 = vld [vmem:[%s15751_s5 + $0x3f0] ss:$8 sps:$4 sm:$0xff]  }
 0x2c6   : > { %v2925_v44 = vadd.f32 %v2924_v32, %v13268_v6  ;;  %v2926_v63 = vpop.f32.mrb[179].mxu1  ;;  %3660 = vmatmul.mubr.bf16.gmra.mrb[236].mxu0 %v3366_v12  ;;  %v3215_v53 = vmax.f32 %v2921_v14, 0.0  ;;  %4375 = vmatpush1.bf16.msra.mxu1 %v11527_v3 }
 0x2c7   : > { %v2927_v41 = vadd.f32 %v2926_v63, %v13272_v4  ;;  %3188 = vmatprep.mubr.bf16.mxu1 %v2672_v18  ;;  %v3216_v22 = vmax.f32 %v2923_v49, 0.0 }
 0x2c8   : > { %v3217_v19 = vmax.f32 %v2925_v44, 0.0  ;;  %3189 = vmatmul.mubr.bf16.gmra.mrb[28].mxu1 %v2671_v58 }
 0x2c9   : > { %v3218_v24 = vmax.f32 %v2927_v41, 0.0 }
 0x2ca   : > { %v3368_v42 = vpack.c.bf16 %v3217_v19, %v3215_v53 }
 0x2cb   : > { %v2930_v26 = vpop.f32.mrb[180].mxu1  ;;  %v3369_v37 = vpack.c.bf16 %v3218_v24, %v3216_v22 }
 0x2cc   : > { %v2931_v28 = vadd.f32 %v2930_v26, %v13268_v6  ;;  %v2932_v29 = vpop.f32.mrb[181].mxu1 }
 0x2cd   : > { %v2933_v30 = vadd.f32 %v2932_v29, %v13272_v4  ;;  %v2934_v33 = vpop.f32.mrb[182].mxu1  ;;  %3669 = vmatprep.mubr.bf16.mxu0 %v3369_v37 }
 0x2ce   : > { %v2935_v25 = vadd.f32 %v2934_v33, %v13268_v6  ;;  %v2936_v38 = vpop.f32.mrb[183].mxu1  ;;  %3670 = vmatmul.mubr.bf16.gmra.mrb[240].mxu0 %v3368_v42  ;;  %v3219_v36 = vmax.f32 %v2931_v28, 0.0 }
 0x2cf   : > { %v2937_v35 = vadd.f32 %v2936_v38, %v13272_v4  ;;  %v3220_v20 = vmax.f32 %v2933_v30, 0.0 }
 0x2d0   : > { %v3221_v45 = vmax.f32 %v2935_v25, 0.0 }
 0x2d1   : > { %v3222_v48 = vmax.f32 %v2937_v35, 0.0  ;;  %v11532_v35 = vld [vmem:[%s15751_s5 + $0x3e4] ss:$8 sps:$4 sm:$0xff]  }
 0x2d2   : > { %v3370_v51 = vpack.c.bf16 %v3221_v45, %v3219_v36  ;;  %4376 = vmatprep.subr.bf16.mxu1 %v11532_v35 }
 0x2d3   : > { %v2940_v17 = vpop.f32.mrb[184].mxu1  ;;  %v3371_v54 = vpack.c.bf16 %v3222_v48, %v3220_v20  ;;  %4377 = vmatpush1.bf16.msra.mxu1 %v11530_v40 }
 0x2d4   : > { %v2941_v50 = vadd.f32 %v2940_v17, %v13268_v6  ;;  %v2942_v55 = vpop.f32.mrb[185].mxu1 }
 0x2d5   : > { %v2943_v57 = vadd.f32 %v2942_v55, %v13272_v4  ;;  %v2944_v59 = vpop.f32.mrb[186].mxu1  ;;  %3679 = vmatprep.mubr.bf16.mxu0 %v3371_v54 }
 0x2d6   : > { %v2945_v0 = vadd.f32 %v2944_v59, %v13268_v6  ;;  %v2946_v56 = vpop.f32.mrb[187].mxu1  ;;  %3680 = vmatmul.mubr.bf16.gmra.mrb[244].mxu0 %v3370_v51  ;;  %v3223_v46 = vmax.f32 %v2941_v50, 0.0 }
 0x2d7   : > { %v2947_v9 = vadd.f32 %v2946_v56, %v13272_v4  ;;  %v3224_v11 = vmax.f32 %v2943_v57, 0.0 }
 0x2d8   : > { %v3225_v23 = vmax.f32 %v2945_v0, 0.0 }
 0x2d9   : > { %v3226_v5 = vmax.f32 %v2947_v9, 0.0 }
 0x2da   : > { %v3372_v21 = vpack.c.bf16 %v3225_v23, %v3223_v46 }
 0x2db   : > { %v2950_v61 = vpop.f32.mrb[188].mxu1  ;;  %v3373_v16 = vpack.c.bf16 %v3226_v5, %v3224_v11 }
 0x2dc   : > { %v2951_v47 = vadd.f32 %v2950_v61, %v13268_v6  ;;  %v2952_v1 = vpop.f32.mrb[189].mxu1 }
 0x2dd   : > { %v2953_v43 = vadd.f32 %v2952_v1, %v13272_v4  ;;  %v2954_v10 = vpop.f32.mrb[190].mxu1  ;;  %3689 = vmatprep.mubr.bf16.mxu0 %v3373_v16 }
 0x2de   : > { %v2955_v34 = vadd.f32 %v2954_v10, %v13268_v6  ;;  %v2956_v8 = vpop.f32.mrb[191].mxu1  ;;  %3690 = vmatmul.mubr.bf16.gmra.mrb[248].mxu0 %v3372_v21  ;;  %v3227_v52 = vmax.f32 %v2951_v47, 0.0 }
 0x2df   : > { %v2957_v12 = vadd.f32 %v2956_v8, %v13272_v4  ;;  %v3228_v31 = vmax.f32 %v2953_v43, 0.0 }
 0x2e0   : > { %v3229_v13 = vmax.f32 %v2955_v34, 0.0 }
 0x2e1   : > { %v3230_v2 = vmax.f32 %v2957_v12, 0.0  ;;  %v11535_v12 = vld [vmem:[%s15751_s5 + $0x3f4] ss:$8 sps:$4 sm:$0xff]  }
 0x2e2   : > { %v3374_v58 = vpack.c.bf16 %v3229_v13, %v3227_v52  ;;  %4378 = vmatprep.subr.bf16.mxu1 %v11535_v12 }
 0x2e3   : > { %v2960_v14 = vpop.f32.mrb[192].mxu1  ;;  %v3375_v15 = vpack.c.bf16 %v3230_v2, %v3228_v31  ;;  %4379 = vmatpush1.bf16.msra.mxu1 %v11533_v27 }
 0x2e4   : > { %v2961_v49 = vadd.f32 %v2960_v14, %v13268_v6  ;;  %v2962_v32 = vpop.f32.mrb[193].mxu1 }
 0x2e5   : > { %v2963_v18 = vadd.f32 %v2962_v32, %v13272_v4  ;;  %v2964_v44 = vpop.f32.mrb[194].mxu1  ;;  %3699 = vmatprep.mubr.bf16.mxu0 %v3375_v15 }
 0x2e6   : > { %v2965_v63 = vadd.f32 %v2964_v44, %v13268_v6  ;;  %v2966_v41 = vpop.f32.mrb[195].mxu1  ;;  %3700 = vmatmul.mubr.bf16.gmra.mrb[252].mxu0 %v3374_v58  ;;  %v3231_v19 = vmax.f32 %v2961_v49, 0.0 }
 0x2e7   : > { %v2967_v53 = vadd.f32 %v2966_v41, %v13272_v4  ;;  %v3232_v24 = vmax.f32 %v2963_v18, 0.0 }
 0x2e8   : > { %v3233_v22 = vmax.f32 %v2965_v63, 0.0 }
 0x2e9   : > { %v3234_v42 = vmax.f32 %v2967_v53, 0.0 }
 0x2ea   : > { %v3376_v26 = vpack.c.bf16 %v3233_v22, %v3231_v19 }
 0x2eb   : > { %v2970_v37 = vpop.f32.mrb[196].mxu1  ;;  %v3377_v28 = vpack.c.bf16 %v3234_v42, %v3232_v24 }
 0x2ec   : > { %v2971_v29 = vadd.f32 %v2970_v37, %v13268_v6  ;;  %v2972_v30 = vpop.f32.mrb[197].mxu1 }
 0x2ed   : > { %v2973_v33 = vadd.f32 %v2972_v30, %v13272_v4  ;;  %v2974_v25 = vpop.f32.mrb[198].mxu1  ;;  %3709 = vmatprep.mubr.bf16.mxu0 %v3377_v28 }
 0x2ee   : > { %v2975_v38 = vadd.f32 %v2974_v25, %v13268_v6  ;;  %v2976_v39 = vpop.f32.mrb[199].mxu1  ;;  %3710 = vmatmul.mubr.bf16.gmra.mrb[0].mxu0 %v3376_v26  ;;  %v3235_v45 = vmax.f32 %v2971_v29, 0.0 }
 0x2ef   : > { %v2977_v36 = vadd.f32 %v2976_v39, %v13272_v4  ;;  %v3236_v48 = vmax.f32 %v2973_v33, 0.0 }
 0x2f0   : > { %v3237_v20 = vmax.f32 %v2975_v38, 0.0 }
 0x2f1   : > { %v3238_v51 = vmax.f32 %v2977_v36, 0.0 }
 0x2f2   : > { %v3378_v17 = vpack.c.bf16 %v3237_v20, %v3235_v45  ;;  %v11538_v20 = vld [vmem:[%s15753_s7 + $0x4] ss:$8 sps:$4 sm:$0xff]  }
 0x2f3   : > { %v2980_v54 = vpop.f32.mrb[200].mxu1  ;;  %v3379_v50 = vpack.c.bf16 %v3238_v51, %v3236_v48  ;;  %5085 = vmatprep.subr.bf16.mxu1 %v11538_v20 }
 0x2f4   : > { %v2981_v55 = vadd.f32 %v2980_v54, %v13268_v6  ;;  %v2982_v57 = vpop.f32.mrb[201].mxu1 }
 0x2f5   : > { %v2983_v59 = vadd.f32 %v2982_v57, %v13272_v4  ;;  %v2984_v0 = vpop.f32.mrb[202].mxu1  ;;  %3719 = vmatprep.mubr.bf16.mxu0 %v3379_v50 }
 0x2f6   : > { %v2985_v56 = vadd.f32 %v2984_v0, %v13268_v6  ;;  %v2986_v9 = vpop.f32.mrb[203].mxu1  ;;  %3720 = vmatmul.mubr.bf16.gmra.mrb[4].mxu0 %v3378_v17  ;;  %v3239_v23 = vmax.f32 %v2981_v55, 0.0 }
 0x2f7   : > { %v2987_v46 = vadd.f32 %v2986_v9, %v13272_v4  ;;  %v3240_v5 = vmax.f32 %v2983_v59, 0.0 }
 0x2f8   : > { %v3241_v11 = vmax.f32 %v2985_v56, 0.0 }
 0x2f9   : > { %v3242_v21 = vmax.f32 %v2987_v46, 0.0 }
 0x2fa   : > { %v3380_v61 = vpack.c.bf16 %v3241_v11, %v3239_v23 }
 0x2fb   : > { %v2990_v16 = vpop.f32.mrb[204].mxu1  ;;  %v3381_v47 = vpack.c.bf16 %v3242_v21, %v3240_v5 }
 0x2fc   : > { %v2991_v1 = vadd.f32 %v2990_v16, %v13268_v6  ;;  %v2992_v43 = vpop.f32.mrb[205].mxu1 }
 0x2fd   : > { %v2993_v10 = vadd.f32 %v2992_v43, %v13272_v4  ;;  %v2994_v34 = vpop.f32.mrb[206].mxu1  ;;  %3729 = vmatprep.mubr.bf16.mxu0 %v3381_v47 }
 0x2fe   : > { %v2995_v8 = vadd.f32 %v2994_v34, %v13268_v6  ;;  %v2996_v3 = vpop.f32.mrb[207].mxu1  ;;  %3730 = vmatmul.mubr.bf16.gmra.mrb[8].mxu0 %v3380_v61  ;;  %v3243_v13 = vmax.f32 %v2991_v1, 0.0 }
 0x2ff   : > { %v2997_v52 = vadd.f32 %v2996_v3, %v13272_v4  ;;  %v3244_v2 = vmax.f32 %v2993_v10, 0.0 }
 0x300   : > { %v3245_v31 = vmax.f32 %v2995_v8, 0.0 }
 0x301   : > { %v3246_v58 = vmax.f32 %v2997_v52, 0.0 }
 0x302   : > { %v3382_v14 = vpack.c.bf16 %v3245_v31, %v3243_v13 }
 0x303   : > { %v3000_v15 = vpop.f32.mrb[208].mxu1  ;;  %v3383_v49 = vpack.c.bf16 %v3246_v58, %v3244_v2 }
 0x304   : > { %v3001_v32 = vadd.f32 %v3000_v15, %v13268_v6  ;;  %v3002_v18 = vpop.f32.mrb[209].mxu1 }
 0x305   : > { %v3003_v44 = vadd.f32 %v3002_v18, %v13272_v4  ;;  %v3004_v63 = vpop.f32.mrb[210].mxu1  ;;  %3739 = vmatprep.mubr.bf16.mxu0 %v3383_v49 }
 0x306   : > { %v3005_v41 = vadd.f32 %v3004_v63, %v13268_v6  ;;  %v3006_v53 = vpop.f32.mrb[211].mxu1  ;;  %3740 = vmatmul.mubr.bf16.gmra.mrb[12].mxu0 %v3382_v14  ;;  %v3247_v22 = vmax.f32 %v3001_v32, 0.0 }
 0x307   : > { %v3007_v19 = vadd.f32 %v3006_v53, %v13272_v4  ;;  %v3248_v42 = vmax.f32 %v3003_v44, 0.0 }
 0x308   : > { %v3249_v24 = vmax.f32 %v3005_v41, 0.0 }
 0x309   : > { %v3250_v26 = vmax.f32 %v3007_v19, 0.0 }
 0x30a   : > { %v3384_v37 = vpack.c.bf16 %v3249_v24, %v3247_v22 }
 0x30b   : > { %v3010_v28 = vpop.f32.mrb[212].mxu1  ;;  %v3385_v29 = vpack.c.bf16 %v3250_v26, %v3248_v42 }
 0x30c   : > { %v3011_v30 = vadd.f32 %v3010_v28, %v13268_v6  ;;  %v3012_v33 = vpop.f32.mrb[213].mxu1 }
 0x30d   : > { %v3013_v25 = vadd.f32 %v3012_v33, %v13272_v4  ;;  %v3014_v38 = vpop.f32.mrb[214].mxu1  ;;  %3749 = vmatprep.mubr.bf16.mxu0 %v3385_v29 }
 0x30e   : > { %v3015_v39 = vadd.f32 %v3014_v38, %v13268_v6  ;;  %v3016_v40 = vpop.f32.mrb[215].mxu1  ;;  %3750 = vmatmul.mubr.bf16.gmra.mrb[16].mxu0 %v3384_v37  ;;  %v3251_v36 = vmax.f32 %v3011_v30, 0.0 }
 0x30f   : > { %v3017_v35 = vadd.f32 %v3016_v40, %v13272_v4  ;;  %v3252_v48 = vmax.f32 %v3013_v25, 0.0 }
 0x310   : > { %v3253_v45 = vmax.f32 %v3015_v39, 0.0 }
 0x311   : > { %v3254_v51 = vmax.f32 %v3017_v35, 0.0 }
 0x312   : > { %v3386_v17 = vpack.c.bf16 %v3253_v45, %v3251_v36 }
 0x313   : > { %v3020_v54 = vpop.f32.mrb[216].mxu1  ;;  %v3387_v50 = vpack.c.bf16 %v3254_v51, %v3252_v48 }
 0x314   : > { %v3021_v55 = vadd.f32 %v3020_v54, %v13268_v6  ;;  %v3022_v57 = vpop.f32.mrb[217].mxu1 }
 0x315   : > { %v3023_v59 = vadd.f32 %v3022_v57, %v13272_v4  ;;  %v3024_v0 = vpop.f32.mrb[218].mxu1  ;;  %3759 = vmatprep.mubr.bf16.mxu0 %v3387_v50 }
 0x316   : > { %v3025_v56 = vadd.f32 %v3024_v0, %v13268_v6  ;;  %v3026_v9 = vpop.f32.mrb[219].mxu1  ;;  %3760 = vmatmul.mubr.bf16.gmra.mrb[20].mxu0 %v3386_v17  ;;  %v3255_v23 = vmax.f32 %v3021_v55, 0.0 }
 0x317   : > { %v3027_v46 = vadd.f32 %v3026_v9, %v13272_v4  ;;  %v3256_v5 = vmax.f32 %v3023_v59, 0.0 }
 0x318   : > { %v3257_v11 = vmax.f32 %v3025_v56, 0.0 }
 0x319   : > { %v3258_v21 = vmax.f32 %v3027_v46, 0.0 }
 0x31a   : > { %v3388_v61 = vpack.c.bf16 %v3257_v11, %v3255_v23 }
 0x31b   : > { %v3030_v16 = vpop.f32.mrb[220].mxu1  ;;  %v3389_v47 = vpack.c.bf16 %v3258_v21, %v3256_v5 }
 0x31c   : > { %v3031_v1 = vadd.f32 %v3030_v16, %v13268_v6  ;;  %v3032_v43 = vpop.f32.mrb[221].mxu1 }
 0x31d   : > { %v3033_v10 = vadd.f32 %v3032_v43, %v13272_v4  ;;  %v3034_v34 = vpop.f32.mrb[222].mxu1  ;;  %3769 = vmatprep.mubr.bf16.mxu0 %v3389_v47 }
 0x31e   : > { %v3035_v8 = vadd.f32 %v3034_v34, %v13268_v6  ;;  %v3036_v3 = vpop.f32.mrb[223].mxu1  ;;  %3770 = vmatmul.mubr.bf16.gmra.mrb[24].mxu0 %v3388_v61  ;;  %v3259_v12 = vmax.f32 %v3031_v1, 0.0 }
 0x31f   : > { %v3037_v27 = vadd.f32 %v3036_v3, %v13272_v4  ;;  %v3260_v13 = vmax.f32 %v3033_v10, 0.0 }
 0x320   : > { %v3261_v52 = vmax.f32 %v3035_v8, 0.0 }
 0x321   : > { %v3262_v31 = vmax.f32 %v3037_v27, 0.0 }
 0x322   : > { %v3390_v2 = vpack.c.bf16 %v3261_v52, %v3259_v12 }
 0x323   : > { %v3040_v58 = vpop.f32.mrb[224].mxu1  ;;  %v3391_v14 = vpack.c.bf16 %v3262_v31, %v3260_v13 }
 0x324   : > { %v3041_v15 = vadd.f32 %v3040_v58, %v13268_v6  ;;  %v3042_v49 = vpop.f32.mrb[225].mxu1 }
 0x325   : > { %v3043_v32 = vadd.f32 %v3042_v49, %v13272_v4  ;;  %v3044_v18 = vpop.f32.mrb[226].mxu1  ;;  %3779 = vmatprep.mubr.bf16.mxu0 %v3391_v14 }
 0x326   : > { %v3045_v44 = vadd.f32 %v3044_v18, %v13268_v6  ;;  %v3046_v63 = vpop.f32.mrb[227].mxu1  ;;  %3780 = vmatmul.mubr.bf16.gmra.mrb[28].mxu0 %v3390_v2  ;;  %v3263_v53 = vmax.f32 %v3041_v15, 0.0 }
 0x327   : > { %v3047_v41 = vadd.f32 %v3046_v63, %v13272_v4  ;;  %v3264_v22 = vmax.f32 %v3043_v32, 0.0 }
 0x328   : > { %v3265_v19 = vmax.f32 %v3045_v44, 0.0 }
 0x329   : > { %v3266_v24 = vmax.f32 %v3047_v41, 0.0 }
 0x32a   : > { %v3392_v42 = vpack.c.bf16 %v3265_v19, %v3263_v53 }
 0x32b   : > { %v3050_v26 = vpop.f32.mrb[228].mxu1  ;;  %v3393_v37 = vpack.c.bf16 %v3266_v24, %v3264_v22 }
 0x32c   : > { %v3051_v28 = vadd.f32 %v3050_v26, %v13268_v6  ;;  %v3052_v29 = vpop.f32.mrb[229].mxu1 }
 0x32d   : > { %v3053_v30 = vadd.f32 %v3052_v29, %v13272_v4  ;;  %v3054_v33 = vpop.f32.mrb[230].mxu1  ;;  %3789 = vmatprep.mubr.bf16.mxu0 %v3393_v37 }
 0x32e   : > { %v3055_v25 = vadd.f32 %v3054_v33, %v13268_v6  ;;  %v3056_v38 = vpop.f32.mrb[231].mxu1  ;;  %3790 = vmatmul.mubr.bf16.gmra.mrb[32].mxu0 %v3392_v42  ;;  %v3267_v40 = vmax.f32 %v3051_v28, 0.0 }
 0x32f   : > { %v3057_v39 = vadd.f32 %v3056_v38, %v13272_v4  ;;  %v3268_v36 = vmax.f32 %v3053_v30, 0.0 }
 0x330   : > { %v3269_v35 = vmax.f32 %v3055_v25, 0.0 }
 0x331   : > { %v3270_v45 = vmax.f32 %v3057_v39, 0.0 }
 0x332   : > { %v3394_v20 = vpack.c.bf16 %v3269_v35, %v3267_v40 }
 0x333   : > { %v3060_v48 = vpop.f32.mrb[232].mxu1  ;;  %v3395_v51 = vpack.c.bf16 %v3270_v45, %v3268_v36 }
 0x334   : > { %v3061_v17 = vadd.f32 %v3060_v48, %v13268_v6  ;;  %v3062_v54 = vpop.f32.mrb[233].mxu1 }
 0x335   : > { %v3063_v50 = vadd.f32 %v3062_v54, %v13272_v4  ;;  %v3064_v55 = vpop.f32.mrb[234].mxu1  ;;  %3799 = vmatprep.mubr.bf16.mxu0 %v3395_v51 }
 0x336   : > { %v3065_v57 = vadd.f32 %v3064_v55, %v13268_v6  ;;  %v3066_v59 = vpop.f32.mrb[235].mxu1  ;;  %3800 = vmatmul.mubr.bf16.gmra.mrb[36].mxu0 %v3394_v20  ;;  %v3271_v56 = vmax.f32 %v3061_v17, 0.0 }
 0x337   : > { %v3067_v0 = vadd.f32 %v3066_v59, %v13272_v4  ;;  %v3272_v46 = vmax.f32 %v3063_v50, 0.0 }
 0x338   : > { %v3273_v9 = vmax.f32 %v3065_v57, 0.0 }
 0x339   : > { %v3274_v23 = vmax.f32 %v3067_v0, 0.0 }
 0x33a   : > { %v3396_v11 = vpack.c.bf16 %v3273_v9, %v3271_v56 }
 0x33b   : > { %v3070_v5 = vpop.f32.mrb[236].mxu1  ;;  %v3397_v21 = vpack.c.bf16 %v3274_v23, %v3272_v46 }
 0x33c   : > { %v3071_v61 = vadd.f32 %v3070_v5, %v13268_v6  ;;  %v3072_v16 = vpop.f32.mrb[237].mxu1 }
 0x33d   : > { %v3073_v47 = vadd.f32 %v3072_v16, %v13272_v4  ;;  %v3074_v1 = vpop.f32.mrb[238].mxu1  ;;  %3809 = vmatprep.mubr.bf16.mxu0 %v3397_v21 }
 0x33e   : > { %v3075_v43 = vadd.f32 %v3074_v1, %v13268_v6  ;;  %v3076_v10 = vpop.f32.mrb[239].mxu1  ;;  %3810 = vmatmul.mubr.bf16.gmra.mrb[40].mxu0 %v3396_v11  ;;  %v3275_v8 = vmax.f32 %v3071_v61, 0.0 }
 0x33f   : > { %v3077_v34 = vadd.f32 %v3076_v10, %v13272_v4  ;;  %v3276_v27 = vmax.f32 %v3073_v47, 0.0 }
 0x340   : > { %v3277_v3 = vmax.f32 %v3075_v43, 0.0 }
 0x341   : > { %v3278_v12 = vmax.f32 %v3077_v34, 0.0 }
 0x342   : > { %v3398_v52 = vpack.c.bf16 %v3277_v3, %v3275_v8 }
 0x343   : > { %v3080_v13 = vpop.f32.mrb[240].mxu1  ;;  %v3399_v31 = vpack.c.bf16 %v3278_v12, %v3276_v27 }
 0x344   : > { %v3081_v2 = vadd.f32 %v3080_v13, %v13268_v6  ;;  %v3082_v58 = vpop.f32.mrb[241].mxu1 }
 0x345   : > { %v3083_v14 = vadd.f32 %v3082_v58, %v13272_v4  ;;  %v3084_v15 = vpop.f32.mrb[242].mxu1  ;;  %3819 = vmatprep.mubr.bf16.mxu0 %v3399_v31 }
 0x346   : > { %v3085_v49 = vadd.f32 %v3084_v15, %v13268_v6  ;;  %v3086_v32 = vpop.f32.mrb[243].mxu1  ;;  %3820 = vmatmul.mubr.bf16.gmra.mrb[44].mxu0 %v3398_v52  ;;  %v3279_v44 = vmax.f32 %v3081_v2, 0.0 }
 0x347   : > { %v3087_v18 = vadd.f32 %v3086_v32, %v13272_v4  ;;  %v3280_v41 = vmax.f32 %v3083_v14, 0.0 }
 0x348   : > { %v3281_v63 = vmax.f32 %v3085_v49, 0.0 }
 0x349   : > { %v3282_v53 = vmax.f32 %v3087_v18, 0.0 }
 0x34a   : > { %v3400_v19 = vpack.c.bf16 %v3281_v63, %v3279_v44 }
 0x34b   : > { %v3090_v22 = vpop.f32.mrb[244].mxu1  ;;  %v3401_v24 = vpack.c.bf16 %v3282_v53, %v3280_v41 }
 0x34c   : > { %v3091_v42 = vadd.f32 %v3090_v22, %v13268_v6  ;;  %v3092_v26 = vpop.f32.mrb[245].mxu1 }
 0x34d   : > { %v3093_v37 = vadd.f32 %v3092_v26, %v13272_v4  ;;  %v3094_v28 = vpop.f32.mrb[246].mxu1  ;;  %3829 = vmatprep.mubr.bf16.mxu0 %v3401_v24 }
 0x34e   : > { %v3095_v29 = vadd.f32 %v3094_v28, %v13268_v6  ;;  %v3096_v30 = vpop.f32.mrb[247].mxu1  ;;  %3830 = vmatmul.mubr.bf16.gmra.mrb[48].mxu0 %v3400_v19  ;;  %v3283_v25 = vmax.f32 %v3091_v42, 0.0 }
 0x34f   : > { %v3097_v33 = vadd.f32 %v3096_v30, %v13272_v4  ;;  %v3284_v39 = vmax.f32 %v3093_v37, 0.0 }
 0x350   : > { %v3285_v38 = vmax.f32 %v3095_v29, 0.0 }
 0x351   : > { %v3286_v40 = vmax.f32 %v3097_v33, 0.0 }
 0x352   : > { %v3402_v35 = vpack.c.bf16 %v3285_v38, %v3283_v25 }
 0x353   : > { %v3100_v36 = vpop.f32.mrb[248].mxu1  ;;  %v3403_v45 = vpack.c.bf16 %v3286_v40, %v3284_v39 }
 0x354   : > { %v3101_v20 = vadd.f32 %v3100_v36, %v13268_v6  ;;  %v3102_v48 = vpop.f32.mrb[249].mxu1 }
 0x355   : > { %v3103_v51 = vadd.f32 %v3102_v48, %v13272_v4  ;;  %v3104_v17 = vpop.f32.mrb[250].mxu1  ;;  %3839 = vmatprep.mubr.bf16.mxu0 %v3403_v45 }
 0x356   : > { %v3105_v54 = vadd.f32 %v3104_v17, %v13268_v6  ;;  %v3106_v50 = vpop.f32.mrb[251].mxu1  ;;  %3840 = vmatmul.mubr.bf16.gmra.mrb[52].mxu0 %v3402_v35  ;;  %v3287_v57 = vmax.f32 %v3101_v20, 0.0 }
 0x357   : > { %v3107_v55 = vadd.f32 %v3106_v50, %v13272_v4  ;;  %v3288_v0 = vmax.f32 %v3103_v51, 0.0 }
 0x358   : > { %v3289_v59 = vmax.f32 %v3105_v54, 0.0 }
 0x359   : > { %v3290_v56 = vmax.f32 %v3107_v55, 0.0 }
 0x35a   : > { %v3404_v9 = vpack.c.bf16 %v3289_v59, %v3287_v57 }
 0x35b   : > { %v3110_v46 = vpop.f32.mrb[252].mxu1  ;;  %v3405_v23 = vpack.c.bf16 %v3290_v56, %v3288_v0 }
 0x35c   : > { %v3111_v11 = vadd.f32 %v3110_v46, %v13268_v6  ;;  %v3112_v5 = vpop.f32.mrb[253].mxu1 }
 0x35d   : > { %v3113_v21 = vadd.f32 %v3112_v5, %v13272_v4  ;;  %v3114_v61 = vpop.f32.mrb[254].mxu1  ;;  %3849 = vmatprep.mubr.bf16.mxu0 %v3405_v23 }
 0x35e   : > { %v3115_v16 = vadd.f32 %v3114_v61, %v13268_v6  ;;  %v3116_v47 = vpop.f32.mrb[255].mxu1  ;;  %3850 = vmatmul.mubr.bf16.gmra.mrb[56].mxu0 %v3404_v9  ;;  %v3291_v43 = vmax.f32 %v3111_v11, 0.0  ;;  %v10522_v9 = vld [vmem:[%s15752_s6 + $0x4] sm:$0x3] }
 0x35f   : > { %v3117_v1 = vadd.f32 %v3116_v47, %v13272_v4  ;;  %v3292_v34 = vmax.f32 %v3113_v21, 0.0 }
 0x360   : > { %v3293_v10 = vmax.f32 %v3115_v16, 0.0  ;;  %v13444_v16 = vrot.slane %v10522_v9, %v12710_v60 }
 0x361   : > { %v3294_v8 = vmax.f32 %v3117_v1, 0.0  ;;  %v13448_v1 = vrot.slane %v10522_v9, %v12715_v62  ;;  %v11539_v9 = vld [vmem:[%s15753_s7 + $0x10] ss:$8 sps:$4 sm:$0xff]  }
 0x362   : > { %v3406_v3 = vpack.c.bf16 %v3293_v10, %v3291_v43 }
 0x363   : > { %v3120_v27 = vpop.f32.mrb[0].mxu1  ;;  %v3407_v12 = vpack.c.bf16 %v3294_v8, %v3292_v34 }
 0x364   : > { %v3121_v52 = vadd.f32 %v3120_v27, %v13268_v6  ;;  %v3122_v13 = vpop.f32.mrb[1].mxu1 }
 0x365   : > { %v3123_v31 = vadd.f32 %v3122_v13, %v13272_v4  ;;  %v3124_v2 = vpop.f32.mrb[2].mxu1  ;;  %3859 = vmatprep.mubr.bf16.mxu0 %v3407_v12 }
 0x366   : > { %v3125_v58 = vadd.f32 %v3124_v2, %v13268_v6  ;;  %v3126_v14 = vpop.f32.mrb[3].mxu1  ;;  %3860 = vmatmul.mubr.bf16.gmra.mrb[60].mxu0 %v3406_v3  ;;  %v3295_v49 = vmax.f32 %v3121_v52, 0.0 }
 0x367   : > { %v3127_v15 = vadd.f32 %v3126_v14, %v13272_v4  ;;  %v3296_v18 = vmax.f32 %v3123_v31, 0.0 }
 0x368   : > { %v3297_v32 = vmax.f32 %v3125_v58, 0.0 }
 0x369   : > { %v3298_v44 = vmax.f32 %v3127_v15, 0.0 }
 0x36a   : > { %v3408_v63 = vpack.c.bf16 %v3297_v32, %v3295_v49 }
 0x36b   : > { %v3130_v41 = vpop.f32.mrb[4].mxu1  ;;  %v3409_v53 = vpack.c.bf16 %v3298_v44, %v3296_v18 }
 0x36c   : > { %v3131_v19 = vadd.f32 %v3130_v41, %v13268_v6  ;;  %v3132_v22 = vpop.f32.mrb[5].mxu1 }
 0x36d   : > { %v3133_v24 = vadd.f32 %v3132_v22, %v13272_v4  ;;  %v3134_v42 = vpop.f32.mrb[6].mxu1  ;;  %3869 = vmatprep.mubr.bf16.mxu0 %v3409_v53 }
 0x36e   : > { %v3135_v26 = vadd.f32 %v3134_v42, %v13268_v6  ;;  %v3136_v37 = vpop.f32.mrb[7].mxu1  ;;  %3870 = vmatmul.mubr.bf16.gmra.mrb[64].mxu0 %v3408_v63  ;;  %v3299_v29 = vmax.f32 %v3131_v19, 0.0 }
 0x36f   : > { %v3137_v28 = vadd.f32 %v3136_v37, %v13272_v4  ;;  %v3300_v33 = vmax.f32 %v3133_v24, 0.0 }
 0x370   : > { %v3301_v30 = vmax.f32 %v3135_v26, 0.0 }
 0x371   : > { %v3302_v25 = vmax.f32 %v3137_v28, 0.0 }
 0x372   : > { %v3410_v38 = vpack.c.bf16 %v3301_v30, %v3299_v29 }
 0x373   : > { %v3140_v39 = vpop.f32.mrb[8].mxu1  ;;  %v3411_v40 = vpack.c.bf16 %v3302_v25, %v3300_v33 }
 0x374   : > { %v3141_v35 = vadd.f32 %v3140_v39, %v13268_v6  ;;  %v3142_v36 = vpop.f32.mrb[9].mxu1  ;;  %v11536_v39 = vld [vmem:[%s15753_s7] ss:$8 sps:$4 sm:$0xff]  }
 0x375   : > { %v3143_v45 = vadd.f32 %v3142_v36, %v13272_v4  ;;  %v3144_v20 = vpop.f32.mrb[10].mxu1  ;;  %3879 = vmatprep.mubr.bf16.mxu0 %v3411_v40 }
 0x376   : > { %v3145_v48 = vadd.f32 %v3144_v20, %v13268_v6  ;;  %v3146_v51 = vpop.f32.mrb[11].mxu1  ;;  %3880 = vmatmul.mubr.bf16.gmra.mrb[68].mxu0 %v3410_v38  ;;  %v3303_v54 = vmax.f32 %v3141_v35, 0.0 }
 0x377   : > { %v3147_v17 = vadd.f32 %v3146_v51, %v13272_v4  ;;  %v3304_v55 = vmax.f32 %v3143_v45, 0.0  ;;  %v11541_v45 = vld [vmem:[%s15753_s7 + $0x14] ss:$8 sps:$4 sm:$0xff]  }
 0x378   : > { %v3305_v50 = vmax.f32 %v3145_v48, 0.0 }
 0x379   : > { %v3306_v57 = vmax.f32 %v3147_v17, 0.0 }
 0x37a   : > { %v3412_v59 = vpack.c.bf16 %v3305_v50, %v3303_v54 }
 0x37b   : > { %v3150_v0 = vpop.f32.mrb[12].mxu1  ;;  %v3413_v56 = vpack.c.bf16 %v3306_v57, %v3304_v55 }
 0x37c   : > { %v3151_v46 = vadd.f32 %v3150_v0, %v13268_v6  ;;  %v3152_v23 = vpop.f32.mrb[13].mxu1 }
 0x37d   : > { %v3153_v11 = vadd.f32 %v3152_v23, %v13272_v4  ;;  %v3154_v5 = vpop.f32.mrb[14].mxu1  ;;  %3889 = vmatprep.mubr.bf16.mxu0 %v3413_v56 }
 0x37e   : > { %v3155_v21 = vadd.f32 %v3154_v5, %v13268_v6  ;;  %v3156_v61 = vpop.f32.mrb[15].mxu1  ;;  %3890 = vmatmul.mubr.bf16.gmra.mrb[72].mxu0 %v3412_v59  ;;  %v3307_v43 = vmax.f32 %v3151_v46, 0.0 }
 0x37f   : > { %v3157_v47 = vadd.f32 %v3156_v61, %v13272_v4  ;;  %v3308_v34 = vmax.f32 %v3153_v11, 0.0 }
 0x380   : > { %v3309_v10 = vmax.f32 %v3155_v21, 0.0  ;;  %v11544_v21 = vld [vmem:[%s15753_s7 + $0x24] ss:$8 sps:$4 sm:$0xff]  }
 0x381   : > { %v3310_v8 = vmax.f32 %v3157_v47, 0.0  ;;  %v3631_v3 = vpop.f32.mrb[224].mxu0 }
 0x382   : > { %v3414_v27 = vpack.c.bf16 %v3309_v10, %v3307_v43  ;;  %v3632_v12 = vadd.f32 %v3631_v3, %v13444_v16  ;;  %v3633_v52 = vpop.f32.mrb[225].mxu0 }
 0x383   : > { %v3634_v13 = vadd.f32 %v3633_v52, %v13448_v1  ;;  %v3160_v31 = vpop.f32.mrb[16].mxu1  ;;  %v3635_v2 = vpop.f32.mrb[226].mxu0  ;;  %v3415_v58 = vpack.c.bf16 %v3310_v8, %v3308_v34 }
 0x384   : > { %v3161_v14 = vadd.f32 %v3160_v31, %v13268_v6  ;;  %v3636_v15 = vadd.f32 %v3635_v2, %v13444_v16  ;;  %v3162_v49 = vpop.f32.mrb[17].mxu1  ;;  %v3637_v32 = vpop.f32.mrb[227].mxu0  ;;  %v3950_v41 = vmax.f32 %v3632_v12, 0.0 }
 0x385   : > { %v3163_v18 = vadd.f32 %v3162_v49, %v13272_v4  ;;  %v3638_v44 = vadd.f32 %v3637_v32, %v13448_v1  ;;  %v3164_v63 = vpop.f32.mrb[18].mxu1  ;;  %3899 = vmatprep.mubr.bf16.mxu0 %v3415_v58  ;;  %v3951_v24 = vmax.f32 %v3634_v13, 0.0  ;;  %v11542_v13 = vld [vmem:[%s15753_s7 + $0x20] ss:$8 sps:$4 sm:$0xff]  }
 0x386   : > { %v3952_v53 = vmax.f32 %v3636_v15, 0.0  ;;  %v3165_v19 = vadd.f32 %v3164_v63, %v13268_v6  ;;  %v3166_v22 = vpop.f32.mrb[19].mxu1  ;;  %3900 = vmatmul.mubr.bf16.gmra.mrb[76].mxu0 %v3414_v27  ;;  %v3311_v37 = vmax.f32 %v3161_v14, 0.0  ;;  %v11547_v14 = vld [vmem:[%s15753_s7 + $0x34] ss:$8 sps:$4 sm:$0xff]  }
 0x387   : > { %v3953_v42 = vmax.f32 %v3638_v44, 0.0  ;;  %v3167_v26 = vadd.f32 %v3166_v22, %v13272_v4  ;;  %v3312_v30 = vmax.f32 %v3163_v18, 0.0 }
 0x388   : > { %v4111_v28 = vpack.c.bf16 %v3952_v53, %v3950_v41  ;;  %v3313_v29 = vmax.f32 %v3165_v19, 0.0 }
 0x389   : > { %v3314_v33 = vmax.f32 %v3167_v26, 0.0  ;;  %v3641_v25 = vpop.f32.mrb[228].mxu0  ;;  %v4112_v38 = vpack.c.bf16 %v3953_v42, %v3951_v24  ;;  %v11545_v42 = vld [vmem:[%s15753_s7 + $0x30] ss:$8 sps:$4 sm:$0xff]  }
 0x38a   : > { %v3416_v40 = vpack.c.bf16 %v3313_v29, %v3311_v37  ;;  %v3642_v35 = vadd.f32 %v3641_v25, %v13444_v16  ;;  %v3643_v36 = vpop.f32.mrb[229].mxu0 }
 0x38b   : > { %v3644_v20 = vadd.f32 %v3643_v36, %v13448_v1  ;;  %v3170_v48 = vpop.f32.mrb[20].mxu1  ;;  %v3645_v51 = vpop.f32.mrb[230].mxu0  ;;  %4380 = vmatprep.mubr.bf16.mxu1 %v4112_v38  ;;  %v3417_v17 = vpack.c.bf16 %v3314_v33, %v3312_v30  ;;  %v11550_v30 = vld [vmem:[%s15753_s7 + $0x44] ss:$8 sps:$4 sm:$0xff]  }
 0x38c   : > { %v3171_v54 = vadd.f32 %v3170_v48, %v13268_v6  ;;  %v3646_v50 = vadd.f32 %v3645_v51, %v13444_v16  ;;  %v3172_v55 = vpop.f32.mrb[21].mxu1  ;;  %v3647_v57 = vpop.f32.mrb[231].mxu0  ;;  %4381 = vmatmul.mubr.bf16.vlgmr.msra.gmra.mrb[160].mxu1 %v4111_v28  ;;  %v3954_v46 = vmax.f32 %v3642_v35, 0.0  ;;  %v11548_v51 = vld [vmem:[%s15753_s7 + $0x40] ss:$8 sps:$4 sm:$0xff]  }
 0x38d   : > { %v3173_v59 = vadd.f32 %v3172_v55, %v13272_v4  ;;  %v3648_v0 = vadd.f32 %v3647_v57, %v13448_v1  ;;  %5086 = vmatpush1.bf16.msra.mxu1 %v11536_v39  ;;  %v3174_v56 = vpop.f32.mrb[22].mxu1  ;;  %3909 = vmatprep.mubr.bf16.mxu0 %v3417_v17  ;;  %v3955_v61 = vmax.f32 %v3644_v20, 0.0  ;;  %v11553_v55 = vld [vmem:[%s15753_s7 + $0x54] ss:$8 sps:$4 sm:$0xff]  }
 0x38e   : > { %v3956_v23 = vmax.f32 %v3646_v50, 0.0  ;;  %v3175_v11 = vadd.f32 %v3174_v56, %v13268_v6  ;;  %v3176_v5 = vpop.f32.mrb[23].mxu1  ;;  %3910 = vmatmul.mubr.bf16.gmra.mrb[80].mxu0 %v3416_v40  ;;  %5087 = vmatprep.subr.bf16.mxu1 %v11541_v45  ;;  %v3315_v10 = vmax.f32 %v3171_v54, 0.0 }
 0x38f   : > { %v3957_v47 = vmax.f32 %v3648_v0, 0.0  ;;  %v3177_v43 = vadd.f32 %v3176_v5, %v13272_v4  ;;  %v3316_v3 = vmax.f32 %v3173_v59, 0.0 }
 0x390   : > { %v4113_v34 = vpack.c.bf16 %v3956_v23, %v3954_v46  ;;  %v3317_v8 = vmax.f32 %v3175_v11, 0.0 }
 0x391   : > { %v3318_v27 = vmax.f32 %v3177_v43, 0.0  ;;  %v3651_v12 = vpop.f32.mrb[232].mxu0  ;;  %v4114_v52 = vpack.c.bf16 %v3957_v47, %v3955_v61  ;;  %5088 = vmatpush1.bf16.msra.mxu1 %v11539_v9  ;;  %v11551_v47 = vld [vmem:[%s15753_s7 + $0x50] ss:$8 sps:$4 sm:$0xff]  }
 0x392   : > { %v3418_v31 = vpack.c.bf16 %v3317_v8, %v3315_v10  ;;  %v3652_v2 = vadd.f32 %v3651_v12, %v13444_v16  ;;  %v3653_v58 = vpop.f32.mrb[233].mxu0  ;;  %5089 = vmatprep.subr.bf16.mxu1 %v11544_v21 }
 0x393   : > { %v3654_v15 = vadd.f32 %v3653_v58, %v13448_v1  ;;  %v3180_v49 = vpop.f32.mrb[24].mxu1  ;;  %v3655_v32 = vpop.f32.mrb[234].mxu0  ;;  %4390 = vmatprep.mubr.bf16.mxu1 %v4114_v52  ;;  %v3419_v18 = vpack.c.bf16 %v3318_v27, %v3316_v3  ;;  %v11556_v3 = vld [vmem:[%s15753_s7 + $0x64] ss:$8 sps:$4 sm:$0xff]  }
 0x394   : > { %v3181_v44 = vadd.f32 %v3180_v49, %v13268_v6  ;;  %v3656_v63 = vadd.f32 %v3655_v32, %v13444_v16  ;;  %v3182_v41 = vpop.f32.mrb[25].mxu1  ;;  %v3657_v53 = vpop.f32.mrb[235].mxu0  ;;  %4391 = vmatmul.mubr.bf16.gmra.mrb[164].mxu1 %v4113_v34  ;;  %v3958_v26 = vmax.f32 %v3652_v2, 0.0 }
 0x395   : > { %v3183_v19 = vadd.f32 %v3182_v41, %v13272_v4  ;;  %v3658_v22 = vadd.f32 %v3657_v53, %v13448_v1  ;;  %v3184_v24 = vpop.f32.mrb[26].mxu1  ;;  %3919 = vmatprep.mubr.bf16.mxu0 %v3419_v18  ;;  %5090 = vmatpush1.bf16.msra.mxu1 %v11542_v13  ;;  %v3959_v33 = vmax.f32 %v3654_v15, 0.0 }
 0x396   : > { %v3960_v37 = vmax.f32 %v3656_v63, 0.0  ;;  %v3185_v28 = vadd.f32 %v3184_v24, %v13268_v6  ;;  %v3186_v29 = vpop.f32.mrb[27].mxu1  ;;  %3920 = vmatmul.mubr.bf16.gmra.mrb[84].mxu0 %v3418_v31  ;;  %5091 = vmatprep.subr.bf16.mxu1 %v11547_v14  ;;  %v3319_v39 = vmax.f32 %v3181_v44, 0.0 }
 0x397   : > { %v3961_v25 = vmax.f32 %v3658_v22, 0.0  ;;  %v3187_v38 = vadd.f32 %v3186_v29, %v13272_v4  ;;  %v3320_v36 = vmax.f32 %v3183_v19, 0.0 }
 0x398   : > { %v4115_v40 = vpack.c.bf16 %v3960_v37, %v3958_v26  ;;  %v3321_v35 = vmax.f32 %v3185_v28, 0.0  ;;  %v11562_v28 = vld [vmem:[%s15753_s7 + $0x84] ss:$8 sps:$4 sm:$0xff]  }
 0x399   : > { %v3322_v45 = vmax.f32 %v3187_v38, 0.0  ;;  %v3661_v20 = vpop.f32.mrb[236].mxu0  ;;  %v4116_v48 = vpack.c.bf16 %v3961_v25, %v3959_v33  ;;  %5092 = vmatpush1.bf16.msra.mxu1 %v11545_v42  ;;  %v11557_v42 = vld [vmem:[%s15753_s7 + $0x70] ss:$8 sps:$4 sm:$0xff]  }
 0x39a   : > { %v3420_v17 = vpack.c.bf16 %v3321_v35, %v3319_v39  ;;  %v3662_v54 = vadd.f32 %v3661_v20, %v13444_v16  ;;  %v3663_v50 = vpop.f32.mrb[237].mxu0  ;;  %5093 = vmatprep.subr.bf16.mxu1 %v11550_v30  ;;  %v11560_v39 = vld [vmem:[%s15753_s7 + $0x80] ss:$8 sps:$4 sm:$0xff]  }
 0x39b   : > { %v3664_v57 = vadd.f32 %v3663_v50, %v13448_v1  ;;  %v3190_v59 = vpop.f32.mrb[28].mxu1  ;;  %v3665_v0 = vpop.f32.mrb[238].mxu0  ;;  %4400 = vmatprep.mubr.bf16.mxu1 %v4116_v48  ;;  %v3421_v56 = vpack.c.bf16 %v3322_v45, %v3320_v36  ;;  %v11565_v36 = vld [vmem:[%s15753_s7 + $0x94] ss:$8 sps:$4 sm:$0xff]  }
 0x39c   : > { %v3191_v9 = vadd.f32 %v3190_v59, %v13268_v6  ;;  %v3666_v46 = vadd.f32 %v3665_v0, %v13444_v16  ;;  %v3192_v23 = vpop.f32.mrb[29].mxu1  ;;  %v3667_v11 = vpop.f32.mrb[239].mxu0  ;;  %4401 = vmatmul.mubr.bf16.gmra.mrb[168].mxu1 %v4115_v40  ;;  %v3962_v43 = vmax.f32 %v3662_v54, 0.0  ;;  %v11563_v54 = vld [vmem:[%s15753_s7 + $0x90] ss:$8 sps:$4 sm:$0xff]  }
 0x39d   : > { %v3193_v5 = vadd.f32 %v3192_v23, %v13272_v4  ;;  %v3668_v21 = vadd.f32 %v3667_v11, %v13448_v1  ;;  %v3194_v61 = vpop.f32.mrb[30].mxu1  ;;  %3929 = vmatprep.mubr.bf16.mxu0 %v3421_v56  ;;  %5094 = vmatpush1.bf16.msra.mxu1 %v11548_v51  ;;  %v3963_v27 = vmax.f32 %v3664_v57, 0.0  ;;  %v11568_v56 = vld [vmem:[%s15753_s7 + $0xa4] ss:$8 sps:$4 sm:$0xff]   ;;  %v11566_v23 = vld [vmem:[%s15753_s7 + $0xa0] ss:$8 sps:$4 sm:$0xff]  }
 0x39e   : > { %v3964_v10 = vmax.f32 %v3666_v46, 0.0  ;;  %v3195_v34 = vadd.f32 %v3194_v61, %v13268_v6  ;;  %v3196_v8 = vpop.f32.mrb[31].mxu1  ;;  %3930 = vmatmul.mubr.bf16.gmra.mrb[88].mxu0 %v3420_v17  ;;  %5095 = vmatprep.subr.bf16.mxu1 %v11553_v55  ;;  %v3323_v13 = vmax.f32 %v3191_v9, 0.0  ;;  %v11554_v6 = vld [vmem:[%s15753_s7 + $0x60] ss:$8 sps:$4 sm:$0xff]  }
 0x39f   : > { %v3965_v12 = vmax.f32 %v3668_v21, 0.0  ;;  %v3197_v52 = vadd.f32 %v3196_v8, %v13272_v4  ;;  %v3324_v58 = vmax.f32 %v3193_v5, 0.0  ;;  %v11559_v4 = vld [vmem:[%s15753_s7 + $0x74] ss:$8 sps:$4 sm:$0xff]  }
 0x3a0   : > { %v4117_v31 = vpack.c.bf16 %v3964_v10, %v3962_v43  ;;  %v3325_v2 = vmax.f32 %v3195_v34, 0.0 }
 0x3a1   : > { %v3326_v14 = vmax.f32 %v3197_v52, 0.0  ;;  %v3671_v15 = vpop.f32.mrb[240].mxu0  ;;  %v4118_v49 = vpack.c.bf16 %v3965_v12, %v3963_v27  ;;  %5096 = vmatpush1.bf16.msra.mxu1 %v11551_v47 }
 0x3a2   : > { %v3422_v32 = vpack.c.bf16 %v3325_v2, %v3323_v13  ;;  %v3672_v18 = vadd.f32 %v3671_v15, %v13444_v16  ;;  %v3673_v44 = vpop.f32.mrb[241].mxu0  ;;  %5097 = vmatprep.subr.bf16.mxu1 %v11556_v3 }
 0x3a3   : > { %v3674_v63 = vadd.f32 %v3673_v44, %v13448_v1  ;;  %v3675_v41 = vpop.f32.mrb[242].mxu0  ;;  %4410 = vmatprep.mubr.bf16.mxu1 %v4118_v49  ;;  %v3423_v53 = vpack.c.bf16 %v3326_v14, %v3324_v58 }
 0x3a4   : > { %v3676_v19 = vadd.f32 %v3675_v41, %v13444_v16  ;;  %v3677_v22 = vpop.f32.mrb[243].mxu0  ;;  %4411 = vmatmul.mubr.bf16.gmra.mrb[172].mxu1 %v4117_v31  ;;  %v3966_v26 = vmax.f32 %v3672_v18, 0.0  ;;  %v11569_v41 = vld [vmem:[%s15753_s7 + $0xb0] ss:$8 sps:$4 sm:$0xff]  }
 0x3a5   : > { %v3678_v24 = vadd.f32 %v3677_v22, %v13448_v1  ;;  %3939 = vmatprep.mubr.bf16.mxu0 %v3423_v53  ;;  %5098 = vmatpush1.bf16.msra.mxu1 %v11554_v6  ;;  %v3967_v29 = vmax.f32 %v3674_v63, 0.0  ;;  %v11571_v53 = vld [vmem:[%s15753_s7 + $0xb4] ss:$8 sps:$4 sm:$0xff]  }
 0x3a6   : > { %v3968_v37 = vmax.f32 %v3676_v19, 0.0  ;;  %3940 = vmatmul.mubr.bf16.gmra.mrb[92].mxu0 %v3422_v32  ;;  %5099 = vmatprep.subr.bf16.mxu1 %v11559_v4 }
 0x3a7   : > { %v3969_v30 = vmax.f32 %v3678_v24, 0.0 }
 0x3a8   : > { %v4119_v33 = vpack.c.bf16 %v3968_v37, %v3966_v26 }
 0x3a9   : > { %v3681_v25 = vpop.f32.mrb[244].mxu0  ;;  %v4120_v38 = vpack.c.bf16 %v3969_v30, %v3967_v29  ;;  %5100 = vmatpush1.bf16.msra.mxu1 %v11557_v42 }
 0x3aa   : > { %v3682_v40 = vadd.f32 %v3681_v25, %v13444_v16  ;;  %v3683_v35 = vpop.f32.mrb[245].mxu0  ;;  %5101 = vmatprep.subr.bf16.mxu1 %v11562_v28 }
 0x3ab   : > { %v3684_v45 = vadd.f32 %v3683_v35, %v13448_v1  ;;  %v3685_v20 = vpop.f32.mrb[246].mxu0  ;;  %4420 = vmatprep.mubr.bf16.mxu1 %v4120_v38 }
 0x3ac   : > { %v3686_v48 = vadd.f32 %v3685_v20, %v13444_v16  ;;  %v3687_v51 = vpop.f32.mrb[247].mxu0  ;;  %4421 = vmatmul.mubr.bf16.gmra.mrb[176].mxu1 %v4119_v33  ;;  %v3970_v50 = vmax.f32 %v3682_v40, 0.0 }
 0x3ad   : > { %v3688_v17 = vadd.f32 %v3687_v51, %v13448_v1  ;;  %5102 = vmatpush1.bf16.msra.mxu1 %v11560_v39  ;;  %v3971_v57 = vmax.f32 %v3684_v45, 0.0 }
 0x3ae   : > { %v3972_v55 = vmax.f32 %v3686_v48, 0.0  ;;  %5103 = vmatprep.subr.bf16.mxu1 %v11565_v36 }
 0x3af   : > { %v3973_v59 = vmax.f32 %v3688_v17, 0.0 }
 0x3b0   : > { %v4121_v0 = vpack.c.bf16 %v3972_v55, %v3970_v50 }
 0x3b1   : > { %v3691_v9 = vpop.f32.mrb[248].mxu0  ;;  %v4122_v46 = vpack.c.bf16 %v3973_v59, %v3971_v57  ;;  %5104 = vmatpush1.bf16.msra.mxu1 %v11563_v54 }
 0x3b2   : > { %v3692_v11 = vadd.f32 %v3691_v9, %v13444_v16  ;;  %v3693_v5 = vpop.f32.mrb[249].mxu0  ;;  %5105 = vmatprep.subr.bf16.mxu1 %v11568_v56  ;;  %v11572_v9 = vld [vmem:[%s15753_s7 + $0xc0] ss:$8 sps:$4 sm:$0xff]  }
 0x3b3   : > { %v3694_v21 = vadd.f32 %v3693_v5, %v13448_v1  ;;  %v3695_v61 = vpop.f32.mrb[250].mxu0  ;;  %4430 = vmatprep.mubr.bf16.mxu1 %v4122_v46  ;;  %v11574_v46 = vld [vmem:[%s15753_s7 + $0xc4] ss:$8 sps:$4 sm:$0xff]  }
 0x3b4   : > { %v3696_v47 = vadd.f32 %v3695_v61, %v13444_v16  ;;  %v3697_v43 = vpop.f32.mrb[251].mxu0  ;;  %4431 = vmatmul.mubr.bf16.gmra.mrb[180].mxu1 %v4121_v0  ;;  %v3974_v34 = vmax.f32 %v3692_v11, 0.0 }
 0x3b5   : > { %v3698_v10 = vadd.f32 %v3697_v43, %v13448_v1  ;;  %5106 = vmatpush1.bf16.msra.mxu1 %v11566_v23  ;;  %v3975_v3 = vmax.f32 %v3694_v21, 0.0 }
 0x3b6   : > { %v3976_v8 = vmax.f32 %v3696_v47, 0.0  ;;  %5107 = vmatprep.subr.bf16.mxu1 %v11571_v53  ;;  %v11575_v53 = vld [vmem:[%s15753_s7 + $0xd0] ss:$8 sps:$4 sm:$0xff]  }
 0x3b7   : > { %v3977_v27 = vmax.f32 %v3698_v10, 0.0 }
 0x3b8   : > { %v4123_v12 = vpack.c.bf16 %v3976_v8, %v3974_v34 }
 0x3b9   : > { %v3701_v52 = vpop.f32.mrb[252].mxu0  ;;  %v4124_v13 = vpack.c.bf16 %v3977_v27, %v3975_v3  ;;  %5108 = vmatpush1.bf16.msra.mxu1 %v11569_v41 }
 0x3ba   : > { %v3702_v31 = vadd.f32 %v3701_v52, %v13444_v16  ;;  %v3703_v2 = vpop.f32.mrb[253].mxu0  ;;  %5109 = vmatprep.subr.bf16.mxu1 %v11574_v46 }
 0x3bb   : > { %v3704_v58 = vadd.f32 %v3703_v2, %v13448_v1  ;;  %v3705_v14 = vpop.f32.mrb[254].mxu0  ;;  %4440 = vmatprep.mubr.bf16.mxu1 %v4124_v13 }
 0x3bc   : > { %v3706_v15 = vadd.f32 %v3705_v14, %v13444_v16  ;;  %v3707_v49 = vpop.f32.mrb[255].mxu0  ;;  %4441 = vmatmul.mubr.bf16.gmra.mrb[184].mxu1 %v4123_v12  ;;  %v3978_v32 = vmax.f32 %v3702_v31, 0.0 }
 0x3bd   : > { %v3708_v6 = vadd.f32 %v3707_v49, %v13448_v1  ;;  %v3979_v44 = vmax.f32 %v3704_v58, 0.0  ;;  %5110 = vmatpush1.bf16.msra.mxu1 %v11572_v9 }
 0x3be   : > { %v3980_v18 = vmax.f32 %v3706_v15, 0.0 }
 0x3bf   : > { %v3981_v4 = vmax.f32 %v3708_v6, 0.0 }
 0x3c0   : > { %v4125_v63 = vpack.c.bf16 %v3980_v18, %v3978_v32 }
 0x3c1   : > { %v3711_v19 = vpop.f32.mrb[0].mxu0  ;;  %v4126_v22 = vpack.c.bf16 %v3981_v4, %v3979_v44 }
 0x3c2   : > { %v3712_v24 = vadd.f32 %v3711_v19, %v13444_v16  ;;  %v3713_v42 = vpop.f32.mrb[1].mxu0  ;;  %v11577_v19 = vld [vmem:[%s15753_s7 + $0xd4] ss:$8 sps:$4 sm:$0xff]  }
 0x3c3   : > { %v3714_v26 = vadd.f32 %v3713_v42, %v13448_v1  ;;  %v3715_v37 = vpop.f32.mrb[2].mxu0  ;;  %4450 = vmatprep.mubr.bf16.mxu1 %v4126_v22  ;;  %5111 = vmatprep.subr.bf16.mxu1 %v11577_v19 }
 0x3c4   : > { %v3716_v28 = vadd.f32 %v3715_v37, %v13444_v16  ;;  %v3717_v29 = vpop.f32.mrb[3].mxu0  ;;  %4451 = vmatmul.mubr.bf16.gmra.mrb[188].mxu1 %v4125_v63  ;;  %v3982_v33 = vmax.f32 %v3712_v24, 0.0 }
 0x3c5   : > { %v3718_v30 = vadd.f32 %v3717_v29, %v13448_v1  ;;  %v3983_v38 = vmax.f32 %v3714_v26, 0.0  ;;  %5112 = vmatpush1.bf16.msra.mxu1 %v11575_v53 }
 0x3c6   : > { %v3984_v25 = vmax.f32 %v3716_v28, 0.0 }
 0x3c7   : > { %v3985_v39 = vmax.f32 %v3718_v30, 0.0 }
 0x3c8   : > { %v4127_v40 = vpack.c.bf16 %v3984_v25, %v3982_v33 }
 0x3c9   : > { %v3721_v35 = vpop.f32.mrb[4].mxu0  ;;  %v4128_v36 = vpack.c.bf16 %v3985_v39, %v3983_v38 }
 0x3ca   : > { %v3722_v45 = vadd.f32 %v3721_v35, %v13444_v16  ;;  %v3723_v20 = vpop.f32.mrb[5].mxu0 }
 0x3cb   : > { %v3724_v48 = vadd.f32 %v3723_v20, %v13448_v1  ;;  %v3725_v51 = vpop.f32.mrb[6].mxu0  ;;  %4460 = vmatprep.mubr.bf16.mxu1 %v4128_v36 }
 0x3cc   : > { %v3726_v17 = vadd.f32 %v3725_v51, %v13444_v16  ;;  %v3727_v54 = vpop.f32.mrb[7].mxu0  ;;  %4461 = vmatmul.mubr.bf16.gmra.mrb[192].mxu1 %v4127_v40  ;;  %v3986_v55 = vmax.f32 %v3722_v45, 0.0 }
 0x3cd   : > { %v3728_v50 = vadd.f32 %v3727_v54, %v13448_v1  ;;  %v3987_v59 = vmax.f32 %v3724_v48, 0.0 }
 0x3ce   : > { %v3988_v57 = vmax.f32 %v3726_v17, 0.0 }
 0x3cf   : > { %v3989_v0 = vmax.f32 %v3728_v50, 0.0 }
 0x3d0   : > { %v4129_v56 = vpack.c.bf16 %v3988_v57, %v3986_v55  ;;  %v11578_v55 = vld [vmem:[%s15751_s5 + $0x400] ss:$8 sps:$4 sm:$0xff]   ;;  %v11580_v57 = vld [vmem:[%s15751_s5 + $0x404] ss:$8 sps:$4 sm:$0xff]  }
 0x3d1   : > { %v3731_v23 = vpop.f32.mrb[8].mxu0  ;;  %v4130_v11 = vpack.c.bf16 %v3989_v0, %v3987_v59  ;;  %5976 = vmatprep.subr.bf16.mxu0 %v11580_v57 }
 0x3d2   : > { %v3732_v5 = vadd.f32 %v3731_v23, %v13444_v16  ;;  %v3733_v21 = vpop.f32.mrb[9].mxu0  ;;  %5977 = vmatpush1.bf16.msra.mxu0 %v11578_v55 }
 0x3d3   : > { %v3734_v61 = vadd.f32 %v3733_v21, %v13448_v1  ;;  %v3735_v47 = vpop.f32.mrb[10].mxu0  ;;  %4470 = vmatprep.mubr.bf16.mxu1 %v4130_v11  ;;  %v11581_v11 = vld [vmem:[%s15753_s7 + $0xe0] ss:$8 sps:$4 sm:$0xff]  }
 0x3d4   : > { %v3736_v43 = vadd.f32 %v3735_v47, %v13444_v16  ;;  %v3737_v10 = vpop.f32.mrb[11].mxu0  ;;  %4471 = vmatmul.mubr.bf16.gmra.mrb[196].mxu1 %v4129_v56  ;;  %v3990_v8 = vmax.f32 %v3732_v5, 0.0  ;;  %v11583_v5 = vld [vmem:[%s15753_s7 + $0xe4] ss:$8 sps:$4 sm:$0xff]  }
 0x3d5   : > { %v3738_v34 = vadd.f32 %v3737_v10, %v13448_v1  ;;  %v3991_v27 = vmax.f32 %v3734_v61, 0.0  ;;  %5113 = vmatprep.subr.bf16.mxu1 %v11583_v5 }
 0x3d6   : > { %v3992_v3 = vmax.f32 %v3736_v43, 0.0  ;;  %5114 = vmatpush1.bf16.msra.mxu1 %v11581_v11 }
 0x3d7   : > { %v3993_v12 = vmax.f32 %v3738_v34, 0.0 }
 0x3d8   : > { %v4131_v52 = vpack.c.bf16 %v3992_v3, %v3990_v8 }
 0x3d9   : > { %v3741_v13 = vpop.f32.mrb[12].mxu0  ;;  %v4132_v31 = vpack.c.bf16 %v3993_v12, %v3991_v27 }
 0x3da   : > { %v3742_v2 = vadd.f32 %v3741_v13, %v13444_v16  ;;  %v3743_v58 = vpop.f32.mrb[13].mxu0 }
 0x3db   : > { %v3744_v14 = vadd.f32 %v3743_v58, %v13448_v1  ;;  %v3745_v15 = vpop.f32.mrb[14].mxu0  ;;  %4480 = vmatprep.mubr.bf16.mxu1 %v4132_v31 }
 0x3dc   : > { %v3746_v49 = vadd.f32 %v3745_v15, %v13444_v16  ;;  %v3747_v6 = vpop.f32.mrb[15].mxu0  ;;  %4481 = vmatmul.mubr.bf16.gmra.mrb[200].mxu1 %v4131_v52  ;;  %v3994_v18 = vmax.f32 %v3742_v2, 0.0 }
 0x3dd   : > { %v3748_v32 = vadd.f32 %v3747_v6, %v13448_v1  ;;  %v3995_v4 = vmax.f32 %v3744_v14, 0.0 }
 0x3de   : > { %v3996_v44 = vmax.f32 %v3746_v49, 0.0 }
 0x3df   : > { %v3997_v63 = vmax.f32 %v3748_v32, 0.0 }
 0x3e0   : > { %v4133_v41 = vpack.c.bf16 %v3996_v44, %v3994_v18 }
 0x3e1   : > { %v3751_v22 = vpop.f32.mrb[16].mxu0  ;;  %v4134_v24 = vpack.c.bf16 %v3997_v63, %v3995_v4  ;;  %v11584_v4 = vld [vmem:[%s15751_s5 + $0x410] ss:$8 sps:$4 sm:$0xff]   ;;  %v11586_v63 = vld [vmem:[%s15751_s5 + $0x414] ss:$8 sps:$4 sm:$0xff]  }
 0x3e2   : > { %v3752_v42 = vadd.f32 %v3751_v22, %v13444_v16  ;;  %v3753_v26 = vpop.f32.mrb[17].mxu0  ;;  %5978 = vmatprep.subr.bf16.mxu0 %v11586_v63 }
 0x3e3   : > { %v3754_v37 = vadd.f32 %v3753_v26, %v13448_v1  ;;  %v3755_v28 = vpop.f32.mrb[18].mxu0  ;;  %4490 = vmatprep.mubr.bf16.mxu1 %v4134_v24  ;;  %5979 = vmatpush1.bf16.msra.mxu0 %v11584_v4  ;;  %v11587_v26 = vld [vmem:[%s15753_s7 + $0xf0] ss:$8 sps:$4 sm:$0xff]  }
 0x3e4   : > { %v3756_v29 = vadd.f32 %v3755_v28, %v13444_v16  ;;  %v3757_v30 = vpop.f32.mrb[19].mxu0  ;;  %4491 = vmatmul.mubr.bf16.gmra.mrb[204].mxu1 %v4133_v41  ;;  %v3998_v25 = vmax.f32 %v3752_v42, 0.0 }
 0x3e5   : > { %v3758_v33 = vadd.f32 %v3757_v30, %v13448_v1  ;;  %v3999_v39 = vmax.f32 %v3754_v37, 0.0  ;;  %v11589_v37 = vld [vmem:[%s15753_s7 + $0xf4] ss:$8 sps:$4 sm:$0xff]  }
 0x3e6   : > { %v4000_v38 = vmax.f32 %v3756_v29, 0.0  ;;  %5115 = vmatprep.subr.bf16.mxu1 %v11589_v37 }
 0x3e7   : > { %v4001_v40 = vmax.f32 %v3758_v33, 0.0  ;;  %5116 = vmatpush1.bf16.msra.mxu1 %v11587_v26 }
 0x3e8   : > { %v4135_v35 = vpack.c.bf16 %v4000_v38, %v3998_v25 }
 0x3e9   : > { %v3761_v36 = vpop.f32.mrb[20].mxu0  ;;  %v4136_v45 = vpack.c.bf16 %v4001_v40, %v3999_v39 }
 0x3ea   : > { %v3762_v20 = vadd.f32 %v3761_v36, %v13444_v16  ;;  %v3763_v48 = vpop.f32.mrb[21].mxu0 }
 0x3eb   : > { %v3764_v51 = vadd.f32 %v3763_v48, %v13448_v1  ;;  %v3765_v17 = vpop.f32.mrb[22].mxu0  ;;  %4500 = vmatprep.mubr.bf16.mxu1 %v4136_v45 }
 0x3ec   : > { %v3766_v54 = vadd.f32 %v3765_v17, %v13444_v16  ;;  %v3767_v50 = vpop.f32.mrb[23].mxu0  ;;  %4501 = vmatmul.mubr.bf16.gmra.mrb[208].mxu1 %v4135_v35  ;;  %v4002_v0 = vmax.f32 %v3762_v20, 0.0 }
 0x3ed   : > { %v3768_v59 = vadd.f32 %v3767_v50, %v13448_v1  ;;  %v4003_v9 = vmax.f32 %v3764_v51, 0.0 }
 0x3ee   : > { %v4004_v56 = vmax.f32 %v3766_v54, 0.0 }
 0x3ef   : > { %v4005_v46 = vmax.f32 %v3768_v59, 0.0 }
 0x3f0   : > { %v4137_v23 = vpack.c.bf16 %v4004_v56, %v4002_v0 }
 0x3f1   : > { %v3771_v21 = vpop.f32.mrb[24].mxu0  ;;  %v4138_v61 = vpack.c.bf16 %v4005_v46, %v4003_v9  ;;  %v11590_v9 = vld [vmem:[%s15751_s5 + $0x420] ss:$8 sps:$4 sm:$0xff]   ;;  %v11592_v46 = vld [vmem:[%s15751_s5 + $0x424] ss:$8 sps:$4 sm:$0xff]  }
 0x3f2   : > { %v3772_v47 = vadd.f32 %v3771_v21, %v13444_v16  ;;  %v3773_v43 = vpop.f32.mrb[25].mxu0  ;;  %5980 = vmatprep.subr.bf16.mxu0 %v11592_v46  ;;  %v11596_v46 = vld [vmem:[%s15751_s5 + $0x440] ss:$8 sps:$4 sm:$0xff]  }
 0x3f3   : > { %v3774_v10 = vadd.f32 %v3773_v43, %v13448_v1  ;;  %v3775_v34 = vpop.f32.mrb[26].mxu0  ;;  %4510 = vmatprep.mubr.bf16.mxu1 %v4138_v61  ;;  %5981 = vmatpush1.bf16.msra.mxu0 %v11590_v9 }
 0x3f4   : > { %v3776_v8 = vadd.f32 %v3775_v34, %v13444_v16  ;;  %v3777_v3 = vpop.f32.mrb[27].mxu0  ;;  %4511 = vmatmul.mubr.bf16.gmra.mrb[212].mxu1 %v4137_v23  ;;  %v4006_v12 = vmax.f32 %v3772_v47, 0.0 }
 0x3f5   : > { %v3778_v27 = vadd.f32 %v3777_v3, %v13448_v1  ;;  %v4007_v13 = vmax.f32 %v3774_v10, 0.0 }
 0x3f6   : > { %v4008_v52 = vmax.f32 %v3776_v8, 0.0 }
 0x3f7   : > { %v4009_v31 = vmax.f32 %v3778_v27, 0.0 }
 0x3f8   : > { %v4139_v2 = vpack.c.bf16 %v4008_v52, %v4006_v12 }
 0x3f9   : > { %v3781_v58 = vpop.f32.mrb[28].mxu0  ;;  %v4140_v14 = vpack.c.bf16 %v4009_v31, %v4007_v13 }
 0x3fa   : > { %v3782_v15 = vadd.f32 %v3781_v58, %v13444_v16  ;;  %v3783_v49 = vpop.f32.mrb[29].mxu0 }
 0x3fb   : > { %v3784_v6 = vadd.f32 %v3783_v49, %v13448_v1  ;;  %v3785_v32 = vpop.f32.mrb[30].mxu0  ;;  %4520 = vmatprep.mubr.bf16.mxu1 %v4140_v14 }
 0x3fc   : > { %v3786_v18 = vadd.f32 %v3785_v32, %v13444_v16  ;;  %v3787_v44 = vpop.f32.mrb[31].mxu0  ;;  %4521 = vmatmul.mubr.bf16.gmra.mrb[216].mxu1 %v4139_v2  ;;  %v4010_v53 = vmax.f32 %v3782_v15, 0.0 }
 0x3fd   : > { %v3788_v41 = vadd.f32 %v3787_v44, %v13448_v1  ;;  %v4011_v22 = vmax.f32 %v3784_v6, 0.0 }
 0x3fe   : > { %v4012_v19 = vmax.f32 %v3786_v18, 0.0 }
 0x3ff   : > { %v4013_v24 = vmax.f32 %v3788_v41, 0.0 }
 0x400   : > { %v4141_v42 = vpack.c.bf16 %v4012_v19, %v4010_v53  ;;  %v11593_v53 = vld [vmem:[%s15751_s5 + $0x430] ss:$8 sps:$4 sm:$0xff]   ;;  %v11595_v19 = vld [vmem:[%s15751_s5 + $0x434] ss:$8 sps:$4 sm:$0xff]  }
 0x401   : > { %v3791_v28 = vpop.f32.mrb[32].mxu0  ;;  %v4142_v29 = vpack.c.bf16 %v4013_v24, %v4011_v22  ;;  %5982 = vmatprep.subr.bf16.mxu0 %v11595_v19  ;;  %v11599_v19 = vld [vmem:[%s15751_s5 + $0x450] ss:$8 sps:$4 sm:$0xff]  }
 0x402   : > { %v3792_v30 = vadd.f32 %v3791_v28, %v13444_v16  ;;  %v3793_v33 = vpop.f32.mrb[33].mxu0  ;;  %5983 = vmatpush1.bf16.msra.mxu0 %v11593_v53 }
 0x403   : > { %v3794_v25 = vadd.f32 %v3793_v33, %v13448_v1  ;;  %v3795_v38 = vpop.f32.mrb[34].mxu0  ;;  %4530 = vmatprep.mubr.bf16.mxu1 %v4142_v29 }
 0x404   : > { %v3796_v39 = vadd.f32 %v3795_v38, %v13444_v16  ;;  %v3797_v40 = vpop.f32.mrb[35].mxu0  ;;  %4531 = vmatmul.mubr.bf16.gmra.mrb[220].mxu1 %v4141_v42  ;;  %v4014_v36 = vmax.f32 %v3792_v30, 0.0 }
 0x405   : > { %v3798_v35 = vadd.f32 %v3797_v40, %v13448_v1  ;;  %v4015_v20 = vmax.f32 %v3794_v25, 0.0 }
 0x406   : > { %v4016_v45 = vmax.f32 %v3796_v39, 0.0 }
 0x407   : > { %v4017_v48 = vmax.f32 %v3798_v35, 0.0 }
 0x408   : > { %v4143_v51 = vpack.c.bf16 %v4016_v45, %v4014_v36 }
 0x409   : > { %v3801_v17 = vpop.f32.mrb[36].mxu0  ;;  %v4144_v54 = vpack.c.bf16 %v4017_v48, %v4015_v20 }
 0x40a   : > { %v3802_v50 = vadd.f32 %v3801_v17, %v13444_v16  ;;  %v3803_v55 = vpop.f32.mrb[37].mxu0 }
 0x40b   : > { %v3804_v57 = vadd.f32 %v3803_v55, %v13448_v1  ;;  %v3805_v59 = vpop.f32.mrb[38].mxu0  ;;  %4540 = vmatprep.mubr.bf16.mxu1 %v4144_v54 }
 0x40c   : > { %v3806_v0 = vadd.f32 %v3805_v59, %v13444_v16  ;;  %v3807_v56 = vpop.f32.mrb[39].mxu0  ;;  %4541 = vmatmul.mubr.bf16.gmra.mrb[224].mxu1 %v4143_v51  ;;  %v4018_v11 = vmax.f32 %v3802_v50, 0.0 }
 0x40d   : > { %v3808_v23 = vadd.f32 %v3807_v56, %v13448_v1  ;;  %v4019_v21 = vmax.f32 %v3804_v57, 0.0 }
 0x40e   : > { %v4020_v5 = vmax.f32 %v3806_v0, 0.0 }
 0x40f   : > { %v4021_v61 = vmax.f32 %v3808_v23, 0.0  ;;  %v11598_v23 = vld [vmem:[%s15751_s5 + $0x444] ss:$8 sps:$4 sm:$0xff]  }
 0x410   : > { %v4145_v47 = vpack.c.bf16 %v4020_v5, %v4018_v11  ;;  %5984 = vmatprep.subr.bf16.mxu0 %v11598_v23  ;;  %v11602_v23 = vld [vmem:[%s15751_s5 + $0x460] ss:$8 sps:$4 sm:$0xff]  }
 0x411   : > { %v3811_v43 = vpop.f32.mrb[40].mxu0  ;;  %v4146_v10 = vpack.c.bf16 %v4021_v61, %v4019_v21  ;;  %5985 = vmatpush1.bf16.msra.mxu0 %v11596_v46 }
 0x412   : > { %v3812_v34 = vadd.f32 %v3811_v43, %v13444_v16  ;;  %v3813_v8 = vpop.f32.mrb[41].mxu0 }
 0x413   : > { %v3814_v3 = vadd.f32 %v3813_v8, %v13448_v1  ;;  %v3815_v27 = vpop.f32.mrb[42].mxu0  ;;  %4550 = vmatprep.mubr.bf16.mxu1 %v4146_v10 }
 0x414   : > { %v3816_v12 = vadd.f32 %v3815_v27, %v13444_v16  ;;  %v3817_v52 = vpop.f32.mrb[43].mxu0  ;;  %4551 = vmatmul.mubr.bf16.gmra.mrb[228].mxu1 %v4145_v47  ;;  %v4022_v31 = vmax.f32 %v3812_v34, 0.0 }
 0x415   : > { %v3818_v13 = vadd.f32 %v3817_v52, %v13448_v1  ;;  %v4023_v58 = vmax.f32 %v3814_v3, 0.0 }
 0x416   : > { %v4024_v2 = vmax.f32 %v3816_v12, 0.0 }
 0x417   : > { %v4025_v14 = vmax.f32 %v3818_v13, 0.0 }
 0x418   : > { %v4147_v15 = vpack.c.bf16 %v4024_v2, %v4022_v31 }
 0x419   : > { %v3821_v49 = vpop.f32.mrb[44].mxu0  ;;  %v4148_v6 = vpack.c.bf16 %v4025_v14, %v4023_v58 }
 0x41a   : > { %v3822_v32 = vadd.f32 %v3821_v49, %v13444_v16  ;;  %v3823_v18 = vpop.f32.mrb[45].mxu0 }
 0x41b   : > { %v3824_v44 = vadd.f32 %v3823_v18, %v13448_v1  ;;  %v3825_v4 = vpop.f32.mrb[46].mxu0  ;;  %4560 = vmatprep.mubr.bf16.mxu1 %v4148_v6 }
 0x41c   : > { %v3826_v63 = vadd.f32 %v3825_v4, %v13444_v16  ;;  %v3827_v41 = vpop.f32.mrb[47].mxu0  ;;  %4561 = vmatmul.mubr.bf16.gmra.mrb[232].mxu1 %v4147_v15  ;;  %v4026_v24 = vmax.f32 %v3822_v32, 0.0 }
 0x41d   : > { %v3828_v22 = vadd.f32 %v3827_v41, %v13448_v1  ;;  %v4027_v26 = vmax.f32 %v3824_v44, 0.0 }
 0x41e   : > { %v4028_v42 = vmax.f32 %v3826_v63, 0.0 }
 0x41f   : > { %v4029_v37 = vmax.f32 %v3828_v22, 0.0  ;;  %v11601_v22 = vld [vmem:[%s15751_s5 + $0x454] ss:$8 sps:$4 sm:$0xff]  }
 0x420   : > { %v4149_v28 = vpack.c.bf16 %v4028_v42, %v4026_v24  ;;  %5986 = vmatprep.subr.bf16.mxu0 %v11601_v22 }
 0x421   : > { %v3831_v29 = vpop.f32.mrb[48].mxu0  ;;  %v4150_v30 = vpack.c.bf16 %v4029_v37, %v4027_v26  ;;  %5987 = vmatpush1.bf16.msra.mxu0 %v11599_v19 }
 0x422   : > { %v3832_v33 = vadd.f32 %v3831_v29, %v13444_v16  ;;  %v3833_v25 = vpop.f32.mrb[49].mxu0 }
 0x423   : > { %v3834_v38 = vadd.f32 %v3833_v25, %v13448_v1  ;;  %v3835_v39 = vpop.f32.mrb[50].mxu0  ;;  %4570 = vmatprep.mubr.bf16.mxu1 %v4150_v30 }
 0x424   : > { %v3836_v40 = vadd.f32 %v3835_v39, %v13444_v16  ;;  %v3837_v35 = vpop.f32.mrb[51].mxu0  ;;  %4571 = vmatmul.mubr.bf16.gmra.mrb[236].mxu1 %v4149_v28  ;;  %v4030_v45 = vmax.f32 %v3832_v33, 0.0 }
 0x425   : > { %v3838_v36 = vadd.f32 %v3837_v35, %v13448_v1  ;;  %v4031_v48 = vmax.f32 %v3834_v38, 0.0 }
 0x426   : > { %v4032_v20 = vmax.f32 %v3836_v40, 0.0 }
 0x427   : > { %v4033_v51 = vmax.f32 %v3838_v36, 0.0 }
 0x428   : > { %v4151_v17 = vpack.c.bf16 %v4032_v20, %v4030_v45 }
 0x429   : > { %v3841_v54 = vpop.f32.mrb[52].mxu0  ;;  %v4152_v50 = vpack.c.bf16 %v4033_v51, %v4031_v48 }
 0x42a   : > { %v3842_v55 = vadd.f32 %v3841_v54, %v13444_v16  ;;  %v3843_v57 = vpop.f32.mrb[53].mxu0 }
 0x42b   : > { %v3844_v59 = vadd.f32 %v3843_v57, %v13448_v1  ;;  %v3845_v0 = vpop.f32.mrb[54].mxu0  ;;  %4580 = vmatprep.mubr.bf16.mxu1 %v4152_v50 }
 0x42c   : > { %v3846_v56 = vadd.f32 %v3845_v0, %v13444_v16  ;;  %v3847_v9 = vpop.f32.mrb[55].mxu0  ;;  %4581 = vmatmul.mubr.bf16.gmra.mrb[240].mxu1 %v4151_v17  ;;  %v4034_v5 = vmax.f32 %v3842_v55, 0.0 }
 0x42d   : > { %v3848_v11 = vadd.f32 %v3847_v9, %v13448_v1  ;;  %v4035_v61 = vmax.f32 %v3844_v59, 0.0 }
 0x42e   : > { %v4036_v21 = vmax.f32 %v3846_v56, 0.0 }
 0x42f   : > { %v4037_v47 = vmax.f32 %v3848_v11, 0.0  ;;  %v11604_v11 = vld [vmem:[%s15751_s5 + $0x464] ss:$8 sps:$4 sm:$0xff]  }
 0x430   : > { %v4153_v43 = vpack.c.bf16 %v4036_v21, %v4034_v5  ;;  %5988 = vmatprep.subr.bf16.mxu0 %v11604_v11 }
 0x431   : > { %v3851_v10 = vpop.f32.mrb[56].mxu0  ;;  %v4154_v34 = vpack.c.bf16 %v4037_v47, %v4035_v61  ;;  %5989 = vmatpush1.bf16.msra.mxu0 %v11602_v23 }
 0x432   : > { %v3852_v8 = vadd.f32 %v3851_v10, %v13444_v16  ;;  %v3853_v3 = vpop.f32.mrb[57].mxu0 }
 0x433   : > { %v3854_v27 = vadd.f32 %v3853_v3, %v13448_v1  ;;  %v3855_v12 = vpop.f32.mrb[58].mxu0  ;;  %4590 = vmatprep.mubr.bf16.mxu1 %v4154_v34 }
 0x434   : > { %v3856_v52 = vadd.f32 %v3855_v12, %v13444_v16  ;;  %v3857_v13 = vpop.f32.mrb[59].mxu0  ;;  %4591 = vmatmul.mubr.bf16.gmra.mrb[244].mxu1 %v4153_v43  ;;  %v4038_v2 = vmax.f32 %v3852_v8, 0.0 }
 0x435   : > { %v3858_v31 = vadd.f32 %v3857_v13, %v13448_v1  ;;  %v4039_v14 = vmax.f32 %v3854_v27, 0.0 }
 0x436   : > { %v4040_v58 = vmax.f32 %v3856_v52, 0.0 }
 0x437   : > { %v4041_v15 = vmax.f32 %v3858_v31, 0.0 }
 0x438   : > { %v4155_v49 = vpack.c.bf16 %v4040_v58, %v4038_v2 }
 0x439   : > { %v3861_v6 = vpop.f32.mrb[60].mxu0  ;;  %v4156_v32 = vpack.c.bf16 %v4041_v15, %v4039_v14 }
 0x43a   : > { %v3862_v18 = vadd.f32 %v3861_v6, %v13444_v16  ;;  %v3863_v44 = vpop.f32.mrb[61].mxu0 }
 0x43b   : > { %v3864_v4 = vadd.f32 %v3863_v44, %v13448_v1  ;;  %v3865_v63 = vpop.f32.mrb[62].mxu0  ;;  %4600 = vmatprep.mubr.bf16.mxu1 %v4156_v32  ;;  %v10587_v44 = vld [vmem:[%s15752_s6 + $0x6] sm:$0x3] }
 0x43c   : > { %v3866_v41 = vadd.f32 %v3865_v63, %v13444_v16  ;;  %v3867_v53 = vpop.f32.mrb[63].mxu0  ;;  %4601 = vmatmul.mubr.bf16.gmra.mrb[248].mxu1 %v4155_v49  ;;  %v4042_v42 = vmax.f32 %v3862_v18, 0.0 }
 0x43d   : > { %v3868_v24 = vadd.f32 %v3867_v53, %v13448_v1  ;;  %v4043_v37 = vmax.f32 %v3864_v4, 0.0 }
 0x43e   : > { %v4044_v26 = vmax.f32 %v3866_v41, 0.0 }
 0x43f   : > { %v4045_v28 = vmax.f32 %v3868_v24, 0.0  ;;  %v13716_v24 = vrot.slane %v10587_v44, %v12710_v60 }
 0x440   : > { %v4157_v29 = vpack.c.bf16 %v4044_v26, %v4042_v42  ;;  %v11605_v42 = vld [vmem:[%s15751_s5 + $0x470] ss:$8 sps:$4 sm:$0xff]   ;;  %v11607_v26 = vld [vmem:[%s15751_s5 + $0x474] ss:$8 sps:$4 sm:$0xff]  }
 0x441   : > { %v3871_v30 = vpop.f32.mrb[64].mxu0  ;;  %v4158_v33 = vpack.c.bf16 %v4045_v28, %v4043_v37  ;;  %v13726_v28 = vrot.slane %v10587_v44, %v12715_v62  ;;  %5990 = vmatprep.subr.bf16.mxu0 %v11607_v26  ;;  %v11610_v26 = vld [vmem:[%s15751_s5 + $0x484] ss:$8 sps:$4 sm:$0xff]  }
 0x442   : > { %v3872_v25 = vadd.f32 %v3871_v30, %v13444_v16  ;;  %v3873_v38 = vpop.f32.mrb[65].mxu0  ;;  %5991 = vmatpush1.bf16.msra.mxu0 %v11605_v42 }
 0x443   : > { %v3874_v39 = vadd.f32 %v3873_v38, %v13448_v1  ;;  %v3875_v40 = vpop.f32.mrb[66].mxu0  ;;  %4610 = vmatprep.mubr.bf16.mxu1 %v4158_v33  ;;  %5992 = vmatprep.subr.bf16.mxu0 %v11610_v26 }
 0x444   : > { %v3876_v35 = vadd.f32 %v3875_v40, %v13444_v16  ;;  %v3877_v36 = vpop.f32.mrb[67].mxu0  ;;  %4611 = vmatmul.mubr.bf16.gmra.mrb[252].mxu1 %v4157_v29  ;;  %v4046_v20 = vmax.f32 %v3872_v25, 0.0 }
 0x445   : > { %v3878_v45 = vadd.f32 %v3877_v36, %v13448_v1  ;;  %v4047_v51 = vmax.f32 %v3874_v39, 0.0 }
 0x446   : > { %v4048_v48 = vmax.f32 %v3876_v35, 0.0 }
 0x447   : > { %v4049_v17 = vmax.f32 %v3878_v45, 0.0 }
 0x448   : > { %v4159_v54 = vpack.c.bf16 %v4048_v48, %v4046_v20 }
 0x449   : > { %v3881_v50 = vpop.f32.mrb[68].mxu0  ;;  %v4160_v55 = vpack.c.bf16 %v4049_v17, %v4047_v51 }
 0x44a   : > { %v3882_v57 = vadd.f32 %v3881_v50, %v13444_v16  ;;  %v3883_v59 = vpop.f32.mrb[69].mxu0 }
 0x44b   : > { %v3884_v0 = vadd.f32 %v3883_v59, %v13448_v1  ;;  %v3885_v56 = vpop.f32.mrb[70].mxu0  ;;  %4620 = vmatprep.mubr.bf16.mxu1 %v4160_v55 }
 0x44c   : > { %v3886_v9 = vadd.f32 %v3885_v56, %v13444_v16  ;;  %v3887_v46 = vpop.f32.mrb[71].mxu0  ;;  %4621 = vmatmul.mubr.bf16.gmra.mrb[0].mxu1 %v4159_v54  ;;  %v4050_v21 = vmax.f32 %v3882_v57, 0.0 }
 0x44d   : > { %v3888_v5 = vadd.f32 %v3887_v46, %v13448_v1  ;;  %v4051_v47 = vmax.f32 %v3884_v0, 0.0 }
 0x44e   : > { %v4052_v61 = vmax.f32 %v3886_v9, 0.0 }
 0x44f   : > { %v4053_v43 = vmax.f32 %v3888_v5, 0.0 }
 0x450   : > { %v4161_v10 = vpack.c.bf16 %v4052_v61, %v4050_v21 }
 0x451   : > { %v3891_v34 = vpop.f32.mrb[72].mxu0  ;;  %v4162_v8 = vpack.c.bf16 %v4053_v43, %v4051_v47 }
 0x452   : > { %v3892_v3 = vadd.f32 %v3891_v34, %v13444_v16  ;;  %v3893_v27 = vpop.f32.mrb[73].mxu0 }
 0x453   : > { %v3894_v12 = vadd.f32 %v3893_v27, %v13448_v1  ;;  %v3895_v52 = vpop.f32.mrb[74].mxu0  ;;  %4630 = vmatprep.mubr.bf16.mxu1 %v4162_v8 }
 0x454   : > { %v3896_v13 = vadd.f32 %v3895_v52, %v13444_v16  ;;  %v3897_v31 = vpop.f32.mrb[75].mxu0  ;;  %4631 = vmatmul.mubr.bf16.gmra.mrb[4].mxu1 %v4161_v10  ;;  %v4054_v58 = vmax.f32 %v3892_v3, 0.0 }
 0x455   : > { %v3898_v2 = vadd.f32 %v3897_v31, %v13448_v1  ;;  %v4055_v15 = vmax.f32 %v3894_v12, 0.0 }
 0x456   : > { %v4056_v14 = vmax.f32 %v3896_v13, 0.0 }
 0x457   : > { %v4057_v49 = vmax.f32 %v3898_v2, 0.0 }
 0x458   : > { %v4163_v6 = vpack.c.bf16 %v4056_v14, %v4054_v58 }
 0x459   : > { %v3901_v32 = vpop.f32.mrb[76].mxu0  ;;  %v4164_v18 = vpack.c.bf16 %v4057_v49, %v4055_v15 }
 0x45a   : > { %v3902_v4 = vadd.f32 %v3901_v32, %v13444_v16  ;;  %v3903_v63 = vpop.f32.mrb[77].mxu0 }
 0x45b   : > { %v3904_v41 = vadd.f32 %v3903_v63, %v13448_v1  ;;  %v3905_v53 = vpop.f32.mrb[78].mxu0  ;;  %4640 = vmatprep.mubr.bf16.mxu1 %v4164_v18 }
 0x45c   : > { %v3906_v19 = vadd.f32 %v3905_v53, %v13444_v16  ;;  %v3907_v22 = vpop.f32.mrb[79].mxu0  ;;  %4641 = vmatmul.mubr.bf16.gmra.mrb[8].mxu1 %v4163_v6  ;;  %v4058_v29 = vmax.f32 %v3902_v4, 0.0  ;;  %v11608_v53 = vld [vmem:[%s15751_s5 + $0x480] ss:$8 sps:$4 sm:$0xff]  }
 0x45d   : > { %v3908_v37 = vadd.f32 %v3907_v22, %v13448_v1  ;;  %v4059_v33 = vmax.f32 %v3904_v41, 0.0  ;;  %5993 = vmatpush1.bf16.msra.mxu0 %v11608_v53 }
 0x45e   : > { %v4060_v30 = vmax.f32 %v3906_v19, 0.0 }
 0x45f   : > { %v4061_v25 = vmax.f32 %v3908_v37, 0.0  ;;  %v4382_v38 = vpop.f32.mrb[160].mxu1 }
 0x460   : > { %v4165_v39 = vpack.c.bf16 %v4060_v30, %v4058_v29  ;;  %v4383_v40 = vadd.f32 %v4382_v38, %v13716_v24  ;;  %v4384_v35 = vpop.f32.mrb[161].mxu1 }
 0x461   : > { %v4385_v36 = vadd.f32 %v4384_v35, %v13726_v28  ;;  %v3911_v45 = vpop.f32.mrb[80].mxu0  ;;  %v4386_v20 = vpop.f32.mrb[162].mxu1  ;;  %v4166_v48 = vpack.c.bf16 %v4061_v25, %v4059_v33 }
 0x462   : > { %v3912_v51 = vadd.f32 %v3911_v45, %v13444_v16  ;;  %v4387_v17 = vadd.f32 %v4386_v20, %v13716_v24  ;;  %v3913_v54 = vpop.f32.mrb[81].mxu0  ;;  %v4388_v50 = vpop.f32.mrb[163].mxu1  ;;  %v4701_v0 = vmax.f32 %v4383_v40, 0.0 }
 0x463   : > { %v3914_v55 = vadd.f32 %v3913_v54, %v13448_v1  ;;  %v4389_v57 = vadd.f32 %v4388_v50, %v13726_v28  ;;  %v3915_v59 = vpop.f32.mrb[82].mxu0  ;;  %4650 = vmatprep.mubr.bf16.mxu1 %v4166_v48  ;;  %v4702_v23 = vmax.f32 %v4385_v36, 0.0 }
 0x464   : > { %v4703_v56 = vmax.f32 %v4387_v17, 0.0  ;;  %v3916_v9 = vadd.f32 %v3915_v59, %v13444_v16  ;;  %v3917_v46 = vpop.f32.mrb[83].mxu0  ;;  %4651 = vmatmul.mubr.bf16.gmra.mrb[12].mxu1 %v4165_v39  ;;  %v4062_v21 = vmax.f32 %v3912_v51, 0.0 }
 0x465   : > { %v4704_v11 = vmax.f32 %v4389_v57, 0.0  ;;  %v3918_v5 = vadd.f32 %v3917_v46, %v13448_v1  ;;  %v4063_v43 = vmax.f32 %v3914_v55, 0.0 }
 0x466   : > { %v13736_v61 = vpack.c.bf16 %v4703_v56, %v4701_v0  ;;  %v4064_v47 = vmax.f32 %v3916_v9, 0.0 }
 0x467   : > { %v4065_v10 = vmax.f32 %v3918_v5, 0.0  ;;  %v4392_v34 = vpop.f32.mrb[164].mxu1  ;;  %v13738_v8 = vpack.c.bf16 %v4704_v11, %v4702_v23 }
 0x468   : > { %v4167_v3 = vpack.c.bf16 %v4064_v47, %v4062_v21  ;;  %v4393_v27 = vadd.f32 %v4392_v34, %v13716_v24  ;;  %v4394_v12 = vpop.f32.mrb[165].mxu1 }
 0x469   : > { %v4395_v52 = vadd.f32 %v4394_v12, %v13726_v28  ;;  %v3921_v13 = vpop.f32.mrb[84].mxu0  ;;  %v4396_v31 = vpop.f32.mrb[166].mxu1  ;;  %v4168_v2 = vpack.c.bf16 %v4065_v10, %v4063_v43 }
 0x46a   : > { %v3922_v58 = vadd.f32 %v3921_v13, %v13444_v16  ;;  %v4397_v14 = vadd.f32 %v4396_v31, %v13716_v24  ;;  %v3923_v15 = vpop.f32.mrb[85].mxu0  ;;  %v4398_v49 = vpop.f32.mrb[167].mxu1  ;;  %v4705_v44 = vmax.f32 %v4393_v27, 0.0 }
 0x46b   : > { %v3924_v6 = vadd.f32 %v3923_v15, %v13448_v1  ;;  %v4399_v32 = vadd.f32 %v4398_v49, %v13726_v28  ;;  %v3925_v18 = vpop.f32.mrb[86].mxu0  ;;  %4660 = vmatprep.mubr.bf16.mxu1 %v4168_v2  ;;  %v4706_v19 = vmax.f32 %v4395_v52, 0.0 }
 0x46c   : > { %v4707_v4 = vmax.f32 %v4397_v14, 0.0  ;;  %v3926_v63 = vadd.f32 %v3925_v18, %v13444_v16  ;;  %v3927_v41 = vpop.f32.mrb[87].mxu0  ;;  %4661 = vmatmul.mubr.bf16.gmra.mrb[16].mxu1 %v4167_v3  ;;  %v4066_v37 = vmax.f32 %v3922_v58, 0.0 }
 0x46d   : > { %v4708_v22 = vmax.f32 %v4399_v32, 0.0  ;;  %v3928_v42 = vadd.f32 %v3927_v41, %v13448_v1  ;;  %v4067_v33 = vmax.f32 %v3924_v6, 0.0 }
 0x46e   : > { %v4068_v29 = vmax.f32 %v3926_v63, 0.0  ;;  %v13754_v30 = vpack.c.bf16 %v4707_v4, %v4705_v44 }
 0x46f   : > { %v4069_v25 = vmax.f32 %v3928_v42, 0.0  ;;  %v4402_v38 = vpop.f32.mrb[168].mxu1  ;;  %v13756_v39 = vpack.c.bf16 %v4708_v22, %v4706_v19  ;;  %v11611_v42 = vld [vmem:[%s15751_s5 + $0x490] ss:$8 sps:$4 sm:$0xff]  }
 0x470   : > { %v4169_v40 = vpack.c.bf16 %v4068_v29, %v4066_v37  ;;  %v4403_v35 = vadd.f32 %v4402_v38, %v13716_v24  ;;  %v4404_v36 = vpop.f32.mrb[169].mxu1 }
 0x471   : > { %v4405_v45 = vadd.f32 %v4404_v36, %v13726_v28  ;;  %v3931_v20 = vpop.f32.mrb[88].mxu0  ;;  %v4406_v48 = vpop.f32.mrb[170].mxu1  ;;  %v4170_v51 = vpack.c.bf16 %v4069_v25, %v4067_v33  ;;  %v11613_v33 = vld [vmem:[%s15751_s5 + $0x494] ss:$8 sps:$4 sm:$0xff]  }
 0x472   : > { %v3932_v17 = vadd.f32 %v3931_v20, %v13444_v16  ;;  %v4407_v54 = vadd.f32 %v4406_v48, %v13716_v24  ;;  %v3933_v50 = vpop.f32.mrb[89].mxu0  ;;  %v4408_v55 = vpop.f32.mrb[171].mxu1  ;;  %v4709_v56 = vmax.f32 %v4403_v35, 0.0  ;;  %5994 = vmatprep.subr.bf16.mxu0 %v11613_v33 }
 0x473   : > { %v3934_v57 = vadd.f32 %v3933_v50, %v13448_v1  ;;  %v4409_v59 = vadd.f32 %v4408_v55, %v13726_v28  ;;  %v3935_v0 = vpop.f32.mrb[90].mxu0  ;;  %4670 = vmatprep.mubr.bf16.mxu1 %v4170_v51  ;;  %v4710_v11 = vmax.f32 %v4405_v45, 0.0  ;;  %5995 = vmatpush1.bf16.msra.mxu0 %v11611_v42 }
 0x474   : > { %v4711_v9 = vmax.f32 %v4407_v54, 0.0  ;;  %v3936_v46 = vadd.f32 %v3935_v0, %v13444_v16  ;;  %v3937_v23 = vpop.f32.mrb[91].mxu0  ;;  %4671 = vmatmul.mubr.bf16.gmra.mrb[20].mxu1 %v4169_v40  ;;  %v4070_v47 = vmax.f32 %v3932_v17, 0.0 }
 0x475   : > { %v4712_v5 = vmax.f32 %v4409_v59, 0.0  ;;  %v3938_v21 = vadd.f32 %v3937_v23, %v13448_v1  ;;  %v4071_v34 = vmax.f32 %v3934_v57, 0.0 }
 0x476   : > { %v4072_v43 = vmax.f32 %v3936_v46, 0.0  ;;  %v13766_v10 = vpack.c.bf16 %v4711_v9, %v4709_v56 }
 0x477   : > { %v4073_v3 = vmax.f32 %v3938_v21, 0.0  ;;  %v4412_v27 = vpop.f32.mrb[172].mxu1  ;;  %v13768_v12 = vpack.c.bf16 %v4712_v5, %v4710_v11 }
 0x478   : > { %v4171_v52 = vpack.c.bf16 %v4072_v43, %v4070_v47  ;;  %v4413_v13 = vadd.f32 %v4412_v27, %v13716_v24  ;;  %v4414_v31 = vpop.f32.mrb[173].mxu1 }
 0x479   : > { %v4415_v2 = vadd.f32 %v4414_v31, %v13726_v28  ;;  %v3941_v58 = vpop.f32.mrb[92].mxu0  ;;  %v4416_v14 = vpop.f32.mrb[174].mxu1  ;;  %v4172_v15 = vpack.c.bf16 %v4073_v3, %v4071_v34  ;;  %v11616_v31 = vld [vmem:[%s15751_s5 + $0x4a4] ss:$8 sps:$4 sm:$0xff]  }
 0x47a   : > { %v3942_v49 = vadd.f32 %v3941_v58, %v13444_v16  ;;  %v4417_v6 = vadd.f32 %v4416_v14, %v13716_v24  ;;  %v3943_v32 = vpop.f32.mrb[93].mxu0  ;;  %v4418_v18 = vpop.f32.mrb[175].mxu1  ;;  %v4713_v41 = vmax.f32 %v4413_v13, 0.0  ;;  %5996 = vmatprep.subr.bf16.mxu0 %v11616_v31 }
 0x47b   : > { %v3944_v44 = vadd.f32 %v3943_v32, %v13448_v1  ;;  %v4419_v4 = vadd.f32 %v4418_v18, %v13726_v28  ;;  %v3945_v63 = vpop.f32.mrb[94].mxu0  ;;  %4680 = vmatprep.mubr.bf16.mxu1 %v4172_v15  ;;  %v4714_v26 = vmax.f32 %v4415_v2, 0.0 }
 0x47c   : > { %v4715_v53 = vmax.f32 %v4417_v6, 0.0  ;;  %v3946_v19 = vadd.f32 %v3945_v63, %v13444_v16  ;;  %v3947_v22 = vpop.f32.mrb[95].mxu0  ;;  %4681 = vmatmul.mubr.bf16.gmra.mrb[24].mxu1 %v4171_v52  ;;  %v4074_v25 = vmax.f32 %v3942_v49, 0.0 }
 0x47d   : > { %v4716_v37 = vmax.f32 %v4419_v4, 0.0  ;;  %v3948_v29 = vadd.f32 %v3947_v22, %v13448_v1  ;;  %v4075_v35 = vmax.f32 %v3944_v44, 0.0 }
 0x47e   : > { %v4076_v38 = vmax.f32 %v3946_v19, 0.0  ;;  %v13784_v40 = vpack.c.bf16 %v4715_v53, %v4713_v41 }
 0x47f   : > { %v4077_v16 = vmax.f32 %v3948_v29, 0.0  ;;  %v4422_v36 = vpop.f32.mrb[176].mxu1  ;;  %v13786_v45 = vpack.c.bf16 %v4716_v37, %v4714_v26 }
 0x480   : > { %v4173_v20 = vpack.c.bf16 %v4076_v38, %v4074_v25  ;;  %v4423_v48 = vadd.f32 %v4422_v36, %v13716_v24  ;;  %v4424_v51 = vpop.f32.mrb[177].mxu1 }
 0x481   : > { %v4425_v1 = vadd.f32 %v4424_v51, %v13726_v28  ;;  %v4426_v17 = vpop.f32.mrb[178].mxu1  ;;  %v4174_v54 = vpack.c.bf16 %v4077_v16, %v4075_v35 }
 0x482   : > { %v4427_v50 = vadd.f32 %v4426_v17, %v13716_v24  ;;  %v4428_v55 = vpop.f32.mrb[179].mxu1  ;;  %v4717_v59 = vmax.f32 %v4423_v48, 0.0 }
 0x483   : > { %v4429_v57 = vadd.f32 %v4428_v55, %v13726_v28  ;;  %4690 = vmatprep.mubr.bf16.mxu1 %v4174_v54  ;;  %v4718_v56 = vmax.f32 %v4425_v1, 0.0 }
 0x484   : > { %v4719_v0 = vmax.f32 %v4427_v50, 0.0  ;;  %4691 = vmatmul.mubr.bf16.gmra.mrb[28].mxu1 %v4173_v20  ;;  %v11619_v20 = vld [vmem:[%s15751_s5 + $0x4b4] ss:$8 sps:$4 sm:$0xff]  }
 0x485   : > { %v4720_v9 = vmax.f32 %v4429_v57, 0.0  ;;  %5117 = vmatprep.mubr.bf16.mxu1 %v13738_v8  ;;  %v11614_v8 = vld [vmem:[%s15751_s5 + $0x4a0] ss:$8 sps:$4 sm:$0xff]  }
 0x486   : > { %v13793_v46 = vpack.c.bf16 %v4719_v0, %v4717_v59  ;;  %5997 = vmatpush1.bf16.msra.mxu0 %v11614_v8 }
 0x487   : > { %v4432_v23 = vpop.f32.mrb[180].mxu1  ;;  %v13795_v11 = vpack.c.bf16 %v4720_v9, %v4718_v56  ;;  %5998 = vmatprep.subr.bf16.mxu0 %v11619_v20 }
 0x488   : > { %v4433_v5 = vadd.f32 %v4432_v23, %v13716_v24  ;;  %v4434_v21 = vpop.f32.mrb[181].mxu1 }
 0x489   : > { %v4435_v47 = vadd.f32 %v4434_v21, %v13726_v28  ;;  %v4436_v43 = vpop.f32.mrb[182].mxu1 }
 0x48a   : > { %v4437_v34 = vadd.f32 %v4436_v43, %v13716_v24  ;;  %v4438_v3 = vpop.f32.mrb[183].mxu1  ;;  %v4721_v52 = vmax.f32 %v4433_v5, 0.0 }
 0x48b   : > { %v4439_v27 = vadd.f32 %v4438_v3, %v13726_v28  ;;  %v4722_v2 = vmax.f32 %v4435_v47, 0.0 }
 0x48c   : > { %v4723_v13 = vmax.f32 %v4437_v34, 0.0  ;;  %5118 = vmatmul.mubr.bf16.vlgmr.msra.gmra.mrb[32].mxu1 %v13736_v61 }
 0x48d   : > { %v4724_v58 = vmax.f32 %v4439_v27, 0.0  ;;  %5127 = vmatprep.mubr.bf16.mxu1 %v13756_v39 }
 0x48e   : > { %v13809_v14 = vpack.c.bf16 %v4723_v13, %v4721_v52 }
 0x48f   : > { %v4442_v15 = vpop.f32.mrb[184].mxu1  ;;  %v13811_v49 = vpack.c.bf16 %v4724_v58, %v4722_v2  ;;  %v11622_v58 = vld [vmem:[%s15751_s5 + $0x4c4] ss:$8 sps:$4 sm:$0xff]  }
 0x490   : > { %v4443_v61 = vadd.f32 %v4442_v15, %v13716_v24  ;;  %v4444_v6 = vpop.f32.mrb[185].mxu1 }
 0x491   : > { %v4445_v32 = vadd.f32 %v4444_v6, %v13726_v28  ;;  %v4446_v18 = vpop.f32.mrb[186].mxu1 }
 0x492   : > { %v4447_v44 = vadd.f32 %v4446_v18, %v13716_v24  ;;  %v4448_v4 = vpop.f32.mrb[187].mxu1  ;;  %v4725_v41 = vmax.f32 %v4443_v61, 0.0 }
 0x493   : > { %v4449_v63 = vadd.f32 %v4448_v4, %v13726_v28  ;;  %v4726_v53 = vmax.f32 %v4445_v32, 0.0 }
 0x494   : > { %v4727_v39 = vmax.f32 %v4447_v44, 0.0  ;;  %5128 = vmatmul.mubr.bf16.gmra.mrb[36].mxu1 %v13754_v30 }
 0x495   : > { %v4728_v19 = vmax.f32 %v4449_v63, 0.0  ;;  %5137 = vmatprep.mubr.bf16.mxu1 %v13768_v12  ;;  %v11617_v12 = vld [vmem:[%s15751_s5 + $0x4b0] ss:$8 sps:$4 sm:$0xff]  }
 0x496   : > { %v13819_v22 = vpack.c.bf16 %v4727_v39, %v4725_v41  ;;  %5999 = vmatpush1.bf16.msra.mxu0 %v11617_v12 }
 0x497   : > { %v4452_v42 = vpop.f32.mrb[188].mxu1  ;;  %v13821_v26 = vpack.c.bf16 %v4728_v19, %v4726_v53  ;;  %6000 = vmatprep.subr.bf16.mxu0 %v11622_v58 }
 0x498   : > { %v4453_v37 = vadd.f32 %v4452_v42, %v13716_v24  ;;  %v4454_v29 = vpop.f32.mrb[189].mxu1 }
 0x499   : > { %v4455_v33 = vadd.f32 %v4454_v29, %v13726_v28  ;;  %v4456_v25 = vpop.f32.mrb[190].mxu1 }
 0x49a   : > { %v4457_v38 = vadd.f32 %v4456_v25, %v13716_v24  ;;  %v4458_v35 = vpop.f32.mrb[191].mxu1  ;;  %v4729_v16 = vmax.f32 %v4453_v37, 0.0 }
 0x49b   : > { %v4459_v30 = vadd.f32 %v4458_v35, %v13726_v28  ;;  %v4730_v48 = vmax.f32 %v4455_v33, 0.0 }
 0x49c   : > { %v4731_v36 = vmax.f32 %v4457_v38, 0.0  ;;  %5138 = vmatmul.mubr.bf16.gmra.mrb[40].mxu1 %v13766_v10 }
 0x49d   : > { %v4732_v51 = vmax.f32 %v4459_v30, 0.0  ;;  %5147 = vmatprep.mubr.bf16.mxu1 %v13786_v45 }
 0x49e   : > { %v13835_v1 = vpack.c.bf16 %v4731_v36, %v4729_v16 }
 0x49f   : > { %v4462_v17 = vpop.f32.mrb[192].mxu1  ;;  %v13837_v54 = vpack.c.bf16 %v4732_v51, %v4730_v48  ;;  %v11625_v51 = vld [vmem:[%s15751_s5 + $0x4d4] ss:$8 sps:$4 sm:$0xff]  }
 0x4a0   : > { %v4463_v10 = vadd.f32 %v4462_v17, %v13716_v24  ;;  %v4464_v50 = vpop.f32.mrb[193].mxu1 }
 0x4a1   : > { %v4465_v55 = vadd.f32 %v4464_v50, %v13726_v28  ;;  %v4466_v57 = vpop.f32.mrb[194].mxu1 }
 0x4a2   : > { %v4467_v59 = vadd.f32 %v4466_v57, %v13716_v24  ;;  %v4468_v0 = vpop.f32.mrb[195].mxu1  ;;  %v4733_v9 = vmax.f32 %v4463_v10, 0.0 }
 0x4a3   : > { %v4469_v56 = vadd.f32 %v4468_v0, %v13726_v28  ;;  %v4734_v23 = vmax.f32 %v4465_v55, 0.0 }
 0x4a4   : > { %v4735_v45 = vmax.f32 %v4467_v59, 0.0  ;;  %5148 = vmatmul.mubr.bf16.gmra.mrb[44].mxu1 %v13784_v40 }
 0x4a5   : > { %v4736_v5 = vmax.f32 %v4469_v56, 0.0  ;;  %5157 = vmatprep.mubr.bf16.mxu1 %v13795_v11  ;;  %v11620_v11 = vld [vmem:[%s15751_s5 + $0x4c0] ss:$8 sps:$4 sm:$0xff]  }
 0x4a6   : > { %v13845_v21 = vpack.c.bf16 %v4735_v45, %v4733_v9  ;;  %6001 = vmatpush1.bf16.msra.mxu0 %v11620_v11 }
 0x4a7   : > { %v4472_v47 = vpop.f32.mrb[196].mxu1  ;;  %v13847_v43 = vpack.c.bf16 %v4736_v5, %v4734_v23  ;;  %6002 = vmatprep.subr.bf16.mxu0 %v11625_v51 }
 0x4a8   : > { %v4473_v34 = vadd.f32 %v4472_v47, %v13716_v24  ;;  %v4474_v3 = vpop.f32.mrb[197].mxu1 }
 0x4a9   : > { %v4475_v27 = vadd.f32 %v4474_v3, %v13726_v28  ;;  %v4476_v52 = vpop.f32.mrb[198].mxu1 }
 0x4aa   : > { %v4477_v13 = vadd.f32 %v4476_v52, %v13716_v24  ;;  %v4478_v8 = vpop.f32.mrb[199].mxu1  ;;  %v4737_v31 = vmax.f32 %v4473_v34, 0.0 }
 0x4ab   : > { %v4479_v40 = vadd.f32 %v4478_v8, %v13726_v28  ;;  %v4738_v15 = vmax.f32 %v4475_v27, 0.0 }
 0x4ac   : > { %v4739_v2 = vmax.f32 %v4477_v13, 0.0  ;;  %5158 = vmatmul.mubr.bf16.gmra.mrb[48].mxu1 %v13793_v46 }
 0x4ad   : > { %v4740_v61 = vmax.f32 %v4479_v40, 0.0  ;;  %5167 = vmatprep.mubr.bf16.mxu1 %v13811_v49 }
 0x4ae   : > { %v13861_v6 = vpack.c.bf16 %v4739_v2, %v4737_v31 }
 0x4af   : > { %v4482_v32 = vpop.f32.mrb[200].mxu1  ;;  %v13863_v18 = vpack.c.bf16 %v4740_v61, %v4738_v15  ;;  %v11628_v61 = vld [vmem:[%s15751_s5 + $0x4e4] ss:$8 sps:$4 sm:$0xff]  }
 0x4b0   : > { %v4483_v46 = vadd.f32 %v4482_v32, %v13716_v24  ;;  %v4484_v44 = vpop.f32.mrb[201].mxu1 }
 0x4b1   : > { %v4485_v4 = vadd.f32 %v4484_v44, %v13726_v28  ;;  %v4486_v63 = vpop.f32.mrb[202].mxu1 }
 0x4b2   : > { %v4487_v41 = vadd.f32 %v4486_v63, %v13716_v24  ;;  %v4488_v39 = vpop.f32.mrb[203].mxu1  ;;  %v4741_v19 = vmax.f32 %v4483_v46, 0.0 }
 0x4b3   : > { %v4489_v53 = vadd.f32 %v4488_v39, %v13726_v28  ;;  %v4742_v42 = vmax.f32 %v4485_v4, 0.0 }
 0x4b4   : > { %v4743_v49 = vmax.f32 %v4487_v41, 0.0  ;;  %5168 = vmatmul.mubr.bf16.gmra.mrb[52].mxu1 %v13809_v14 }
 0x4b5   : > { %v4744_v37 = vmax.f32 %v4489_v53, 0.0  ;;  %5177 = vmatprep.mubr.bf16.mxu1 %v13821_v26  ;;  %v11623_v26 = vld [vmem:[%s15751_s5 + $0x4d0] ss:$8 sps:$4 sm:$0xff]  }
 0x4b6   : > { %v13871_v29 = vpack.c.bf16 %v4743_v49, %v4741_v19  ;;  %6003 = vmatpush1.bf16.msra.mxu0 %v11623_v26 }
 0x4b7   : > { %v4492_v33 = vpop.f32.mrb[204].mxu1  ;;  %v13873_v25 = vpack.c.bf16 %v4744_v37, %v4742_v42  ;;  %6004 = vmatprep.subr.bf16.mxu0 %v11628_v61 }
 0x4b8   : > { %v4493_v38 = vadd.f32 %v4492_v33, %v13716_v24  ;;  %v4494_v35 = vpop.f32.mrb[205].mxu1 }
 0x4b9   : > { %v4495_v30 = vadd.f32 %v4494_v35, %v13726_v28  ;;  %v4496_v16 = vpop.f32.mrb[206].mxu1 }
 0x4ba   : > { %v4497_v36 = vadd.f32 %v4496_v16, %v13716_v24  ;;  %v4498_v12 = vpop.f32.mrb[207].mxu1  ;;  %v4745_v20 = vmax.f32 %v4493_v38, 0.0 }
 0x4bb   : > { %v4499_v14 = vadd.f32 %v4498_v12, %v13726_v28  ;;  %v4746_v17 = vmax.f32 %v4495_v30, 0.0 }
 0x4bc   : > { %v4747_v48 = vmax.f32 %v4497_v36, 0.0  ;;  %5178 = vmatmul.mubr.bf16.gmra.mrb[56].mxu1 %v13819_v22 }
 0x4bd   : > { %v4748_v10 = vmax.f32 %v4499_v14, 0.0  ;;  %5187 = vmatprep.mubr.bf16.mxu1 %v13837_v54 }
 0x4be   : > { %v13887_v50 = vpack.c.bf16 %v4747_v48, %v4745_v20 }
 0x4bf   : > { %v4502_v55 = vpop.f32.mrb[208].mxu1  ;;  %v13889_v57 = vpack.c.bf16 %v4748_v10, %v4746_v17  ;;  %v11631_v10 = vld [vmem:[%s15751_s5 + $0x4f4] ss:$8 sps:$4 sm:$0xff]  }
 0x4c0   : > { %v4503_v22 = vadd.f32 %v4502_v55, %v13716_v24  ;;  %v4504_v59 = vpop.f32.mrb[209].mxu1 }
 0x4c1   : > { %v4505_v0 = vadd.f32 %v4504_v59, %v13726_v28  ;;  %v4506_v56 = vpop.f32.mrb[210].mxu1 }
 0x4c2   : > { %v4507_v9 = vadd.f32 %v4506_v56, %v13716_v24  ;;  %v4508_v45 = vpop.f32.mrb[211].mxu1  ;;  %v4749_v5 = vmax.f32 %v4503_v22, 0.0 }
 0x4c3   : > { %v4509_v23 = vadd.f32 %v4508_v45, %v13726_v28  ;;  %v4750_v47 = vmax.f32 %v4505_v0, 0.0 }
 0x4c4   : > { %v4751_v54 = vmax.f32 %v4507_v9, 0.0  ;;  %5188 = vmatmul.mubr.bf16.gmra.mrb[60].mxu1 %v13835_v1 }
 0x4c5   : > { %v4752_v34 = vmax.f32 %v4509_v23, 0.0  ;;  %5197 = vmatprep.mubr.bf16.mxu1 %v13847_v43  ;;  %v11626_v43 = vld [vmem:[%s15751_s5 + $0x4e0] ss:$8 sps:$4 sm:$0xff]  }
 0x4c6   : > { %v13897_v3 = vpack.c.bf16 %v4751_v54, %v4749_v5  ;;  %6005 = vmatpush1.bf16.msra.mxu0 %v11626_v43 }
 0x4c7   : > { %v4512_v27 = vpop.f32.mrb[212].mxu1  ;;  %v13899_v52 = vpack.c.bf16 %v4752_v34, %v4750_v47  ;;  %6006 = vmatprep.subr.bf16.mxu0 %v11631_v10 }
 0x4c8   : > { %v4513_v13 = vadd.f32 %v4512_v27, %v13716_v24  ;;  %v4514_v8 = vpop.f32.mrb[213].mxu1 }
 0x4c9   : > { %v4515_v40 = vadd.f32 %v4514_v8, %v13726_v28  ;;  %v4516_v31 = vpop.f32.mrb[214].mxu1 }
 0x4ca   : > { %v4517_v2 = vadd.f32 %v4516_v31, %v13716_v24  ;;  %v4518_v11 = vpop.f32.mrb[215].mxu1  ;;  %v4753_v58 = vmax.f32 %v4513_v13, 0.0 }
 0x4cb   : > { %v4519_v1 = vadd.f32 %v4518_v11, %v13726_v28  ;;  %v4754_v32 = vmax.f32 %v4515_v40, 0.0 }
 0x4cc   : > { %v4755_v15 = vmax.f32 %v4517_v2, 0.0  ;;  %5198 = vmatmul.mubr.bf16.gmra.mrb[64].mxu1 %v13845_v21 }
 0x4cd   : > { %v4756_v46 = vmax.f32 %v4519_v1, 0.0  ;;  %5207 = vmatprep.mubr.bf16.mxu1 %v13863_v18 }
 0x4ce   : > { %v13913_v44 = vpack.c.bf16 %v4755_v15, %v4753_v58 }
 0x4cf   : > { %v4522_v4 = vpop.f32.mrb[216].mxu1  ;;  %v13915_v63 = vpack.c.bf16 %v4756_v46, %v4754_v32 }
 0x4d0   : > { %v4523_v21 = vadd.f32 %v4522_v4, %v13716_v24  ;;  %v4524_v41 = vpop.f32.mrb[217].mxu1 }
 0x4d1   : > { %v4525_v39 = vadd.f32 %v4524_v41, %v13726_v28  ;;  %v4526_v53 = vpop.f32.mrb[218].mxu1 }
 0x4d2   : > { %v4527_v19 = vadd.f32 %v4526_v53, %v13716_v24  ;;  %v4528_v49 = vpop.f32.mrb[219].mxu1  ;;  %v4757_v37 = vmax.f32 %v4523_v21, 0.0  ;;  %v11634_v21 = vld [vmem:[%s15751_s5 + $0x504] ss:$8 sps:$4 sm:$0xff]  }
 0x4d3   : > { %v4529_v42 = vadd.f32 %v4528_v49, %v13726_v28  ;;  %v4758_v33 = vmax.f32 %v4525_v39, 0.0 }
 0x4d4   : > { %v4759_v18 = vmax.f32 %v4527_v19, 0.0  ;;  %5208 = vmatmul.mubr.bf16.gmra.mrb[68].mxu1 %v13861_v6 }
 0x4d5   : > { %v4760_v38 = vmax.f32 %v4529_v42, 0.0  ;;  %5217 = vmatprep.mubr.bf16.mxu1 %v13873_v25  ;;  %v11629_v25 = vld [vmem:[%s15751_s5 + $0x4f0] ss:$8 sps:$4 sm:$0xff]  }
 0x4d6   : > { %v13923_v35 = vpack.c.bf16 %v4759_v18, %v4757_v37  ;;  %6007 = vmatpush1.bf16.msra.mxu0 %v11629_v25 }
 0x4d7   : > { %v4532_v30 = vpop.f32.mrb[220].mxu1  ;;  %v13925_v16 = vpack.c.bf16 %v4760_v38, %v4758_v33  ;;  %6727 = vmatprep.subr.bf16.mxu0 %v11634_v21 }
 0x4d8   : > { %v4533_v36 = vadd.f32 %v4532_v30, %v13716_v24  ;;  %v4534_v12 = vpop.f32.mrb[221].mxu1 }
 0x4d9   : > { %v4535_v14 = vadd.f32 %v4534_v12, %v13726_v28  ;;  %v4536_v20 = vpop.f32.mrb[222].mxu1 }
 0x4da   : > { %v4537_v48 = vadd.f32 %v4536_v20, %v13716_v24  ;;  %v4538_v26 = vpop.f32.mrb[223].mxu1  ;;  %v4761_v51 = vmax.f32 %v4533_v36, 0.0 }
 0x4db   : > { %v4539_v6 = vadd.f32 %v4538_v26, %v13726_v28  ;;  %v4762_v55 = vmax.f32 %v4535_v14, 0.0 }
 0x4dc   : > { %v4763_v17 = vmax.f32 %v4537_v48, 0.0  ;;  %5218 = vmatmul.mubr.bf16.gmra.mrb[72].mxu1 %v13871_v29 }
 0x4dd   : > { %v4764_v22 = vmax.f32 %v4539_v6, 0.0  ;;  %5227 = vmatprep.mubr.bf16.mxu1 %v13889_v57 }
 0x4de   : > { %v13939_v59 = vpack.c.bf16 %v4763_v17, %v4761_v51 }
 0x4df   : > { %v4542_v0 = vpop.f32.mrb[224].mxu1  ;;  %v13941_v56 = vpack.c.bf16 %v4764_v22, %v4762_v55 }
 0x4e0   : > { %v4543_v29 = vadd.f32 %v4542_v0, %v13716_v24  ;;  %v4544_v9 = vpop.f32.mrb[225].mxu1 }
 0x4e1   : > { %v4545_v45 = vadd.f32 %v4544_v9, %v13726_v28  ;;  %v4546_v23 = vpop.f32.mrb[226].mxu1 }
 0x4e2   : > { %v4547_v5 = vadd.f32 %v4546_v23, %v13716_v24  ;;  %v4548_v54 = vpop.f32.mrb[227].mxu1  ;;  %v4765_v34 = vmax.f32 %v4543_v29, 0.0 }
 0x4e3   : > { %v4549_v47 = vadd.f32 %v4548_v54, %v13726_v28  ;;  %v4766_v27 = vmax.f32 %v4545_v45, 0.0 }
 0x4e4   : > { %v4767_v57 = vmax.f32 %v4547_v5, 0.0  ;;  %5228 = vmatmul.mubr.bf16.gmra.mrb[76].mxu1 %v13887_v50 }
 0x4e5   : > { %v4768_v13 = vmax.f32 %v4549_v47, 0.0  ;;  %5237 = vmatprep.mubr.bf16.mxu1 %v13899_v52 }
 0x4e6   : > { %v13949_v8 = vpack.c.bf16 %v4767_v57, %v4765_v34 }
 0x4e7   : > { %v4552_v40 = vpop.f32.mrb[228].mxu1  ;;  %v4894_v31 = vpack.c.bf16 %v4768_v13, %v4766_v27 }
 0x4e8   : > { %v4553_v2 = vadd.f32 %v4552_v40, %v13716_v24  ;;  %v4554_v11 = vpop.f32.mrb[229].mxu1 }
 0x4e9   : > { %v4555_v1 = vadd.f32 %v4554_v11, %v13726_v28  ;;  %v4556_v58 = vpop.f32.mrb[230].mxu1 }
 0x4ea   : > { %v4557_v15 = vadd.f32 %v4556_v58, %v13716_v24  ;;  %v4558_v43 = vpop.f32.mrb[231].mxu1  ;;  %v4769_v50 = vmax.f32 %v4553_v2, 0.0 }
 0x4eb   : > { %v4559_v61 = vadd.f32 %v4558_v43, %v13726_v28  ;;  %v4770_v52 = vmax.f32 %v4555_v1, 0.0 }
 0x4ec   : > { %v4771_v32 = vmax.f32 %v4557_v15, 0.0  ;;  %5238 = vmatmul.mubr.bf16.gmra.mrb[80].mxu1 %v13897_v3 }
 0x4ed   : > { %v4772_v46 = vmax.f32 %v4559_v61, 0.0  ;;  %5247 = vmatprep.mubr.bf16.mxu1 %v13915_v63 }
 0x4ee   : > { %v13957_v4 = vpack.c.bf16 %v4771_v32, %v4769_v50 }
 0x4ef   : > { %v4562_v41 = vpop.f32.mrb[232].mxu1  ;;  %v4896_v39 = vpack.c.bf16 %v4772_v46, %v4770_v52 }
 0x4f0   : > { %v4563_v53 = vadd.f32 %v4562_v41, %v13716_v24  ;;  %v4564_v19 = vpop.f32.mrb[233].mxu1 }
 0x4f1   : > { %v4565_v49 = vadd.f32 %v4564_v19, %v13726_v28  ;;  %v4566_v42 = vpop.f32.mrb[234].mxu1 }
 0x4f2   : > { %v4567_v3 = vadd.f32 %v4566_v42, %v13716_v24  ;;  %v4568_v37 = vpop.f32.mrb[235].mxu1  ;;  %v4773_v18 = vmax.f32 %v4563_v53, 0.0 }
 0x4f3   : > { %v4569_v63 = vadd.f32 %v4568_v37, %v13726_v28  ;;  %v4774_v38 = vmax.f32 %v4565_v49, 0.0 }
 0x4f4   : > { %v4775_v33 = vmax.f32 %v4567_v3, 0.0  ;;  %5248 = vmatmul.mubr.bf16.gmra.mrb[84].mxu1 %v13913_v44 }
 0x4f5   : > { %v4776_v30 = vmax.f32 %v4569_v63, 0.0  ;;  %5257 = vmatprep.mubr.bf16.mxu1 %v13925_v16 }
 0x4f6   : > { %v13968_v36 = vpack.c.bf16 %v4775_v33, %v4773_v18 }
 0x4f7   : > { %v4572_v12 = vpop.f32.mrb[236].mxu1  ;;  %v4898_v14 = vpack.c.bf16 %v4776_v30, %v4774_v38 }
 0x4f8   : > { %v4573_v20 = vadd.f32 %v4572_v12, %v13716_v24  ;;  %v4574_v48 = vpop.f32.mrb[237].mxu1 }
 0x4f9   : > { %v4575_v26 = vadd.f32 %v4574_v48, %v13726_v28  ;;  %v4576_v6 = vpop.f32.mrb[238].mxu1 }
 0x4fa   : > { %v4577_v51 = vadd.f32 %v4576_v6, %v13716_v24  ;;  %v4578_v17 = vpop.f32.mrb[239].mxu1  ;;  %v4777_v44 = vmax.f32 %v4573_v20, 0.0 }
 0x4fb   : > { %v4579_v25 = vadd.f32 %v4578_v17, %v13726_v28  ;;  %v4778_v16 = vmax.f32 %v4575_v26, 0.0 }
 0x4fc   : > { %v4779_v10 = vmax.f32 %v4577_v51, 0.0  ;;  %5258 = vmatmul.mubr.bf16.gmra.mrb[88].mxu1 %v13923_v35 }
 0x4fd   : > { %v4780_v55 = vmax.f32 %v4579_v25, 0.0  ;;  %5267 = vmatprep.mubr.bf16.mxu1 %v13941_v56 }
 0x4fe   : > { %v13976_v22 = vpack.c.bf16 %v4779_v10, %v4777_v44 }
 0x4ff   : > { %v4582_v0 = vpop.f32.mrb[240].mxu1  ;;  %v4900_v29 = vpack.c.bf16 %v4780_v55, %v4778_v16 }
 0x500   : > { %v4583_v9 = vadd.f32 %v4582_v0, %v13716_v24  ;;  %v4584_v45 = vpop.f32.mrb[241].mxu1 }
 0x501   : > { %v4585_v23 = vadd.f32 %v4584_v45, %v13726_v28  ;;  %v4586_v5 = vpop.f32.mrb[242].mxu1 }
 0x502   : > { %v4587_v54 = vadd.f32 %v4586_v5, %v13716_v24  ;;  %v4588_v47 = vpop.f32.mrb[243].mxu1  ;;  %v4781_v35 = vmax.f32 %v4583_v9, 0.0 }
 0x503   : > { %v4589_v34 = vadd.f32 %v4588_v47, %v13726_v28  ;;  %v4782_v56 = vmax.f32 %v4585_v23, 0.0 }
 0x504   : > { %v4783_v57 = vmax.f32 %v4587_v54, 0.0  ;;  %5268 = vmatmul.mubr.bf16.gmra.mrb[92].mxu1 %v13939_v59 }
 0x505   : > { %v4784_v27 = vmax.f32 %v4589_v34, 0.0  ;;  %5277 = vmatprep.mubr.bf16.mxu1 %v4894_v31 }
 0x506   : > { %v13983_v13 = vpack.c.bf16 %v4783_v57, %v4781_v35 }
 0x507   : > { %v4592_v40 = vpop.f32.mrb[244].mxu1  ;;  %v4902_v2 = vpack.c.bf16 %v4784_v27, %v4782_v56 }
 0x508   : > { %v4593_v11 = vadd.f32 %v4592_v40, %v13716_v24  ;;  %v4594_v1 = vpop.f32.mrb[245].mxu1 }
 0x509   : > { %v4595_v58 = vadd.f32 %v4594_v1, %v13726_v28  ;;  %v4596_v15 = vpop.f32.mrb[246].mxu1 }
 0x50a   : > { %v4597_v43 = vadd.f32 %v4596_v15, %v13716_v24  ;;  %v4598_v61 = vpop.f32.mrb[247].mxu1  ;;  %v4785_v32 = vmax.f32 %v4593_v11, 0.0 }
 0x50b   : > { %v4599_v50 = vadd.f32 %v4598_v61, %v13726_v28  ;;  %v4786_v31 = vmax.f32 %v4595_v58, 0.0 }
 0x50c   : > { %v4787_v59 = vmax.f32 %v4597_v43, 0.0  ;;  %5278 = vmatmul.mubr.bf16.gmra.mrb[96].mxu1 %v13949_v8 }
 0x50d   : > { %v4788_v52 = vmax.f32 %v4599_v50, 0.0  ;;  %5287 = vmatprep.mubr.bf16.mxu1 %v4896_v39 }
 0x50e   : > { %v13990_v46 = vpack.c.bf16 %v4787_v59, %v4785_v32 }
 0x50f   : > { %v4602_v21 = vpop.f32.mrb[248].mxu1  ;;  %v4904_v41 = vpack.c.bf16 %v4788_v52, %v4786_v31 }
 0x510   : > { %v4603_v53 = vadd.f32 %v4602_v21, %v13716_v24  ;;  %v4604_v19 = vpop.f32.mrb[249].mxu1 }
 0x511   : > { %v4605_v49 = vadd.f32 %v4604_v19, %v13726_v28  ;;  %v4606_v42 = vpop.f32.mrb[250].mxu1 }
 0x512   : > { %v4607_v3 = vadd.f32 %v4606_v42, %v13716_v24  ;;  %v4608_v37 = vpop.f32.mrb[251].mxu1  ;;  %v4789_v18 = vmax.f32 %v4603_v53, 0.0 }
 0x513   : > { %v4609_v63 = vadd.f32 %v4608_v37, %v13726_v28  ;;  %v4790_v39 = vmax.f32 %v4605_v49, 0.0 }
 0x514   : > { %v4791_v8 = vmax.f32 %v4607_v3, 0.0  ;;  %5288 = vmatmul.mubr.bf16.gmra.mrb[100].mxu1 %v13957_v4 }
 0x515   : > { %v4792_v33 = vmax.f32 %v4609_v63, 0.0  ;;  %5297 = vmatprep.mubr.bf16.mxu1 %v4898_v14 }
 0x516   : > { %v13997_v38 = vpack.c.bf16 %v4791_v8, %v4789_v18 }
 0x517   : > { %v4612_v30 = vpop.f32.mrb[252].mxu1  ;;  %v4906_v12 = vpack.c.bf16 %v4792_v33, %v4790_v39 }
 0x518   : > { %v4613_v20 = vadd.f32 %v4612_v30, %v13716_v24  ;;  %v4614_v48 = vpop.f32.mrb[253].mxu1 }
 0x519   : > { %v4615_v26 = vadd.f32 %v4614_v48, %v13726_v28  ;;  %v4616_v6 = vpop.f32.mrb[254].mxu1 }
 0x51a   : > { %v4617_v51 = vadd.f32 %v4616_v6, %v13716_v24  ;;  %v4618_v17 = vpop.f32.mrb[255].mxu1  ;;  %v4793_v44 = vmax.f32 %v4613_v20, 0.0 }
 0x51b   : > { %v4619_v25 = vadd.f32 %v4618_v17, %v13726_v28  ;;  %v4794_v14 = vmax.f32 %v4615_v26, 0.0 }
 0x51c   : > { %v4795_v4 = vmax.f32 %v4617_v51, 0.0  ;;  %5298 = vmatmul.mubr.bf16.gmra.mrb[104].mxu1 %v13968_v36 }
 0x51d   : > { %v4796_v10 = vmax.f32 %v4619_v25, 0.0  ;;  %5307 = vmatprep.mubr.bf16.mxu1 %v4900_v29 }
 0x51e   : > { %v14004_v16 = vpack.c.bf16 %v4795_v4, %v4793_v44 }
 0x51f   : > { %v4622_v55 = vpop.f32.mrb[0].mxu1  ;;  %v4908_v0 = vpack.c.bf16 %v4796_v10, %v4794_v14 }
 0x520   : > { %v4623_v9 = vadd.f32 %v4622_v55, %v13716_v24  ;;  %v4624_v45 = vpop.f32.mrb[1].mxu1 }
 0x521   : > { %v4625_v23 = vadd.f32 %v4624_v45, %v13726_v28  ;;  %v4626_v5 = vpop.f32.mrb[2].mxu1 }
 0x522   : > { %v4627_v54 = vadd.f32 %v4626_v5, %v13716_v24  ;;  %v4628_v47 = vpop.f32.mrb[3].mxu1  ;;  %v4797_v35 = vmax.f32 %v4623_v9, 0.0 }
 0x523   : > { %v4629_v34 = vadd.f32 %v4628_v47, %v13726_v28  ;;  %v4798_v29 = vmax.f32 %v4625_v23, 0.0 }
 0x524   : > { %v4799_v36 = vmax.f32 %v4627_v54, 0.0  ;;  %5308 = vmatmul.mubr.bf16.gmra.mrb[108].mxu1 %v13976_v22 }
 0x525   : > { %v4800_v57 = vmax.f32 %v4629_v34, 0.0  ;;  %5317 = vmatprep.mubr.bf16.mxu1 %v4902_v2 }
 0x526   : > { %v14011_v56 = vpack.c.bf16 %v4799_v36, %v4797_v35 }
 0x527   : > { %v4632_v27 = vpop.f32.mrb[4].mxu1  ;;  %v4910_v40 = vpack.c.bf16 %v4800_v57, %v4798_v29 }
 0x528   : > { %v4633_v11 = vadd.f32 %v4632_v27, %v13716_v24  ;;  %v4634_v1 = vpop.f32.mrb[5].mxu1 }
 0x529   : > { %v4635_v58 = vadd.f32 %v4634_v1, %v13726_v28  ;;  %v4636_v15 = vpop.f32.mrb[6].mxu1 }
 0x52a   : > { %v4637_v43 = vadd.f32 %v4636_v15, %v13716_v24  ;;  %v4638_v61 = vpop.f32.mrb[7].mxu1  ;;  %v4801_v32 = vmax.f32 %v4633_v11, 0.0 }
 0x52b   : > { %v4639_v50 = vadd.f32 %v4638_v61, %v13726_v28  ;;  %v4802_v2 = vmax.f32 %v4635_v58, 0.0 }
 0x52c   : > { %v4803_v22 = vmax.f32 %v4637_v43, 0.0  ;;  %5318 = vmatmul.mubr.bf16.gmra.mrb[112].mxu1 %v13983_v13 }
 0x52d   : > { %v4804_v59 = vmax.f32 %v4639_v50, 0.0  ;;  %5327 = vmatprep.mubr.bf16.mxu1 %v4904_v41 }
 0x52e   : > { %v14018_v31 = vpack.c.bf16 %v4803_v22, %v4801_v32 }
 0x52f   : > { %v4642_v52 = vpop.f32.mrb[8].mxu1  ;;  %v4912_v21 = vpack.c.bf16 %v4804_v59, %v4802_v2 }
 0x530   : > { %v4643_v53 = vadd.f32 %v4642_v52, %v13716_v24  ;;  %v4644_v19 = vpop.f32.mrb[9].mxu1 }
 0x531   : > { %v4645_v49 = vadd.f32 %v4644_v19, %v13726_v28  ;;  %v4646_v42 = vpop.f32.mrb[10].mxu1 }
 0x532   : > { %v4647_v3 = vadd.f32 %v4646_v42, %v13716_v24  ;;  %v4648_v37 = vpop.f32.mrb[11].mxu1  ;;  %v4805_v18 = vmax.f32 %v4643_v53, 0.0 }
 0x533   : > { %v4649_v63 = vadd.f32 %v4648_v37, %v13726_v28  ;;  %v4806_v41 = vmax.f32 %v4645_v49, 0.0 }
 0x534   : > { %v4807_v13 = vmax.f32 %v4647_v3, 0.0  ;;  %5328 = vmatmul.mubr.bf16.gmra.mrb[116].mxu1 %v13990_v46 }
 0x535   : > { %v4808_v8 = vmax.f32 %v4649_v63, 0.0  ;;  %5337 = vmatprep.mubr.bf16.mxu1 %v4906_v12 }
 0x536   : > { %v14025_v39 = vpack.c.bf16 %v4807_v13, %v4805_v18 }
 0x537   : > { %v4652_v33 = vpop.f32.mrb[12].mxu1  ;;  %v4914_v30 = vpack.c.bf16 %v4808_v8, %v4806_v41 }
 0x538   : > { %v4653_v20 = vadd.f32 %v4652_v33, %v13716_v24  ;;  %v4654_v48 = vpop.f32.mrb[13].mxu1 }
 0x539   : > { %v4655_v26 = vadd.f32 %v4654_v48, %v13726_v28  ;;  %v4656_v6 = vpop.f32.mrb[14].mxu1 }
 0x53a   : > { %v4657_v51 = vadd.f32 %v4656_v6, %v13716_v24  ;;  %v4658_v17 = vpop.f32.mrb[15].mxu1  ;;  %v4809_v44 = vmax.f32 %v4653_v20, 0.0 }
 0x53b   : > { %v4659_v25 = vadd.f32 %v4658_v17, %v13726_v28  ;;  %v4810_v12 = vmax.f32 %v4655_v26, 0.0 }
 0x53c   : > { %v4811_v46 = vmax.f32 %v4657_v51, 0.0  ;;  %5338 = vmatmul.mubr.bf16.gmra.mrb[120].mxu1 %v13997_v38  ;;  %v5438_v51 = vld [vmem:[%s15754_s8] sm:$0x3] }
 0x53d   : > { %v4812_v4 = vmax.f32 %v4659_v25, 0.0  ;;  %5347 = vmatprep.mubr.bf16.mxu1 %v4908_v0 }
 0x53e   : > { %v14032_v14 = vpack.c.bf16 %v4811_v46, %v4809_v44  ;;  %v14070_v46 = vrot.slane %v5438_v51, %v12710_v60 }
 0x53f   : > { %v4662_v10 = vpop.f32.mrb[16].mxu1  ;;  %v4916_v55 = vpack.c.bf16 %v4812_v4, %v4810_v12 }
 0x540   : > { %v4663_v9 = vadd.f32 %v4662_v10, %v13716_v24  ;;  %v4664_v45 = vpop.f32.mrb[17].mxu1  ;;  %v14073_v10 = vrot.slane %v5438_v51, %v12715_v62 }
 0x541   : > { %v4665_v23 = vadd.f32 %v4664_v45, %v13726_v28  ;;  %v4666_v5 = vpop.f32.mrb[18].mxu1 }
 0x542   : > { %v4667_v54 = vadd.f32 %v4666_v5, %v13716_v24  ;;  %v4668_v47 = vpop.f32.mrb[19].mxu1  ;;  %v4813_v35 = vmax.f32 %v4663_v9, 0.0 }
 0x543   : > { %v4669_v34 = vadd.f32 %v4668_v47, %v13726_v28  ;;  %v4814_v0 = vmax.f32 %v4665_v23, 0.0 }
 0x544   : > { %v4815_v38 = vmax.f32 %v4667_v54, 0.0  ;;  %5348 = vmatmul.mubr.bf16.gmra.mrb[124].mxu1 %v14004_v16 }
 0x545   : > { %v4816_v36 = vmax.f32 %v4669_v34, 0.0  ;;  %5357 = vmatprep.mubr.bf16.mxu1 %v4910_v40 }
 0x546   : > { %v14039_v29 = vpack.c.bf16 %v4815_v38, %v4813_v35 }
 0x547   : > { %v4672_v57 = vpop.f32.mrb[20].mxu1  ;;  %v14041_v27 = vpack.c.bf16 %v4816_v36, %v4814_v0 }
 0x548   : > { %v4673_v11 = vadd.f32 %v4672_v57, %v13716_v24  ;;  %v4674_v1 = vpop.f32.mrb[21].mxu1 }
 0x549   : > { %v4675_v58 = vadd.f32 %v4674_v1, %v13726_v28  ;;  %v4676_v15 = vpop.f32.mrb[22].mxu1  ;;  %v11632_v1 = vld [vmem:[%s15751_s5 + $0x500] ss:$8 sps:$4 sm:$0xff]  }
 0x54a   : > { %v4677_v43 = vadd.f32 %v4676_v15, %v13716_v24  ;;  %v4678_v61 = vpop.f32.mrb[23].mxu1  ;;  %v4817_v16 = vmax.f32 %v4673_v11, 0.0 }
 0x54b   : > { %v4679_v50 = vadd.f32 %v4678_v61, %v13726_v28  ;;  %v4818_v40 = vmax.f32 %v4675_v58, 0.0 }
 0x54c   : > { %v4819_v32 = vmax.f32 %v4677_v43, 0.0  ;;  %5358 = vmatmul.mubr.bf16.gmra.mrb[128].mxu1 %v14011_v56  ;;  %v11637_v43 = vld [vmem:[%s15751_s5 + $0x514] ss:$8 sps:$4 sm:$0xff]  }
 0x54d   : > { %v4820_v22 = vmax.f32 %v4679_v50, 0.0  ;;  %5367 = vmatprep.mubr.bf16.mxu1 %v4912_v21 }
 0x54e   : > { %v14048_v2 = vpack.c.bf16 %v4819_v32, %v4817_v16  ;;  %v11635_v32 = vld [vmem:[%s15751_s5 + $0x510] ss:$8 sps:$4 sm:$0xff]  }
 0x54f   : > { %v4682_v59 = vpop.f32.mrb[24].mxu1  ;;  %v14050_v52 = vpack.c.bf16 %v4820_v22, %v4818_v40 }
 0x550   : > { %v4683_v53 = vadd.f32 %v4682_v59, %v13716_v24  ;;  %v4684_v19 = vpop.f32.mrb[25].mxu1  ;;  %v11640_v59 = vld [vmem:[%s15751_s5 + $0x524] ss:$8 sps:$4 sm:$0xff]  }
 0x551   : > { %v4685_v49 = vadd.f32 %v4684_v19, %v13726_v28  ;;  %v4686_v42 = vpop.f32.mrb[26].mxu1 }
 0x552   : > { %v4687_v3 = vadd.f32 %v4686_v42, %v13716_v24  ;;  %v4688_v37 = vpop.f32.mrb[27].mxu1  ;;  %v4821_v56 = vmax.f32 %v4683_v53, 0.0 }
 0x553   : > { %v4689_v63 = vadd.f32 %v4688_v37, %v13726_v28  ;;  %v4822_v21 = vmax.f32 %v4685_v49, 0.0  ;;  %v11638_v37 = vld [vmem:[%s15751_s5 + $0x520] ss:$8 sps:$4 sm:$0xff]  }
 0x554   : > { %v4823_v18 = vmax.f32 %v4687_v3, 0.0  ;;  %5368 = vmatmul.mubr.bf16.gmra.mrb[132].mxu1 %v14018_v31 }
 0x555   : > { %v4824_v13 = vmax.f32 %v4689_v63, 0.0  ;;  %5377 = vmatprep.mubr.bf16.mxu1 %v4914_v30 }
 0x556   : > { %v14057_v41 = vpack.c.bf16 %v4823_v18, %v4821_v56  ;;  %v11643_v56 = vld [vmem:[%s15751_s5 + $0x534] ss:$8 sps:$4 sm:$0xff]  }
 0x557   : > { %v4692_v8 = vpop.f32.mrb[28].mxu1  ;;  %v14059_v33 = vpack.c.bf16 %v4824_v13, %v4822_v21 }
 0x558   : > { %v4693_v20 = vadd.f32 %v4692_v8, %v13716_v24  ;;  %v4694_v48 = vpop.f32.mrb[29].mxu1 }
 0x559   : > { %v4695_v26 = vadd.f32 %v4694_v48, %v13726_v28  ;;  %v4696_v6 = vpop.f32.mrb[30].mxu1 }
 0x55a   : > { %v4697_v31 = vadd.f32 %v4696_v6, %v13716_v24  ;;  %v4698_v17 = vpop.f32.mrb[31].mxu1  ;;  %v4825_v25 = vmax.f32 %v4693_v20, 0.0  ;;  %v11641_v20 = vld [vmem:[%s15751_s5 + $0x530] ss:$8 sps:$4 sm:$0xff]   ;;  %v11646_v6 = vld [vmem:[%s15751_s5 + $0x544] ss:$8 sps:$4 sm:$0xff]  }
 0x55b   : > { %v4699_v30 = vadd.f32 %v4698_v17, %v13726_v28  ;;  %v4826_v12 = vmax.f32 %v4695_v26, 0.0 }
 0x55c   : > { %v4827_v44 = vmax.f32 %v4697_v31, 0.0  ;;  %5378 = vmatmul.mubr.bf16.gmra.mrb[136].mxu1 %v14025_v39 }
 0x55d   : > { %v4828_v4 = vmax.f32 %v4699_v30, 0.0  ;;  %5387 = vmatprep.mubr.bf16.mxu1 %v4916_v55 }
 0x55e   : > { %v14075_v9 = vpack.c.bf16 %v4827_v44, %v4825_v25  ;;  %v11644_v44 = vld [vmem:[%s15751_s5 + $0x540] ss:$8 sps:$4 sm:$0xff]  }
 0x55f   : > { %v5119_v45 = vpop.f32.mrb[32].mxu1  ;;  %v14077_v24 = vpack.c.bf16 %v4828_v4, %v4826_v12  ;;  %v11649_v4 = vld [vmem:[%s15751_s5 + $0x554] ss:$8 sps:$4 sm:$0xff]  }
 0x560   : > { %v5450_v28 = vadd.f32 %v14070_v46, %v5119_v45  ;;  %v5121_v23 = vpop.f32.mrb[33].mxu1 }
 0x561   : > { %v5451_v5 = vadd.f32 %v14073_v10, %v5121_v23  ;;  %v5123_v39 = vpop.f32.mrb[34].mxu1 }
 0x562   : > { %v5452_v54 = vadd.f32 %v14070_v46, %v5123_v39  ;;  %v5125_v47 = vpop.f32.mrb[35].mxu1  ;;  %v5578_v55 = vmax.f32 %v5450_v28, 0.0  ;;  %v11647_v39 = vld [vmem:[%s15751_s5 + $0x550] ss:$8 sps:$4 sm:$0xff]  }
 0x563   : > { %v5453_v34 = vadd.f32 %v14073_v10, %v5125_v47  ;;  %v5579_v38 = vmax.f32 %v5451_v5, 0.0 }
 0x564   : > { %v5580_v35 = vmax.f32 %v5452_v54, 0.0  ;;  %5388 = vmatmul.mubr.bf16.gmra.mrb[140].mxu1 %v14032_v14 }
 0x565   : > { %v5581_v0 = vmax.f32 %v5453_v34, 0.0  ;;  %5397 = vmatprep.mubr.bf16.mxu1 %v14041_v27  ;;  %v11652_v34 = vld [vmem:[%s15751_s5 + $0x564] ss:$8 sps:$4 sm:$0xff]  }
 0x566   : > { %v5739_v36 = vpack.c.bf16 %v5580_v35, %v5578_v55 }
 0x567   : > { %v5129_v57 = vpop.f32.mrb[36].mxu1  ;;  %v5740_v11 = vpack.c.bf16 %v5581_v0, %v5579_v38 }
 0x568   : > { %v5454_v58 = vadd.f32 %v14070_v46, %v5129_v57  ;;  %v5131_v15 = vpop.f32.mrb[37].mxu1  ;;  %v11650_v57 = vld [vmem:[%s15751_s5 + $0x560] ss:$8 sps:$4 sm:$0xff]  }
 0x569   : > { %v5455_v14 = vadd.f32 %v14073_v10, %v5131_v15  ;;  %v5133_v61 = vpop.f32.mrb[38].mxu1  ;;  %6008 = vmatprep.mubr.bf16.mxu0 %v5740_v11 }
 0x56a   : > { %v5456_v27 = vadd.f32 %v14070_v46, %v5133_v61  ;;  %v5135_v50 = vpop.f32.mrb[39].mxu1  ;;  %6009 = vmatmul.mubr.bf16.vlgmr.msra.gmra.mrb[96].mxu0 %v5739_v36  ;;  %v5582_v40 = vmax.f32 %v5454_v58, 0.0  ;;  %v11653_v61 = vld [vmem:[%s15751_s5 + $0x570] ss:$8 sps:$4 sm:$0xff]  }
 0x56b   : > { %v5457_v16 = vadd.f32 %v14073_v10, %v5135_v50  ;;  %6728 = vmatpush1.bf16.msra.mxu0 %v11632_v1  ;;  %v5583_v53 = vmax.f32 %v5455_v14, 0.0  ;;  %v11655_v1 = vld [vmem:[%s15751_s5 + $0x574] ss:$8 sps:$4 sm:$0xff]  }
 0x56c   : > { %v5584_v22 = vmax.f32 %v5456_v27, 0.0  ;;  %5398 = vmatmul.mubr.bf16.gmra.mrb[144].mxu1 %v14039_v29  ;;  %6729 = vmatprep.subr.bf16.mxu0 %v11637_v43 }
 0x56d   : > { %v5585_v19 = vmax.f32 %v5457_v16, 0.0  ;;  %5407 = vmatprep.mubr.bf16.mxu1 %v14050_v52  ;;  %v11658_v16 = vld [vmem:[%s15751_s5 + $0x584] ss:$8 sps:$4 sm:$0xff]  }
 0x56e   : > { %v5741_v49 = vpack.c.bf16 %v5584_v22, %v5582_v40 }
 0x56f   : > { %v5139_v42 = vpop.f32.mrb[40].mxu1  ;;  %v5742_v3 = vpack.c.bf16 %v5585_v19, %v5583_v53  ;;  %6730 = vmatpush1.bf16.msra.mxu0 %v11635_v32  ;;  %v11656_v19 = vld [vmem:[%s15751_s5 + $0x580] ss:$8 sps:$4 sm:$0xff]  }
 0x570   : > { %v5458_v63 = vadd.f32 %v14070_v46, %v5139_v42  ;;  %v5141_v29 = vpop.f32.mrb[41].mxu1  ;;  %6731 = vmatprep.subr.bf16.mxu0 %v11640_v59 }
 0x571   : > { %v5459_v18 = vadd.f32 %v14073_v10, %v5141_v29  ;;  %v5143_v21 = vpop.f32.mrb[42].mxu1  ;;  %6018 = vmatprep.mubr.bf16.mxu0 %v5742_v3 }
 0x572   : > { %v5460_v52 = vadd.f32 %v14070_v46, %v5143_v21  ;;  %v5145_v13 = vpop.f32.mrb[43].mxu1  ;;  %6019 = vmatmul.mubr.bf16.gmra.mrb[100].mxu0 %v5741_v49  ;;  %v5586_v48 = vmax.f32 %v5458_v63, 0.0 }
 0x573   : > { %v5461_v8 = vadd.f32 %v14073_v10, %v5145_v13  ;;  %6732 = vmatpush1.bf16.msra.mxu0 %v11638_v37  ;;  %v5587_v51 = vmax.f32 %v5459_v18, 0.0  ;;  %v11659_v18 = vld [vmem:[%s15751_s5 + $0x590] ss:$8 sps:$4 sm:$0xff]  }
 0x574   : > { %v5588_v26 = vmax.f32 %v5460_v52, 0.0  ;;  %5408 = vmatmul.mubr.bf16.gmra.mrb[148].mxu1 %v14048_v2  ;;  %6733 = vmatprep.subr.bf16.mxu0 %v11643_v56 }
 0x575   : > { %v5589_v31 = vmax.f32 %v5461_v8, 0.0  ;;  %5417 = vmatprep.mubr.bf16.mxu1 %v14059_v33 }
 0x576   : > { %v5743_v17 = vpack.c.bf16 %v5588_v26, %v5586_v48  ;;  %v11664_v48 = vld [vmem:[%s15751_s5 + $0x5a4] ss:$8 sps:$4 sm:$0xff]  }
 0x577   : > { %v5149_v30 = vpop.f32.mrb[44].mxu1  ;;  %v5744_v25 = vpack.c.bf16 %v5589_v31, %v5587_v51  ;;  %6734 = vmatpush1.bf16.msra.mxu0 %v11641_v20  ;;  %v11662_v51 = vld [vmem:[%s15751_s5 + $0x5a0] ss:$8 sps:$4 sm:$0xff]  }
 0x578   : > { %v5462_v12 = vadd.f32 %v14070_v46, %v5149_v30  ;;  %v5151_v2 = vpop.f32.mrb[45].mxu1  ;;  %6735 = vmatprep.subr.bf16.mxu0 %v11646_v6 }
 0x579   : > { %v5463_v45 = vadd.f32 %v14073_v10, %v5151_v2  ;;  %v5153_v28 = vpop.f32.mrb[46].mxu1  ;;  %6028 = vmatprep.mubr.bf16.mxu0 %v5744_v25 }
 0x57a   : > { %v5464_v33 = vadd.f32 %v14070_v46, %v5153_v28  ;;  %v5155_v23 = vpop.f32.mrb[47].mxu1  ;;  %6029 = vmatmul.mubr.bf16.gmra.mrb[104].mxu0 %v5743_v17  ;;  %v5590_v54 = vmax.f32 %v5462_v12, 0.0 }
 0x57b   : > { %v5465_v5 = vadd.f32 %v14073_v10, %v5155_v23  ;;  %6736 = vmatpush1.bf16.msra.mxu0 %v11644_v44  ;;  %v5591_v55 = vmax.f32 %v5463_v45, 0.0 }
 0x57c   : > { %v5592_v47 = vmax.f32 %v5464_v33, 0.0  ;;  %5418 = vmatmul.mubr.bf16.gmra.mrb[152].mxu1 %v14057_v41  ;;  %6737 = vmatprep.subr.bf16.mxu0 %v11649_v4 }
 0x57d   : > { %v5593_v35 = vmax.f32 %v5465_v5, 0.0  ;;  %5427 = vmatprep.mubr.bf16.mxu1 %v14077_v24 }
 0x57e   : > { %v5745_v38 = vpack.c.bf16 %v5592_v47, %v5590_v54 }
 0x57f   : > { %v5159_v0 = vpop.f32.mrb[48].mxu1  ;;  %v5746_v36 = vpack.c.bf16 %v5593_v35, %v5591_v55  ;;  %6738 = vmatpush1.bf16.msra.mxu0 %v11647_v39 }
 0x580   : > { %v5466_v11 = vadd.f32 %v14070_v46, %v5159_v0  ;;  %v5161_v41 = vpop.f32.mrb[49].mxu1  ;;  %6739 = vmatprep.subr.bf16.mxu0 %v11652_v34 }
 0x581   : > { %v5467_v58 = vadd.f32 %v14073_v10, %v5161_v41  ;;  %v5163_v15 = vpop.f32.mrb[50].mxu1  ;;  %6038 = vmatprep.mubr.bf16.mxu0 %v5746_v36 }
 0x582   : > { %v5468_v24 = vadd.f32 %v14070_v46, %v5163_v15  ;;  %v5165_v43 = vpop.f32.mrb[51].mxu1  ;;  %6039 = vmatmul.mubr.bf16.gmra.mrb[108].mxu0 %v5745_v38  ;;  %v5594_v27 = vmax.f32 %v5466_v11, 0.0  ;;  %v11667_v15 = vld [vmem:[%s15751_s5 + $0x5b4] ss:$8 sps:$4 sm:$0xff]  }
 0x583   : > { %v5469_v14 = vadd.f32 %v14073_v10, %v5165_v43  ;;  %6740 = vmatpush1.bf16.msra.mxu0 %v11650_v57  ;;  %v5595_v32 = vmax.f32 %v5467_v58, 0.0  ;;  %v11665_v58 = vld [vmem:[%s15751_s5 + $0x5b0] ss:$8 sps:$4 sm:$0xff]  }
 0x584   : > { %v5596_v50 = vmax.f32 %v5468_v24, 0.0  ;;  %5428 = vmatmul.mubr.bf16.gmra.mrb[156].mxu1 %v14075_v9  ;;  %6741 = vmatprep.subr.bf16.mxu0 %v11655_v1  ;;  %v11661_v9 = vld [vmem:[%s15751_s5 + $0x594] ss:$8 sps:$4 sm:$0xff]  }
 0x585   : > { %v5597_v40 = vmax.f32 %v5469_v14, 0.0 }
 0x586   : > { %v5747_v22 = vpack.c.bf16 %v5596_v50, %v5594_v27 }
 0x587   : > { %v5169_v59 = vpop.f32.mrb[52].mxu1  ;;  %v5748_v53 = vpack.c.bf16 %v5597_v40, %v5595_v32  ;;  %6742 = vmatpush1.bf16.msra.mxu0 %v11653_v61 }
 0x588   : > { %v5470_v49 = vadd.f32 %v14070_v46, %v5169_v59  ;;  %v5171_v42 = vpop.f32.mrb[53].mxu1  ;;  %6743 = vmatprep.subr.bf16.mxu0 %v11658_v16 }
 0x589   : > { %v5471_v3 = vadd.f32 %v14073_v10, %v5171_v42  ;;  %v5173_v37 = vpop.f32.mrb[54].mxu1  ;;  %6048 = vmatprep.mubr.bf16.mxu0 %v5748_v53 }
 0x58a   : > { %v5472_v63 = vadd.f32 %v14070_v46, %v5173_v37  ;;  %v5175_v29 = vpop.f32.mrb[55].mxu1  ;;  %6049 = vmatmul.mubr.bf16.gmra.mrb[112].mxu0 %v5747_v22  ;;  %v5598_v21 = vmax.f32 %v5470_v49, 0.0 }
 0x58b   : > { %v5473_v56 = vadd.f32 %v14073_v10, %v5175_v29  ;;  %6744 = vmatpush1.bf16.msra.mxu0 %v11656_v19  ;;  %v5599_v13 = vmax.f32 %v5471_v3, 0.0 }
 0x58c   : > { %v5600_v52 = vmax.f32 %v5472_v63, 0.0  ;;  %6745 = vmatprep.subr.bf16.mxu0 %v11661_v9 }
 0x58d   : > { %v5601_v8 = vmax.f32 %v5473_v56, 0.0 }
 0x58e   : > { %v5749_v20 = vpack.c.bf16 %v5600_v52, %v5598_v21 }
 0x58f   : > { %v5179_v26 = vpop.f32.mrb[56].mxu1  ;;  %v5750_v6 = vpack.c.bf16 %v5601_v8, %v5599_v13  ;;  %6746 = vmatpush1.bf16.msra.mxu0 %v11659_v18 }
 0x590   : > { %v5474_v31 = vadd.f32 %v14070_v46, %v5179_v26  ;;  %v5181_v17 = vpop.f32.mrb[57].mxu1  ;;  %6747 = vmatprep.subr.bf16.mxu0 %v11664_v48  ;;  %v11668_v26 = vld [vmem:[%s15751_s5 + $0x5c0] ss:$8 sps:$4 sm:$0xff]  }
 0x591   : > { %v5475_v30 = vadd.f32 %v14073_v10, %v5181_v17  ;;  %v5183_v25 = vpop.f32.mrb[58].mxu1  ;;  %6058 = vmatprep.mubr.bf16.mxu0 %v5750_v6  ;;  %v11670_v6 = vld [vmem:[%s15751_s5 + $0x5c4] ss:$8 sps:$4 sm:$0xff]  }
 0x592   : > { %v5476_v44 = vadd.f32 %v14070_v46, %v5183_v25  ;;  %v5185_v12 = vpop.f32.mrb[59].mxu1  ;;  %6059 = vmatmul.mubr.bf16.gmra.mrb[116].mxu0 %v5749_v20  ;;  %v5602_v4 = vmax.f32 %v5474_v31, 0.0 }
 0x593   : > { %v5477_v2 = vadd.f32 %v14073_v10, %v5185_v12  ;;  %6748 = vmatpush1.bf16.msra.mxu0 %v11662_v51  ;;  %v5603_v28 = vmax.f32 %v5475_v30, 0.0 }
 0x594   : > { %v5604_v45 = vmax.f32 %v5476_v44, 0.0  ;;  %6749 = vmatprep.subr.bf16.mxu0 %v11667_v15  ;;  %v11671_v15 = vld [vmem:[%s15751_s5 + $0x5d0] ss:$8 sps:$4 sm:$0xff]  }
 0x595   : > { %v5605_v33 = vmax.f32 %v5477_v2, 0.0 }
 0x596   : > { %v5751_v23 = vpack.c.bf16 %v5604_v45, %v5602_v4 }
 0x597   : > { %v5189_v5 = vpop.f32.mrb[60].mxu1  ;;  %v5752_v39 = vpack.c.bf16 %v5605_v33, %v5603_v28  ;;  %6750 = vmatpush1.bf16.msra.mxu0 %v11665_v58 }
 0x598   : > { %v5478_v54 = vadd.f32 %v14070_v46, %v5189_v5  ;;  %v5191_v47 = vpop.f32.mrb[61].mxu1  ;;  %6751 = vmatprep.subr.bf16.mxu0 %v11670_v6 }
 0x599   : > { %v5479_v34 = vadd.f32 %v14073_v10, %v5191_v47  ;;  %v5193_v55 = vpop.f32.mrb[62].mxu1  ;;  %6068 = vmatprep.mubr.bf16.mxu0 %v5752_v39 }
 0x59a   : > { %v5480_v35 = vadd.f32 %v14070_v46, %v5193_v55  ;;  %v5195_v38 = vpop.f32.mrb[63].mxu1  ;;  %6069 = vmatmul.mubr.bf16.gmra.mrb[120].mxu0 %v5751_v23  ;;  %v5606_v36 = vmax.f32 %v5478_v54, 0.0 }
 0x59b   : > { %v5481_v0 = vadd.f32 %v14073_v10, %v5195_v38  ;;  %v5607_v11 = vmax.f32 %v5479_v34, 0.0  ;;  %6752 = vmatpush1.bf16.msra.mxu0 %v11668_v26 }
 0x59c   : > { %v5608_v57 = vmax.f32 %v5480_v35, 0.0 }
 0x59d   : > { %v5609_v41 = vmax.f32 %v5481_v0, 0.0 }
 0x59e   : > { %v5753_v1 = vpack.c.bf16 %v5608_v57, %v5606_v36 }
 0x59f   : > { %v5199_v24 = vpop.f32.mrb[64].mxu1  ;;  %v5754_v43 = vpack.c.bf16 %v5609_v41, %v5607_v11 }
 0x5a0   : > { %v5482_v14 = vadd.f32 %v14070_v46, %v5199_v24  ;;  %v5201_v61 = vpop.f32.mrb[65].mxu1  ;;  %v11673_v24 = vld [vmem:[%s15751_s5 + $0x5d4] ss:$8 sps:$4 sm:$0xff]  }
 0x5a1   : > { %v5483_v27 = vadd.f32 %v14073_v10, %v5201_v61  ;;  %v5203_v50 = vpop.f32.mrb[66].mxu1  ;;  %6078 = vmatprep.mubr.bf16.mxu0 %v5754_v43  ;;  %6753 = vmatprep.subr.bf16.mxu0 %v11673_v24  ;;  %v11682_v24 = vld [vmem:[%s15755_s9 + $0x14] ss:$8 sps:$4 sm:$0xff]  }
 0x5a2   : > { %v5484_v16 = vadd.f32 %v14070_v46, %v5203_v50  ;;  %v5205_v32 = vpop.f32.mrb[67].mxu1  ;;  %6079 = vmatmul.mubr.bf16.gmra.mrb[124].mxu0 %v5753_v1  ;;  %v5610_v22 = vmax.f32 %v5482_v14, 0.0 }
 0x5a3   : > { %v5485_v40 = vadd.f32 %v14073_v10, %v5205_v32  ;;  %v5611_v53 = vmax.f32 %v5483_v27, 0.0  ;;  %6754 = vmatpush1.bf16.msra.mxu0 %v11671_v15  ;;  %v11680_v15 = vld [vmem:[%s15755_s9 + $0x10] ss:$8 sps:$4 sm:$0xff]  }
 0x5a4   : > { %v5612_v59 = vmax.f32 %v5484_v16, 0.0 }
 0x5a5   : > { %v5613_v19 = vmax.f32 %v5485_v40, 0.0 }
 0x5a6   : > { %v5755_v49 = vpack.c.bf16 %v5612_v59, %v5610_v22 }
 0x5a7   : > { %v5209_v42 = vpop.f32.mrb[68].mxu1  ;;  %v5756_v9 = vpack.c.bf16 %v5613_v19, %v5611_v53 }
 0x5a8   : > { %v5486_v3 = vadd.f32 %v14070_v46, %v5209_v42  ;;  %v5211_v37 = vpop.f32.mrb[69].mxu1 }
 0x5a9   : > { %v5487_v63 = vadd.f32 %v14073_v10, %v5211_v37  ;;  %v5213_v29 = vpop.f32.mrb[70].mxu1  ;;  %6088 = vmatprep.mubr.bf16.mxu0 %v5756_v9 }
 0x5aa   : > { %v5488_v56 = vadd.f32 %v14070_v46, %v5213_v29  ;;  %v5215_v18 = vpop.f32.mrb[71].mxu1  ;;  %6089 = vmatmul.mubr.bf16.gmra.mrb[128].mxu0 %v5755_v49  ;;  %v5614_v52 = vmax.f32 %v5486_v3, 0.0 }
 0x5ab   : > { %v5489_v21 = vadd.f32 %v14073_v10, %v5215_v18  ;;  %v5615_v8 = vmax.f32 %v5487_v63, 0.0 }
 0x5ac   : > { %v5616_v13 = vmax.f32 %v5488_v56, 0.0 }
 0x5ad   : > { %v5617_v20 = vmax.f32 %v5489_v21, 0.0 }
 0x5ae   : > { %v5757_v48 = vpack.c.bf16 %v5616_v13, %v5614_v52 }
 0x5af   : > { %v5219_v51 = vpop.f32.mrb[72].mxu1  ;;  %v5758_v31 = vpack.c.bf16 %v5617_v20, %v5615_v8  ;;  %v11674_v20 = vld [vmem:[%s15755_s9] ss:$8 sps:$4 sm:$0xff]  }
 0x5b0   : > { %v5490_v17 = vadd.f32 %v14070_v46, %v5219_v51  ;;  %v5221_v30 = vpop.f32.mrb[73].mxu1 }
 0x5b1   : > { %v5491_v25 = vadd.f32 %v14073_v10, %v5221_v30  ;;  %v5223_v44 = vpop.f32.mrb[74].mxu1  ;;  %6098 = vmatprep.mubr.bf16.mxu0 %v5758_v31  ;;  %v11677_v31 = vld [vmem:[%s15751_s5 + $0x5e0] ss:$8 sps:$4 sm:$0xff]  }
 0x5b2   : > { %v5492_v12 = vadd.f32 %v14070_v46, %v5223_v44  ;;  %v5225_v2 = vpop.f32.mrb[75].mxu1  ;;  %6099 = vmatmul.mubr.bf16.gmra.mrb[132].mxu0 %v5757_v48  ;;  %v5618_v45 = vmax.f32 %v5490_v17, 0.0  ;;  %v11676_v48 = vld [vmem:[%s15755_s9 + $0x4] ss:$8 sps:$4 sm:$0xff]  }
 0x5b3   : > { %v5493_v4 = vadd.f32 %v14073_v10, %v5225_v2  ;;  %v5619_v33 = vmax.f32 %v5491_v25, 0.0  ;;  %8321 = vmatprep.subr.bf16.mxu1 %v11676_v48  ;;  %v11679_v17 = vld [vmem:[%s15751_s5 + $0x5e4] ss:$8 sps:$4 sm:$0xff]  }
 0x5b4   : > { %v5620_v28 = vmax.f32 %v5492_v12, 0.0  ;;  %8322 = vmatpush1.bf16.msra.mxu1 %v11674_v20  ;;  %6755 = vmatprep.subr.bf16.mxu0 %v11679_v17  ;;  %v11688_v17 = vld [vmem:[%s15755_s9 + $0x24] ss:$8 sps:$4 sm:$0xff]  }
 0x5b5   : > { %v5621_v23 = vmax.f32 %v5493_v4, 0.0  ;;  %6756 = vmatpush1.bf16.msra.mxu0 %v11677_v31  ;;  %8323 = vmatprep.subr.bf16.mxu1 %v11682_v24  ;;  %v11686_v31 = vld [vmem:[%s15755_s9 + $0x20] ss:$8 sps:$4 sm:$0xff]  }
 0x5b6   : > { %v5759_v5 = vpack.c.bf16 %v5620_v28, %v5618_v45 }
 0x5b7   : > { %v5229_v39 = vpop.f32.mrb[76].mxu1  ;;  %v5760_v54 = vpack.c.bf16 %v5621_v23, %v5619_v33 }
 0x5b8   : > { %v5494_v47 = vadd.f32 %v14070_v46, %v5229_v39  ;;  %v5231_v34 = vpop.f32.mrb[77].mxu1  ;;  %8324 = vmatpush1.bf16.msra.mxu1 %v11680_v15 }
 0x5b9   : > { %v5495_v55 = vadd.f32 %v14073_v10, %v5231_v34  ;;  %v5233_v35 = vpop.f32.mrb[78].mxu1  ;;  %6108 = vmatprep.mubr.bf16.mxu0 %v5760_v54  ;;  %8325 = vmatprep.subr.bf16.mxu1 %v11688_v17  ;;  %v11692_v17 = vld [vmem:[%s15755_s9 + $0x40] ss:$8 sps:$4 sm:$0xff]  }
 0x5ba   : > { %v5496_v38 = vadd.f32 %v14070_v46, %v5233_v35  ;;  %v5235_v0 = vpop.f32.mrb[79].mxu1  ;;  %6109 = vmatmul.mubr.bf16.gmra.mrb[136].mxu0 %v5759_v5  ;;  %v5622_v57 = vmax.f32 %v5494_v47, 0.0 }
 0x5bb   : > { %v5497_v36 = vadd.f32 %v14073_v10, %v5235_v0  ;;  %v5623_v41 = vmax.f32 %v5495_v55, 0.0 }
 0x5bc   : > { %v5624_v11 = vmax.f32 %v5496_v38, 0.0  ;;  %8326 = vmatpush1.bf16.msra.mxu1 %v11686_v31 }
 0x5bd   : > { %v5625_v1 = vmax.f32 %v5497_v36, 0.0 }
 0x5be   : > { %v5761_v58 = vpack.c.bf16 %v5624_v11, %v5622_v57 }
 0x5bf   : > { %v5239_v43 = vpop.f32.mrb[80].mxu1  ;;  %v5762_v14 = vpack.c.bf16 %v5625_v1, %v5623_v41 }
 0x5c0   : > { %v5498_v61 = vadd.f32 %v14070_v46, %v5239_v43  ;;  %v5241_v27 = vpop.f32.mrb[81].mxu1 }
 0x5c1   : > { %v5499_v50 = vadd.f32 %v14073_v10, %v5241_v27  ;;  %v5243_v16 = vpop.f32.mrb[82].mxu1  ;;  %6118 = vmatprep.mubr.bf16.mxu0 %v5762_v14  ;;  %v11683_v27 = vld [vmem:[%s15751_s5 + $0x5f0] ss:$8 sps:$4 sm:$0xff]  }
 0x5c2   : > { %v5500_v32 = vadd.f32 %v14070_v46, %v5243_v16  ;;  %v5245_v40 = vpop.f32.mrb[83].mxu1  ;;  %6119 = vmatmul.mubr.bf16.gmra.mrb[140].mxu0 %v5761_v58  ;;  %v5626_v59 = vmax.f32 %v5498_v61, 0.0 }
 0x5c3   : > { %v5501_v22 = vadd.f32 %v14073_v10, %v5245_v40  ;;  %v5627_v19 = vmax.f32 %v5499_v50, 0.0  ;;  %v11685_v50 = vld [vmem:[%s15751_s5 + $0x5f4] ss:$8 sps:$4 sm:$0xff]  }
 0x5c4   : > { %v5628_v53 = vmax.f32 %v5500_v32, 0.0  ;;  %6757 = vmatprep.subr.bf16.mxu0 %v11685_v50 }
 0x5c5   : > { %v5629_v49 = vmax.f32 %v5501_v22, 0.0  ;;  %6758 = vmatpush1.bf16.msra.mxu0 %v11683_v27 }
 0x5c6   : > { %v5763_v42 = vpack.c.bf16 %v5628_v53, %v5626_v59  ;;  %8994 = vmatprep.subr.bf16.mxu0 %v12146_v7 }
 0x5c7   : > { %v5249_v9 = vpop.f32.mrb[84].mxu1  ;;  %v5764_v3 = vpack.c.bf16 %v5629_v49, %v5627_v19 }
 0x5c8   : > { %v5502_v37 = vadd.f32 %v14070_v46, %v5249_v9  ;;  %v5251_v63 = vpop.f32.mrb[85].mxu1 }
 0x5c9   : > { %v5503_v29 = vadd.f32 %v14073_v10, %v5251_v63  ;;  %v5253_v56 = vpop.f32.mrb[86].mxu1  ;;  %6128 = vmatprep.mubr.bf16.mxu0 %v5764_v3 }
 0x5ca   : > { %v5504_v18 = vadd.f32 %v14070_v46, %v5253_v56  ;;  %v5255_v21 = vpop.f32.mrb[87].mxu1  ;;  %6129 = vmatmul.mubr.bf16.gmra.mrb[144].mxu0 %v5763_v42  ;;  %v5630_v13 = vmax.f32 %v5502_v37, 0.0 }
 0x5cb   : > { %v5505_v52 = vadd.f32 %v14073_v10, %v5255_v21  ;;  %v5631_v26 = vmax.f32 %v5503_v29, 0.0 }
 0x5cc   : > { %v5632_v8 = vmax.f32 %v5504_v18, 0.0 }
 0x5cd   : > { %v5633_v6 = vmax.f32 %v5505_v52, 0.0 }
 0x5ce   : > { %v5765_v51 = vpack.c.bf16 %v5632_v8, %v5630_v13 }
 0x5cf   : > { %v5259_v30 = vpop.f32.mrb[88].mxu1  ;;  %v5766_v25 = vpack.c.bf16 %v5633_v6, %v5631_v26 }
 0x5d0   : > { %v5506_v44 = vadd.f32 %v14070_v46, %v5259_v30  ;;  %v5261_v12 = vpop.f32.mrb[89].mxu1 }
 0x5d1   : > { %v5507_v2 = vadd.f32 %v14073_v10, %v5261_v12  ;;  %v5263_v4 = vpop.f32.mrb[90].mxu1  ;;  %6138 = vmatprep.mubr.bf16.mxu0 %v5766_v25 }
 0x5d2   : > { %v5508_v45 = vadd.f32 %v14070_v46, %v5263_v4  ;;  %v5265_v28 = vpop.f32.mrb[91].mxu1  ;;  %6139 = vmatmul.mubr.bf16.gmra.mrb[148].mxu0 %v5765_v51  ;;  %v5634_v23 = vmax.f32 %v5506_v44, 0.0 }
 0x5d3   : > { %v5509_v33 = vadd.f32 %v14073_v10, %v5265_v28  ;;  %v5635_v39 = vmax.f32 %v5507_v2, 0.0 }
 0x5d4   : > { %v5636_v5 = vmax.f32 %v5508_v45, 0.0 }
 0x5d5   : > { %v5637_v54 = vmax.f32 %v5509_v33, 0.0 }
 0x5d6   : > { %v5767_v47 = vpack.c.bf16 %v5636_v5, %v5634_v23 }
 0x5d7   : > { %v5269_v34 = vpop.f32.mrb[92].mxu1  ;;  %v5768_v55 = vpack.c.bf16 %v5637_v54, %v5635_v39 }
 0x5d8   : > { %v5510_v35 = vadd.f32 %v14070_v46, %v5269_v34  ;;  %v5271_v38 = vpop.f32.mrb[93].mxu1 }
 0x5d9   : > { %v5511_v0 = vadd.f32 %v14073_v10, %v5271_v38  ;;  %v5273_v36 = vpop.f32.mrb[94].mxu1  ;;  %6148 = vmatprep.mubr.bf16.mxu0 %v5768_v55 }
 0x5da   : > { %v5512_v57 = vadd.f32 %v14070_v46, %v5273_v36  ;;  %v5275_v11 = vpop.f32.mrb[95].mxu1  ;;  %6149 = vmatmul.mubr.bf16.gmra.mrb[152].mxu0 %v5767_v47  ;;  %v5638_v1 = vmax.f32 %v5510_v35, 0.0 }
 0x5db   : > { %v5513_v41 = vadd.f32 %v14073_v10, %v5275_v11  ;;  %v5639_v43 = vmax.f32 %v5511_v0, 0.0 }
 0x5dc   : > { %v5640_v58 = vmax.f32 %v5512_v57, 0.0 }
 0x5dd   : > { %v5641_v14 = vmax.f32 %v5513_v41, 0.0 }
 0x5de   : > { %v5769_v61 = vpack.c.bf16 %v5640_v58, %v5638_v1 }
 0x5df   : > { %v5279_v16 = vpop.f32.mrb[96].mxu1  ;;  %v5770_v32 = vpack.c.bf16 %v5641_v14, %v5639_v43  ;;  %v11689_v14 = vld [vmem:[%s15755_s9 + $0x30] ss:$8 sps:$4 sm:$0xff]  }
 0x5e0   : > { %v5514_v40 = vadd.f32 %v14070_v46, %v5279_v16  ;;  %v5281_v22 = vpop.f32.mrb[97].mxu1 }
 0x5e1   : > { %v5515_v59 = vadd.f32 %v14073_v10, %v5281_v22  ;;  %v5283_v53 = vpop.f32.mrb[98].mxu1  ;;  %6158 = vmatprep.mubr.bf16.mxu0 %v5770_v32 }
 0x5e2   : > { %v5516_v19 = vadd.f32 %v14070_v46, %v5283_v53  ;;  %v5285_v49 = vpop.f32.mrb[99].mxu1  ;;  %6159 = vmatmul.mubr.bf16.gmra.mrb[156].mxu0 %v5769_v61  ;;  %v5642_v9 = vmax.f32 %v5514_v40, 0.0  ;;  %v11691_v61 = vld [vmem:[%s15755_s9 + $0x34] ss:$8 sps:$4 sm:$0xff]  }
 0x5e3   : > { %v5517_v42 = vadd.f32 %v14073_v10, %v5285_v49  ;;  %v5643_v37 = vmax.f32 %v5515_v59, 0.0  ;;  %8327 = vmatprep.subr.bf16.mxu1 %v11691_v61  ;;  %v11695_v61 = vld [vmem:[%s15755_s9 + $0x50] ss:$8 sps:$4 sm:$0xff]  }
 0x5e4   : > { %v5644_v3 = vmax.f32 %v5516_v19, 0.0  ;;  %8328 = vmatpush1.bf16.msra.mxu1 %v11689_v14 }
 0x5e5   : > { %v5645_v63 = vmax.f32 %v5517_v42, 0.0 }
 0x5e6   : > { %v5771_v29 = vpack.c.bf16 %v5644_v3, %v5642_v9 }
 0x5e7   : > { %v5772_v56 = vpack.c.bf16 %v5645_v63, %v5643_v37  ;;  %v5289_v18 = vpop.f32.mrb[100].mxu1 }
 0x5e8   : > { %v5518_v21 = vadd.f32 %v14070_v46, %v5289_v18  ;;  %v5291_v52 = vpop.f32.mrb[101].mxu1 }
 0x5e9   : > { %v5519_v13 = vadd.f32 %v14073_v10, %v5291_v52  ;;  %v5293_v8 = vpop.f32.mrb[102].mxu1  ;;  %6168 = vmatprep.mubr.bf16.mxu0 %v5772_v56 }
 0x5ea   : > { %v5520_v20 = vadd.f32 %v14070_v46, %v5293_v8  ;;  %v5295_v48 = vpop.f32.mrb[103].mxu1  ;;  %6169 = vmatmul.mubr.bf16.gmra.mrb[160].mxu0 %v5771_v29  ;;  %v5646_v6 = vmax.f32 %v5518_v21, 0.0 }
 0x5eb   : > { %v5521_v26 = vadd.f32 %v14073_v10, %v5295_v48  ;;  %v5647_v30 = vmax.f32 %v5519_v13, 0.0 }
 0x5ec   : > { %v5648_v51 = vmax.f32 %v5520_v20, 0.0 }
 0x5ed   : > { %v5649_v25 = vmax.f32 %v5521_v26, 0.0 }
 0x5ee   : > { %v5773_v44 = vpack.c.bf16 %v5648_v51, %v5646_v6 }
 0x5ef   : > { %v5774_v12 = vpack.c.bf16 %v5649_v25, %v5647_v30  ;;  %v5299_v2 = vpop.f32.mrb[104].mxu1  ;;  %v11694_v30 = vld [vmem:[%s15755_s9 + $0x44] ss:$8 sps:$4 sm:$0xff]  }
 0x5f0   : > { %v5522_v4 = vadd.f32 %v14070_v46, %v5299_v2  ;;  %v5301_v45 = vpop.f32.mrb[105].mxu1  ;;  %8329 = vmatprep.subr.bf16.mxu1 %v11694_v30  ;;  %v11698_v30 = vld [vmem:[%s15755_s9 + $0x60] ss:$8 sps:$4 sm:$0xff]  }
 0x5f1   : > { %v5523_v28 = vadd.f32 %v14073_v10, %v5301_v45  ;;  %v5303_v33 = vpop.f32.mrb[106].mxu1  ;;  %6178 = vmatprep.mubr.bf16.mxu0 %v5774_v12  ;;  %8330 = vmatpush1.bf16.msra.mxu1 %v11692_v17 }
 0x5f2   : > { %v5524_v23 = vadd.f32 %v14070_v46, %v5303_v33  ;;  %v5305_v5 = vpop.f32.mrb[107].mxu1  ;;  %6179 = vmatmul.mubr.bf16.gmra.mrb[164].mxu0 %v5773_v44  ;;  %v5650_v54 = vmax.f32 %v5522_v4, 0.0 }
 0x5f3   : > { %v5525_v39 = vadd.f32 %v14073_v10, %v5305_v5  ;;  %v5651_v34 = vmax.f32 %v5523_v28, 0.0 }
 0x5f4   : > { %v5652_v47 = vmax.f32 %v5524_v23, 0.0 }
 0x5f5   : > { %v5653_v55 = vmax.f32 %v5525_v39, 0.0 }
 0x5f6   : > { %v5775_v35 = vpack.c.bf16 %v5652_v47, %v5650_v54 }
 0x5f7   : > { %v5776_v38 = vpack.c.bf16 %v5653_v55, %v5651_v34  ;;  %v5309_v0 = vpop.f32.mrb[108].mxu1 }
 0x5f8   : > { %v5526_v36 = vadd.f32 %v14070_v46, %v5309_v0  ;;  %v5311_v57 = vpop.f32.mrb[109].mxu1 }
 0x5f9   : > { %v5527_v11 = vadd.f32 %v14073_v10, %v5311_v57  ;;  %v5313_v41 = vpop.f32.mrb[110].mxu1  ;;  %6188 = vmatprep.mubr.bf16.mxu0 %v5776_v38 }
 0x5fa   : > { %v5528_v1 = vadd.f32 %v14070_v46, %v5313_v41  ;;  %v5315_v58 = vpop.f32.mrb[111].mxu1  ;;  %6189 = vmatmul.mubr.bf16.gmra.mrb[168].mxu0 %v5775_v35  ;;  %v5654_v24 = vmax.f32 %v5526_v36, 0.0 }
 0x5fb   : > { %v5529_v15 = vadd.f32 %v14073_v10, %v5315_v58  ;;  %v5655_v27 = vmax.f32 %v5527_v11, 0.0 }
 0x5fc   : > { %v5656_v43 = vmax.f32 %v5528_v1, 0.0 }
 0x5fd   : > { %v5657_v50 = vmax.f32 %v5529_v15, 0.0 }
 0x5fe   : > { %v5777_v16 = vpack.c.bf16 %v5656_v43, %v5654_v24 }
 0x5ff   : > { %v5778_v32 = vpack.c.bf16 %v5657_v50, %v5655_v27  ;;  %v5319_v40 = vpop.f32.mrb[112].mxu1  ;;  %v11697_v27 = vld [vmem:[%s15755_s9 + $0x54] ss:$8 sps:$4 sm:$0xff]  }
 0x600   : > { %v5530_v22 = vadd.f32 %v14070_v46, %v5319_v40  ;;  %v5321_v59 = vpop.f32.mrb[113].mxu1  ;;  %8331 = vmatprep.subr.bf16.mxu1 %v11697_v27 }
 0x601   : > { %v5531_v53 = vadd.f32 %v14073_v10, %v5321_v59  ;;  %v5323_v19 = vpop.f32.mrb[114].mxu1  ;;  %6198 = vmatprep.mubr.bf16.mxu0 %v5778_v32  ;;  %8332 = vmatpush1.bf16.msra.mxu1 %v11695_v61 }
 0x602   : > { %v5532_v49 = vadd.f32 %v14070_v46, %v5323_v19  ;;  %v5325_v42 = vpop.f32.mrb[115].mxu1  ;;  %6199 = vmatmul.mubr.bf16.gmra.mrb[172].mxu0 %v5777_v16  ;;  %v5658_v3 = vmax.f32 %v5530_v22, 0.0 }
 0x603   : > { %v5533_v9 = vadd.f32 %v14073_v10, %v5325_v42  ;;  %v5659_v63 = vmax.f32 %v5531_v53, 0.0 }
 0x604   : > { %v5660_v37 = vmax.f32 %v5532_v49, 0.0 }
 0x605   : > { %v5661_v29 = vmax.f32 %v5533_v9, 0.0 }
 0x606   : > { %v5779_v56 = vpack.c.bf16 %v5660_v37, %v5658_v3 }
 0x607   : > { %v5780_v18 = vpack.c.bf16 %v5661_v29, %v5659_v63  ;;  %v5329_v21 = vpop.f32.mrb[116].mxu1 }
 0x608   : > { %v5534_v52 = vadd.f32 %v14070_v46, %v5329_v21  ;;  %v5331_v13 = vpop.f32.mrb[117].mxu1 }
 0x609   : > { %v5535_v8 = vadd.f32 %v14073_v10, %v5331_v13  ;;  %v5333_v20 = vpop.f32.mrb[118].mxu1  ;;  %6208 = vmatprep.mubr.bf16.mxu0 %v5780_v18 }
 0x60a   : > { %v5536_v48 = vadd.f32 %v14070_v46, %v5333_v20  ;;  %v5335_v26 = vpop.f32.mrb[119].mxu1  ;;  %6209 = vmatmul.mubr.bf16.gmra.mrb[176].mxu0 %v5779_v56  ;;  %v5662_v51 = vmax.f32 %v5534_v52, 0.0 }
 0x60b   : > { %v5537_v6 = vadd.f32 %v14073_v10, %v5335_v26  ;;  %v5663_v25 = vmax.f32 %v5535_v8, 0.0 }
 0x60c   : > { %v5664_v31 = vmax.f32 %v5536_v48, 0.0 }
 0x60d   : > { %v5665_v44 = vmax.f32 %v5537_v6, 0.0 }
 0x60e   : > { %v5781_v12 = vpack.c.bf16 %v5664_v31, %v5662_v51 }
 0x60f   : > { %v5782_v2 = vpack.c.bf16 %v5665_v44, %v5663_v25  ;;  %v5339_v4 = vpop.f32.mrb[120].mxu1  ;;  %v11700_v25 = vld [vmem:[%s15755_s9 + $0x64] ss:$8 sps:$4 sm:$0xff]  }
 0x610   : > { %v5538_v45 = vadd.f32 %v14070_v46, %v5339_v4  ;;  %v5341_v28 = vpop.f32.mrb[121].mxu1  ;;  %8333 = vmatprep.subr.bf16.mxu1 %v11700_v25 }
 0x611   : > { %v5539_v33 = vadd.f32 %v14073_v10, %v5341_v28  ;;  %v5343_v23 = vpop.f32.mrb[122].mxu1  ;;  %6218 = vmatprep.mubr.bf16.mxu0 %v5782_v2  ;;  %8334 = vmatpush1.bf16.msra.mxu1 %v11698_v30 }
 0x612   : > { %v5540_v5 = vadd.f32 %v14070_v46, %v5343_v23  ;;  %v5345_v39 = vpop.f32.mrb[123].mxu1  ;;  %6219 = vmatmul.mubr.bf16.gmra.mrb[180].mxu0 %v5781_v12  ;;  %v5666_v47 = vmax.f32 %v5538_v45, 0.0 }
 0x613   : > { %v5541_v54 = vadd.f32 %v14073_v10, %v5345_v39  ;;  %v5667_v55 = vmax.f32 %v5539_v33, 0.0 }
 0x614   : > { %v5668_v34 = vmax.f32 %v5540_v5, 0.0 }
 0x615   : > { %v5669_v35 = vmax.f32 %v5541_v54, 0.0 }
 0x616   : > { %v5783_v38 = vpack.c.bf16 %v5668_v34, %v5666_v47 }
 0x617   : > { %v5784_v0 = vpack.c.bf16 %v5669_v35, %v5667_v55  ;;  %v5349_v36 = vpop.f32.mrb[124].mxu1 }
 0x618   : > { %v5542_v57 = vadd.f32 %v14070_v46, %v5349_v36  ;;  %v5351_v11 = vpop.f32.mrb[125].mxu1 }
 0x619   : > { %v5543_v41 = vadd.f32 %v14073_v10, %v5351_v11  ;;  %v5353_v1 = vpop.f32.mrb[126].mxu1  ;;  %6228 = vmatprep.mubr.bf16.mxu0 %v5784_v0  ;;  %v10684_v11 = vld [vmem:[%s15752_s6 + $0x8] sm:$0x3] }
 0x61a   : > { %v5544_v58 = vadd.f32 %v14070_v46, %v5353_v1  ;;  %v5355_v15 = vpop.f32.mrb[127].mxu1  ;;  %6229 = vmatmul.mubr.bf16.gmra.mrb[184].mxu0 %v5783_v38  ;;  %v5670_v43 = vmax.f32 %v5542_v57, 0.0  ;;  %v14343_v27 = vrot.slane %v10684_v11, %v12715_v62 }
 0x61b   : > { %v5545_v24 = vadd.f32 %v14073_v10, %v5355_v15  ;;  %v5671_v50 = vmax.f32 %v5543_v41, 0.0 }
 0x61c   : > { %v5672_v14 = vmax.f32 %v5544_v58, 0.0 }
 0x61d   : > { %v5673_v16 = vmax.f32 %v5545_v24, 0.0 }
 0x61e   : > { %v5785_v32 = vpack.c.bf16 %v5672_v14, %v5670_v43  ;;  %v14339_v14 = vrot.slane %v10684_v11, %v12710_v60 }
 0x61f   : > { %v5786_v40 = vpack.c.bf16 %v5673_v16, %v5671_v50  ;;  %v5359_v22 = vpop.f32.mrb[128].mxu1 }
 0x620   : > { %v5546_v59 = vadd.f32 %v14070_v46, %v5359_v22  ;;  %v5361_v53 = vpop.f32.mrb[129].mxu1 }
 0x621   : > { %v5547_v19 = vadd.f32 %v14073_v10, %v5361_v53  ;;  %v5363_v49 = vpop.f32.mrb[130].mxu1  ;;  %6238 = vmatprep.mubr.bf16.mxu0 %v5786_v40  ;;  %v11703_v40 = vld [vmem:[%s15755_s9 + $0x74] ss:$8 sps:$4 sm:$0xff]  }
 0x622   : > { %v5548_v42 = vadd.f32 %v14070_v46, %v5363_v49  ;;  %v5365_v9 = vpop.f32.mrb[131].mxu1  ;;  %6239 = vmatmul.mubr.bf16.gmra.mrb[188].mxu0 %v5785_v32  ;;  %v5674_v37 = vmax.f32 %v5546_v59, 0.0  ;;  %v11701_v32 = vld [vmem:[%s15755_s9 + $0x70] ss:$8 sps:$4 sm:$0xff]   ;;  %8335 = vmatprep.subr.bf16.mxu1 %v11703_v40  ;;  %v11706_v40 = vld [vmem:[%s15755_s9 + $0x84] ss:$8 sps:$4 sm:$0xff]  }
 0x623   : > { %v5549_v3 = vadd.f32 %v14073_v10, %v5365_v9  ;;  %v5675_v29 = vmax.f32 %v5547_v19, 0.0  ;;  %8336 = vmatpush1.bf16.msra.mxu1 %v11701_v32  ;;  %v11704_v32 = vld [vmem:[%s15755_s9 + $0x80] ss:$8 sps:$4 sm:$0xff]  }
 0x624   : > { %v5676_v63 = vmax.f32 %v5548_v42, 0.0  ;;  %8337 = vmatprep.subr.bf16.mxu1 %v11706_v40 }
 0x625   : > { %v5677_v56 = vmax.f32 %v5549_v3, 0.0 }
 0x626   : > { %v5787_v18 = vpack.c.bf16 %v5676_v63, %v5674_v37 }
 0x627   : > { %v5788_v21 = vpack.c.bf16 %v5677_v56, %v5675_v29  ;;  %v5369_v52 = vpop.f32.mrb[132].mxu1  ;;  %8338 = vmatpush1.bf16.msra.mxu1 %v11704_v32 }
 0x628   : > { %v5550_v13 = vadd.f32 %v14070_v46, %v5369_v52  ;;  %v5371_v8 = vpop.f32.mrb[133].mxu1 }
 0x629   : > { %v5551_v20 = vadd.f32 %v14073_v10, %v5371_v8  ;;  %v5373_v48 = vpop.f32.mrb[134].mxu1  ;;  %6248 = vmatprep.mubr.bf16.mxu0 %v5788_v21 }
 0x62a   : > { %v5552_v26 = vadd.f32 %v14070_v46, %v5373_v48  ;;  %v5375_v6 = vpop.f32.mrb[135].mxu1  ;;  %6249 = vmatmul.mubr.bf16.gmra.mrb[192].mxu0 %v5787_v18  ;;  %v5678_v31 = vmax.f32 %v5550_v13, 0.0 }
 0x62b   : > { %v5553_v51 = vadd.f32 %v14073_v10, %v5375_v6  ;;  %v5679_v44 = vmax.f32 %v5551_v20, 0.0 }
 0x62c   : > { %v5680_v17 = vmax.f32 %v5552_v26, 0.0 }
 0x62d   : > { %v5681_v12 = vmax.f32 %v5553_v51, 0.0 }
 0x62e   : > { %v5789_v2 = vpack.c.bf16 %v5680_v17, %v5678_v31 }
 0x62f   : > { %v5790_v4 = vpack.c.bf16 %v5681_v12, %v5679_v44  ;;  %v5379_v45 = vpop.f32.mrb[136].mxu1 }
 0x630   : > { %v5554_v28 = vadd.f32 %v14070_v46, %v5379_v45  ;;  %v5381_v33 = vpop.f32.mrb[137].mxu1 }
 0x631   : > { %v5555_v23 = vadd.f32 %v14073_v10, %v5381_v33  ;;  %v5383_v5 = vpop.f32.mrb[138].mxu1  ;;  %6258 = vmatprep.mubr.bf16.mxu0 %v5790_v4 }
 0x632   : > { %v5556_v39 = vadd.f32 %v14070_v46, %v5383_v5  ;;  %v5385_v54 = vpop.f32.mrb[139].mxu1  ;;  %6259 = vmatmul.mubr.bf16.gmra.mrb[196].mxu0 %v5789_v2  ;;  %v5682_v34 = vmax.f32 %v5554_v28, 0.0 }
 0x633   : > { %v5557_v47 = vadd.f32 %v14073_v10, %v5385_v54  ;;  %v5683_v35 = vmax.f32 %v5555_v23, 0.0 }
 0x634   : > { %v5684_v55 = vmax.f32 %v5556_v39, 0.0 }
 0x635   : > { %v5685_v38 = vmax.f32 %v5557_v47, 0.0 }
 0x636   : > { %v5791_v0 = vpack.c.bf16 %v5684_v55, %v5682_v34 }
 0x637   : > { %v5792_v36 = vpack.c.bf16 %v5685_v38, %v5683_v35  ;;  %v5389_v57 = vpop.f32.mrb[140].mxu1 }
 0x638   : > { %v5558_v41 = vadd.f32 %v14070_v46, %v5389_v57  ;;  %v5391_v1 = vpop.f32.mrb[141].mxu1 }
 0x639   : > { %v5559_v58 = vadd.f32 %v14073_v10, %v5391_v1  ;;  %v5393_v15 = vpop.f32.mrb[142].mxu1  ;;  %6268 = vmatprep.mubr.bf16.mxu0 %v5792_v36 }
 0x63a   : > { %v5560_v24 = vadd.f32 %v14070_v46, %v5393_v15  ;;  %v5395_v43 = vpop.f32.mrb[143].mxu1  ;;  %6269 = vmatmul.mubr.bf16.gmra.mrb[200].mxu0 %v5791_v0  ;;  %v5686_v50 = vmax.f32 %v5558_v41, 0.0 }
 0x63b   : > { %v5561_v61 = vadd.f32 %v14073_v10, %v5395_v43  ;;  %v5687_v22 = vmax.f32 %v5559_v58, 0.0 }
 0x63c   : > { %v5688_v16 = vmax.f32 %v5560_v24, 0.0 }
 0x63d   : > { %v5689_v59 = vmax.f32 %v5561_v61, 0.0  ;;  %v6010_v53 = vpop.f32.mrb[96].mxu0 }
 0x63e   : > { %v5793_v19 = vpack.c.bf16 %v5688_v16, %v5686_v50  ;;  %v6011_v49 = vadd.f32 %v6010_v53, %v14339_v14  ;;  %v6012_v42 = vpop.f32.mrb[97].mxu0 }
 0x63f   : > { %v5794_v9 = vpack.c.bf16 %v5689_v59, %v5687_v22  ;;  %v6013_v3 = vadd.f32 %v6012_v42, %v14343_v27  ;;  %v5399_v37 = vpop.f32.mrb[144].mxu1  ;;  %v6014_v63 = vpop.f32.mrb[98].mxu0 }
 0x640   : > { %v5562_v29 = vadd.f32 %v14070_v46, %v5399_v37  ;;  %v6015_v56 = vadd.f32 %v6014_v63, %v14339_v14  ;;  %v5401_v18 = vpop.f32.mrb[145].mxu1  ;;  %v6016_v21 = vpop.f32.mrb[99].mxu0  ;;  %v6329_v20 = vmax.f32 %v6011_v49, 0.0 }
 0x641   : > { %v5563_v52 = vadd.f32 %v14073_v10, %v5401_v18  ;;  %v6017_v13 = vadd.f32 %v6016_v21, %v14343_v27  ;;  %v5403_v8 = vpop.f32.mrb[146].mxu1  ;;  %6278 = vmatprep.mubr.bf16.mxu0 %v5794_v9  ;;  %v6330_v51 = vmax.f32 %v6013_v3, 0.0 }
 0x642   : > { %v6331_v48 = vmax.f32 %v6015_v56, 0.0  ;;  %v5564_v26 = vadd.f32 %v14070_v46, %v5403_v8  ;;  %v5405_v6 = vpop.f32.mrb[147].mxu1  ;;  %6279 = vmatmul.mubr.bf16.gmra.mrb[204].mxu0 %v5793_v19  ;;  %v5690_v30 = vmax.f32 %v5562_v29, 0.0 }
 0x643   : > { %v6332_v31 = vmax.f32 %v6017_v13, 0.0  ;;  %v5565_v17 = vadd.f32 %v14073_v10, %v5405_v6  ;;  %v5691_v12 = vmax.f32 %v5563_v52, 0.0 }
 0x644   : > { %v14359_v25 = vpack.c.bf16 %v6331_v48, %v6329_v20  ;;  %v5692_v44 = vmax.f32 %v5564_v26, 0.0 }
 0x645   : > { %v5693_v2 = vmax.f32 %v5565_v17, 0.0  ;;  %v6020_v4 = vpop.f32.mrb[100].mxu0  ;;  %v14361_v45 = vpack.c.bf16 %v6332_v31, %v6330_v51 }
 0x646   : > { %v5795_v28 = vpack.c.bf16 %v5692_v44, %v5690_v30  ;;  %v6021_v33 = vadd.f32 %v6020_v4, %v14339_v14  ;;  %v6022_v23 = vpop.f32.mrb[101].mxu0 }
 0x647   : > { %v5796_v5 = vpack.c.bf16 %v5693_v2, %v5691_v12  ;;  %v6023_v39 = vadd.f32 %v6022_v23, %v14343_v27  ;;  %v5409_v54 = vpop.f32.mrb[148].mxu1  ;;  %v6024_v47 = vpop.f32.mrb[102].mxu0 }
 0x648   : > { %v5566_v34 = vadd.f32 %v14070_v46, %v5409_v54  ;;  %v6025_v55 = vadd.f32 %v6024_v47, %v14339_v14  ;;  %v5411_v35 = vpop.f32.mrb[149].mxu1  ;;  %v6026_v38 = vpop.f32.mrb[103].mxu0  ;;  %v6333_v11 = vmax.f32 %v6021_v33, 0.0 }
 0x649   : > { %v5567_v0 = vadd.f32 %v14073_v10, %v5411_v35  ;;  %v6027_v36 = vadd.f32 %v6026_v38, %v14343_v27  ;;  %v5413_v57 = vpop.f32.mrb[150].mxu1  ;;  %6288 = vmatprep.mubr.bf16.mxu0 %v5796_v5  ;;  %v6334_v15 = vmax.f32 %v6023_v39, 0.0 }
 0x64a   : > { %v6335_v41 = vmax.f32 %v6025_v55, 0.0  ;;  %v5568_v1 = vadd.f32 %v14070_v46, %v5413_v57  ;;  %v5415_v58 = vpop.f32.mrb[151].mxu1  ;;  %6289 = vmatmul.mubr.bf16.gmra.mrb[208].mxu0 %v5795_v28  ;;  %v5694_v61 = vmax.f32 %v5566_v34, 0.0 }
 0x64b   : > { %v6336_v24 = vmax.f32 %v6027_v36, 0.0  ;;  %v5569_v43 = vadd.f32 %v14073_v10, %v5415_v58  ;;  %v5695_v22 = vmax.f32 %v5567_v0, 0.0 }
 0x64c   : > { %v14371_v50 = vpack.c.bf16 %v6335_v41, %v6333_v11  ;;  %v5696_v16 = vmax.f32 %v5568_v1, 0.0 }
 0x64d   : > { %v5697_v59 = vmax.f32 %v5569_v43, 0.0  ;;  %v6030_v53 = vpop.f32.mrb[104].mxu0  ;;  %v14379_v19 = vpack.c.bf16 %v6336_v24, %v6334_v15 }
 0x64e   : > { %v5797_v49 = vpack.c.bf16 %v5696_v16, %v5694_v61  ;;  %v6031_v42 = vadd.f32 %v6030_v53, %v14339_v14  ;;  %v6032_v9 = vpop.f32.mrb[105].mxu0  ;;  %v11707_v53 = vld [vmem:[%s15755_s9 + $0x90] ss:$8 sps:$4 sm:$0xff]  }
 0x64f   : > { %v5798_v3 = vpack.c.bf16 %v5697_v59, %v5695_v22  ;;  %v6033_v37 = vadd.f32 %v6032_v9, %v14343_v27  ;;  %v5419_v63 = vpop.f32.mrb[152].mxu1  ;;  %v6034_v29 = vpop.f32.mrb[106].mxu0 }
 0x650   : > { %v5570_v56 = vadd.f32 %v14070_v46, %v5419_v63  ;;  %v6035_v18 = vadd.f32 %v6034_v29, %v14339_v14  ;;  %v5421_v21 = vpop.f32.mrb[153].mxu1  ;;  %v6036_v52 = vpop.f32.mrb[107].mxu0  ;;  %v6337_v48 = vmax.f32 %v6031_v42, 0.0 }
 0x651   : > { %v5571_v13 = vadd.f32 %v14073_v10, %v5421_v21  ;;  %v6037_v8 = vadd.f32 %v6036_v52, %v14343_v27  ;;  %v5423_v20 = vpop.f32.mrb[154].mxu1  ;;  %6298 = vmatprep.mubr.bf16.mxu0 %v5798_v3  ;;  %v6338_v31 = vmax.f32 %v6033_v37, 0.0 }
 0x652   : > { %v6339_v26 = vmax.f32 %v6035_v18, 0.0  ;;  %v5572_v6 = vadd.f32 %v14070_v46, %v5423_v20  ;;  %v5425_v51 = vpop.f32.mrb[155].mxu1  ;;  %6299 = vmatmul.mubr.bf16.gmra.mrb[212].mxu0 %v5797_v49  ;;  %v5698_v44 = vmax.f32 %v5570_v56, 0.0  ;;  %v11709_v49 = vld [vmem:[%s15755_s9 + $0x94] ss:$8 sps:$4 sm:$0xff]  }
 0x653   : > { %v6340_v17 = vmax.f32 %v6037_v8, 0.0  ;;  %v5573_v30 = vadd.f32 %v14073_v10, %v5425_v51  ;;  %v5699_v4 = vmax.f32 %v5571_v13, 0.0  ;;  %8339 = vmatprep.subr.bf16.mxu1 %v11709_v49 }
 0x654   : > { %v14389_v12 = vpack.c.bf16 %v6339_v26, %v6337_v48  ;;  %v5700_v2 = vmax.f32 %v5572_v6, 0.0  ;;  %8340 = vmatpush1.bf16.msra.mxu1 %v11707_v53 }
 0x655   : > { %v5701_v28 = vmax.f32 %v5573_v30, 0.0  ;;  %v6040_v33 = vpop.f32.mrb[108].mxu0  ;;  %v14391_v23 = vpack.c.bf16 %v6340_v17, %v6338_v31 }
 0x656   : > { %v5799_v5 = vpack.c.bf16 %v5700_v2, %v5698_v44  ;;  %v6041_v39 = vadd.f32 %v6040_v33, %v14339_v14  ;;  %v6042_v54 = vpop.f32.mrb[109].mxu0 }
 0x657   : > { %v5800_v47 = vpack.c.bf16 %v5701_v28, %v5699_v4  ;;  %v6043_v34 = vadd.f32 %v6042_v54, %v14343_v27  ;;  %v5429_v55 = vpop.f32.mrb[156].mxu1  ;;  %v6044_v35 = vpop.f32.mrb[110].mxu0 }
 0x658   : > { %v5574_v38 = vadd.f32 %v14070_v46, %v5429_v55  ;;  %v6045_v0 = vadd.f32 %v6044_v35, %v14339_v14  ;;  %v5431_v36 = vpop.f32.mrb[157].mxu1  ;;  %v6046_v57 = vpop.f32.mrb[111].mxu0  ;;  %v6341_v58 = vmax.f32 %v6041_v39, 0.0  ;;  %v11712_v55 = vld [vmem:[%s15755_s9 + $0xa4] ss:$8 sps:$4 sm:$0xff]  }
 0x659   : > { %v5575_v11 = vadd.f32 %v14073_v10, %v5431_v36  ;;  %v6047_v41 = vadd.f32 %v6046_v57, %v14343_v27  ;;  %v5433_v1 = vpop.f32.mrb[158].mxu1  ;;  %6308 = vmatprep.mubr.bf16.mxu0 %v5800_v47  ;;  %v6342_v61 = vmax.f32 %v6043_v34, 0.0  ;;  %v11710_v34 = vld [vmem:[%s15755_s9 + $0xa0] ss:$8 sps:$4 sm:$0xff]   ;;  %8341 = vmatprep.subr.bf16.mxu1 %v11712_v55 }
 0x65a   : > { %v6343_v15 = vmax.f32 %v6045_v0, 0.0  ;;  %v5576_v24 = vadd.f32 %v14070_v46, %v5433_v1  ;;  %v5435_v43 = vpop.f32.mrb[159].mxu1  ;;  %6309 = vmatmul.mubr.bf16.gmra.mrb[216].mxu0 %v5799_v5  ;;  %v5702_v40 = vmax.f32 %v5574_v38, 0.0  ;;  %8342 = vmatpush1.bf16.msra.mxu1 %v11710_v34 }
 0x65b   : > { %v6344_v16 = vmax.f32 %v6047_v41, 0.0  ;;  %v5577_v32 = vadd.f32 %v14073_v10, %v5435_v43  ;;  %v5703_v42 = vmax.f32 %v5575_v11, 0.0 }
 0x65c   : > { %v14401_v22 = vpack.c.bf16 %v6343_v15, %v6341_v58  ;;  %v5704_v59 = vmax.f32 %v5576_v24, 0.0 }
 0x65d   : > { %v5705_v46 = vmax.f32 %v5577_v32, 0.0  ;;  %v6050_v9 = vpop.f32.mrb[112].mxu0  ;;  %v14409_v3 = vpack.c.bf16 %v6344_v16, %v6342_v61 }
 0x65e   : > { %v5801_v37 = vpack.c.bf16 %v5704_v59, %v5702_v40  ;;  %v6051_v10 = vadd.f32 %v6050_v9, %v14339_v14  ;;  %v6052_v63 = vpop.f32.mrb[113].mxu0 }
 0x65f   : > { %v5802_v29 = vpack.c.bf16 %v5705_v46, %v5703_v42  ;;  %v6053_v56 = vadd.f32 %v6052_v63, %v14343_v27  ;;  %v6054_v18 = vpop.f32.mrb[114].mxu0  ;;  %v11713_v63 = vld [vmem:[%s15755_s9 + $0xb0] ss:$8 sps:$4 sm:$0xff]  }
 0x660   : > { %v6055_v21 = vadd.f32 %v6054_v18, %v14339_v14  ;;  %v6056_v52 = vpop.f32.mrb[115].mxu0  ;;  %v6345_v8 = vmax.f32 %v6051_v10, 0.0 }
 0x661   : > { %v6057_v13 = vadd.f32 %v6056_v52, %v14343_v27  ;;  %6318 = vmatprep.mubr.bf16.mxu0 %v5802_v29  ;;  %v6346_v48 = vmax.f32 %v6053_v56, 0.0  ;;  %v11715_v29 = vld [vmem:[%s15755_s9 + $0xb4] ss:$8 sps:$4 sm:$0xff]  }
 0x662   : > { %v6347_v20 = vmax.f32 %v6055_v21, 0.0  ;;  %6319 = vmatmul.mubr.bf16.gmra.mrb[220].mxu0 %v5801_v37  ;;  %8343 = vmatprep.subr.bf16.mxu1 %v11715_v29 }
 0x663   : > { %v6348_v26 = vmax.f32 %v6057_v13, 0.0  ;;  %6759 = vmatprep.mubr.bf16.mxu0 %v14361_v45  ;;  %8344 = vmatpush1.bf16.msra.mxu1 %v11713_v63 }
 0x664   : > { %v14416_v6 = vpack.c.bf16 %v6347_v20, %v6345_v8 }
 0x665   : > { %v6060_v51 = vpop.f32.mrb[116].mxu0  ;;  %v14418_v31 = vpack.c.bf16 %v6348_v26, %v6346_v48 }
 0x666   : > { %v6061_v17 = vadd.f32 %v6060_v51, %v14339_v14  ;;  %v6062_v30 = vpop.f32.mrb[117].mxu0 }
 0x667   : > { %v6063_v44 = vadd.f32 %v6062_v30, %v14343_v27  ;;  %v6064_v2 = vpop.f32.mrb[118].mxu0 }
 0x668   : > { %v6065_v4 = vadd.f32 %v6064_v2, %v14339_v14  ;;  %v6066_v28 = vpop.f32.mrb[119].mxu0  ;;  %v6349_v5 = vmax.f32 %v6061_v17, 0.0 }
 0x669   : > { %v6067_v33 = vadd.f32 %v6066_v28, %v14343_v27  ;;  %v6350_v45 = vmax.f32 %v6063_v44, 0.0 }
 0x66a   : > { %v6351_v39 = vmax.f32 %v6065_v4, 0.0  ;;  %6760 = vmatmul.mubr.bf16.vlgmr.msra.gmra.mrb[224].mxu0 %v14359_v25 }
 0x66b   : > { %v6352_v54 = vmax.f32 %v6067_v33, 0.0  ;;  %6769 = vmatprep.mubr.bf16.mxu0 %v14379_v19 }
 0x66c   : > { %v14426_v47 = vpack.c.bf16 %v6351_v39, %v6349_v5 }
 0x66d   : > { %v6070_v35 = vpop.f32.mrb[120].mxu0  ;;  %v14434_v38 = vpack.c.bf16 %v6352_v54, %v6350_v45 }
 0x66e   : > { %v6071_v0 = vadd.f32 %v6070_v35, %v14339_v14  ;;  %v6072_v25 = vpop.f32.mrb[121].mxu0 }
 0x66f   : > { %v6073_v36 = vadd.f32 %v6072_v25, %v14343_v27  ;;  %v6074_v19 = vpop.f32.mrb[122].mxu0  ;;  %v11718_v25 = vld [vmem:[%s15755_s9 + $0xc4] ss:$8 sps:$4 sm:$0xff]  }
 0x670   : > { %v6075_v57 = vadd.f32 %v6074_v19, %v14339_v14  ;;  %v6076_v11 = vpop.f32.mrb[123].mxu0  ;;  %v6353_v1 = vmax.f32 %v6071_v0, 0.0  ;;  %v11716_v0 = vld [vmem:[%s15755_s9 + $0xc0] ss:$8 sps:$4 sm:$0xff]   ;;  %8345 = vmatprep.subr.bf16.mxu1 %v11718_v25 }
 0x671   : > { %v6077_v41 = vadd.f32 %v6076_v11, %v14343_v27  ;;  %v6354_v15 = vmax.f32 %v6073_v36, 0.0  ;;  %8346 = vmatpush1.bf16.msra.mxu1 %v11716_v0 }
 0x672   : > { %v6355_v58 = vmax.f32 %v6075_v57, 0.0  ;;  %6770 = vmatmul.mubr.bf16.gmra.mrb[228].mxu0 %v14371_v50 }
 0x673   : > { %v6356_v24 = vmax.f32 %v6077_v41, 0.0  ;;  %6779 = vmatprep.mubr.bf16.mxu0 %v14391_v23 }
 0x674   : > { %v14442_v43 = vpack.c.bf16 %v6355_v58, %v6353_v1 }
 0x675   : > { %v6080_v61 = vpop.f32.mrb[124].mxu0  ;;  %v14444_v16 = vpack.c.bf16 %v6356_v24, %v6354_v15 }
 0x676   : > { %v6081_v32 = vadd.f32 %v6080_v61, %v14339_v14  ;;  %v6082_v40 = vpop.f32.mrb[125].mxu0 }
 0x677   : > { %v6083_v59 = vadd.f32 %v6082_v40, %v14343_v27  ;;  %v6084_v53 = vpop.f32.mrb[126].mxu0 }
 0x678   : > { %v6085_v49 = vadd.f32 %v6084_v53, %v14339_v14  ;;  %v6086_v42 = vpop.f32.mrb[127].mxu0  ;;  %v6357_v46 = vmax.f32 %v6081_v32, 0.0 }
 0x679   : > { %v6087_v50 = vadd.f32 %v6086_v42, %v14343_v27  ;;  %v6358_v23 = vmax.f32 %v6083_v59, 0.0 }
 0x67a   : > { %v6359_v9 = vmax.f32 %v6085_v49, 0.0  ;;  %6780 = vmatmul.mubr.bf16.gmra.mrb[232].mxu0 %v14389_v12 }
 0x67b   : > { %v6360_v37 = vmax.f32 %v6087_v50, 0.0  ;;  %6789 = vmatprep.mubr.bf16.mxu0 %v14409_v3 }
 0x67c   : > { %v14452_v10 = vpack.c.bf16 %v6359_v9, %v6357_v46 }
 0x67d   : > { %v6090_v56 = vpop.f32.mrb[128].mxu0  ;;  %v14460_v18 = vpack.c.bf16 %v6360_v37, %v6358_v23 }
 0x67e   : > { %v6091_v21 = vadd.f32 %v6090_v56, %v14339_v14  ;;  %v6092_v12 = vpop.f32.mrb[129].mxu0 }
 0x67f   : > { %v6093_v52 = vadd.f32 %v6092_v12, %v14343_v27  ;;  %v6094_v3 = vpop.f32.mrb[130].mxu0  ;;  %v11721_v12 = vld [vmem:[%s15755_s9 + $0xd4] ss:$8 sps:$4 sm:$0xff]  }
 0x680   : > { %v6095_v13 = vadd.f32 %v6094_v3, %v14339_v14  ;;  %v6096_v8 = vpop.f32.mrb[131].mxu0  ;;  %v6361_v48 = vmax.f32 %v6091_v21, 0.0  ;;  %v11719_v21 = vld [vmem:[%s15755_s9 + $0xd0] ss:$8 sps:$4 sm:$0xff]   ;;  %8347 = vmatprep.subr.bf16.mxu1 %v11721_v12 }
 0x681   : > { %v6097_v20 = vadd.f32 %v6096_v8, %v14343_v27  ;;  %v6362_v51 = vmax.f32 %v6093_v52, 0.0  ;;  %8348 = vmatpush1.bf16.msra.mxu1 %v11719_v21 }
 0x682   : > { %v6363_v26 = vmax.f32 %v6095_v13, 0.0  ;;  %6790 = vmatmul.mubr.bf16.gmra.mrb[236].mxu0 %v14401_v22 }
 0x683   : > { %v6364_v17 = vmax.f32 %v6097_v20, 0.0  ;;  %6799 = vmatprep.mubr.bf16.mxu0 %v14418_v31 }
 0x684   : > { %v14468_v30 = vpack.c.bf16 %v6363_v26, %v6361_v48 }
 0x685   : > { %v6100_v44 = vpop.f32.mrb[132].mxu0  ;;  %v14470_v2 = vpack.c.bf16 %v6364_v17, %v6362_v51 }
 0x686   : > { %v6101_v4 = vadd.f32 %v6100_v44, %v14339_v14  ;;  %v6102_v28 = vpop.f32.mrb[133].mxu0 }
 0x687   : > { %v6103_v33 = vadd.f32 %v6102_v28, %v14343_v27  ;;  %v6104_v5 = vpop.f32.mrb[134].mxu0 }
 0x688   : > { %v6105_v39 = vadd.f32 %v6104_v5, %v14339_v14  ;;  %v6106_v45 = vpop.f32.mrb[135].mxu0  ;;  %v6365_v54 = vmax.f32 %v6101_v4, 0.0 }
 0x689   : > { %v6107_v22 = vadd.f32 %v6106_v45, %v14343_v27  ;;  %v6366_v31 = vmax.f32 %v6103_v33, 0.0  ;;  %v11722_v33 = vld [vmem:[%s15758_s12] sm:$0xff]  }
 0x68a   : > { %v6367_v34 = vmax.f32 %v6105_v39, 0.0  ;;  %6800 = vmatmul.mubr.bf16.gmra.mrb[240].mxu0 %v14416_v6 }
 0x68b   : > { %v6368_v55 = vmax.f32 %v6107_v22, 0.0  ;;  %6809 = vmatprep.mubr.bf16.mxu0 %v14434_v38  ;;  %8995 = vmatpush1.bf16.msra.mxu0 %v11722_v33 }
 0x68c   : > { %v14478_v35 = vpack.c.bf16 %v6367_v34, %v6365_v54  ;;  %8996 = vmatprep.subr.bf16.mxu0 %v12146_v7 }
 0x68d   : > { %v6110_v36 = vpop.f32.mrb[136].mxu0  ;;  %v14486_v19 = vpack.c.bf16 %v6368_v55, %v6366_v31 }
 0x68e   : > { %v6111_v57 = vadd.f32 %v6110_v36, %v14339_v14  ;;  %v6112_v6 = vpop.f32.mrb[137].mxu0 }
 0x68f   : > { %v6113_v11 = vadd.f32 %v6112_v6, %v14343_v27  ;;  %v6114_v38 = vpop.f32.mrb[138].mxu0  ;;  %v11723_v6 = vld [vmem:[%s15755_s9 + $0xe0] ss:$8 sps:$4 sm:$0xff]  }
 0x690   : > { %v6115_v41 = vadd.f32 %v6114_v38, %v14339_v14  ;;  %v6116_v1 = vpop.f32.mrb[139].mxu0  ;;  %v6369_v15 = vmax.f32 %v6111_v57, 0.0 }
 0x691   : > { %v6117_v58 = vadd.f32 %v6116_v1, %v14343_v27  ;;  %v6370_v61 = vmax.f32 %v6113_v11, 0.0  ;;  %v11725_v11 = vld [vmem:[%s15755_s9 + $0xe4] ss:$8 sps:$4 sm:$0xff]  }
 0x692   : > { %v6371_v24 = vmax.f32 %v6115_v41, 0.0  ;;  %6810 = vmatmul.mubr.bf16.gmra.mrb[244].mxu0 %v14426_v47  ;;  %8349 = vmatprep.subr.bf16.mxu1 %v11725_v11 }
 0x693   : > { %v6372_v32 = vmax.f32 %v6117_v58, 0.0  ;;  %6819 = vmatprep.mubr.bf16.mxu0 %v14444_v16  ;;  %8350 = vmatpush1.bf16.msra.mxu1 %v11723_v6 }
 0x694   : > { %v14494_v40 = vpack.c.bf16 %v6371_v24, %v6369_v15 }
 0x695   : > { %v6120_v59 = vpop.f32.mrb[140].mxu0  ;;  %v14496_v53 = vpack.c.bf16 %v6372_v32, %v6370_v61 }
 0x696   : > { %v6121_v49 = vadd.f32 %v6120_v59, %v14339_v14  ;;  %v6122_v42 = vpop.f32.mrb[141].mxu0 }
 0x697   : > { %v6123_v50 = vadd.f32 %v6122_v42, %v14343_v27  ;;  %v6124_v46 = vpop.f32.mrb[142].mxu0 }
 0x698   : > { %v6125_v9 = vadd.f32 %v6124_v46, %v14339_v14  ;;  %v6126_v23 = vpop.f32.mrb[143].mxu0  ;;  %v6373_v37 = vmax.f32 %v6121_v49, 0.0  ;;  %v11726_v46 = vld [vmem:[%s15758_s12 + $0x8] sm:$0xff]  }
 0x699   : > { %v6127_v47 = vadd.f32 %v6126_v23, %v14343_v27  ;;  %v6374_v16 = vmax.f32 %v6123_v50, 0.0  ;;  %8997 = vmatpush1.bf16.msra.mxu0 %v11726_v46 }
 0x69a   : > { %v6375_v63 = vmax.f32 %v6125_v9, 0.0  ;;  %6820 = vmatmul.mubr.bf16.gmra.mrb[248].mxu0 %v14442_v43  ;;  %8998 = vmatprep.subr.bf16.mxu0 %v12146_v7 }
 0x69b   : > { %v6376_v29 = vmax.f32 %v6127_v47, 0.0  ;;  %6829 = vmatprep.mubr.bf16.mxu0 %v14460_v18 }
 0x69c   : > { %v14504_v56 = vpack.c.bf16 %v6375_v63, %v6373_v37 }
 0x69d   : > { %v6130_v52 = vpop.f32.mrb[144].mxu0  ;;  %v14512_v3 = vpack.c.bf16 %v6376_v29, %v6374_v16 }
 0x69e   : > { %v6131_v13 = vadd.f32 %v6130_v52, %v14339_v14  ;;  %v6132_v43 = vpop.f32.mrb[145].mxu0 }
 0x69f   : > { %v6133_v8 = vadd.f32 %v6132_v43, %v14343_v27  ;;  %v6134_v18 = vpop.f32.mrb[146].mxu0 }
 0x6a0   : > { %v6135_v20 = vadd.f32 %v6134_v18, %v14339_v14  ;;  %v6136_v48 = vpop.f32.mrb[147].mxu0  ;;  %v6377_v51 = vmax.f32 %v6131_v13, 0.0  ;;  %v11729_v18 = vld [vmem:[%s15755_s9 + $0xf4] ss:$8 sps:$4 sm:$0xff]  }
 0x6a1   : > { %v6137_v26 = vadd.f32 %v6136_v48, %v14343_v27  ;;  %v6378_v44 = vmax.f32 %v6133_v8, 0.0  ;;  %v11727_v8 = vld [vmem:[%s15755_s9 + $0xf0] ss:$8 sps:$4 sm:$0xff]   ;;  %8351 = vmatprep.subr.bf16.mxu1 %v11729_v18 }
 0x6a2   : > { %v6379_v17 = vmax.f32 %v6135_v20, 0.0  ;;  %6830 = vmatmul.mubr.bf16.gmra.mrb[252].mxu0 %v14452_v10  ;;  %8352 = vmatpush1.bf16.msra.mxu1 %v11727_v8 }
 0x6a3   : > { %v6380_v4 = vmax.f32 %v6137_v26, 0.0  ;;  %6839 = vmatprep.mubr.bf16.mxu0 %v14470_v2 }
 0x6a4   : > { %v14520_v28 = vpack.c.bf16 %v6379_v17, %v6377_v51 }
 0x6a5   : > { %v6140_v5 = vpop.f32.mrb[148].mxu0  ;;  %v14525_v39 = vpack.c.bf16 %v6380_v4, %v6378_v44 }
 0x6a6   : > { %v6141_v45 = vadd.f32 %v6140_v5, %v14339_v14  ;;  %v6142_v22 = vpop.f32.mrb[149].mxu0 }
 0x6a7   : > { %v6143_v54 = vadd.f32 %v6142_v22, %v14343_v27  ;;  %v6144_v10 = vpop.f32.mrb[150].mxu0 }
 0x6a8   : > { %v6145_v2 = vadd.f32 %v6144_v10, %v14339_v14  ;;  %v6146_v34 = vpop.f32.mrb[151].mxu0  ;;  %v6381_v55 = vmax.f32 %v6141_v45, 0.0 }
 0x6a9   : > { %v6147_v31 = vadd.f32 %v6146_v34, %v14343_v27  ;;  %v6382_v25 = vmax.f32 %v6143_v54, 0.0  ;;  %v11730_v34 = vld [vmem:[%s15758_s12 + $0x10] sm:$0xff]  }
 0x6aa   : > { %v6383_v0 = vmax.f32 %v6145_v2, 0.0  ;;  %6840 = vmatmul.mubr.bf16.gmra.mrb[0].mxu0 %v14468_v30 }
 0x6ab   : > { %v6384_v36 = vmax.f32 %v6147_v31, 0.0  ;;  %6849 = vmatprep.mubr.bf16.mxu0 %v14486_v19  ;;  %8999 = vmatpush1.bf16.msra.mxu0 %v11730_v34 }
 0x6ac   : > { %v14534_v57 = vpack.c.bf16 %v6383_v0, %v6381_v55  ;;  %9000 = vmatprep.subr.bf16.mxu0 %v12146_v7 }
 0x6ad   : > { %v6150_v38 = vpop.f32.mrb[152].mxu0  ;;  %v14542_v41 = vpack.c.bf16 %v6384_v36, %v6382_v25 }
 0x6ae   : > { %v6151_v1 = vadd.f32 %v6150_v38, %v14339_v14  ;;  %v6152_v30 = vpop.f32.mrb[153].mxu0 }
 0x6af   : > { %v6153_v58 = vadd.f32 %v6152_v30, %v14343_v27  ;;  %v6154_v19 = vpop.f32.mrb[154].mxu0 }
 0x6b0   : > { %v6155_v15 = vadd.f32 %v6154_v19, %v14339_v14  ;;  %v6156_v24 = vpop.f32.mrb[155].mxu0  ;;  %v6385_v32 = vmax.f32 %v6151_v1, 0.0 }
 0x6b1   : > { %v6157_v61 = vadd.f32 %v6156_v24, %v14343_v27  ;;  %v6386_v49 = vmax.f32 %v6153_v58, 0.0 }
 0x6b2   : > { %v6387_v59 = vmax.f32 %v6155_v15, 0.0  ;;  %6850 = vmatmul.mubr.bf16.gmra.mrb[4].mxu0 %v14478_v35 }
 0x6b3   : > { %v6388_v42 = vmax.f32 %v6157_v61, 0.0  ;;  %6859 = vmatprep.mubr.bf16.mxu0 %v14496_v53 }
 0x6b4   : > { %v14550_v50 = vpack.c.bf16 %v6387_v59, %v6385_v32 }
 0x6b5   : > { %v6160_v9 = vpop.f32.mrb[156].mxu0  ;;  %v14555_v23 = vpack.c.bf16 %v6388_v42, %v6386_v49 }
 0x6b6   : > { %v6161_v47 = vadd.f32 %v6160_v9, %v14339_v14  ;;  %v6162_v37 = vpop.f32.mrb[157].mxu0 }
 0x6b7   : > { %v6163_v63 = vadd.f32 %v6162_v37, %v14343_v27  ;;  %v6164_v35 = vpop.f32.mrb[158].mxu0 }
 0x6b8   : > { %v6165_v53 = vadd.f32 %v6164_v35, %v14339_v14  ;;  %v6166_v16 = vpop.f32.mrb[159].mxu0  ;;  %v6389_v21 = vmax.f32 %v6161_v47, 0.0  ;;  %v11731_v35 = vld [vmem:[%s15758_s12 + $0x18] sm:$0xff]  }
 0x6b9   : > { %v6167_v29 = vadd.f32 %v6166_v16, %v14343_v27  ;;  %v6390_v52 = vmax.f32 %v6163_v63, 0.0  ;;  %9001 = vmatpush1.bf16.msra.mxu0 %v11731_v35 }
 0x6ba   : > { %v6391_v12 = vmax.f32 %v6165_v53, 0.0  ;;  %6860 = vmatmul.mubr.bf16.gmra.mrb[8].mxu0 %v14494_v40  ;;  %9002 = vmatprep.subr.bf16.mxu0 %v12146_v7 }
 0x6bb   : > { %v6392_v13 = vmax.f32 %v6167_v29, 0.0  ;;  %6869 = vmatprep.mubr.bf16.mxu0 %v14512_v3 }
 0x6bc   : > { %v14564_v43 = vpack.c.bf16 %v6391_v12, %v6389_v21 }
 0x6bd   : > { %v6170_v20 = vpop.f32.mrb[160].mxu0  ;;  %v14572_v48 = vpack.c.bf16 %v6392_v13, %v6390_v52 }
 0x6be   : > { %v6171_v26 = vadd.f32 %v6170_v20, %v14339_v14  ;;  %v6172_v40 = vpop.f32.mrb[161].mxu0 }
 0x6bf   : > { %v6173_v51 = vadd.f32 %v6172_v40, %v14343_v27  ;;  %v6174_v3 = vpop.f32.mrb[162].mxu0 }
 0x6c0   : > { %v6175_v17 = vadd.f32 %v6174_v3, %v14339_v14  ;;  %v6176_v44 = vpop.f32.mrb[163].mxu0  ;;  %v6393_v33 = vmax.f32 %v6171_v26, 0.0 }
 0x6c1   : > { %v6177_v4 = vadd.f32 %v6176_v44, %v14343_v27  ;;  %v6394_v45 = vmax.f32 %v6173_v51, 0.0 }
 0x6c2   : > { %v6395_v5 = vmax.f32 %v6175_v17, 0.0  ;;  %6870 = vmatmul.mubr.bf16.gmra.mrb[12].mxu0 %v14504_v56 }
 0x6c3   : > { %v6396_v22 = vmax.f32 %v6177_v4, 0.0  ;;  %6879 = vmatprep.mubr.bf16.mxu0 %v14525_v39 }
 0x6c4   : > { %v14580_v54 = vpack.c.bf16 %v6395_v5, %v6393_v33 }
 0x6c5   : > { %v6180_v10 = vpop.f32.mrb[164].mxu0  ;;  %v14582_v2 = vpack.c.bf16 %v6396_v22, %v6394_v45 }
 0x6c6   : > { %v6181_v31 = vadd.f32 %v6180_v10, %v14339_v14  ;;  %v6182_v55 = vpop.f32.mrb[165].mxu0 }
 0x6c7   : > { %v6183_v0 = vadd.f32 %v6182_v55, %v14343_v27  ;;  %v6184_v25 = vpop.f32.mrb[166].mxu0  ;;  %v11732_v55 = vld [vmem:[%s15758_s12 + $0x20] sm:$0xff]  }
 0x6c8   : > { %v6185_v56 = vadd.f32 %v6184_v25, %v14339_v14  ;;  %v6186_v36 = vpop.f32.mrb[167].mxu0  ;;  %v6397_v6 = vmax.f32 %v6181_v31, 0.0  ;;  %9003 = vmatpush1.bf16.msra.mxu0 %v11732_v55 }
 0x6c9   : > { %v6187_v39 = vadd.f32 %v6186_v36, %v14343_v27  ;;  %v6398_v38 = vmax.f32 %v6183_v0, 0.0  ;;  %9004 = vmatprep.subr.bf16.mxu0 %v12146_v7 }
 0x6ca   : > { %v6399_v11 = vmax.f32 %v6185_v56, 0.0  ;;  %6880 = vmatmul.mubr.bf16.gmra.mrb[16].mxu0 %v14520_v28 }
 0x6cb   : > { %v6400_v1 = vmax.f32 %v6187_v39, 0.0  ;;  %6889 = vmatprep.mubr.bf16.mxu0 %v14542_v41 }
 0x6cc   : > { %v14594_v30 = vpack.c.bf16 %v6399_v11, %v6397_v6 }
 0x6cd   : > { %v6190_v58 = vpop.f32.mrb[168].mxu0  ;;  %v14596_v19 = vpack.c.bf16 %v6400_v1, %v6398_v38 }
 0x6ce   : > { %v6191_v15 = vadd.f32 %v6190_v58, %v14339_v14  ;;  %v6192_v24 = vpop.f32.mrb[169].mxu0 }
 0x6cf   : > { %v6193_v61 = vadd.f32 %v6192_v24, %v14343_v27  ;;  %v6194_v32 = vpop.f32.mrb[170].mxu0 }
 0x6d0   : > { %v6195_v59 = vadd.f32 %v6194_v32, %v14339_v14  ;;  %v6196_v49 = vpop.f32.mrb[171].mxu0  ;;  %v6401_v42 = vmax.f32 %v6191_v15, 0.0 }
 0x6d1   : > { %v6197_v28 = vadd.f32 %v6196_v49, %v14343_v27  ;;  %v6402_v41 = vmax.f32 %v6193_v61, 0.0 }
 0x6d2   : > { %v6403_v46 = vmax.f32 %v6195_v59, 0.0  ;;  %6890 = vmatmul.mubr.bf16.gmra.mrb[20].mxu0 %v14534_v57 }
 0x6d3   : > { %v6404_v9 = vmax.f32 %v6197_v28, 0.0  ;;  %6899 = vmatprep.mubr.bf16.mxu0 %v14555_v23 }
 0x6d4   : > { %v14604_v47 = vpack.c.bf16 %v6403_v46, %v6401_v42 }
 0x6d5   : > { %v6200_v37 = vpop.f32.mrb[172].mxu0  ;;  %v14606_v63 = vpack.c.bf16 %v6404_v9, %v6402_v41 }
 0x6d6   : > { %v6201_v53 = vadd.f32 %v6200_v37, %v14339_v14  ;;  %v6202_v16 = vpop.f32.mrb[173].mxu0 }
 0x6d7   : > { %v6203_v29 = vadd.f32 %v6202_v16, %v14343_v27  ;;  %v6204_v21 = vpop.f32.mrb[174].mxu0  ;;  %v11733_v16 = vld [vmem:[%s15758_s12 + $0x28] sm:$0xff]  }
 0x6d8   : > { %v6205_v57 = vadd.f32 %v6204_v21, %v14339_v14  ;;  %v6206_v12 = vpop.f32.mrb[175].mxu0  ;;  %v6405_v52 = vmax.f32 %v6201_v53, 0.0  ;;  %9005 = vmatpush1.bf16.msra.mxu0 %v11733_v16 }
 0x6d9   : > { %v6207_v23 = vadd.f32 %v6206_v12, %v14343_v27  ;;  %v6406_v8 = vmax.f32 %v6203_v29, 0.0  ;;  %9006 = vmatprep.subr.bf16.mxu0 %v12146_v7 }
 0x6da   : > { %v6407_v13 = vmax.f32 %v6205_v57, 0.0  ;;  %6900 = vmatmul.mubr.bf16.gmra.mrb[24].mxu0 %v14550_v50 }
 0x6db   : > { %v6408_v18 = vmax.f32 %v6207_v23, 0.0  ;;  %6909 = vmatprep.mubr.bf16.mxu0 %v14572_v48 }
 0x6dc   : > { %v14618_v20 = vpack.c.bf16 %v6407_v13, %v6405_v52 }
 0x6dd   : > { %v6210_v26 = vpop.f32.mrb[176].mxu0  ;;  %v14620_v40 = vpack.c.bf16 %v6408_v18, %v6406_v8 }
 0x6de   : > { %v6211_v51 = vadd.f32 %v6210_v26, %v14339_v14  ;;  %v6212_v3 = vpop.f32.mrb[177].mxu0 }
 0x6df   : > { %v6213_v17 = vadd.f32 %v6212_v3, %v14343_v27  ;;  %v6214_v44 = vpop.f32.mrb[178].mxu0 }
 0x6e0   : > { %v6215_v4 = vadd.f32 %v6214_v44, %v14339_v14  ;;  %v6216_v33 = vpop.f32.mrb[179].mxu0  ;;  %v6409_v5 = vmax.f32 %v6211_v51, 0.0 }
 0x6e1   : > { %v6217_v50 = vadd.f32 %v6216_v33, %v14343_v27  ;;  %v6410_v48 = vmax.f32 %v6213_v17, 0.0 }
 0x6e2   : > { %v6411_v45 = vmax.f32 %v6215_v4, 0.0  ;;  %6910 = vmatmul.mubr.bf16.gmra.mrb[28].mxu0 %v14564_v43 }
 0x6e3   : > { %v6412_v22 = vmax.f32 %v6217_v50, 0.0  ;;  %6919 = vmatprep.mubr.bf16.mxu0 %v14582_v2 }
 0x6e4   : > { %v14628_v10 = vpack.c.bf16 %v6411_v45, %v6409_v5 }
 0x6e5   : > { %v6220_v34 = vpop.f32.mrb[180].mxu0  ;;  %v14630_v31 = vpack.c.bf16 %v6412_v22, %v6410_v48 }
 0x6e6   : > { %v6221_v0 = vadd.f32 %v6220_v34, %v14339_v14  ;;  %v6222_v25 = vpop.f32.mrb[181].mxu0 }
 0x6e7   : > { %v6223_v56 = vadd.f32 %v6222_v25, %v14343_v27  ;;  %v6224_v36 = vpop.f32.mrb[182].mxu0  ;;  %v11734_v25 = vld [vmem:[%s15758_s12 + $0x30] sm:$0xff]  }
 0x6e8   : > { %v6225_v43 = vadd.f32 %v6224_v36, %v14339_v14  ;;  %v6226_v39 = vpop.f32.mrb[183].mxu0  ;;  %v6413_v6 = vmax.f32 %v6221_v0, 0.0  ;;  %9007 = vmatpush1.bf16.msra.mxu0 %v11734_v25 }
 0x6e9   : > { %v6227_v2 = vadd.f32 %v6226_v39, %v14343_v27  ;;  %v6414_v38 = vmax.f32 %v6223_v56, 0.0  ;;  %9008 = vmatprep.subr.bf16.mxu0 %v12146_v7 }
 0x6ea   : > { %v6415_v11 = vmax.f32 %v6225_v43, 0.0  ;;  %6920 = vmatmul.mubr.bf16.gmra.mrb[32].mxu0 %v14580_v54 }
 0x6eb   : > { %v6416_v1 = vmax.f32 %v6227_v2, 0.0  ;;  %6929 = vmatprep.mubr.bf16.mxu0 %v14596_v19 }
 0x6ec   : > { %v14642_v58 = vpack.c.bf16 %v6415_v11, %v6413_v6 }
 0x6ed   : > { %v6230_v15 = vpop.f32.mrb[184].mxu0  ;;  %v14644_v24 = vpack.c.bf16 %v6416_v1, %v6414_v38 }
 0x6ee   : > { %v6231_v61 = vadd.f32 %v6230_v15, %v14339_v14  ;;  %v6232_v32 = vpop.f32.mrb[185].mxu0 }
 0x6ef   : > { %v6233_v59 = vadd.f32 %v6232_v32, %v14343_v27  ;;  %v6234_v49 = vpop.f32.mrb[186].mxu0 }
 0x6f0   : > { %v6235_v28 = vadd.f32 %v6234_v49, %v14339_v14  ;;  %v6236_v42 = vpop.f32.mrb[187].mxu0  ;;  %v6417_v46 = vmax.f32 %v6231_v61, 0.0 }
 0x6f1   : > { %v6237_v54 = vadd.f32 %v6236_v42, %v14343_v27  ;;  %v6418_v19 = vmax.f32 %v6233_v59, 0.0 }
 0x6f2   : > { %v6419_v41 = vmax.f32 %v6235_v28, 0.0  ;;  %6930 = vmatmul.mubr.bf16.gmra.mrb[36].mxu0 %v14594_v30 }
 0x6f3   : > { %v6420_v9 = vmax.f32 %v6237_v54, 0.0  ;;  %6939 = vmatprep.mubr.bf16.mxu0 %v14606_v63 }
 0x6f4   : > { %v14652_v37 = vpack.c.bf16 %v6419_v41, %v6417_v46 }
 0x6f5   : > { %v6240_v35 = vpop.f32.mrb[188].mxu0  ;;  %v14654_v53 = vpack.c.bf16 %v6420_v9, %v6418_v19 }
 0x6f6   : > { %v6241_v29 = vadd.f32 %v6240_v35, %v14339_v14  ;;  %v6242_v21 = vpop.f32.mrb[189].mxu0 }
 0x6f7   : > { %v6243_v57 = vadd.f32 %v6242_v21, %v14343_v27  ;;  %v6244_v12 = vpop.f32.mrb[190].mxu0  ;;  %v11735_v21 = vld [vmem:[%s15758_s12 + $0x38] sm:$0xff]  }
 0x6f8   : > { %v6245_v30 = vadd.f32 %v6244_v12, %v14339_v14  ;;  %v6246_v23 = vpop.f32.mrb[191].mxu0  ;;  %v6421_v52 = vmax.f32 %v6241_v29, 0.0  ;;  %9009 = vmatpush1.bf16.msra.mxu0 %v11735_v21 }
 0x6f9   : > { %v6247_v63 = vadd.f32 %v6246_v23, %v14343_v27  ;;  %v6422_v8 = vmax.f32 %v6243_v57, 0.0  ;;  %9010 = vmatprep.subr.bf16.mxu0 %v12146_v7 }
 0x6fa   : > { %v6423_v13 = vmax.f32 %v6245_v30, 0.0  ;;  %6940 = vmatmul.mubr.bf16.gmra.mrb[40].mxu0 %v14604_v47 }
 0x6fb   : > { %v6424_v18 = vmax.f32 %v6247_v63, 0.0  ;;  %6949 = vmatprep.mubr.bf16.mxu0 %v14620_v40 }
 0x6fc   : > { %v14666_v26 = vpack.c.bf16 %v6423_v13, %v6421_v52 }
 0x6fd   : > { %v6250_v51 = vpop.f32.mrb[192].mxu0  ;;  %v14668_v3 = vpack.c.bf16 %v6424_v18, %v6422_v8 }
 0x6fe   : > { %v6251_v17 = vadd.f32 %v6250_v51, %v14339_v14  ;;  %v6252_v44 = vpop.f32.mrb[193].mxu0 }
 0x6ff   : > { %v6253_v4 = vadd.f32 %v6252_v44, %v14343_v27  ;;  %v6254_v33 = vpop.f32.mrb[194].mxu0 }
 0x700   : > { %v6255_v50 = vadd.f32 %v6254_v33, %v14339_v14  ;;  %v6256_v5 = vpop.f32.mrb[195].mxu0  ;;  %v6425_v45 = vmax.f32 %v6251_v17, 0.0 }
 0x701   : > { %v6257_v47 = vadd.f32 %v6256_v5, %v14343_v27  ;;  %v6426_v40 = vmax.f32 %v6253_v4, 0.0 }
 0x702   : > { %v6427_v48 = vmax.f32 %v6255_v50, 0.0  ;;  %6950 = vmatmul.mubr.bf16.gmra.mrb[44].mxu0 %v14618_v20 }
 0x703   : > { %v6428_v22 = vmax.f32 %v6257_v47, 0.0  ;;  %6959 = vmatprep.mubr.bf16.mxu0 %v14630_v31 }
 0x704   : > { %v14676_v34 = vpack.c.bf16 %v6427_v48, %v6425_v45 }
 0x705   : > { %v6260_v55 = vpop.f32.mrb[196].mxu0  ;;  %v14678_v0 = vpack.c.bf16 %v6428_v22, %v6426_v40 }
 0x706   : > { %v6261_v56 = vadd.f32 %v6260_v55, %v14339_v14  ;;  %v6262_v36 = vpop.f32.mrb[197].mxu0 }
 0x707   : > { %v6263_v43 = vadd.f32 %v6262_v36, %v14343_v27  ;;  %v6264_v39 = vpop.f32.mrb[198].mxu0  ;;  %v11736_v36 = vld [vmem:[%s15758_s12 + $0x40] sm:$0xff]  }
 0x708   : > { %v6265_v20 = vadd.f32 %v6264_v39, %v14339_v14  ;;  %v6266_v2 = vpop.f32.mrb[199].mxu0  ;;  %v6429_v6 = vmax.f32 %v6261_v56, 0.0  ;;  %9011 = vmatpush1.bf16.msra.mxu0 %v11736_v36 }
 0x709   : > { %v6267_v31 = vadd.f32 %v6266_v2, %v14343_v27  ;;  %v6430_v38 = vmax.f32 %v6263_v43, 0.0  ;;  %9012 = vmatprep.subr.bf16.mxu0 %v12146_v7 }
 0x70a   : > { %v6431_v11 = vmax.f32 %v6265_v20, 0.0  ;;  %6960 = vmatmul.mubr.bf16.gmra.mrb[48].mxu0 %v14628_v10 }
 0x70b   : > { %v6432_v1 = vmax.f32 %v6267_v31, 0.0  ;;  %6969 = vmatprep.mubr.bf16.mxu0 %v14644_v24 }
 0x70c   : > { %v14690_v15 = vpack.c.bf16 %v6431_v11, %v6429_v6 }
 0x70d   : > { %v6270_v61 = vpop.f32.mrb[200].mxu0  ;;  %v14692_v32 = vpack.c.bf16 %v6432_v1, %v6430_v38 }
 0x70e   : > { %v6271_v59 = vadd.f32 %v6270_v61, %v14339_v14  ;;  %v6272_v49 = vpop.f32.mrb[201].mxu0 }
 0x70f   : > { %v6273_v28 = vadd.f32 %v6272_v49, %v14343_v27  ;;  %v6274_v42 = vpop.f32.mrb[202].mxu0 }
 0x710   : > { %v6275_v54 = vadd.f32 %v6274_v42, %v14339_v14  ;;  %v6276_v46 = vpop.f32.mrb[203].mxu0  ;;  %v6433_v41 = vmax.f32 %v6271_v59, 0.0 }
 0x711   : > { %v6277_v10 = vadd.f32 %v6276_v46, %v14343_v27  ;;  %v6434_v24 = vmax.f32 %v6273_v28, 0.0 }
 0x712   : > { %v6435_v19 = vmax.f32 %v6275_v54, 0.0  ;;  %6970 = vmatmul.mubr.bf16.gmra.mrb[52].mxu0 %v14642_v58 }
 0x713   : > { %v6436_v9 = vmax.f32 %v6277_v10, 0.0  ;;  %6979 = vmatprep.mubr.bf16.mxu0 %v14654_v53 }
 0x714   : > { %v14700_v35 = vpack.c.bf16 %v6435_v19, %v6433_v41 }
 0x715   : > { %v6280_v16 = vpop.f32.mrb[204].mxu0  ;;  %v14702_v29 = vpack.c.bf16 %v6436_v9, %v6434_v24 }
 0x716   : > { %v6281_v57 = vadd.f32 %v6280_v16, %v14339_v14  ;;  %v6282_v12 = vpop.f32.mrb[205].mxu0 }
 0x717   : > { %v6283_v30 = vadd.f32 %v6282_v12, %v14343_v27  ;;  %v6284_v23 = vpop.f32.mrb[206].mxu0  ;;  %v11737_v12 = vld [vmem:[%s15758_s12 + $0x48] sm:$0xff]  }
 0x718   : > { %v6285_v58 = vadd.f32 %v6284_v23, %v14339_v14  ;;  %v6286_v63 = vpop.f32.mrb[207].mxu0  ;;  %v6437_v52 = vmax.f32 %v6281_v57, 0.0  ;;  %9013 = vmatpush1.bf16.msra.mxu0 %v11737_v12 }
 0x719   : > { %v6287_v53 = vadd.f32 %v6286_v63, %v14343_v27  ;;  %v6438_v8 = vmax.f32 %v6283_v30, 0.0  ;;  %9014 = vmatprep.subr.bf16.mxu0 %v12146_v7 }
 0x71a   : > { %v6439_v13 = vmax.f32 %v6285_v58, 0.0  ;;  %6980 = vmatmul.mubr.bf16.gmra.mrb[56].mxu0 %v14652_v37 }
 0x71b   : > { %v6440_v18 = vmax.f32 %v6287_v53, 0.0  ;;  %6989 = vmatprep.mubr.bf16.mxu0 %v14668_v3 }
 0x71c   : > { %v14714_v51 = vpack.c.bf16 %v6439_v13, %v6437_v52 }
 0x71d   : > { %v6290_v17 = vpop.f32.mrb[208].mxu0  ;;  %v14716_v44 = vpack.c.bf16 %v6440_v18, %v6438_v8 }
 0x71e   : > { %v6291_v4 = vadd.f32 %v6290_v17, %v14339_v14  ;;  %v6292_v33 = vpop.f32.mrb[209].mxu0 }
 0x71f   : > { %v6293_v50 = vadd.f32 %v6292_v33, %v14343_v27  ;;  %v6294_v5 = vpop.f32.mrb[210].mxu0 }
 0x720   : > { %v6295_v47 = vadd.f32 %v6294_v5, %v14339_v14  ;;  %v6296_v45 = vpop.f32.mrb[211].mxu0  ;;  %v6441_v48 = vmax.f32 %v6291_v4, 0.0 }
 0x721   : > { %v6297_v37 = vadd.f32 %v6296_v45, %v14343_v27  ;;  %v6442_v3 = vmax.f32 %v6293_v50, 0.0 }
 0x722   : > { %v6443_v40 = vmax.f32 %v6295_v47, 0.0  ;;  %6990 = vmatmul.mubr.bf16.gmra.mrb[60].mxu0 %v14666_v26 }
 0x723   : > { %v6444_v22 = vmax.f32 %v6297_v37, 0.0  ;;  %6999 = vmatprep.mubr.bf16.mxu0 %v14678_v0 }
 0x724   : > { %v14724_v55 = vpack.c.bf16 %v6443_v40, %v6441_v48 }
 0x725   : > { %v6300_v25 = vpop.f32.mrb[212].mxu0  ;;  %v14726_v56 = vpack.c.bf16 %v6444_v22, %v6442_v3 }
 0x726   : > { %v6301_v43 = vadd.f32 %v6300_v25, %v14339_v14  ;;  %v6302_v39 = vpop.f32.mrb[213].mxu0 }
 0x727   : > { %v6303_v20 = vadd.f32 %v6302_v39, %v14343_v27  ;;  %v6304_v2 = vpop.f32.mrb[214].mxu0 }
 0x728   : > { %v6305_v26 = vadd.f32 %v6304_v2, %v14339_v14  ;;  %v6306_v31 = vpop.f32.mrb[215].mxu0  ;;  %v6445_v6 = vmax.f32 %v6301_v43, 0.0 }
 0x729   : > { %v6307_v0 = vadd.f32 %v6306_v31, %v14343_v27  ;;  %v6446_v38 = vmax.f32 %v6303_v20, 0.0 }
 0x72a   : > { %v6447_v11 = vmax.f32 %v6305_v26, 0.0  ;;  %7000 = vmatmul.mubr.bf16.gmra.mrb[64].mxu0 %v14676_v34 }
 0x72b   : > { %v6448_v1 = vmax.f32 %v6307_v0, 0.0  ;;  %7009 = vmatprep.mubr.bf16.mxu0 %v14692_v32 }
 0x72c   : > { %v14738_v61 = vpack.c.bf16 %v6447_v11, %v6445_v6 }
 0x72d   : > { %v6310_v59 = vpop.f32.mrb[216].mxu0  ;;  %v14740_v49 = vpack.c.bf16 %v6448_v1, %v6446_v38  ;;  %v11738_v1 = vld [vmem:[%s15758_s12 + $0x50] sm:$0xff]  }
 0x72e   : > { %v6311_v28 = vadd.f32 %v6310_v59, %v14339_v14  ;;  %v6312_v42 = vpop.f32.mrb[217].mxu0  ;;  %9015 = vmatpush1.bf16.msra.mxu0 %v11738_v1 }
 0x72f   : > { %v6313_v54 = vadd.f32 %v6312_v42, %v14343_v27  ;;  %v6314_v46 = vpop.f32.mrb[218].mxu0  ;;  %9016 = vmatprep.subr.bf16.mxu0 %v12146_v7 }
 0x730   : > { %v6315_v10 = vadd.f32 %v6314_v46, %v14339_v14  ;;  %v6316_v41 = vpop.f32.mrb[219].mxu0  ;;  %v6449_v19 = vmax.f32 %v6311_v28, 0.0 }
 0x731   : > { %v6317_v34 = vadd.f32 %v6316_v41, %v14343_v27  ;;  %v6450_v32 = vmax.f32 %v6313_v54, 0.0 }
 0x732   : > { %v6451_v24 = vmax.f32 %v6315_v10, 0.0  ;;  %7010 = vmatmul.mubr.bf16.gmra.mrb[68].mxu0 %v14690_v15  ;;  %v10749_v15 = vld [vmem:[%s15752_s6 + $0xa] sm:$0x3] }
 0x733   : > { %v6452_v9 = vmax.f32 %v6317_v34, 0.0  ;;  %7019 = vmatprep.mubr.bf16.mxu0 %v14702_v29  ;;  %v14765_v18 = vrot.slane %v10749_v15, %v12710_v60  ;;  %v14769_v33 = vrot.slane %v10749_v15, %v12715_v62 }
 0x734   : > { %v14748_v16 = vpack.c.bf16 %v6451_v24, %v6449_v19 }
 0x735   : > { %v6320_v21 = vpop.f32.mrb[220].mxu0  ;;  %v14750_v57 = vpack.c.bf16 %v6452_v9, %v6450_v32 }
 0x736   : > { %v6321_v30 = vadd.f32 %v6320_v21, %v14339_v14  ;;  %v6322_v23 = vpop.f32.mrb[221].mxu0 }
 0x737   : > { %v6323_v58 = vadd.f32 %v6322_v23, %v14343_v27  ;;  %v6324_v63 = vpop.f32.mrb[222].mxu0 }
 0x738   : > { %v6325_v29 = vadd.f32 %v6324_v63, %v14339_v14  ;;  %v6326_v53 = vpop.f32.mrb[223].mxu0  ;;  %v6453_v13 = vmax.f32 %v6321_v30, 0.0  ;;  %v7208_v14 = vld [vmem:[%s15757_s11] sm:$0x3] }
 0x739   : > { %v6327_v52 = vadd.f32 %v6326_v53, %v14343_v27  ;;  %v6454_v17 = vmax.f32 %v6323_v58, 0.0  ;;  %v14780_v45 = vrot.slane %v7208_v14, %v12710_v60  ;;  %v14784_v48 = vrot.slane %v7208_v14, %v12715_v62 }
 0x73a   : > { %v6455_v8 = vmax.f32 %v6325_v29, 0.0  ;;  %7020 = vmatmul.mubr.bf16.gmra.mrb[72].mxu0 %v14700_v35 }
 0x73b   : > { %v6456_v4 = vmax.f32 %v6327_v52, 0.0  ;;  %7029 = vmatprep.mubr.bf16.mxu0 %v14716_v44 }
 0x73c   : > { %v14774_v50 = vpack.c.bf16 %v6455_v8, %v6453_v13 }
 0x73d   : > { %v6761_v27 = vpop.f32.mrb[224].mxu0  ;;  %v14776_v5 = vpack.c.bf16 %v6456_v4, %v6454_v17 }
 0x73e   : > { %v6762_v35 = vadd.f32 %v6761_v27, %v14765_v18  ;;  %v6763_v47 = vpop.f32.mrb[225].mxu0 }
 0x73f   : > { %v6764_v44 = vadd.f32 %v6763_v47, %v14769_v33  ;;  %v6765_v37 = vpop.f32.mrb[226].mxu0 }
 0x740   : > { %v7080_v40 = vmax.f32 %v6762_v35, 0.0  ;;  %v6766_v3 = vadd.f32 %v6765_v37, %v14765_v18  ;;  %v6767_v22 = vpop.f32.mrb[227].mxu0 }
 0x741   : > { %v7081_v25 = vmax.f32 %v6764_v44, 0.0  ;;  %v6768_v36 = vadd.f32 %v6767_v22, %v14769_v33 }
 0x742   : > { %v7082_v43 = vmax.f32 %v6766_v3, 0.0  ;;  %7030 = vmatmul.mubr.bf16.gmra.mrb[76].mxu0 %v14714_v51  ;;  %v7220_v39 = vmul.f32 %v14780_v45, %v7080_v40 }
 0x743   : > { %v7083_v20 = vmax.f32 %v6768_v36, 0.0  ;;  %7039 = vmatprep.mubr.bf16.mxu0 %v14726_v56  ;;  %v7221_v2 = vmul.f32 %v14784_v48, %v7081_v25  ;;  %v11739_v36 = vld [vmem:[%s15758_s12 + $0x58] sm:$0xff]  }
 0x744   : > { %v7222_v26 = vmul.f32 %v14780_v45, %v7082_v43  ;;  %v8085_v31 = vpack.c.bf16 %v7082_v43, %v7080_v40  ;;  %9017 = vmatpush1.bf16.msra.mxu0 %v11739_v36 }
 0x745   : > { %v7223_v0 = vmul.f32 %v14784_v48, %v7083_v20  ;;  %v8086_v6 = vpack.c.bf16 %v7083_v20, %v7081_v25  ;;  %v6771_v11 = vpop.f32.mrb[228].mxu0  ;;  %v7348_v38 = vadd.f32 %v7221_v2, %v7220_v39  ;;  %9018 = vmatprep.subr.bf16.mxu0 %v12146_v7 }
 0x746   : > { %v6772_v51 = vadd.f32 %v6771_v11, %v14765_v18  ;;  %v6773_v59 = vpop.f32.mrb[229].mxu0 }
 0x747   : > { %v6774_v28 = vadd.f32 %v6773_v59, %v14769_v33  ;;  %v6775_v56 = vpop.f32.mrb[230].mxu0  ;;  %8353 = vmatprep.mubr.bf16.mxu1 %v8086_v6  ;;  %7349 = vadd.xlane.f32.xlu0 %v7348_v38  ;;  %v7351_v42 = vadd.f32 %v7223_v0, %v7222_v26 }
 0x748   : > { %v7084_v54 = vmax.f32 %v6772_v51, 0.0  ;;  %v6776_v46 = vadd.f32 %v6775_v56, %v14765_v18  ;;  %v6777_v10 = vpop.f32.mrb[231].mxu0  ;;  %8354 = vmatmul.mubr.bf16.vlgmr.msra.gmra.mrb[160].mxu1 %v8085_v31 }
 0x749   : > { %v7085_v41 = vmax.f32 %v6774_v28, 0.0  ;;  %v6778_v34 = vadd.f32 %v6777_v10, %v14769_v33 }
 0x74a   : > { %v7086_v19 = vmax.f32 %v6776_v46, 0.0  ;;  %7040 = vmatmul.mubr.bf16.gmra.mrb[80].mxu0 %v14724_v55  ;;  %v7224_v24 = vmul.f32 %v14780_v45, %v7084_v54 }
 0x74b   : > { %v7087_v32 = vmax.f32 %v6778_v34, 0.0  ;;  %7049 = vmatprep.mubr.bf16.mxu0 %v14740_v49  ;;  %7352 = vadd.xlane.f32.xlu0 %v7351_v42  ;;  %v7225_v9 = vmul.f32 %v14784_v48, %v7085_v41 }
 0x74c   : > { %v7226_v21 = vmul.f32 %v14780_v45, %v7086_v19  ;;  %v8087_v12 = vpack.c.bf16 %v7086_v19, %v7084_v54 }
 0x74d   : > { %v7227_v30 = vmul.f32 %v14784_v48, %v7087_v32  ;;  %v8088_v23 = vpack.c.bf16 %v7087_v32, %v7085_v41  ;;  %v6781_v58 = vpop.f32.mrb[232].mxu0  ;;  %v7354_v63 = vadd.f32 %v7225_v9, %v7224_v24 }
 0x74e   : > { %v6782_v15 = vadd.f32 %v6781_v58, %v14765_v18  ;;  %v6783_v29 = vpop.f32.mrb[233].mxu0 }
 0x74f   : > { %v6784_v55 = vadd.f32 %v6783_v29, %v14769_v33  ;;  %v6785_v53 = vpop.f32.mrb[234].mxu0  ;;  %7355 = vadd.xlane.f32.xlu1 %v7354_v63  ;;  %8363 = vmatprep.mubr.bf16.mxu1 %v8088_v23  ;;  %v7357_v49 = vadd.f32 %v7227_v30, %v7226_v21 }
 0x750   : > { %v7088_v52 = vmax.f32 %v6782_v15, 0.0  ;;  %v6786_v13 = vadd.f32 %v6785_v53, %v14765_v18  ;;  %v6787_v8 = vpop.f32.mrb[235].mxu0  ;;  %8364 = vmatmul.mubr.bf16.gmra.mrb[164].mxu1 %v8087_v12 }
 0x751   : > { %v7089_v17 = vmax.f32 %v6784_v55, 0.0  ;;  %v6788_v4 = vadd.f32 %v6787_v8, %v14769_v33 }
 0x752   : > { %v7228_v14 = vmul.f32 %v14780_v45, %v7088_v52  ;;  %v7090_v27 = vmax.f32 %v6786_v13, 0.0  ;;  %7050 = vmatmul.mubr.bf16.gmra.mrb[84].mxu0 %v14738_v61 }
 0x753   : > { %v7229_v35 = vmul.f32 %v14784_v48, %v7089_v17  ;;  %v7091_v47 = vmax.f32 %v6788_v4, 0.0  ;;  %7059 = vmatprep.mubr.bf16.mxu0 %v14750_v57  ;;  %7358 = vadd.xlane.f32.xlu1 %v7357_v49 }
 0x754   : > { %v7230_v44 = vmul.f32 %v14780_v45, %v7090_v27  ;;  %v8089_v37 = vpack.c.bf16 %v7090_v27, %v7088_v52 }
 0x755   : > { %v7231_v40 = vmul.f32 %v14784_v48, %v7091_v47  ;;  %v8090_v3 = vpack.c.bf16 %v7091_v47, %v7089_v17  ;;  %v6791_v22 = vpop.f32.mrb[236].mxu0  ;;  %v7360_v25 = vadd.f32 %v7229_v35, %v7228_v14 }
 0x756   : > { %v6792_v61 = vadd.f32 %v6791_v22, %v14765_v18  ;;  %v6793_v43 = vpop.f32.mrb[237].mxu0 }
 0x757   : > { %v6794_v39 = vadd.f32 %v6793_v43, %v14769_v33  ;;  %v6795_v20 = vpop.f32.mrb[238].mxu0  ;;  %8373 = vmatprep.mubr.bf16.mxu1 %v8090_v3  ;;  %7361 = vadd.xlane.f32.xlu0 %v7360_v25  ;;  %v7363_v57 = vadd.f32 %v7231_v40, %v7230_v44 }
 0x758   : > { %v7092_v2 = vmax.f32 %v6792_v61, 0.0  ;;  %v6796_v26 = vadd.f32 %v6795_v20, %v14765_v18  ;;  %v6797_v31 = vpop.f32.mrb[239].mxu0  ;;  %8374 = vmatmul.mubr.bf16.gmra.mrb[168].mxu1 %v8089_v37 }
 0x759   : > { %v7093_v0 = vmax.f32 %v6794_v39, 0.0  ;;  %v6798_v6 = vadd.f32 %v6797_v31, %v14769_v33  ;;  %7364 = vadd.xlane.f32.xlu1 %v7363_v57 }
 0x75a   : > { %v7232_v11 = vmul.f32 %v14780_v45, %v7092_v2  ;;  %v7094_v38 = vmax.f32 %v6796_v26, 0.0  ;;  %7060 = vmatmul.mubr.bf16.gmra.mrb[88].mxu0 %v14748_v16 }
 0x75b   : > { %v7233_v1 = vmul.f32 %v14784_v48, %v7093_v0  ;;  %v7095_v51 = vmax.f32 %v6798_v6, 0.0  ;;  %7069 = vmatprep.mubr.bf16.mxu0 %v14776_v5 }
 0x75c   : > { %v7234_v59 = vmul.f32 %v14780_v45, %v7094_v38  ;;  %v8091_v28 = vpack.c.bf16 %v7094_v38, %v7092_v2 }
 0x75d   : > { %v7235_v56 = vmul.f32 %v14784_v48, %v7095_v51  ;;  %v8092_v42 = vpack.c.bf16 %v7095_v51, %v7093_v0  ;;  %v6801_v54 = vpop.f32.mrb[240].mxu0  ;;  %v7366_v46 = vadd.f32 %v7233_v1, %v7232_v11 }
 0x75e   : > { %v6802_v10 = vadd.f32 %v6801_v54, %v14765_v18  ;;  %v6803_v41 = vpop.f32.mrb[241].mxu0 }
 0x75f   : > { %v6804_v34 = vadd.f32 %v6803_v41, %v14769_v33  ;;  %v6805_v19 = vpop.f32.mrb[242].mxu0  ;;  %8383 = vmatprep.mubr.bf16.mxu1 %v8092_v42  ;;  %7367 = vadd.xlane.f32.xlu0 %v7366_v46  ;;  %v7369_v16 = vadd.f32 %v7235_v56, %v7234_v59  ;;  %v11740_v46 = vld [vmem:[%s15758_s12 + $0x60] sm:$0xff]  }
 0x760   : > { %v7096_v24 = vmax.f32 %v6802_v10, 0.0  ;;  %v6806_v5 = vadd.f32 %v6805_v19, %v14765_v18  ;;  %v6807_v32 = vpop.f32.mrb[243].mxu0  ;;  %8384 = vmatmul.mubr.bf16.gmra.mrb[172].mxu1 %v8091_v28  ;;  %9019 = vmatpush1.bf16.msra.mxu0 %v11740_v46 }
 0x761   : > { %v7097_v9 = vmax.f32 %v6804_v34, 0.0  ;;  %v6808_v21 = vadd.f32 %v6807_v32, %v14769_v33  ;;  %7370 = vadd.xlane.f32.xlu1 %v7369_v16  ;;  %9020 = vmatprep.subr.bf16.mxu0 %v12146_v7 }
 0x762   : > { %v7236_v12 = vmul.f32 %v14780_v45, %v7096_v24  ;;  %v7098_v30 = vmax.f32 %v6806_v5, 0.0  ;;  %7070 = vmatmul.mubr.bf16.gmra.mrb[92].mxu0 %v14774_v50 }
 0x763   : > { %v7237_v23 = vmul.f32 %v14784_v48, %v7097_v9  ;;  %v7099_v58 = vmax.f32 %v6808_v21, 0.0 }
 0x764   : > { %v7238_v63 = vmul.f32 %v14780_v45, %v7098_v30  ;;  %v8093_v15 = vpack.c.bf16 %v7098_v30, %v7096_v24 }
 0x765   : > { %v7239_v29 = vmul.f32 %v14784_v48, %v7099_v58  ;;  %v8094_v55 = vpack.c.bf16 %v7099_v58, %v7097_v9  ;;  %v6811_v53 = vpop.f32.mrb[244].mxu0  ;;  %v7372_v49 = vadd.f32 %v7237_v23, %v7236_v12 }
 0x766   : > { %v6812_v52 = vadd.f32 %v6811_v53, %v14765_v18  ;;  %v6813_v13 = vpop.f32.mrb[245].mxu0 }
 0x767   : > { %v6814_v8 = vadd.f32 %v6813_v13, %v14769_v33  ;;  %v6815_v17 = vpop.f32.mrb[246].mxu0  ;;  %8393 = vmatprep.mubr.bf16.mxu1 %v8094_v55  ;;  %7373 = vadd.xlane.f32.xlu0 %v7372_v49  ;;  %v7375_v50 = vadd.f32 %v7239_v29, %v7238_v63 }
 0x768   : > { %v7100_v4 = vmax.f32 %v6812_v52, 0.0  ;;  %v6816_v14 = vadd.f32 %v6815_v17, %v14765_v18  ;;  %v6817_v27 = vpop.f32.mrb[247].mxu0  ;;  %8394 = vmatmul.mubr.bf16.gmra.mrb[176].mxu1 %v8093_v15 }
 0x769   : > { %v7101_v35 = vmax.f32 %v6814_v8, 0.0  ;;  %v6818_v47 = vadd.f32 %v6817_v27, %v14769_v33  ;;  %7376 = vadd.xlane.f32.xlu1 %v7375_v50 }
 0x76a   : > { %v7240_v44 = vmul.f32 %v14780_v45, %v7100_v4  ;;  %v7102_v37 = vmax.f32 %v6816_v14, 0.0 }
 0x76b   : > { %v7241_v40 = vmul.f32 %v14784_v48, %v7101_v35  ;;  %v7103_v3 = vmax.f32 %v6818_v47, 0.0 }
 0x76c   : > { %v7242_v22 = vmul.f32 %v14780_v45, %v7102_v37  ;;  %v8095_v25 = vpack.c.bf16 %v7102_v37, %v7100_v4 }
 0x76d   : > { %v7243_v36 = vmul.f32 %v14784_v48, %v7103_v3  ;;  %v8096_v61 = vpack.c.bf16 %v7103_v3, %v7101_v35  ;;  %v6821_v43 = vpop.f32.mrb[248].mxu0  ;;  %v7378_v39 = vadd.f32 %v7241_v40, %v7240_v44 }
 0x76e   : > { %v6822_v20 = vadd.f32 %v6821_v43, %v14765_v18  ;;  %v6823_v57 = vpop.f32.mrb[249].mxu0 }
 0x76f   : > { %v6824_v2 = vadd.f32 %v6823_v57, %v14769_v33  ;;  %v6825_v26 = vpop.f32.mrb[250].mxu0  ;;  %8403 = vmatprep.mubr.bf16.mxu1 %v8096_v61  ;;  %7379 = vadd.xlane.f32.xlu0 %v7378_v39  ;;  %v7381_v31 = vadd.f32 %v7243_v36, %v7242_v22  ;;  %v11741_v36 = vld [vmem:[%s15758_s12 + $0x68] sm:$0xff]  }
 0x770   : > { %v7104_v0 = vmax.f32 %v6822_v20, 0.0  ;;  %v6826_v6 = vadd.f32 %v6825_v26, %v14765_v18  ;;  %v6827_v11 = vpop.f32.mrb[251].mxu0  ;;  %8404 = vmatmul.mubr.bf16.gmra.mrb[180].mxu1 %v8095_v25  ;;  %9021 = vmatpush1.bf16.msra.mxu0 %v11741_v36 }
 0x771   : > { %v7105_v38 = vmax.f32 %v6824_v2, 0.0  ;;  %v6828_v1 = vadd.f32 %v6827_v11, %v14769_v33  ;;  %7382 = vadd.xlane.f32.xlu1 %v7381_v31  ;;  %9022 = vmatprep.subr.bf16.mxu0 %v12146_v7 }
 0x772   : > { %v7244_v51 = vmul.f32 %v14780_v45, %v7104_v0  ;;  %v7106_v59 = vmax.f32 %v6826_v6, 0.0 }
 0x773   : > { %v7245_v28 = vmul.f32 %v14784_v48, %v7105_v38  ;;  %v7107_v56 = vmax.f32 %v6828_v1, 0.0 }
 0x774   : > { %v7246_v42 = vmul.f32 %v14780_v45, %v7106_v59  ;;  %v8097_v54 = vpack.c.bf16 %v7106_v59, %v7104_v0 }
 0x775   : > { %v7247_v10 = vmul.f32 %v14784_v48, %v7107_v56  ;;  %v8098_v41 = vpack.c.bf16 %v7107_v56, %v7105_v38  ;;  %v6831_v34 = vpop.f32.mrb[252].mxu0  ;;  %v7384_v19 = vadd.f32 %v7245_v28, %v7244_v51 }
 0x776   : > { %v6832_v16 = vadd.f32 %v6831_v34, %v14765_v18  ;;  %v6833_v24 = vpop.f32.mrb[253].mxu0 }
 0x777   : > { %v6834_v5 = vadd.f32 %v6833_v24, %v14769_v33  ;;  %v6835_v32 = vpop.f32.mrb[254].mxu0  ;;  %8413 = vmatprep.mubr.bf16.mxu1 %v8098_v41  ;;  %7385 = vadd.xlane.f32.xlu0 %v7384_v19  ;;  %v7387_v9 = vadd.f32 %v7247_v10, %v7246_v42 }
 0x778   : > { %v7108_v21 = vmax.f32 %v6832_v16, 0.0  ;;  %v6836_v12 = vadd.f32 %v6835_v32, %v14765_v18  ;;  %v6837_v30 = vpop.f32.mrb[255].mxu0  ;;  %8414 = vmatmul.mubr.bf16.gmra.mrb[184].mxu1 %v8097_v54 }
 0x779   : > { %v7109_v23 = vmax.f32 %v6834_v5, 0.0  ;;  %v6838_v58 = vadd.f32 %v6837_v30, %v14769_v33  ;;  %7388 = vadd.xlane.f32.xlu1 %v7387_v9 }
 0x77a   : > { %v7248_v63 = vmul.f32 %v14780_v45, %v7108_v21  ;;  %v7110_v15 = vmax.f32 %v6836_v12, 0.0 }
 0x77b   : > { %v7249_v29 = vmul.f32 %v14784_v48, %v7109_v23  ;;  %v7111_v55 = vmax.f32 %v6838_v58, 0.0 }
 0x77c   : > { %v7250_v53 = vmul.f32 %v14780_v45, %v7110_v15  ;;  %v8099_v49 = vpack.c.bf16 %v7110_v15, %v7108_v21 }
 0x77d   : > { %v7251_v52 = vmul.f32 %v14784_v48, %v7111_v55  ;;  %v8100_v13 = vpack.c.bf16 %v7111_v55, %v7109_v23  ;;  %v6841_v8 = vpop.f32.mrb[0].mxu0  ;;  %v7390_v17 = vadd.f32 %v7249_v29, %v7248_v63 }
 0x77e   : > { %v6842_v50 = vadd.f32 %v6841_v8, %v14765_v18  ;;  %v6843_v4 = vpop.f32.mrb[1].mxu0 }
 0x77f   : > { %v6844_v14 = vadd.f32 %v6843_v4, %v14769_v33  ;;  %v6845_v27 = vpop.f32.mrb[2].mxu0  ;;  %8423 = vmatprep.mubr.bf16.mxu1 %v8100_v13  ;;  %7391 = vadd.xlane.f32.xlu0 %v7390_v17  ;;  %v7393_v35 = vadd.f32 %v7251_v52, %v7250_v53  ;;  %v11742_v52 = vld [vmem:[%s15758_s12 + $0x70] sm:$0xff]  }
 0x780   : > { %v7112_v47 = vmax.f32 %v6842_v50, 0.0  ;;  %v6846_v44 = vadd.f32 %v6845_v27, %v14765_v18  ;;  %v6847_v37 = vpop.f32.mrb[3].mxu0  ;;  %8424 = vmatmul.mubr.bf16.gmra.mrb[188].mxu1 %v8099_v49  ;;  %9023 = vmatpush1.bf16.msra.mxu0 %v11742_v52 }
 0x781   : > { %v7113_v40 = vmax.f32 %v6844_v14, 0.0  ;;  %v6848_v3 = vadd.f32 %v6847_v37, %v14769_v33  ;;  %7394 = vadd.xlane.f32.xlu1 %v7393_v35  ;;  %9024 = vmatprep.subr.bf16.mxu0 %v12146_v7 }
 0x782   : > { %v7252_v22 = vmul.f32 %v14780_v45, %v7112_v47  ;;  %v7114_v25 = vmax.f32 %v6846_v44, 0.0 }
 0x783   : > { %v7253_v61 = vmul.f32 %v14784_v48, %v7113_v40  ;;  %v7115_v43 = vmax.f32 %v6848_v3, 0.0 }
 0x784   : > { %v7254_v39 = vmul.f32 %v14780_v45, %v7114_v25  ;;  %v8101_v20 = vpack.c.bf16 %v7114_v25, %v7112_v47 }
 0x785   : > { %v7255_v57 = vmul.f32 %v14784_v48, %v7115_v43  ;;  %v8102_v2 = vpack.c.bf16 %v7115_v43, %v7113_v40  ;;  %v6851_v26 = vpop.f32.mrb[4].mxu0  ;;  %v7396_v31 = vadd.f32 %v7253_v61, %v7252_v22 }
 0x786   : > { %v6852_v0 = vadd.f32 %v6851_v26, %v14765_v18  ;;  %v6853_v6 = vpop.f32.mrb[5].mxu0 }
 0x787   : > { %v6854_v11 = vadd.f32 %v6853_v6, %v14769_v33  ;;  %v6855_v38 = vpop.f32.mrb[6].mxu0  ;;  %8433 = vmatprep.mubr.bf16.mxu1 %v8102_v2  ;;  %7397 = vadd.xlane.f32.xlu0 %v7396_v31  ;;  %v7399_v1 = vadd.f32 %v7255_v57, %v7254_v39 }
 0x788   : > { %v7116_v51 = vmax.f32 %v6852_v0, 0.0  ;;  %v6856_v59 = vadd.f32 %v6855_v38, %v14765_v18  ;;  %v6857_v28 = vpop.f32.mrb[7].mxu0  ;;  %8434 = vmatmul.mubr.bf16.gmra.mrb[192].mxu1 %v8101_v20 }
 0x789   : > { %v7117_v56 = vmax.f32 %v6854_v11, 0.0  ;;  %v6858_v42 = vadd.f32 %v6857_v28, %v14769_v33  ;;  %7400 = vadd.xlane.f32.xlu1 %v7399_v1 }
 0x78a   : > { %v7256_v54 = vmul.f32 %v14780_v45, %v7116_v51  ;;  %v7118_v46 = vmax.f32 %v6856_v59, 0.0 }
 0x78b   : > { %v7257_v10 = vmul.f32 %v14784_v48, %v7117_v56  ;;  %v7119_v41 = vmax.f32 %v6858_v42, 0.0 }
 0x78c   : > { %v7258_v34 = vmul.f32 %v14780_v45, %v7118_v46  ;;  %v8103_v19 = vpack.c.bf16 %v7118_v46, %v7116_v51  ;;  %v11743_v46 = vld [vmem:[%s15758_s12 + $0x78] sm:$0xff]  }
 0x78d   : > { %v7259_v16 = vmul.f32 %v14784_v48, %v7119_v41  ;;  %v8104_v24 = vpack.c.bf16 %v7119_v41, %v7117_v56  ;;  %v6861_v5 = vpop.f32.mrb[8].mxu0  ;;  %v7402_v32 = vadd.f32 %v7257_v10, %v7256_v54  ;;  %9025 = vmatpush1.bf16.msra.mxu0 %v11743_v46 }
 0x78e   : > { %v6862_v9 = vadd.f32 %v6861_v5, %v14765_v18  ;;  %v6863_v21 = vpop.f32.mrb[9].mxu0 }
 0x78f   : > { %v6864_v12 = vadd.f32 %v6863_v21, %v14769_v33  ;;  %v6865_v30 = vpop.f32.mrb[10].mxu0  ;;  %8443 = vmatprep.mubr.bf16.mxu1 %v8104_v24  ;;  %7403 = vadd.xlane.f32.xlu0 %v7402_v32  ;;  %v7405_v23 = vadd.f32 %v7259_v16, %v7258_v34 }
 0x790   : > { %v7120_v58 = vmax.f32 %v6862_v9, 0.0  ;;  %v6866_v63 = vadd.f32 %v6865_v30, %v14765_v18  ;;  %v6867_v15 = vpop.f32.mrb[11].mxu0  ;;  %8444 = vmatmul.mubr.bf16.gmra.mrb[196].mxu1 %v8103_v19 }
 0x791   : > { %v7121_v29 = vmax.f32 %v6864_v12, 0.0  ;;  %v6868_v55 = vadd.f32 %v6867_v15, %v14769_v33  ;;  %7406 = vadd.xlane.f32.xlu1 %v7405_v23 }
 0x792   : > { %v7260_v53 = vmul.f32 %v14780_v45, %v7120_v58  ;;  %v7122_v49 = vmax.f32 %v6866_v63, 0.0 }
 0x793   : > { %v7261_v13 = vmul.f32 %v14784_v48, %v7121_v29  ;;  %v7123_v8 = vmax.f32 %v6868_v55, 0.0 }
 0x794   : > { %v7262_v17 = vmul.f32 %v14780_v45, %v7122_v49  ;;  %v8105_v50 = vpack.c.bf16 %v7122_v49, %v7120_v58 }
 0x795   : > { %v7263_v4 = vmul.f32 %v14784_v48, %v7123_v8  ;;  %v8106_v14 = vpack.c.bf16 %v7123_v8, %v7121_v29  ;;  %v6871_v27 = vpop.f32.mrb[12].mxu0  ;;  %v7408_v35 = vadd.f32 %v7261_v13, %v7260_v53 }
 0x796   : > { %v6872_v47 = vadd.f32 %v6871_v27, %v14765_v18  ;;  %v6873_v44 = vpop.f32.mrb[13].mxu0 }
 0x797   : > { %v6874_v37 = vadd.f32 %v6873_v44, %v14769_v33  ;;  %v6875_v40 = vpop.f32.mrb[14].mxu0  ;;  %8453 = vmatprep.mubr.bf16.mxu1 %v8106_v14  ;;  %7409 = vadd.xlane.f32.xlu0 %v7408_v35  ;;  %v7411_v3 = vadd.f32 %v7263_v4, %v7262_v17 }
 0x798   : > { %v7124_v22 = vmax.f32 %v6872_v47, 0.0  ;;  %v6876_v25 = vadd.f32 %v6875_v40, %v14765_v18  ;;  %v6877_v36 = vpop.f32.mrb[15].mxu0  ;;  %8454 = vmatmul.mubr.bf16.gmra.mrb[200].mxu1 %v8105_v50 }
 0x799   : > { %v7125_v61 = vmax.f32 %v6874_v37, 0.0  ;;  %v6878_v43 = vadd.f32 %v6877_v36, %v14769_v33  ;;  %7412 = vadd.xlane.f32.xlu1 %v7411_v3 }
 0x79a   : > { %v7264_v7 = vmul.f32 %v14780_v45, %v7124_v22  ;;  %v7126_v39 = vmax.f32 %v6876_v25, 0.0 }
 0x79b   : > { %v7265_v20 = vmul.f32 %v14784_v48, %v7125_v61  ;;  %v7127_v57 = vmax.f32 %v6878_v43, 0.0 }
 0x79c   : > { %v7266_v2 = vmul.f32 %v14780_v45, %v7126_v39  ;;  %v8107_v26 = vpack.c.bf16 %v7126_v39, %v7124_v22 }
 0x79d   : > { %v7267_v31 = vmul.f32 %v14784_v48, %v7127_v57  ;;  %v8108_v0 = vpack.c.bf16 %v7127_v57, %v7125_v61  ;;  %v6881_v6 = vpop.f32.mrb[16].mxu0  ;;  %v7414_v11 = vadd.f32 %v7265_v20, %v7264_v7 }
 0x79e   : > { %v6882_v38 = vadd.f32 %v6881_v6, %v14765_v18  ;;  %v6883_v1 = vpop.f32.mrb[17].mxu0 }
 0x79f   : > { %v6884_v51 = vadd.f32 %v6883_v1, %v14769_v33  ;;  %v6885_v59 = vpop.f32.mrb[18].mxu0  ;;  %8463 = vmatprep.mubr.bf16.mxu1 %v8108_v0  ;;  %7415 = vadd.xlane.f32.xlu0 %v7414_v11  ;;  %v7417_v28 = vadd.f32 %v7267_v31, %v7266_v2 }
 0x7a0   : > { %v7128_v56 = vmax.f32 %v6882_v38, 0.0  ;;  %v6886_v42 = vadd.f32 %v6885_v59, %v14765_v18  ;;  %v6887_v54 = vpop.f32.mrb[19].mxu0  ;;  %8464 = vmatmul.mubr.bf16.gmra.mrb[204].mxu1 %v8107_v26 }
 0x7a1   : > { %v7129_v10 = vmax.f32 %v6884_v51, 0.0  ;;  %v6888_v41 = vadd.f32 %v6887_v54, %v14769_v33  ;;  %7418 = vadd.xlane.f32.xlu1 %v7417_v28 }
 0x7a2   : > { %v7268_v34 = vmul.f32 %v14780_v45, %v7128_v56  ;;  %v7130_v19 = vmax.f32 %v6886_v42, 0.0 }
 0x7a3   : > { %v7269_v16 = vmul.f32 %v14784_v48, %v7129_v10  ;;  %v7131_v24 = vmax.f32 %v6888_v41, 0.0 }
 0x7a4   : > { %v7270_v5 = vmul.f32 %v14780_v45, %v7130_v19  ;;  %v8109_v32 = vpack.c.bf16 %v7130_v19, %v7128_v56 }
 0x7a5   : > { %v7271_v9 = vmul.f32 %v14784_v48, %v7131_v24  ;;  %v8110_v21 = vpack.c.bf16 %v7131_v24, %v7129_v10  ;;  %v6891_v12 = vpop.f32.mrb[20].mxu0  ;;  %v7420_v30 = vadd.f32 %v7269_v16, %v7268_v34 }
 0x7a6   : > { %v6892_v23 = vadd.f32 %v6891_v12, %v14765_v18  ;;  %v6893_v58 = vpop.f32.mrb[21].mxu0 }
 0x7a7   : > { %v6894_v63 = vadd.f32 %v6893_v58, %v14769_v33  ;;  %v6895_v15 = vpop.f32.mrb[22].mxu0  ;;  %8473 = vmatprep.mubr.bf16.mxu1 %v8110_v21  ;;  %7421 = vadd.xlane.f32.xlu0 %v7420_v30  ;;  %v7423_v29 = vadd.f32 %v7271_v9, %v7270_v5 }
 0x7a8   : > { %v7132_v55 = vmax.f32 %v6892_v23, 0.0  ;;  %v6896_v53 = vadd.f32 %v6895_v15, %v14765_v18  ;;  %v6897_v49 = vpop.f32.mrb[23].mxu0  ;;  %8474 = vmatmul.mubr.bf16.gmra.mrb[208].mxu1 %v8109_v32 }
 0x7a9   : > { %v7133_v52 = vmax.f32 %v6894_v63, 0.0  ;;  %v6898_v13 = vadd.f32 %v6897_v49, %v14769_v33  ;;  %7424 = vadd.xlane.f32.xlu1 %v7423_v29 }
 0x7aa   : > { %v7272_v8 = vmul.f32 %v14780_v45, %v7132_v55  ;;  %v7134_v17 = vmax.f32 %v6896_v53, 0.0 }
 0x7ab   : > { %v7273_v50 = vmul.f32 %v14784_v48, %v7133_v52  ;;  %v7135_v4 = vmax.f32 %v6898_v13, 0.0 }
 0x7ac   : > { %v7274_v14 = vmul.f32 %v14780_v45, %v7134_v17  ;;  %v8111_v27 = vpack.c.bf16 %v7134_v17, %v7132_v55 }
 0x7ad   : > { %v7275_v35 = vmul.f32 %v14784_v48, %v7135_v4  ;;  %v8112_v47 = vpack.c.bf16 %v7135_v4, %v7133_v52  ;;  %v6901_v44 = vpop.f32.mrb[24].mxu0  ;;  %v7426_v37 = vadd.f32 %v7273_v50, %v7272_v8 }
 0x7ae   : > { %v6902_v40 = vadd.f32 %v6901_v44, %v14765_v18  ;;  %v6903_v3 = vpop.f32.mrb[25].mxu0 }
 0x7af   : > { %v6904_v22 = vadd.f32 %v6903_v3, %v14769_v33  ;;  %v6905_v25 = vpop.f32.mrb[26].mxu0  ;;  %8483 = vmatprep.mubr.bf16.mxu1 %v8112_v47  ;;  %7427 = vadd.xlane.f32.xlu0 %v7426_v37  ;;  %v7429_v36 = vadd.f32 %v7275_v35, %v7274_v14 }
 0x7b0   : > { %v7136_v61 = vmax.f32 %v6902_v40, 0.0  ;;  %v6906_v43 = vadd.f32 %v6905_v25, %v14765_v18  ;;  %v6907_v7 = vpop.f32.mrb[27].mxu0  ;;  %8484 = vmatmul.mubr.bf16.gmra.mrb[212].mxu1 %v8111_v27 }
 0x7b1   : > { %v7137_v39 = vmax.f32 %v6904_v22, 0.0  ;;  %v6908_v20 = vadd.f32 %v6907_v7, %v14769_v33  ;;  %7430 = vadd.xlane.f32.xlu1 %v7429_v36 }
 0x7b2   : > { %v7276_v57 = vmul.f32 %v14780_v45, %v7136_v61  ;;  %v7138_v2 = vmax.f32 %v6906_v43, 0.0 }
 0x7b3   : > { %v7277_v26 = vmul.f32 %v14784_v48, %v7137_v39  ;;  %v7139_v31 = vmax.f32 %v6908_v20, 0.0 }
 0x7b4   : > { %v7278_v0 = vmul.f32 %v14780_v45, %v7138_v2  ;;  %v8113_v6 = vpack.c.bf16 %v7138_v2, %v7136_v61 }
 0x7b5   : > { %v7279_v11 = vmul.f32 %v14784_v48, %v7139_v31  ;;  %v8114_v38 = vpack.c.bf16 %v7139_v31, %v7137_v39  ;;  %v6911_v1 = vpop.f32.mrb[28].mxu0  ;;  %v7432_v51 = vadd.f32 %v7277_v26, %v7276_v57 }
 0x7b6   : > { %v6912_v59 = vadd.f32 %v6911_v1, %v14765_v18  ;;  %v6913_v28 = vpop.f32.mrb[29].mxu0 }
 0x7b7   : > { %v6914_v56 = vadd.f32 %v6913_v28, %v14769_v33  ;;  %v6915_v42 = vpop.f32.mrb[30].mxu0  ;;  %8493 = vmatprep.mubr.bf16.mxu1 %v8114_v38  ;;  %7433 = vadd.xlane.f32.xlu0 %v7432_v51  ;;  %v7435_v54 = vadd.f32 %v7279_v11, %v7278_v0 }
 0x7b8   : > { %v7140_v46 = vmax.f32 %v6912_v59, 0.0  ;;  %v6916_v10 = vadd.f32 %v6915_v42, %v14765_v18  ;;  %v6917_v41 = vpop.f32.mrb[31].mxu0  ;;  %8494 = vmatmul.mubr.bf16.gmra.mrb[216].mxu1 %v8113_v6 }
 0x7b9   : > { %v7141_v34 = vmax.f32 %v6914_v56, 0.0  ;;  %v6918_v19 = vadd.f32 %v6917_v41, %v14769_v33  ;;  %7436 = vadd.xlane.f32.xlu1 %v7435_v54 }
 0x7ba   : > { %v7280_v16 = vmul.f32 %v14780_v45, %v7140_v46  ;;  %v7142_v24 = vmax.f32 %v6916_v10, 0.0 }
 0x7bb   : > { %v7281_v5 = vmul.f32 %v14784_v48, %v7141_v34  ;;  %v7143_v32 = vmax.f32 %v6918_v19, 0.0 }
 0x7bc   : > { %v7282_v9 = vmul.f32 %v14780_v45, %v7142_v24  ;;  %v8115_v21 = vpack.c.bf16 %v7142_v24, %v7140_v46 }
 0x7bd   : > { %v7283_v12 = vmul.f32 %v14784_v48, %v7143_v32  ;;  %v8116_v30 = vpack.c.bf16 %v7143_v32, %v7141_v34  ;;  %v6921_v23 = vpop.f32.mrb[32].mxu0  ;;  %v7438_v58 = vadd.f32 %v7281_v5, %v7280_v16  ;;  %v7604_v16 = vld [vmem:[%s14964_s17] sm:$0xff] }
 0x7be   : > { %v6922_v63 = vadd.f32 %v6921_v23, %v14765_v18  ;;  %v6923_v15 = vpop.f32.mrb[33].mxu0 }
 0x7bf   : > { %v6924_v29 = vadd.f32 %v6923_v15, %v14769_v33  ;;  %v6925_v55 = vpop.f32.mrb[34].mxu0  ;;  %8503 = vmatprep.mubr.bf16.mxu1 %v8116_v30  ;;  %7439 = vadd.xlane.f32.xlu0 %v7438_v58  ;;  %v7441_v53 = vadd.f32 %v7283_v12, %v7282_v9  ;;  %v7668_v30 = vsub.f32 0.0, %v7604_v16  ;;  %v7605_v15 = vld [vmem:[%s14964_s17 + $0x8] sm:$0xff] }
 0x7c0   : > { %v7144_v49 = vmax.f32 %v6922_v63, 0.0  ;;  %v6926_v52 = vadd.f32 %v6925_v55, %v14765_v18  ;;  %v6927_v13 = vpop.f32.mrb[35].mxu0  ;;  %8504 = vmatmul.mubr.bf16.gmra.mrb[220].mxu1 %v8115_v21 }
 0x7c1   : > { %v7145_v8 = vmax.f32 %v6924_v29, 0.0  ;;  %v6928_v17 = vadd.f32 %v6927_v13, %v14769_v33  ;;  %7442 = vadd.xlane.f32.xlu1 %v7441_v53 }
 0x7c2   : > { %v7284_v50 = vmul.f32 %v14780_v45, %v7144_v49  ;;  %v7146_v4 = vmax.f32 %v6926_v52, 0.0 }
 0x7c3   : > { %v7285_v14 = vmul.f32 %v14784_v48, %v7145_v8  ;;  %v7147_v27 = vmax.f32 %v6928_v17, 0.0 }
 0x7c4   : > { %v7286_v35 = vmul.f32 %v14780_v45, %v7146_v4  ;;  %v8117_v47 = vpack.c.bf16 %v7146_v4, %v7144_v49 }
 0x7c5   : > { %v7287_v44 = vmul.f32 %v14784_v48, %v7147_v27  ;;  %v8118_v37 = vpack.c.bf16 %v7147_v27, %v7145_v8  ;;  %v6931_v40 = vpop.f32.mrb[36].mxu0  ;;  %v7444_v3 = vadd.f32 %v7285_v14, %v7284_v50  ;;  %v7669_v14 = vsub.f32 0.0, %v7605_v15 }
 0x7c6   : > { %v6932_v22 = vadd.f32 %v6931_v40, %v14765_v18  ;;  %v6933_v25 = vpop.f32.mrb[37].mxu0 }
 0x7c7   : > { %v6934_v36 = vadd.f32 %v6933_v25, %v14769_v33  ;;  %v6935_v61 = vpop.f32.mrb[38].mxu0  ;;  %8513 = vmatprep.mubr.bf16.mxu1 %v8118_v37  ;;  %7445 = vadd.xlane.f32.xlu0 %v7444_v3  ;;  %v7447_v43 = vadd.f32 %v7287_v44, %v7286_v35  ;;  %v7606_v35 = vld [vmem:[%s14964_s17 + $0x10] sm:$0xff] }
 0x7c8   : > { %v7148_v7 = vmax.f32 %v6932_v22, 0.0  ;;  %v6936_v39 = vadd.f32 %v6935_v61, %v14765_v18  ;;  %v6937_v20 = vpop.f32.mrb[39].mxu0  ;;  %8514 = vmatmul.mubr.bf16.gmra.mrb[224].mxu1 %v8117_v47 }
 0x7c9   : > { %v7149_v57 = vmax.f32 %v6934_v36, 0.0  ;;  %v6938_v2 = vadd.f32 %v6937_v20, %v14769_v33  ;;  %7448 = vadd.xlane.f32.xlu1 %v7447_v43 }
 0x7ca   : > { %v7288_v26 = vmul.f32 %v14780_v45, %v7148_v7  ;;  %v7150_v31 = vmax.f32 %v6936_v39, 0.0 }
 0x7cb   : > { %v7289_v0 = vmul.f32 %v14784_v48, %v7149_v57  ;;  %v7151_v6 = vmax.f32 %v6938_v2, 0.0  ;;  %v7607_v2 = vld [vmem:[%s14964_s17 + $0x18] sm:$0xff] }
 0x7cc   : > { %v7290_v11 = vmul.f32 %v14780_v45, %v7150_v31  ;;  %v8119_v38 = vpack.c.bf16 %v7150_v31, %v7148_v7  ;;  %v7670_v7 = vsub.f32 0.0, %v7606_v35 }
 0x7cd   : > { %v7291_v1 = vmul.f32 %v14784_v48, %v7151_v6  ;;  %v8120_v51 = vpack.c.bf16 %v7151_v6, %v7149_v57  ;;  %v6941_v59 = vpop.f32.mrb[40].mxu0  ;;  %v7450_v28 = vadd.f32 %v7289_v0, %v7288_v26 }
 0x7ce   : > { %v6942_v56 = vadd.f32 %v6941_v59, %v14765_v18  ;;  %v6943_v42 = vpop.f32.mrb[41].mxu0 }
 0x7cf   : > { %v6944_v54 = vadd.f32 %v6943_v42, %v14769_v33  ;;  %v6945_v46 = vpop.f32.mrb[42].mxu0  ;;  %8523 = vmatprep.mubr.bf16.mxu1 %v8120_v51  ;;  %7451 = vadd.xlane.f32.xlu0 %v7450_v28  ;;  %v7453_v10 = vadd.f32 %v7291_v1, %v7290_v11  ;;  %v7671_v42 = vsub.f32 0.0, %v7607_v2 }
 0x7d0   : > { %v7152_v41 = vmax.f32 %v6942_v56, 0.0  ;;  %v6946_v34 = vadd.f32 %v6945_v46, %v14765_v18  ;;  %v6947_v19 = vpop.f32.mrb[43].mxu0  ;;  %8524 = vmatmul.mubr.bf16.gmra.mrb[228].mxu1 %v8119_v38 }
 0x7d1   : > { %v7153_v24 = vmax.f32 %v6944_v54, 0.0  ;;  %v6948_v5 = vadd.f32 %v6947_v19, %v14769_v33  ;;  %7454 = vadd.xlane.f32.xlu1 %v7453_v10 }
 0x7d2   : > { %v7292_v32 = vmul.f32 %v14780_v45, %v7152_v41  ;;  %v7154_v9 = vmax.f32 %v6946_v34, 0.0  ;;  %v7608_v34 = vld [vmem:[%s14964_s17 + $0x20] sm:$0xff] }
 0x7d3   : > { %v7293_v21 = vmul.f32 %v14784_v48, %v7153_v24  ;;  %v7155_v12 = vmax.f32 %v6948_v5, 0.0 }
 0x7d4   : > { %v7294_v23 = vmul.f32 %v14780_v45, %v7154_v9  ;;  %v8121_v58 = vpack.c.bf16 %v7154_v9, %v7152_v41  ;;  %v7350_v63 = vpop.xlane.xlu0 %7349 }
 0x7d5   : > { %v7295_v29 = vmul.f32 %v14784_v48, %v7155_v12  ;;  %v8122_v55 = vpack.c.bf16 %v7155_v12, %v7153_v24  ;;  %v7540_v53 = vmax.f32 %v7350_v63, 0.0  ;;  %v6951_v49 = vpop.f32.mrb[44].mxu0  ;;  %v7456_v52 = vadd.f32 %v7293_v21, %v7292_v32 }
 0x7d6   : > { %v6952_v13 = vadd.f32 %v6951_v49, %v14765_v18  ;;  %v6953_v8 = vpop.f32.mrb[45].mxu0  ;;  %v7672_v63 = vsub.f32 0.0, %v7608_v34 }
 0x7d7   : > { %v7732_v17 = vmul.f32 %v7668_v30, %v7540_v53  ;;  %v6954_v50 = vadd.f32 %v6953_v8, %v14769_v33  ;;  %v6955_v4 = vpop.f32.mrb[46].mxu0  ;;  %8533 = vmatprep.mubr.bf16.mxu1 %v8122_v55  ;;  %7457 = vadd.xlane.f32.xlu0 %v7456_v52  ;;  %v7459_v27 = vadd.f32 %v7295_v29, %v7294_v23  ;;  %v7609_v30 = vld [vmem:[%s14964_s17 + $0x28] sm:$0xff] }
 0x7d8   : > { %v7156_v47 = vmax.f32 %v6952_v13, 0.0  ;;  %v6956_v44 = vadd.f32 %v6955_v4, %v14765_v18  ;;  %v6957_v37 = vpop.f32.mrb[47].mxu0  ;;  %8534 = vmatmul.mubr.bf16.gmra.mrb[232].mxu1 %v8121_v58  ;;  %v7353_v40 = vpop.xlane.xlu0 %7352  ;;  %v7673_v13 = vsub.f32 0.0, %v7609_v30 }
 0x7d9   : > { %v7796_v3 = vmul.f32 1.442695, %v7732_v17  ;;  %v7157_v22 = vmax.f32 %v6954_v50, 0.0  ;;  %v6958_v25 = vadd.f32 %v6957_v37, %v14769_v33  ;;  %v7541_v36 = vmax.f32 %v7353_v40, 0.0  ;;  %7460 = vadd.xlane.f32.xlu1 %v7459_v27 }
 0x7da   : > { %v7296_v61 = vmul.f32 %v14780_v45, %v7156_v47  ;;  %v7158_v43 = vmax.f32 %v6956_v44, 0.0 }
 0x7db   : > { %11752 = vpow2.f32 %v7796_v3  ;;  %v7297_v39 = vmul.f32 %v14784_v48, %v7157_v22  ;;  %v7159_v20 = vmax.f32 %v6958_v25, 0.0  ;;  %v7733_v57 = vmul.f32 %v7669_v14, %v7541_v36 }
 0x7dc   : > { %v7298_v26 = vmul.f32 %v14780_v45, %v7158_v43  ;;  %v8123_v31 = vpack.c.bf16 %v7158_v43, %v7156_v47  ;;  %v7356_v0 = vpop.xlane.xlu1 %7355 }
 0x7dd   : > { %v7299_v6 = vmul.f32 %v14784_v48, %v7159_v20  ;;  %v8124_v11 = vpack.c.bf16 %v7159_v20, %v7157_v22  ;;  %v7798_v38 = vmul.f32 1.442695, %v7733_v57  ;;  %v7542_v1 = vmax.f32 %v7356_v0, 0.0  ;;  %v6961_v51 = vpop.f32.mrb[48].mxu0 }
 0x7de   : > { %v6962_v59 = vadd.f32 %v6961_v51, %v14765_v18  ;;  %v6963_v28 = vpop.f32.mrb[49].mxu0  ;;  %v7462_v56 = vadd.f32 %v7297_v39, %v7296_v61  ;;  %v7610_v61 = vld [vmem:[%s14964_s17 + $0x30] sm:$0xff] }
 0x7df   : > { %11754 = vpow2.f32 %v7798_v38  ;;  %v7734_v54 = vmul.f32 %v7670_v7, %v7542_v1  ;;  %v6964_v46 = vadd.f32 %v6963_v28, %v14769_v33  ;;  %v6965_v10 = vpop.f32.mrb[50].mxu0  ;;  %8543 = vmatprep.mubr.bf16.mxu1 %v8124_v11  ;;  %v7465_v41 = vadd.f32 %v7299_v6, %v7298_v26  ;;  %v7611_v6 = vld [vmem:[%s14964_s17 + $0x38] sm:$0xff] }
 0x7e0   : > { %v7160_v19 = vmax.f32 %v6962_v59, 0.0  ;;  %v6966_v16 = vadd.f32 %v6965_v10, %v14765_v18  ;;  %7463 = vadd.xlane.f32.xlu0 %v7462_v56  ;;  %v6967_v24 = vpop.f32.mrb[51].mxu0  ;;  %v7359_v5 = vpop.xlane.xlu1 %7358  ;;  %8544 = vmatmul.mubr.bf16.gmra.mrb[236].mxu1 %v8123_v31  ;;  %v7674_v51 = vsub.f32 0.0, %v7610_v61  ;;  %v7675_v10 = vsub.f32 0.0, %v7611_v6 }
 0x7e1   : > { %v7800_v32 = vmul.f32 1.442695, %v7734_v54  ;;  %v7161_v9 = vmax.f32 %v6964_v46, 0.0  ;;  %v6968_v21 = vadd.f32 %v6967_v24, %v14769_v33  ;;  %v7543_v12 = vmax.f32 %v7359_v5, 0.0  ;;  %7466 = vadd.xlane.f32.xlu1 %v7465_v41 }
 0x7e2   : > { %v7300_v23 = vmul.f32 %v14780_v45, %v7160_v19  ;;  %v7162_v58 = vmax.f32 %v6966_v16, 0.0 }
 0x7e3   : > { %11756 = vpow2.f32 %v7800_v32  ;;  %v7301_v15 = vmul.f32 %v14784_v48, %v7161_v9  ;;  %v7163_v29 = vmax.f32 %v6968_v21, 0.0  ;;  %v7735_v55 = vmul.f32 %v7671_v42, %v7543_v12 }
 0x7e4   : > { %v7302_v53 = vmul.f32 %v14780_v45, %v7162_v58  ;;  %v8125_v49 = vpack.c.bf16 %v7162_v58, %v7160_v19  ;;  %v7362_v52 = vpop.xlane.xlu0 %7361 }
 0x7e5   : > { %v11753_v8 = vpop.eup %11752  ;;  %v7303_v17 = vmul.f32 %v14784_v48, %v7163_v29  ;;  %v8126_v50 = vpack.c.bf16 %v7163_v29, %v7161_v9  ;;  %v7802_v4 = vmul.f32 1.442695, %v7735_v55  ;;  %v7544_v14 = vmax.f32 %v7362_v52, 0.0  ;;  %v6971_v27 = vpop.f32.mrb[52].mxu0  ;;  %v7612_v29 = vld [vmem:[%s14964_s17 + $0x40] sm:$0xff] }
 0x7e6   : > { %v7924_v35 = vsub.f32 1.0, %v11753_v8  ;;  %v6972_v47 = vadd.f32 %v6971_v27, %v14765_v18  ;;  %v6973_v44 = vpop.f32.mrb[53].mxu0  ;;  %v7365_v37 = vpop.xlane.xlu1 %7364  ;;  %v7468_v40 = vadd.f32 %v7301_v15, %v7300_v23 }
 0x7e7   : > { %11758 = vpow2.f32 %v7802_v4  ;;  %v7736_v3 = vmul.f32 %v7672_v63, %v7544_v14  ;;  %v6974_v22 = vadd.f32 %v6973_v44, %v14769_v33  ;;  %v7545_v25 = vmax.f32 %v7365_v37, 0.0  ;;  %v6975_v36 = vpop.f32.mrb[54].mxu0  ;;  %8553 = vmatprep.mubr.bf16.mxu1 %v8126_v50  ;;  %v7613_v4 = vld [vmem:[%s14964_s17 + $0x48] sm:$0xff] }
 0x7e8   : > { %7989 = vst.msk [vmem:[%s14999_s22] sm:$0xff] %vm7988_vm3, %v7924_v35  ;;  %v7164_v43 = vmax.f32 %v6972_v47, 0.0  ;;  %v6976_v7 = vadd.f32 %v6975_v36, %v14765_v18  ;;  %7469 = vadd.xlane.f32.xlu0 %v7468_v40  ;;  %v6977_v39 = vpop.f32.mrb[55].mxu0  ;;  %8554 = vmatmul.mubr.bf16.gmra.mrb[240].mxu1 %v8125_v49  ;;  %v7471_v20 = vadd.f32 %v7303_v17, %v7302_v53  ;;  %v7676_v47 = vsub.f32 0.0, %v7612_v29 }
 0x7e9   : > { %v11755_v57 = vpop.eup %11754  ;;  %v7804_v2 = vmul.f32 1.442695, %v7736_v3  ;;  %v7165_v26 = vmax.f32 %v6974_v22, 0.0  ;;  %v7737_v31 = vmul.f32 %v7673_v13, %v7545_v25  ;;  %v6978_v0 = vadd.f32 %v6977_v39, %v14769_v33 }
 0x7ea   : > { %v7925_v11 = vsub.f32 1.0, %v11755_v57  ;;  %v7304_v38 = vmul.f32 %v14780_v45, %v7164_v43  ;;  %v7166_v1 = vmax.f32 %v6976_v7, 0.0  ;;  %7472 = vadd.xlane.f32.xlu1 %v7471_v20  ;;  %v7677_v36 = vsub.f32 0.0, %v7613_v4 }
 0x7eb   : > { %11760 = vpow2.f32 %v7804_v2  ;;  %v7305_v59 = vmul.f32 %v14784_v48, %v7165_v26  ;;  %v7806_v28 = vmul.f32 1.442695, %v7737_v31  ;;  %v7167_v56 = vmax.f32 %v6978_v0, 0.0 }
 0x7ec   : > { %7990 = vst.msk [vmem:[%s14999_s22 + $0x8] sm:$0xff] %vm7988_vm3, %v7925_v11  ;;  %v7306_v42 = vmul.f32 %v14780_v45, %v7166_v1  ;;  %v8127_v54 = vpack.c.bf16 %v7166_v1, %v7164_v43  ;;  %v7368_v46 = vpop.xlane.xlu0 %7367 }
 0x7ed   : > { %v11757_v41 = vpop.eup %11756  ;;  %11762 = vpow2.f32 %v7806_v28  ;;  %v7307_v34 = vmul.f32 %v14784_v48, %v7167_v56  ;;  %v8128_v19 = vpack.c.bf16 %v7167_v56, %v7165_v26  ;;  %v7546_v16 = vmax.f32 %v7368_v46, 0.0  ;;  %v6981_v24 = vpop.f32.mrb[56].mxu0  ;;  %v7614_v28 = vld [vmem:[%s14964_s17 + $0x50] sm:$0xff] }
 0x7ee   : > { %v7926_v5 = vsub.f32 1.0, %v11757_v41  ;;  %v6982_v32 = vadd.f32 %v6981_v24, %v14765_v18  ;;  %v6983_v9 = vpop.f32.mrb[57].mxu0  ;;  %v7371_v21 = vpop.xlane.xlu1 %7370  ;;  %v7474_v12 = vadd.f32 %v7305_v59, %v7304_v38 }
 0x7ef   : > { %v7738_v30 = vmul.f32 %v7674_v51, %v7546_v16  ;;  %v6984_v23 = vadd.f32 %v6983_v9, %v14769_v33  ;;  %v7547_v58 = vmax.f32 %v7371_v21, 0.0  ;;  %v6985_v63 = vpop.f32.mrb[58].mxu0  ;;  %8563 = vmatprep.mubr.bf16.mxu1 %v8128_v19  ;;  %v7477_v15 = vadd.f32 %v7307_v34, %v7306_v42  ;;  %v7615_v16 = vld [vmem:[%s14964_s17 + $0x58] sm:$0xff] }
 0x7f0   : > { %7991 = vst.msk [vmem:[%s14999_s22 + $0x10] sm:$0xff] %vm7988_vm3, %v7926_v5  ;;  %v7168_v55 = vmax.f32 %v6982_v32, 0.0  ;;  %v6986_v53 = vadd.f32 %v6985_v63, %v14765_v18  ;;  %7475 = vadd.xlane.f32.xlu0 %v7474_v12  ;;  %v6987_v49 = vpop.f32.mrb[59].mxu0  ;;  %8564 = vmatmul.mubr.bf16.gmra.mrb[244].mxu1 %v8127_v54  ;;  %v7678_v32 = vsub.f32 0.0, %v7614_v28  ;;  %v7679_v63 = vsub.f32 0.0, %v7615_v16 }
 0x7f1   : > { %v11759_v52 = vpop.eup %11758  ;;  %v7808_v13 = vmul.f32 1.442695, %v7738_v30  ;;  %v7169_v8 = vmax.f32 %v6984_v23, 0.0  ;;  %v7739_v17 = vmul.f32 %v7675_v10, %v7547_v58  ;;  %v6988_v50 = vadd.f32 %v6987_v49, %v14769_v33  ;;  %7478 = vadd.xlane.f32.xlu1 %v7477_v15 }
 0x7f2   : > { %v7927_v14 = vsub.f32 1.0, %v11759_v52  ;;  %v7308_v27 = vmul.f32 %v14780_v45, %v7168_v55  ;;  %v7170_v35 = vmax.f32 %v6986_v53, 0.0 }
 0x7f3   : > { %11764 = vpow2.f32 %v7808_v13  ;;  %v7309_v44 = vmul.f32 %v14784_v48, %v7169_v8  ;;  %v7810_v37 = vmul.f32 1.442695, %v7739_v17  ;;  %v7171_v40 = vmax.f32 %v6988_v50, 0.0 }
 0x7f4   : > { %7992 = vst.msk [vmem:[%s14999_s22 + $0x18] sm:$0xff] %vm7988_vm3, %v7927_v14  ;;  %v7310_v3 = vmul.f32 %v14780_v45, %v7170_v35  ;;  %v8129_v22 = vpack.c.bf16 %v7170_v35, %v7168_v55  ;;  %v7374_v25 = vpop.xlane.xlu0 %7373 }
 0x7f5   : > { %v11761_v61 = vpop.eup %11760  ;;  %11766 = vpow2.f32 %v7810_v37  ;;  %v7311_v43 = vmul.f32 %v14784_v48, %v7171_v40  ;;  %v8130_v7 = vpack.c.bf16 %v7171_v40, %v7169_v8  ;;  %v7548_v39 = vmax.f32 %v7374_v25, 0.0  ;;  %v6991_v20 = vpop.f32.mrb[60].mxu0  ;;  %v7616_v37 = vld [vmem:[%s14964_s17 + $0x60] sm:$0xff] }
 0x7f6   : > { %v7928_v57 = vsub.f32 1.0, %v11761_v61  ;;  %v6992_v2 = vadd.f32 %v6991_v20, %v14765_v18  ;;  %v6993_v26 = vpop.f32.mrb[61].mxu0  ;;  %v7377_v31 = vpop.xlane.xlu1 %7376  ;;  %v7480_v0 = vadd.f32 %v7309_v44, %v7308_v27 }
 0x7f7   : > { %v11763_v6 = vpop.eup %11762  ;;  %v7740_v11 = vmul.f32 %v7676_v47, %v7548_v39  ;;  %v6994_v38 = vadd.f32 %v6993_v26, %v14769_v33  ;;  %v7549_v1 = vmax.f32 %v7377_v31, 0.0  ;;  %v6995_v51 = vpop.f32.mrb[62].mxu0  ;;  %8573 = vmatprep.mubr.bf16.mxu1 %v8130_v7  ;;  %v7483_v59 = vadd.f32 %v7311_v43, %v7310_v3  ;;  %v7617_v39 = vld [vmem:[%s14964_s17 + $0x68] sm:$0xff] }
 0x7f8   : > { %7993 = vst.msk [vmem:[%s14999_s22 + $0x20] sm:$0xff] %vm7988_vm3, %v7928_v57  ;;  %v7929_v56 = vsub.f32 1.0, %v11763_v6  ;;  %v7172_v42 = vmax.f32 %v6992_v2, 0.0  ;;  %v6996_v54 = vadd.f32 %v6995_v51, %v14765_v18  ;;  %7481 = vadd.xlane.f32.xlu0 %v7480_v0  ;;  %v6997_v46 = vpop.f32.mrb[63].mxu0  ;;  %8574 = vmatmul.mubr.bf16.gmra.mrb[248].mxu1 %v8129_v22  ;;  %v7680_v2 = vsub.f32 0.0, %v7616_v37 }
 0x7f9   : > { %v7812_v10 = vmul.f32 1.442695, %v7740_v11  ;;  %v7173_v41 = vmax.f32 %v6994_v38, 0.0  ;;  %v7741_v34 = vmul.f32 %v7677_v36, %v7549_v1  ;;  %v6998_v19 = vadd.f32 %v6997_v46, %v14769_v33  ;;  %7484 = vadd.xlane.f32.xlu1 %v7483_v59 }
 0x7fa   : > { %7994 = vst.msk [vmem:[%s14999_s22 + $0x28] sm:$0xff] %vm7988_vm3, %v7929_v56  ;;  %v7312_v24 = vmul.f32 %v14780_v45, %v7172_v42  ;;  %v7174_v5 = vmax.f32 %v6996_v54, 0.0  ;;  %v7681_v1 = vsub.f32 0.0, %v7617_v39 }
 0x7fb   : > { %11768 = vpow2.f32 %v7812_v10  ;;  %v7313_v9 = vmul.f32 %v14784_v48, %v7173_v41  ;;  %v7814_v21 = vmul.f32 1.442695, %v7741_v34  ;;  %v7175_v12 = vmax.f32 %v6998_v19, 0.0 }
 0x7fc   : > { %v7314_v30 = vmul.f32 %v14780_v45, %v7174_v5  ;;  %v8131_v23 = vpack.c.bf16 %v7174_v5, %v7172_v42  ;;  %v7380_v58 = vpop.xlane.xlu0 %7379 }
 0x7fd   : > { %v11765_v15 = vpop.eup %11764  ;;  %11770 = vpow2.f32 %v7814_v21  ;;  %v7315_v29 = vmul.f32 %v14784_v48, %v7175_v12  ;;  %v8132_v55 = vpack.c.bf16 %v7175_v12, %v7173_v41  ;;  %v7550_v53 = vmax.f32 %v7380_v58, 0.0  ;;  %v7001_v49 = vpop.f32.mrb[64].mxu0  ;;  %v7618_v21 = vld [vmem:[%s14964_s17 + $0x70] sm:$0xff] }
 0x7fe   : > { %v7930_v52 = vsub.f32 1.0, %v11765_v15  ;;  %v7002_v13 = vadd.f32 %v7001_v49, %v14765_v18  ;;  %v7003_v8 = vpop.f32.mrb[65].mxu0  ;;  %v7383_v17 = vpop.xlane.xlu1 %7382  ;;  %v7486_v50 = vadd.f32 %v7313_v9, %v7312_v24 }
 0x7ff   : > { %v11767_v4 = vpop.eup %11766  ;;  %v7742_v14 = vmul.f32 %v7678_v32, %v7550_v53  ;;  %v7004_v27 = vadd.f32 %v7003_v8, %v14769_v33  ;;  %v7551_v35 = vmax.f32 %v7383_v17, 0.0  ;;  %v7005_v47 = vpop.f32.mrb[66].mxu0  ;;  %8583 = vmatprep.mubr.bf16.mxu1 %v8132_v55  ;;  %v7489_v44 = vadd.f32 %v7315_v29, %v7314_v30  ;;  %v7619_v53 = vld [vmem:[%s14964_s17 + $0x78] sm:$0xff] }
 0x800   : > { %7995 = vst.msk [vmem:[%s14999_s22 + $0x30] sm:$0xff] %vm7988_vm3, %v7930_v52  ;;  %v7931_v40 = vsub.f32 1.0, %v11767_v4  ;;  %v7176_v3 = vmax.f32 %v7002_v13, 0.0  ;;  %v7006_v22 = vadd.f32 %v7005_v47, %v14765_v18  ;;  %7487 = vadd.xlane.f32.xlu0 %v7486_v50  ;;  %v7007_v25 = vpop.f32.mrb[67].mxu0  ;;  %8584 = vmatmul.mubr.bf16.gmra.mrb[252].mxu1 %v8131_v23  ;;  %v7682_v13 = vsub.f32 0.0, %v7618_v21 }
 0x801   : > { %v7816_v36 = vmul.f32 1.442695, %v7742_v14  ;;  %v7177_v61 = vmax.f32 %v7004_v27, 0.0  ;;  %v7743_v43 = vmul.f32 %v7679_v63, %v7551_v35  ;;  %v7008_v7 = vadd.f32 %v7007_v25, %v14769_v33  ;;  %7490 = vadd.xlane.f32.xlu1 %v7489_v44 }
 0x802   : > { %7996 = vst.msk [vmem:[%s14999_s22 + $0x38] sm:$0xff] %vm7988_vm3, %v7931_v40  ;;  %v7316_v20 = vmul.f32 %v14780_v45, %v7176_v3  ;;  %v7178_v57 = vmax.f32 %v7006_v22, 0.0  ;;  %v7683_v35 = vsub.f32 0.0, %v7619_v53  ;;  %v7620_v22 = vld [vmem:[%s14964_s17 + $0x80] sm:$0xff] }
 0x803   : > { %11772 = vpow2.f32 %v7816_v36  ;;  %v7317_v26 = vmul.f32 %v14784_v48, %v7177_v61  ;;  %v7818_v31 = vmul.f32 1.442695, %v7743_v43  ;;  %v7179_v0 = vmax.f32 %v7008_v7, 0.0  ;;  %v15109_v53 = vld [vmem:[%s14964_s17 + $0xa0] sm:$0xff] }
 0x804   : > { %v7318_v6 = vmul.f32 %v14780_v45, %v7178_v57  ;;  %v8133_v11 = vpack.c.bf16 %v7178_v57, %v7176_v3  ;;  %v7386_v38 = vpop.xlane.xlu0 %7385 }
 0x805   : > { %v11769_v51 = vpop.eup %11768  ;;  %11774 = vpow2.f32 %v7818_v31  ;;  %v7319_v59 = vmul.f32 %v14784_v48, %v7179_v0  ;;  %v8134_v28 = vpack.c.bf16 %v7179_v0, %v7177_v61  ;;  %v7552_v56 = vmax.f32 %v7386_v38, 0.0  ;;  %v7011_v42 = vpop.f32.mrb[68].mxu0  ;;  %v15076_v0 = vld [vmem:[%s14964_s17 + $0x88] sm:$0xff] }
 0x806   : > { %v7932_v54 = vsub.f32 1.0, %v11769_v51  ;;  %v7012_v46 = vadd.f32 %v7011_v42, %v14765_v18  ;;  %v7013_v10 = vpop.f32.mrb[69].mxu0  ;;  %v7389_v41 = vpop.xlane.xlu1 %7388  ;;  %v7492_v34 = vadd.f32 %v7317_v26, %v7316_v20 }
 0x807   : > { %v11771_v19 = vpop.eup %11770  ;;  %v7744_v16 = vmul.f32 %v7680_v2, %v7552_v56  ;;  %v7014_v24 = vadd.f32 %v7013_v10, %v14769_v33  ;;  %v7553_v5 = vmax.f32 %v7389_v41, 0.0  ;;  %v7015_v32 = vpop.f32.mrb[70].mxu0  ;;  %8593 = vmatprep.mubr.bf16.mxu1 %v8134_v28  ;;  %v7495_v9 = vadd.f32 %v7319_v59, %v7318_v6  ;;  %v8149_v6 = vld [vmem:[%s15756_s10] sm:$0x3] }
 0x808   : > { %7997 = vst.msk [vmem:[%s14999_s22 + $0x40] sm:$0xff] %vm7988_vm3, %v7932_v54  ;;  %v7933_v12 = vsub.f32 1.0, %v11771_v19  ;;  %v7180_v30 = vmax.f32 %v7012_v46, 0.0  ;;  %v7016_v23 = vadd.f32 %v7015_v32, %v14765_v18  ;;  %7493 = vadd.xlane.f32.xlu0 %v7492_v34  ;;  %v7017_v58 = vpop.f32.mrb[71].mxu0  ;;  %8594 = vmatmul.mubr.bf16.gmra.mrb[0].mxu1 %v8133_v11  ;;  %v7684_v59 = vsub.f32 0.0, %v7620_v22  ;;  %v15086_v46 = vld [vmem:[%s14964_s17 + $0x90] sm:$0xff] }
 0x809   : > { %v7820_v63 = vmul.f32 1.442695, %v7744_v16  ;;  %v7181_v15 = vmax.f32 %v7014_v24, 0.0  ;;  %v7745_v29 = vmul.f32 %v7681_v1, %v7553_v5  ;;  %v7018_v55 = vadd.f32 %v7017_v58, %v14769_v33  ;;  %7496 = vadd.xlane.f32.xlu1 %v7495_v9  ;;  %v11744_v16 = vld [vmem:[%s15759_s13] sm:$0xff]   ;;  %v15100_v9 = vld [vmem:[%s14964_s17 + $0x98] sm:$0xff] }
 0x80a   : > { %7998 = vst.msk [vmem:[%s14999_s22 + $0x48] sm:$0xff] %vm7988_vm3, %v7933_v12  ;;  %v7320_v49 = vmul.f32 %v14780_v45, %v7180_v30  ;;  %v7182_v52 = vmax.f32 %v7016_v23, 0.0  ;;  %v7685_v34 = vsub.f32 0.0, %v15076_v0  ;;  %v15093_v19 = vrot.slane %v8149_v6, %v12710_v60  ;;  %11104 = vmatprep.subr.bf16.mxu1 %v11744_v16 }
 0x80b   : > { %11776 = vpow2.f32 %v7820_v63  ;;  %v7321_v8 = vmul.f32 %v14784_v48, %v7181_v15  ;;  %v7822_v17 = vmul.f32 1.442695, %v7745_v29  ;;  %v7183_v50 = vmax.f32 %v7018_v55, 0.0  ;;  %11105 = vmatpush3.bf16.msra.mxu1 %v11744_v16 }
 0x80c   : > { %v7322_v4 = vmul.f32 %v14780_v45, %v7182_v52  ;;  %v8135_v14 = vpack.c.bf16 %v7182_v52, %v7180_v30  ;;  %v7392_v27 = vpop.xlane.xlu0 %7391  ;;  %v15104_v23 = vrot.slane %v8149_v6, %v12715_v62  ;;  %v7686_v60 = vsub.f32 0.0, %v15086_v46 }
 0x80d   : > { %v11773_v47 = vpop.eup %11772  ;;  %11778 = vpow2.f32 %v7822_v17  ;;  %v7323_v44 = vmul.f32 %v14784_v48, %v7183_v50  ;;  %v8136_v37 = vpack.c.bf16 %v7183_v50, %v7181_v15  ;;  %v7554_v40 = vmax.f32 %v7392_v27, 0.0  ;;  %v7021_v3 = vpop.f32.mrb[72].mxu0 }
 0x80e   : > { %v7934_v25 = vsub.f32 1.0, %v11773_v47  ;;  %v7022_v36 = vadd.f32 %v7021_v3, %v14765_v18  ;;  %v7023_v61 = vpop.f32.mrb[73].mxu0  ;;  %v7395_v43 = vpop.xlane.xlu1 %7394  ;;  %v7498_v7 = vadd.f32 %v7321_v8, %v7320_v49  ;;  %v7687_v17 = vsub.f32 0.0, %v15100_v9 }
 0x80f   : > { %v11775_v39 = vpop.eup %11774  ;;  %v7746_v20 = vmul.f32 %v7682_v13, %v7554_v40  ;;  %v7024_v57 = vadd.f32 %v7023_v61, %v14769_v33  ;;  %v7555_v2 = vmax.f32 %v7395_v43, 0.0  ;;  %v7025_v26 = vpop.f32.mrb[74].mxu0  ;;  %8603 = vmatprep.mubr.bf16.mxu1 %v8136_v37  ;;  %v7501_v31 = vadd.f32 %v7323_v44, %v7322_v4  ;;  %v15115_v44 = vld [vmem:[%s14964_s17 + $0xa8] sm:$0xff]  ;;  %v15118_v37 = vld [vmem:[%s14964_s17 + $0xb0] sm:$0xff] }
 0x810   : > { %7999 = vst.msk [vmem:[%s14999_s22 + $0x50] sm:$0xff] %vm7988_vm3, %v7934_v25  ;;  %v7935_v11 = vsub.f32 1.0, %v11775_v39  ;;  %v7184_v38 = vmax.f32 %v7022_v36, 0.0  ;;  %v7026_v1 = vadd.f32 %v7025_v26, %v14765_v18  ;;  %7499 = vadd.xlane.f32.xlu0 %v7498_v7  ;;  %v7027_v51 = vpop.f32.mrb[75].mxu0  ;;  %8604 = vmatmul.mubr.bf16.gmra.mrb[4].mxu1 %v8135_v14  ;;  %v7688_v36 = vsub.f32 0.0, %v15109_v53 }
 0x811   : > { %v7824_v28 = vmul.f32 1.442695, %v7746_v20  ;;  %v7185_v56 = vmax.f32 %v7024_v57, 0.0  ;;  %v7747_v42 = vmul.f32 %v7683_v35, %v7555_v2  ;;  %v7028_v54 = vadd.f32 %v7027_v51, %v14769_v33  ;;  %7502 = vadd.xlane.f32.xlu1 %v7501_v31  ;;  %v15126_v20 = vld [vmem:[%s14964_s17 + $0xb8] sm:$0xff] }
 0x812   : > { %8000 = vst.msk [vmem:[%s14999_s22 + $0x58] sm:$0xff] %vm7988_vm3, %v7935_v11  ;;  %v7324_v10 = vmul.f32 %v14780_v45, %v7184_v38  ;;  %v7186_v41 = vmax.f32 %v7026_v1, 0.0  ;;  %v7689_v26 = vsub.f32 0.0, %v15115_v44  ;;  %v7690_v31 = vsub.f32 0.0, %v15118_v37 }
 0x813   : > { %11780 = vpow2.f32 %v7824_v28  ;;  %v7325_v24 = vmul.f32 %v14784_v48, %v7185_v56  ;;  %v7826_v5 = vmul.f32 1.442695, %v7747_v42  ;;  %v7187_v32 = vmax.f32 %v7028_v54, 0.0 }
 0x814   : > { %v7326_v21 = vmul.f32 %v14780_v45, %v7186_v41  ;;  %v8137_v12 = vpack.c.bf16 %v7186_v41, %v7184_v38  ;;  %v7398_v30 = vpop.xlane.xlu0 %7397  ;;  %v7691_v42 = vsub.f32 0.0, %v15126_v20 }
 0x815   : > { %v11777_v58 = vpop.eup %11776  ;;  %11782 = vpow2.f32 %v7826_v5  ;;  %v7327_v63 = vmul.f32 %v14784_v48, %v7187_v32  ;;  %v8138_v15 = vpack.c.bf16 %v7187_v32, %v7185_v56  ;;  %v7556_v29 = vmax.f32 %v7398_v30, 0.0  ;;  %v7031_v55 = vpop.f32.mrb[76].mxu0 }
 0x816   : > { %v7936_v49 = vsub.f32 1.0, %v11777_v58  ;;  %v7032_v62 = vadd.f32 %v7031_v55, %v14765_v18  ;;  %v7033_v52 = vpop.f32.mrb[77].mxu0  ;;  %v7401_v13 = vpop.xlane.xlu1 %7400  ;;  %v7504_v8 = vadd.f32 %v7325_v24, %v7324_v10 }
 0x817   : > { %v11779_v50 = vpop.eup %11778  ;;  %v7748_v4 = vmul.f32 %v7684_v59, %v7556_v29  ;;  %v7034_v14 = vadd.f32 %v7033_v52, %v14769_v33  ;;  %v7557_v27 = vmax.f32 %v7401_v13, 0.0  ;;  %v7035_v35 = vpop.f32.mrb[78].mxu0  ;;  %8613 = vmatprep.mubr.bf16.mxu1 %v8138_v15  ;;  %v7507_v47 = vadd.f32 %v7327_v63, %v7326_v21  ;;  %v15145_v13 = vld [vmem:[%s14964_s17 + $0xc0] sm:$0xff] }
 0x818   : > { %8001 = vst.msk [vmem:[%s14999_s22 + $0x60] sm:$0xff] %vm7988_vm3, %v7936_v49  ;;  %v7937_v40 = vsub.f32 1.0, %v11779_v50  ;;  %v7188_v3 = vmax.f32 %v7032_v62, 0.0  ;;  %v7036_v22 = vadd.f32 %v7035_v35, %v14765_v18  ;;  %7505 = vadd.xlane.f32.xlu0 %v7504_v8  ;;  %v7037_v25 = vpop.f32.mrb[79].mxu0  ;;  %8614 = vmatmul.mubr.bf16.gmra.mrb[8].mxu1 %v8137_v12  ;;  %v15148_v8 = vld [vmem:[%s14964_s17 + $0xc8] sm:$0xff] }
 0x819   : > { %v7828_v61 = vmul.f32 1.442695, %v7748_v4  ;;  %v7189_v43 = vmax.f32 %v7034_v14, 0.0  ;;  %v7749_v7 = vmul.f32 %v7685_v34, %v7557_v27  ;;  %v7038_v39 = vadd.f32 %v7037_v25, %v14769_v33  ;;  %7508 = vadd.xlane.f32.xlu1 %v7507_v47 }
 0x81a   : > { %8002 = vst.msk [vmem:[%s14999_s22 + $0x68] sm:$0xff] %vm7988_vm3, %v7937_v40  ;;  %v7328_v57 = vmul.f32 %v14780_v45, %v7188_v3  ;;  %v7190_v2 = vmax.f32 %v7036_v22, 0.0 }
 0x81b   : > { %11784 = vpow2.f32 %v7828_v61  ;;  %v7329_v0 = vmul.f32 %v14784_v48, %v7189_v43  ;;  %v7830_v6 = vmul.f32 1.442695, %v7749_v7  ;;  %v7191_v11 = vmax.f32 %v7038_v39, 0.0  ;;  %v8355_v38 = vpop.f32.mrb[160].mxu1 }
 0x81c   : > { %v7330_v1 = vmul.f32 %v14780_v45, %v7190_v2  ;;  %v8139_v51 = vpack.c.bf16 %v7190_v2, %v7188_v3  ;;  %v15136_v59 = vadd.f32 %v8355_v38, %v15093_v19  ;;  %v8357_v28 = vpop.f32.mrb[161].mxu1  ;;  %v7404_v56 = vpop.xlane.xlu0 %7403  ;;  %v7693_v61 = vsub.f32 0.0, %v15148_v8 }
 0x81d   : > { %v11781_v54 = vpop.eup %11780  ;;  %11786 = vpow2.f32 %v7830_v6  ;;  %v7331_v10 = vmul.f32 %v14784_v48, %v7191_v11  ;;  %v8140_v41 = vpack.c.bf16 %v7191_v11, %v7189_v43  ;;  %v8358_v34 = vadd.f32 %v8357_v28, %v15104_v23  ;;  %v7041_v16 = vpop.f32.mrb[80].mxu0 }
 0x81e   : > { %v8359_v24 = vpop.f32.mrb[162].mxu1  ;;  %v7938_v5 = vsub.f32 1.0, %v11781_v54  ;;  %v7558_v32 = vmax.f32 %v7404_v56, 0.0  ;;  %v7042_v21 = vadd.f32 %v7041_v16, %v14765_v18  ;;  %v7043_v30 = vpop.f32.mrb[81].mxu0  ;;  %v7510_v62 = vadd.f32 %v7329_v0, %v7328_v57 }
 0x81f   : > { %v8360_v12 = vadd.f32 %v8359_v24, %v15093_v19  ;;  %v7407_v58 = vpop.xlane.xlu1 %7406  ;;  %v11783_v63 = vpop.eup %11782  ;;  %v7044_v15 = vadd.f32 %v7043_v30, %v14769_v33  ;;  %8623 = vmatprep.mubr.bf16.mxu1 %v8140_v41  ;;  %v7513_v52 = vadd.f32 %v7331_v10, %v7330_v1 }
 0x820   : > { %v7559_v29 = vmax.f32 %v7407_v58, 0.0  ;;  %v8361_v55 = vpop.f32.mrb[163].mxu1  ;;  %v7045_v49 = vpop.f32.mrb[82].mxu0  ;;  %8003 = vst.msk [vmem:[%s14999_s22 + $0x70] sm:$0xff] %vm7988_vm3, %v7938_v5  ;;  %v7939_v50 = vsub.f32 1.0, %v11783_v63  ;;  %v7750_v4 = vmul.f32 %v7686_v60, %v7558_v32  ;;  %v7192_v14 = vmax.f32 %v7042_v21, 0.0  ;;  %8624 = vmatmul.mubr.bf16.gmra.mrb[12].mxu1 %v8139_v51  ;;  %7511 = vadd.xlane.f32.xlu0 %v7510_v62 }
 0x821   : > { %v8706_v27 = vpack.c.bf16 %v8360_v12, %v15136_v59  ;;  %v7047_v35 = vpop.f32.mrb[83].mxu0  ;;  %v7193_v47 = vmax.f32 %v7044_v15, 0.0  ;;  %v8362_v3 = vadd.f32 %v8361_v55, %v15104_v23  ;;  %v7046_v22 = vadd.f32 %v7045_v49, %v14765_v18  ;;  %7514 = vadd.xlane.f32.xlu1 %v7513_v52 }
 0x822   : > { %v7751_v40 = vmul.f32 %v7687_v17, %v7559_v29  ;;  %8004 = vst.msk [vmem:[%s14999_s22 + $0x78] sm:$0xff] %vm7988_vm3, %v7939_v50  ;;  %v7832_v25 = vmul.f32 1.442695, %v7750_v4  ;;  %v7048_v46 = vadd.f32 %v7047_v35, %v14769_v33  ;;  %v7692_v60 = vsub.f32 0.0, %v15145_v13 }
 0x823   : > { %v7332_v43 = vmul.f32 %v14780_v45, %v7192_v14  ;;  %v8707_v9 = vpack.c.bf16 %v8362_v3, %v8358_v34  ;;  %v7194_v17 = vmax.f32 %v7046_v22, 0.0  ;;  %v8365_v39 = vpop.f32.mrb[164].mxu1  ;;  %v7333_v57 = vmul.f32 %v14784_v48, %v7193_v47 }
 0x824   : > { %v7834_v7 = vmul.f32 1.442695, %v7751_v40  ;;  %11788 = vpow2.f32 %v7832_v25  ;;  %v7195_v2 = vmax.f32 %v7048_v46, 0.0  ;;  %v15167_v0 = vadd.f32 %v8365_v39, %v15093_v19  ;;  %v8367_v6 = vpop.f32.mrb[165].mxu1  ;;  %v7410_v11 = vpop.xlane.xlu0 %7409 }
 0x825   : > { %v11785_v38 = vpop.eup %11784  ;;  %v7334_v1 = vmul.f32 %v14780_v45, %v7194_v17  ;;  %v8141_v51 = vpack.c.bf16 %v7194_v17, %v7192_v14  ;;  %9026 = vmatprep.mubr.bf16.mxu0 %v8707_v9  ;;  %v8368_v59 = vadd.f32 %v8367_v6, %v15104_v23  ;;  %v7051_v28 = vpop.f32.mrb[84].mxu0  ;;  %v7560_v34 = vmax.f32 %v7410_v11, 0.0 }
 0x826   : > { %11790 = vpow2.f32 %v7834_v7  ;;  %v8369_v56 = vpop.f32.mrb[166].mxu1  ;;  %v7940_v54 = vsub.f32 1.0, %v11785_v38  ;;  %v7335_v10 = vmul.f32 %v14784_v48, %v7195_v2  ;;  %v8142_v41 = vpack.c.bf16 %v7195_v2, %v7193_v47  ;;  %9027 = vmatmul.mubr.bf16.vlgmr.msra.gmra.mrb[96].mxu0 %v8706_v27  ;;  %v7053_v16 = vpop.f32.mrb[85].mxu0 }
 0x827   : > { %v7413_v24 = vpop.xlane.xlu1 %7412  ;;  %v11787_v5 = vpop.eup %11786  ;;  %v7052_v32 = vadd.f32 %v7051_v28, %v14765_v18  ;;  %v8370_v21 = vadd.f32 %v8369_v56, %v15093_v19  ;;  %v7054_v12 = vadd.f32 %v7053_v16, %v14769_v33  ;;  %v7752_v29 = vmul.f32 %v7688_v36, %v7560_v34 }
 0x828   : > { %v7561_v30 = vmax.f32 %v7413_v24, 0.0  ;;  %v8371_v58 = vpop.f32.mrb[167].mxu1  ;;  %v7055_v63 = vpop.f32.mrb[86].mxu0  ;;  %8005 = vst.msk [vmem:[%s14999_s22 + $0x80] sm:$0xff] %vm7988_vm3, %v7940_v54  ;;  %v7941_v15 = vsub.f32 1.0, %v11787_v5  ;;  %8633 = vmatprep.mubr.bf16.mxu1 %v8142_v41  ;;  %v7516_v36 = vadd.f32 %v7333_v57, %v7332_v43  ;;  %v15199_v24 = vld [vmem:[%s14964_s17 + $0xd0] sm:$0xff] }
 0x829   : > { %v8372_v55 = vadd.f32 %v8371_v58, %v15104_v23  ;;  %v7056_v49 = vadd.f32 %v7055_v63, %v14765_v18  ;;  %v7057_v62 = vpop.f32.mrb[87].mxu0  ;;  %v7196_v52 = vmax.f32 %v7052_v32, 0.0  ;;  %v8708_v50 = vpack.c.bf16 %v8370_v21, %v15167_v0  ;;  %8634 = vmatmul.mubr.bf16.gmra.mrb[16].mxu1 %v8141_v51 }
 0x82a   : > { %v7197_v4 = vmax.f32 %v7054_v12, 0.0  ;;  %v7753_v14 = vmul.f32 %v7689_v26, %v7561_v30  ;;  %8006 = vst.msk [vmem:[%s14999_s22 + $0x88] sm:$0xff] %vm7988_vm3, %v7941_v15  ;;  %v7836_v27 = vmul.f32 1.442695, %v7752_v29  ;;  %v7058_v22 = vadd.f32 %v7057_v62, %v14769_v33  ;;  %7517 = vadd.xlane.f32.xlu0 %v7516_v36  ;;  %v11745_v62 = vld [vmem:[%s15759_s13 + $0x8] sm:$0xff]  }
 0x82b   : > { %v8709_v35 = vpack.c.bf16 %v8372_v55, %v8368_v59  ;;  %v7198_v53 = vmax.f32 %v7056_v49, 0.0  ;;  %v7336_v47 = vmul.f32 %v14780_v45, %v7196_v52  ;;  %v8375_v25 = vpop.f32.mrb[168].mxu1  ;;  %v7519_v26 = vadd.f32 %v7335_v10, %v7334_v1  ;;  %11106 = vmatprep.subr.bf16.mxu1 %v11745_v62 }
 0x82c   : > { %v7337_v40 = vmul.f32 %v14784_v48, %v7197_v4  ;;  %v7838_v3 = vmul.f32 1.442695, %v7753_v14  ;;  %11792 = vpow2.f32 %v7836_v27  ;;  %v8377_v7 = vpop.f32.mrb[169].mxu1  ;;  %v7416_v9 = vpop.xlane.xlu0 %7415  ;;  %v7199_v17 = vmax.f32 %v7058_v22, 0.0  ;;  %11107 = vmatpush3.bf16.msra.mxu1 %v11745_v62 }
 0x82d   : > { %v7338_v46 = vmul.f32 %v14780_v45, %v7198_v53  ;;  %v8143_v44 = vpack.c.bf16 %v7198_v53, %v7196_v52  ;;  %9034 = vmatprep.mubr.bf16.mxu0 %v8709_v35  ;;  %v15191_v43 = vadd.f32 %v8375_v25, %v15093_v19  ;;  %v8378_v39 = vadd.f32 %v8377_v7, %v15104_v23  ;;  %v7061_v57 = vpop.f32.mrb[88].mxu0  ;;  %v8379_v2 = vpop.f32.mrb[170].mxu1 }
 0x82e   : > { %11794 = vpow2.f32 %v7838_v3  ;;  %v11789_v0 = vpop.eup %11788  ;;  %7520 = vadd.xlane.f32.xlu1 %v7519_v26  ;;  %v7562_v6 = vmax.f32 %v7416_v9, 0.0  ;;  %9035 = vmatmul.mubr.bf16.gmra.mrb[100].mxu0 %v8708_v50  ;;  %v7062_v11 = vadd.f32 %v7061_v57, %v14765_v18  ;;  %v8380_v38 = vadd.f32 %v8379_v2, %v15093_v19  ;;  %v7063_v1 = vpop.f32.mrb[89].mxu0 }
 0x82f   : > { %v7419_v51 = vpop.xlane.xlu1 %7418  ;;  %v7522_v59 = vadd.f32 %v7337_v40, %v7336_v47  ;;  %v7942_v56 = vsub.f32 1.0, %v11789_v0  ;;  %v7339_v54 = vmul.f32 %v14784_v48, %v7199_v17  ;;  %v8144_v10 = vpack.c.bf16 %v7199_v17, %v7197_v4  ;;  %v8381_v34 = vpop.f32.mrb[171].mxu1 }
 0x830   : > { %v11791_v28 = vpop.eup %11790  ;;  %v7064_v41 = vadd.f32 %v7063_v1, %v14769_v33  ;;  %v7065_v16 = vpop.f32.mrb[90].mxu0  ;;  %v7754_v32 = vmul.f32 %v7690_v31, %v7562_v6  ;;  %v7200_v21 = vmax.f32 %v7062_v11, 0.0  ;;  %v8710_v12 = vpack.c.bf16 %v8380_v38, %v15191_v43 }
 0x831   : > { %v7943_v5 = vsub.f32 1.0, %v11791_v28  ;;  %7523 = vadd.xlane.f32.xlu0 %v7522_v59  ;;  %v7067_v30 = vpop.f32.mrb[91].mxu0  ;;  %8007 = vst.msk [vmem:[%s14999_s22 + $0x90] sm:$0xff] %vm7988_vm3, %v7942_v56  ;;  %v7563_v63 = vmax.f32 %v7419_v51, 0.0  ;;  %v8382_v15 = vadd.f32 %v8381_v34, %v15104_v23  ;;  %v7066_v29 = vadd.f32 %v7065_v16, %v14765_v18  ;;  %8643 = vmatprep.mubr.bf16.mxu1 %v8144_v10  ;;  %v7631_v16 = vld [vmem:[%s14964_s17 + $0xd8] sm:$0xff] }
 0x832   : > { %v7201_v58 = vmax.f32 %v7064_v41, 0.0  ;;  %v7840_v55 = vmul.f32 1.442695, %v7754_v32  ;;  %v7068_v37 = vadd.f32 %v7067_v30, %v14769_v33  ;;  %8644 = vmatmul.mubr.bf16.gmra.mrb[20].mxu1 %v8143_v44  ;;  %v7525_v31 = vadd.f32 %v7339_v54, %v7338_v46 }
 0x833   : > { %8008 = vst.msk [vmem:[%s14999_s22 + $0x98] sm:$0xff] %vm7988_vm3, %v7943_v5  ;;  %v7694_v49 = vsub.f32 0.0, %v15199_v24  ;;  %v7340_v52 = vmul.f32 %v14780_v45, %v7200_v21  ;;  %v7755_v50 = vmul.f32 %v7691_v42, %v7563_v63  ;;  %v8711_v4 = vpack.c.bf16 %v8382_v15, %v8378_v39  ;;  %v8385_v27 = vpop.f32.mrb[172].mxu1 }
 0x834   : > { %v7202_v14 = vmax.f32 %v7066_v29, 0.0  ;;  %11796 = vpow2.f32 %v7840_v55  ;;  %v7341_v35 = vmul.f32 %v14784_v48, %v7201_v58  ;;  %v7203_v53 = vmax.f32 %v7068_v37, 0.0  ;;  %7526 = vadd.xlane.f32.xlu1 %v7525_v31  ;;  %v8387_v47 = vpop.f32.mrb[173].mxu1  ;;  %v7422_v40 = vpop.xlane.xlu0 %7421 }
 0x835   : > { %v15220_v36 = vadd.f32 %v8385_v27, %v15093_v19  ;;  %v7842_v3 = vmul.f32 1.442695, %v7755_v50  ;;  %9042 = vmatprep.mubr.bf16.mxu0 %v8711_v4  ;;  %v8388_v20 = vadd.f32 %v8387_v47, %v15104_v23  ;;  %v7071_v42 = vpop.f32.mrb[92].mxu0  ;;  %v8389_v46 = vpop.f32.mrb[174].mxu1  ;;  %v7564_v9 = vmax.f32 %v7422_v40, 0.0 }
 0x836   : > { %v7342_v22 = vmul.f32 %v14780_v45, %v7202_v14  ;;  %v8145_v25 = vpack.c.bf16 %v7202_v14, %v7200_v21  ;;  %v11793_v44 = vpop.eup %11792  ;;  %v7343_v26 = vmul.f32 %v14784_v48, %v7203_v53  ;;  %v8146_v7 = vpack.c.bf16 %v7203_v53, %v7201_v58  ;;  %9043 = vmatmul.mubr.bf16.gmra.mrb[104].mxu0 %v8710_v12  ;;  %v7425_v43 = vpop.xlane.xlu1 %7424 }
 0x837   : > { %v7072_v17 = vadd.f32 %v7071_v42, %v14765_v18  ;;  %v7073_v39 = vpop.f32.mrb[93].mxu0  ;;  %v7944_v2 = vsub.f32 1.0, %v11793_v44  ;;  %11798 = vpow2.f32 %v7842_v3  ;;  %v8390_v0 = vadd.f32 %v8389_v46, %v15093_v19  ;;  %v8391_v11 = vpop.f32.mrb[175].mxu1 }
 0x838   : > { %v11795_v57 = vpop.eup %11794  ;;  %v7565_v6 = vmax.f32 %v7425_v43, 0.0  ;;  %v7075_v38 = vpop.f32.mrb[94].mxu0  ;;  %v7756_v51 = vmul.f32 %v7692_v60, %v7564_v9  ;;  %v7074_v28 = vadd.f32 %v7073_v39, %v14769_v33  ;;  %8653 = vmatprep.mubr.bf16.mxu1 %v8146_v7  ;;  %v8392_v41 = vadd.f32 %v8391_v11, %v15104_v23 }
 0x839   : > { %v7945_v1 = vsub.f32 1.0, %v11795_v57  ;;  %v7204_v59 = vmax.f32 %v7072_v17, 0.0  ;;  %v7077_v56 = vpop.f32.mrb[95].mxu0  ;;  %8009 = vst.msk [vmem:[%s14999_s22 + $0xa0] sm:$0xff] %vm7988_vm3, %v7944_v2  ;;  %v8712_v54 = vpack.c.bf16 %v8390_v0, %v15220_v36  ;;  %v7528_v34 = vadd.f32 %v7341_v35, %v7340_v52 }
 0x83a   : > { %v7757_v10 = vmul.f32 %v7693_v61, %v7565_v6  ;;  %v7844_v13 = vmul.f32 1.442695, %v7756_v51  ;;  %v7205_v5 = vmax.f32 %v7074_v28, 0.0  ;;  %v7076_v32 = vadd.f32 %v7075_v38, %v14765_v18  ;;  %8654 = vmatmul.mubr.bf16.gmra.mrb[24].mxu1 %v8145_v25 }
 0x83b   : > { %8010 = vst.msk [vmem:[%s14999_s22 + $0xa8] sm:$0xff] %vm7988_vm3, %v7945_v1  ;;  %v7344_v60 = vmul.f32 %v14780_v45, %v7204_v59  ;;  %v8713_v12 = vpack.c.bf16 %v8392_v41, %v8388_v20  ;;  %7529 = vadd.xlane.f32.xlu0 %v7528_v34  ;;  %v7078_v30 = vadd.f32 %v7077_v56, %v14769_v33  ;;  %v8395_v61 = vpop.f32.mrb[176].mxu1  ;;  %v7695_v55 = vsub.f32 0.0, %v7631_v16  ;;  %v7632_v20 = vld [vmem:[%s14964_s17 + $0xe0] sm:$0xff] }
 0x83c   : > { %v7846_v21 = vmul.f32 1.442695, %v7757_v10  ;;  %v7531_v8 = vadd.f32 %v7343_v26, %v7342_v22  ;;  %11800 = vpow2.f32 %v7844_v13  ;;  %v7345_v58 = vmul.f32 %v14784_v48, %v7205_v5  ;;  %v8397_v15 = vpop.f32.mrb[177].mxu1  ;;  %v7428_v29 = vpop.xlane.xlu0 %7427  ;;  %v7634_v13 = vld [vmem:[%s14964_s17 + $0xf0] sm:$0xff] }
 0x83d   : > { %v7206_v63 = vmax.f32 %v7076_v32, 0.0  ;;  %v7207_v37 = vmax.f32 %v7078_v30, 0.0  ;;  %v8396_v18 = vadd.f32 %v8395_v61, %v15093_v19  ;;  %9050 = vmatprep.mubr.bf16.mxu0 %v8713_v12  ;;  %v7566_v31 = vmax.f32 %v7428_v29, 0.0  ;;  %v8399_v62 = vpop.f32.mrb[178].mxu1 }
 0x83e   : > { %11802 = vpow2.f32 %v7846_v21  ;;  %7532 = vadd.xlane.f32.xlu1 %v7531_v8  ;;  %v11797_v52 = vpop.eup %11796  ;;  %9051 = vmatmul.mubr.bf16.gmra.mrb[108].mxu0 %v8712_v54  ;;  %v8400_v4 = vadd.f32 %v8399_v62, %v15093_v19  ;;  %v7431_v14 = vpop.xlane.xlu1 %7430  ;;  %v7534_v35 = vadd.f32 %v7345_v58, %v7344_v60  ;;  %v8398_v3 = vadd.f32 %v8397_v15, %v15104_v23  ;;  %v7635_v21 = vld [vmem:[%s14964_s17 + $0xf8] sm:$0xff] }
 0x83f   : > { %v7346_v33 = vmul.f32 %v14780_v45, %v7206_v63  ;;  %v8147_v50 = vpack.c.bf16 %v7206_v63, %v7204_v59  ;;  %v8401_v27 = vpop.f32.mrb[179].mxu1  ;;  %v7946_v53 = vsub.f32 1.0, %v11797_v52  ;;  %v7347_v36 = vmul.f32 %v14784_v48, %v7207_v37 }
 0x840   : > { %v8148_v47 = vpack.c.bf16 %v7207_v37, %v7205_v5  ;;  %v7758_v40 = vmul.f32 %v7694_v49, %v7566_v31  ;;  %v8714_v45 = vpack.c.bf16 %v8400_v4, %v8396_v18  ;;  %v7567_v22 = vmax.f32 %v7431_v14, 0.0  ;;  %7535 = vadd.xlane.f32.xlu0 %v7534_v35  ;;  %v7633_v49 = vld [vmem:[%s14964_s17 + $0xe8] sm:$0xff] }
 0x841   : > { %v8402_v25 = vadd.f32 %v8401_v27, %v15104_v23  ;;  %v11799_v42 = vpop.eup %11798  ;;  %8011 = vst.msk [vmem:[%s14999_s22 + $0xb0] sm:$0xff] %vm7988_vm3, %v7946_v53  ;;  %v7537_v48 = vadd.f32 %v7347_v36, %v7346_v33  ;;  %v7696_v9 = vsub.f32 0.0, %v7632_v20  ;;  %v7697_v0 = vsub.f32 0.0, %v7633_v49  ;;  %v7636_v53 = vld [vmem:[%s14964_s17 + $0x100] sm:$0xff]  ;;  %v11746_v49 = vld [vmem:[%s15759_s13 + $0x10] sm:$0xff]  }
 0x842   : > { %v7848_v46 = vmul.f32 1.442695, %v7758_v40  ;;  %8663 = vmatprep.mubr.bf16.mxu1 %v8148_v47  ;;  %v7947_v44 = vsub.f32 1.0, %v11799_v42  ;;  %v7759_v26 = vmul.f32 %v7695_v55, %v7567_v22  ;;  %v7698_v8 = vsub.f32 0.0, %v7634_v13  ;;  %11108 = vmatprep.subr.bf16.mxu1 %v11746_v49 }
 0x843   : > { %v8715_v24 = vpack.c.bf16 %v8402_v25, %v8398_v3  ;;  %8664 = vmatmul.mubr.bf16.gmra.mrb[28].mxu1 %v8147_v50  ;;  %7538 = vadd.xlane.f32.xlu1 %v7537_v48  ;;  %v8405_v7 = vpop.f32.mrb[180].mxu1  ;;  %v7699_v55 = vsub.f32 0.0, %v7635_v21  ;;  %v7700_v20 = vsub.f32 0.0, %v7636_v53 }
 0x844   : > { %11804 = vpow2.f32 %v7848_v46  ;;  %8012 = vst.msk [vmem:[%s14999_s22 + $0xb8] sm:$0xff] %vm7988_vm3, %v7947_v44  ;;  %v7850_v17 = vmul.f32 1.442695, %v7759_v26  ;;  %v8407_v43 = vpop.f32.mrb[181].mxu1  ;;  %v7434_v39 = vpop.xlane.xlu0 %7433  ;;  %v8406_v11 = vadd.f32 %v8405_v7, %v15093_v19  ;;  %11109 = vmatpush3.bf16.msra.mxu1 %v11746_v49 }
 0x845   : > { %9058 = vmatprep.mubr.bf16.mxu0 %v8715_v24  ;;  %v7568_v57 = vmax.f32 %v7434_v39, 0.0  ;;  %v8409_v2 = vpop.f32.mrb[182].mxu1  ;;  %v8408_v38 = vadd.f32 %v8407_v43, %v15104_v23 }
 0x846   : > { %v11801_v6 = vpop.eup %11800  ;;  %11806 = vpow2.f32 %v7850_v17  ;;  %9059 = vmatmul.mubr.bf16.gmra.mrb[112].mxu0 %v8714_v45  ;;  %v8410_v1 = vadd.f32 %v8409_v2, %v15093_v19  ;;  %v7437_v51 = vpop.xlane.xlu1 %7436  ;;  %v7637_v45 = vld [vmem:[%s14964_s17 + $0x108] sm:$0xff] }
 0x847   : > { %v8411_v59 = vpop.f32.mrb[183].mxu1  ;;  %v7948_v56 = vsub.f32 1.0, %v11801_v6  ;;  %v7760_v54 = vmul.f32 %v7696_v9, %v7568_v57  ;;  %v7569_v10 = vmax.f32 %v7437_v51, 0.0  ;;  %v7701_v24 = vsub.f32 0.0, %v7637_v45  ;;  %v7638_v51 = vld [vmem:[%s14964_s17 + $0x110] sm:$0xff] }
 0x848   : > { %v11803_v28 = vpop.eup %11802  ;;  %v8412_v41 = vadd.f32 %v8411_v59, %v15104_v23  ;;  %v8716_v16 = vpack.c.bf16 %v8410_v1, %v8406_v11 }
 0x849   : > { %v7949_v34 = vsub.f32 1.0, %v11803_v28  ;;  %8013 = vst.msk [vmem:[%s14999_s22 + $0xc0] sm:$0xff] %vm7988_vm3, %v7948_v56  ;;  %v7852_v60 = vmul.f32 1.442695, %v7760_v54  ;;  %v7761_v5 = vmul.f32 %v7697_v0, %v7569_v10  ;;  %v7639_v54 = vld [vmem:[%s14964_s17 + $0x118] sm:$0xff] }
 0x84a   : > { %v8717_v32 = vpack.c.bf16 %v8412_v41, %v8408_v38  ;;  %v7703_v21 = vsub.f32 0.0, %v7639_v54 }
 0x84b   : > { %8014 = vst.msk [vmem:[%s14999_s22 + $0xc8] sm:$0xff] %vm7988_vm3, %v7949_v34  ;;  %11808 = vpow2.f32 %v7852_v60  ;;  %v7854_v12 = vmul.f32 1.442695, %v7761_v5  ;;  %v8415_v30 = vpop.f32.mrb[184].mxu1  ;;  %v7702_v34 = vsub.f32 0.0, %v7638_v51 }
 0x84c   : > { %9066 = vmatprep.mubr.bf16.mxu0 %v8717_v32  ;;  %v8417_v61 = vpop.f32.mrb[185].mxu1  ;;  %v7440_v58 = vpop.xlane.xlu0 %7439  ;;  %v8416_v18 = vadd.f32 %v8415_v30, %v15093_v19 }
 0x84d   : > { %11810 = vpow2.f32 %v7854_v12  ;;  %v7570_v15 = vmax.f32 %v7440_v58, 0.0  ;;  %v8419_v29 = vpop.f32.mrb[186].mxu1  ;;  %v8418_v33 = vadd.f32 %v8417_v61, %v15104_v23 }
 0x84e   : > { %v11805_v63 = vpop.eup %11804  ;;  %9067 = vmatmul.mubr.bf16.gmra.mrb[116].mxu0 %v8716_v16  ;;  %v8420_v31 = vadd.f32 %v8419_v29, %v15093_v19  ;;  %v7443_v62 = vpop.xlane.xlu1 %7442 }
 0x84f   : > { %v7950_v37 = vsub.f32 1.0, %v11805_v63  ;;  %v8421_v52 = vpop.f32.mrb[187].mxu1  ;;  %v7762_v50 = vmul.f32 %v7698_v8, %v7570_v15  ;;  %v7571_v4 = vmax.f32 %v7443_v62, 0.0  ;;  %v7640_v62 = vld [vmem:[%s14964_s17 + $0x120] sm:$0xff] }
 0x850   : > { %v8422_v14 = vadd.f32 %v8421_v52, %v15104_v23  ;;  %v11807_v27 = vpop.eup %11806  ;;  %v8718_v35 = vpack.c.bf16 %v8420_v31, %v8416_v18 }
 0x851   : > { %8015 = vst.msk [vmem:[%s14999_s22 + $0xd0] sm:$0xff] %vm7988_vm3, %v7950_v37  ;;  %v7951_v36 = vsub.f32 1.0, %v11807_v27  ;;  %v7856_v47 = vmul.f32 1.442695, %v7762_v50  ;;  %v7763_v40 = vmul.f32 %v7699_v55, %v7571_v4  ;;  %v7641_v4 = vld [vmem:[%s14964_s17 + $0x128] sm:$0xff] }
 0x852   : > { %v8719_v3 = vpack.c.bf16 %v8422_v14, %v8418_v33 }
 0x853   : > { %8016 = vst.msk [vmem:[%s14999_s22 + $0xd8] sm:$0xff] %vm7988_vm3, %v7951_v36  ;;  %11812 = vpow2.f32 %v7856_v47  ;;  %v7858_v22 = vmul.f32 1.442695, %v7763_v40  ;;  %v8425_v25 = vpop.f32.mrb[188].mxu1  ;;  %v11747_v47 = vld [vmem:[%s15759_s13 + $0x18] sm:$0xff]  }
 0x854   : > { %9074 = vmatprep.mubr.bf16.mxu0 %v8719_v3  ;;  %v8427_v42 = vpop.f32.mrb[189].mxu1  ;;  %v7446_v46 = vpop.xlane.xlu0 %7445  ;;  %v8426_v9 = vadd.f32 %v8425_v25, %v15093_v19  ;;  %11110 = vmatprep.subr.bf16.mxu1 %v11747_v47 }
 0x855   : > { %v11809_v48 = vpop.eup %11808  ;;  %11814 = vpow2.f32 %v7858_v22  ;;  %v7572_v44 = vmax.f32 %v7446_v46, 0.0  ;;  %v8429_v26 = vpop.f32.mrb[190].mxu1  ;;  %v8428_v2 = vadd.f32 %v8427_v42, %v15104_v23  ;;  %v7705_v22 = vsub.f32 0.0, %v7641_v4  ;;  %11111 = vmatpush3.bf16.msra.mxu1 %v11747_v47 }
 0x856   : > { %v7952_v7 = vsub.f32 1.0, %v11809_v48  ;;  %9075 = vmatmul.mubr.bf16.gmra.mrb[120].mxu0 %v8718_v35  ;;  %v8430_v17 = vadd.f32 %v8429_v26, %v15093_v19  ;;  %v7449_v43 = vpop.xlane.xlu1 %7448  ;;  %v8431_v39 = vpop.f32.mrb[191].mxu1  ;;  %v7704_v35 = vsub.f32 0.0, %v7640_v62 }
 0x857   : > { %v11811_v57 = vpop.eup %11810  ;;  %v7764_v0 = vmul.f32 %v7700_v20, %v7572_v44  ;;  %v7573_v6 = vmax.f32 %v7449_v43, 0.0  ;;  %v8432_v11 = vadd.f32 %v8431_v39, %v15104_v23 }
 0x858   : > { %8017 = vst.msk [vmem:[%s14999_s22 + $0xe0] sm:$0xff] %vm7988_vm3, %v7952_v7  ;;  %v7953_v38 = vsub.f32 1.0, %v11811_v57  ;;  %v8720_v1 = vpack.c.bf16 %v8430_v17, %v8426_v9 }
 0x859   : > { %v7860_v59 = vmul.f32 1.442695, %v7764_v0  ;;  %v7765_v28 = vmul.f32 %v7701_v24, %v7573_v6  ;;  %v8721_v56 = vpack.c.bf16 %v8432_v11, %v8428_v2  ;;  %v7642_v2 = vld [vmem:[%s14964_s17 + $0x130] sm:$0xff]  ;;  %v7643_v0 = vld [vmem:[%s14964_s17 + $0x138] sm:$0xff] }
 0x85a   : > { %8018 = vst.msk [vmem:[%s14999_s22 + $0xe8] sm:$0xff] %vm7988_vm3, %v7953_v38 }
 0x85b   : > { %11816 = vpow2.f32 %v7860_v59  ;;  %v7862_v10 = vmul.f32 1.442695, %v7765_v28  ;;  %v8435_v41 = vpop.f32.mrb[192].mxu1  ;;  %9082 = vmatprep.mubr.bf16.mxu0 %v8721_v56  ;;  %v7707_v56 = vsub.f32 0.0, %v7643_v0 }
 0x85c   : > { %v8437_v16 = vpop.f32.mrb[193].mxu1  ;;  %v7452_v13 = vpop.xlane.xlu0 %7451  ;;  %v8436_v30 = vadd.f32 %v8435_v41, %v15093_v19 }
 0x85d   : > { %v11813_v60 = vpop.eup %11812  ;;  %11818 = vpow2.f32 %v7862_v10  ;;  %v7574_v5 = vmax.f32 %v7452_v13, 0.0  ;;  %v8439_v32 = vpop.f32.mrb[194].mxu1  ;;  %v8438_v15 = vadd.f32 %v8437_v16, %v15104_v23 }
 0x85e   : > { %v7954_v12 = vsub.f32 1.0, %v11813_v60  ;;  %9083 = vmatmul.mubr.bf16.gmra.mrb[124].mxu0 %v8720_v1  ;;  %v8440_v8 = vadd.f32 %v8439_v32, %v15093_v19  ;;  %v7455_v61 = vpop.xlane.xlu1 %7454  ;;  %v8441_v58 = vpop.f32.mrb[195].mxu1  ;;  %v7706_v1 = vsub.f32 0.0, %v7642_v2 }
 0x85f   : > { %v11815_v63 = vpop.eup %11814  ;;  %v7766_v29 = vmul.f32 %v7702_v34, %v7574_v5  ;;  %v7575_v55 = vmax.f32 %v7455_v61, 0.0  ;;  %v8442_v37 = vadd.f32 %v8441_v58, %v15104_v23 }
 0x860   : > { %8019 = vst.msk [vmem:[%s14999_s22 + $0xf0] sm:$0xff] %vm7988_vm3, %v7954_v12  ;;  %v7955_v18 = vsub.f32 1.0, %v11815_v63  ;;  %v8722_v31 = vpack.c.bf16 %v8440_v8, %v8436_v30  ;;  %v7644_v63 = vld [vmem:[%s14964_s17 + $0x140] sm:$0xff] }
 0x861   : > { %v7864_v52 = vmul.f32 1.442695, %v7766_v29  ;;  %v7767_v33 = vmul.f32 %v7703_v21, %v7575_v55  ;;  %v8723_v50 = vpack.c.bf16 %v8442_v37, %v8438_v15  ;;  %v7645_v29 = vld [vmem:[%s14964_s17 + $0x148] sm:$0xff] }
 0x862   : > { %8020 = vst.msk [vmem:[%s14999_s22 + $0xf8] sm:$0xff] %vm7988_vm3, %v7955_v18 }
 0x863   : > { %11820 = vpow2.f32 %v7864_v52  ;;  %v7866_v14 = vmul.f32 1.442695, %v7767_v33  ;;  %v8445_v27 = vpop.f32.mrb[196].mxu1  ;;  %9090 = vmatprep.mubr.bf16.mxu0 %v8723_v50  ;;  %v7709_v50 = vsub.f32 0.0, %v7645_v29 }
 0x864   : > { %v8447_v53 = vpop.f32.mrb[197].mxu1  ;;  %v7458_v36 = vpop.xlane.xlu0 %7457  ;;  %v8446_v20 = vadd.f32 %v8445_v27, %v15093_v19 }
 0x865   : > { %v11817_v40 = vpop.eup %11816  ;;  %11822 = vpow2.f32 %v7866_v14  ;;  %v7576_v3 = vmax.f32 %v7458_v36, 0.0  ;;  %v8449_v45 = vpop.f32.mrb[198].mxu1  ;;  %v8448_v26 = vadd.f32 %v8447_v53, %v15104_v23 }
 0x866   : > { %v7956_v25 = vsub.f32 1.0, %v11817_v40  ;;  %9091 = vmatmul.mubr.bf16.gmra.mrb[128].mxu0 %v8722_v31  ;;  %v8450_v42 = vadd.f32 %v8449_v45, %v15093_v19  ;;  %v7461_v46 = vpop.xlane.xlu1 %7460  ;;  %v8451_v48 = vpop.f32.mrb[199].mxu1  ;;  %v7708_v31 = vsub.f32 0.0, %v7644_v63 }
 0x867   : > { %v11819_v44 = vpop.eup %11818  ;;  %v7768_v24 = vmul.f32 %v7704_v35, %v7576_v3  ;;  %v7577_v49 = vmax.f32 %v7461_v46, 0.0  ;;  %v8452_v7 = vadd.f32 %v8451_v48, %v15104_v23  ;;  %v7646_v46 = vld [vmem:[%s14964_s17 + $0x150] sm:$0xff] }
 0x868   : > { %8021 = vst.msk [vmem:[%s14999_s22 + $0x100] sm:$0xff] %vm7988_vm3, %v7956_v25  ;;  %v7957_v9 = vsub.f32 1.0, %v11819_v44  ;;  %v8724_v17 = vpack.c.bf16 %v8450_v42, %v8446_v20 }
 0x869   : > { %v7868_v43 = vmul.f32 1.442695, %v7768_v24  ;;  %v7769_v39 = vmul.f32 %v7705_v22, %v7577_v49  ;;  %v8725_v57 = vpack.c.bf16 %v8452_v7, %v8448_v26  ;;  %v7647_v26 = vld [vmem:[%s14964_s17 + $0x158] sm:$0xff]  ;;  %v11748_v49 = vld [vmem:[%s15759_s13 + $0x20] sm:$0xff]  }
 0x86a   : > { %8022 = vst.msk [vmem:[%s14999_s22 + $0x108] sm:$0xff] %vm7988_vm3, %v7957_v9  ;;  %11112 = vmatprep.subr.bf16.mxu1 %v11748_v49 }
 0x86b   : > { %11824 = vpow2.f32 %v7868_v43  ;;  %v7870_v6 = vmul.f32 1.442695, %v7769_v39  ;;  %v8455_v11 = vpop.f32.mrb[200].mxu1  ;;  %9098 = vmatprep.mubr.bf16.mxu0 %v8725_v57  ;;  %v7711_v57 = vsub.f32 0.0, %v7647_v26  ;;  %11113 = vmatpush3.bf16.msra.mxu1 %v11748_v49 }
 0x86c   : > { %v8457_v38 = vpop.f32.mrb[201].mxu1  ;;  %v8456_v10 = vadd.f32 %v8455_v11, %v15093_v19 }
 0x86d   : > { %v11821_v51 = vpop.eup %11820  ;;  %11826 = vpow2.f32 %v7870_v6  ;;  %v7464_v59 = vpop.xlane.xlu0 %7463  ;;  %v8458_v5 = vadd.f32 %v8457_v38, %v15104_v23 }
 0x86e   : > { %v8459_v28 = vpop.f32.mrb[202].mxu1  ;;  %v7958_v54 = vsub.f32 1.0, %v11821_v51  ;;  %v7578_v41 = vmax.f32 %v7464_v59, 0.0  ;;  %9099 = vmatmul.mubr.bf16.gmra.mrb[132].mxu0 %v8724_v17  ;;  %v7467_v16 = vpop.xlane.xlu1 %7466  ;;  %v7710_v17 = vsub.f32 0.0, %v7646_v46 }
 0x86f   : > { %v8460_v34 = vadd.f32 %v8459_v28, %v15093_v19  ;;  %v8461_v13 = vpop.f32.mrb[203].mxu1  ;;  %v11823_v60 = vpop.eup %11822  ;;  %v7579_v32 = vmax.f32 %v7467_v16, 0.0 }
 0x870   : > { %v8462_v21 = vadd.f32 %v8461_v13, %v15104_v23  ;;  %8023 = vst.msk [vmem:[%s14999_s22 + $0x110] sm:$0xff] %vm7988_vm3, %v7958_v54  ;;  %v7959_v12 = vsub.f32 1.0, %v11823_v60  ;;  %v7770_v30 = vmul.f32 %v7706_v1, %v7578_v41 }
 0x871   : > { %v8726_v8 = vpack.c.bf16 %v8460_v34, %v8456_v10  ;;  %v7771_v61 = vmul.f32 %v7707_v56, %v7579_v32  ;;  %v11749_v10 = vld [vmem:[%s15759_s13 + $0x28] sm:$0xff]  }
 0x872   : > { %v8727_v58 = vpack.c.bf16 %v8462_v21, %v8458_v5  ;;  %8024 = vst.msk [vmem:[%s14999_s22 + $0x118] sm:$0xff] %vm7988_vm3, %v7959_v12  ;;  %v7872_v15 = vmul.f32 1.442695, %v7770_v30  ;;  %v7648_v5 = vld [vmem:[%s14964_s17 + $0x160] sm:$0xff]  ;;  %11114 = vmatprep.subr.bf16.mxu1 %v11749_v10  ;;  %v7649_v21 = vld [vmem:[%s14964_s17 + $0x168] sm:$0xff] }
 0x873   : > { %v7874_v55 = vmul.f32 1.442695, %v7771_v61  ;;  %v8465_v37 = vpop.f32.mrb[204].mxu1  ;;  %11115 = vmatpush3.bf16.msra.mxu1 %v11749_v10  ;;  %v7713_v29 = vsub.f32 0.0, %v7649_v21  ;;  %v7653_v10 = vld [vmem:[%s14964_s17 + $0x188] sm:$0xff] }
 0x874   : > { %9106 = vmatprep.mubr.bf16.mxu0 %v8727_v58  ;;  %11828 = vpow2.f32 %v7872_v15  ;;  %v8467_v18 = vpop.f32.mrb[205].mxu1  ;;  %v8466_v14 = vadd.f32 %v8465_v37, %v15093_v19  ;;  %v7712_v58 = vsub.f32 0.0, %v7648_v5 }
 0x875   : > { %v11825_v62 = vpop.eup %11824  ;;  %11830 = vpow2.f32 %v7874_v55  ;;  %v7470_v52 = vpop.xlane.xlu0 %7469  ;;  %v8468_v47 = vadd.f32 %v8467_v18, %v15104_v23 }
 0x876   : > { %v8469_v33 = vpop.f32.mrb[206].mxu1  ;;  %v7960_v4 = vsub.f32 1.0, %v11825_v62  ;;  %v7580_v27 = vmax.f32 %v7470_v52, 0.0  ;;  %9107 = vmatmul.mubr.bf16.gmra.mrb[136].mxu0 %v8726_v8  ;;  %v11750_v8 = vld [vmem:[%s15759_s13 + $0x30] sm:$0xff]  }
 0x877   : > { %v8470_v35 = vadd.f32 %v8469_v33, %v15093_v19  ;;  %v8471_v53 = vpop.f32.mrb[207].mxu1  ;;  %v11827_v36 = vpop.eup %11826  ;;  %11116 = vmatprep.subr.bf16.mxu1 %v11750_v8 }
 0x878   : > { %v7473_v40 = vpop.xlane.xlu1 %7472  ;;  %v8472_v3 = vadd.f32 %v8471_v53, %v15104_v23  ;;  %8025 = vst.msk [vmem:[%s14999_s22 + $0x120] sm:$0xff] %vm7988_vm3, %v7960_v4  ;;  %v7961_v45 = vsub.f32 1.0, %v11827_v36  ;;  %v7772_v22 = vmul.f32 %v7708_v31, %v7580_v27  ;;  %11117 = vmatpush3.bf16.msra.mxu1 %v11750_v8  ;;  %v11751_v27 = vld [vmem:[%s15759_s13 + $0x38] sm:$0xff]  }
 0x879   : > { %v8728_v25 = vpack.c.bf16 %v8470_v35, %v8466_v14  ;;  %v7581_v20 = vmax.f32 %v7473_v40, 0.0  ;;  %11118 = vmatprep.subr.bf16.mxu1 %v11751_v27 }
 0x87a   : > { %v8729_v42 = vpack.c.bf16 %v8472_v3, %v8468_v47  ;;  %8026 = vst.msk [vmem:[%s14999_s22 + $0x128] sm:$0xff] %vm7988_vm3, %v7961_v45  ;;  %v7876_v48 = vmul.f32 1.442695, %v7772_v22  ;;  %v7650_v45 = vld [vmem:[%s14964_s17 + $0x170] sm:$0xff] }
 0x87b   : > { %v7773_v44 = vmul.f32 %v7709_v50, %v7581_v20  ;;  %v8475_v24 = vpop.f32.mrb[208].mxu1 }
 0x87c   : > { %9114 = vmatprep.mubr.bf16.mxu0 %v8729_v42  ;;  %11832 = vpow2.f32 %v7876_v48  ;;  %v8477_v9 = vpop.f32.mrb[209].mxu1  ;;  %v8476_v0 = vadd.f32 %v8475_v24, %v15093_v19  ;;  %11119 = vmatpush3.bf16.msra.mxu1 %v11751_v27  ;;  %v7714_v48 = vsub.f32 0.0, %v7650_v45 }
 0x87d   : > { %v7878_v7 = vmul.f32 1.442695, %v7773_v44  ;;  %v7476_v43 = vpop.xlane.xlu0 %7475  ;;  %v8479_v39 = vpop.f32.mrb[210].mxu1  ;;  %v8478_v28 = vadd.f32 %v8477_v9, %v15104_v23 }
 0x87e   : > { %v11829_v2 = vpop.eup %11828  ;;  %v7582_v6 = vmax.f32 %v7476_v43, 0.0  ;;  %9115 = vmatmul.mubr.bf16.gmra.mrb[140].mxu0 %v8728_v25  ;;  %v8480_v11 = vadd.f32 %v8479_v39, %v15093_v19  ;;  %v7479_v38 = vpop.xlane.xlu1 %7478  ;;  %v7651_v25 = vld [vmem:[%s14964_s17 + $0x178] sm:$0xff] }
 0x87f   : > { %11834 = vpow2.f32 %v7878_v7  ;;  %v8481_v1 = vpop.f32.mrb[211].mxu1  ;;  %v11831_v51 = vpop.eup %11830  ;;  %v7962_v59 = vsub.f32 1.0, %v11829_v2  ;;  %v7583_v56 = vmax.f32 %v7479_v38, 0.0  ;;  %v7715_v24 = vsub.f32 0.0, %v7651_v25 }
 0x880   : > { %v8482_v54 = vadd.f32 %v8481_v1, %v15104_v23  ;;  %v7963_v41 = vsub.f32 1.0, %v11831_v51  ;;  %v7774_v34 = vmul.f32 %v7710_v17, %v7582_v6  ;;  %v8730_v16 = vpack.c.bf16 %v8480_v11, %v8476_v0 }
 0x881   : > { %8027 = vst.msk [vmem:[%s14999_s22 + $0x130] sm:$0xff] %vm7988_vm3, %v7962_v59  ;;  %v7775_v13 = vmul.f32 %v7711_v57, %v7583_v56  ;;  %v7652_v56 = vld [vmem:[%s14964_s17 + $0x180] sm:$0xff] }
 0x882   : > { %v8731_v60 = vpack.c.bf16 %v8482_v54, %v8478_v28  ;;  %8028 = vst.msk [vmem:[%s14999_s22 + $0x138] sm:$0xff] %vm7988_vm3, %v7963_v41  ;;  %v7880_v32 = vmul.f32 1.442695, %v7774_v34 }
 0x883   : > { %v7882_v12 = vmul.f32 1.442695, %v7775_v13  ;;  %v8485_v30 = vpop.f32.mrb[212].mxu1  ;;  %v7716_v13 = vsub.f32 0.0, %v7652_v56 }
 0x884   : > { %9122 = vmatprep.mubr.bf16.mxu0 %v8731_v60  ;;  %11836 = vpow2.f32 %v7880_v32  ;;  %v8487_v61 = vpop.f32.mrb[213].mxu1  ;;  %v8486_v37 = vadd.f32 %v8485_v30, %v15093_v19  ;;  %v7717_v32 = vsub.f32 0.0, %v7653_v10 }
 0x885   : > { %11838 = vpow2.f32 %v7882_v12  ;;  %v7482_v63 = vpop.xlane.xlu0 %7481  ;;  %v8489_v15 = vpop.f32.mrb[214].mxu1  ;;  %v8488_v50 = vadd.f32 %v8487_v61, %v15104_v23 }
 0x886   : > { %v11833_v55 = vpop.eup %11832  ;;  %v7584_v18 = vmax.f32 %v7482_v63, 0.0  ;;  %9123 = vmatmul.mubr.bf16.gmra.mrb[144].mxu0 %v8730_v16  ;;  %v8490_v31 = vadd.f32 %v8489_v15, %v15093_v19  ;;  %v7485_v62 = vpop.xlane.xlu1 %7484 }
 0x887   : > { %v8491_v52 = vpop.f32.mrb[215].mxu1  ;;  %v7964_v33 = vsub.f32 1.0, %v11833_v55  ;;  %v7585_v4 = vmax.f32 %v7485_v62, 0.0 }
 0x888   : > { %v8492_v14 = vadd.f32 %v8491_v52, %v15104_v23  ;;  %v7776_v53 = vmul.f32 %v7712_v58, %v7584_v18  ;;  %v8732_v36 = vpack.c.bf16 %v8490_v31, %v8486_v37 }
 0x889   : > { %v11835_v35 = vpop.eup %11834  ;;  %8029 = vst.msk [vmem:[%s14999_s22 + $0x140] sm:$0xff] %vm7988_vm3, %v7964_v33  ;;  %v7777_v40 = vmul.f32 %v7713_v29, %v7585_v4 }
 0x88a   : > { %v7965_v47 = vsub.f32 1.0, %v11835_v35  ;;  %v8733_v3 = vpack.c.bf16 %v8492_v14, %v8488_v50  ;;  %v7884_v22 = vmul.f32 1.442695, %v7776_v53  ;;  %v7654_v50 = vld [vmem:[%s14964_s17 + $0x190] sm:$0xff]  ;;  %v7655_v14 = vld [vmem:[%s14964_s17 + $0x198] sm:$0xff] }
 0x88b   : > { %v7886_v20 = vmul.f32 1.442695, %v7777_v40  ;;  %v8495_v42 = vpop.f32.mrb[216].mxu1 }
 0x88c   : > { %8030 = vst.msk [vmem:[%s14999_s22 + $0x148] sm:$0xff] %vm7988_vm3, %v7965_v47  ;;  %9130 = vmatprep.mubr.bf16.mxu0 %v8733_v3  ;;  %11840 = vpow2.f32 %v7884_v22  ;;  %v8497_v46 = vpop.f32.mrb[217].mxu1  ;;  %v8496_v7 = vadd.f32 %v8495_v42, %v15093_v19  ;;  %v7719_v3 = vsub.f32 0.0, %v7655_v14 }
 0x88d   : > { %11842 = vpow2.f32 %v7886_v20  ;;  %v7488_v44 = vpop.xlane.xlu0 %7487  ;;  %v8499_v26 = vpop.f32.mrb[218].mxu1  ;;  %v8498_v0 = vadd.f32 %v8497_v46, %v15104_v23 }
 0x88e   : > { %v11837_v49 = vpop.eup %11836  ;;  %v7586_v9 = vmax.f32 %v7488_v44, 0.0  ;;  %9131 = vmatmul.mubr.bf16.gmra.mrb[148].mxu0 %v8732_v36  ;;  %v8500_v17 = vadd.f32 %v8499_v26, %v15093_v19  ;;  %v7491_v43 = vpop.xlane.xlu1 %7490  ;;  %v7718_v36 = vsub.f32 0.0, %v7654_v50 }
 0x88f   : > { %v8501_v39 = vpop.f32.mrb[219].mxu1  ;;  %v11839_v57 = vpop.eup %11838  ;;  %v7966_v2 = vsub.f32 1.0, %v11837_v49  ;;  %v7587_v6 = vmax.f32 %v7491_v43, 0.0 }
 0x890   : > { %v8502_v11 = vadd.f32 %v8501_v39, %v15104_v23  ;;  %v7967_v38 = vsub.f32 1.0, %v11839_v57  ;;  %v7778_v1 = vmul.f32 %v7714_v48, %v7586_v9  ;;  %v8734_v51 = vpack.c.bf16 %v8500_v17, %v8496_v7  ;;  %v7656_v57 = vld [vmem:[%s14964_s17 + $0x1a0] sm:$0xff] }
 0x891   : > { %8031 = vst.msk [vmem:[%s14999_s22 + $0x150] sm:$0xff] %vm7988_vm3, %v7966_v2  ;;  %v7779_v59 = vmul.f32 %v7715_v24, %v7587_v6 }
 0x892   : > { %v8735_v28 = vpack.c.bf16 %v8502_v11, %v8498_v0  ;;  %8032 = vst.msk [vmem:[%s14999_s22 + $0x158] sm:$0xff] %vm7988_vm3, %v7967_v38  ;;  %v7888_v54 = vmul.f32 1.442695, %v7778_v1  ;;  %v7657_v0 = vld [vmem:[%s14964_s17 + $0x1a8] sm:$0xff]  ;;  %v7720_v1 = vsub.f32 0.0, %v7656_v57 }
 0x893   : > { %v7890_v41 = vmul.f32 1.442695, %v7779_v59  ;;  %v8505_v34 = vpop.f32.mrb[220].mxu1 }
 0x894   : > { %9138 = vmatprep.mubr.bf16.mxu0 %v8735_v28  ;;  %11844 = vpow2.f32 %v7888_v54  ;;  %v8507_v16 = vpop.f32.mrb[221].mxu1  ;;  %v8506_v12 = vadd.f32 %v8505_v34, %v15093_v19  ;;  %v7721_v28 = vsub.f32 0.0, %v7657_v0 }
 0x895   : > { %11846 = vpow2.f32 %v7890_v41  ;;  %v7494_v60 = vpop.xlane.xlu0 %7493  ;;  %v8509_v5 = vpop.f32.mrb[222].mxu1  ;;  %v8508_v29 = vadd.f32 %v8507_v16, %v15104_v23 }
 0x896   : > { %v11841_v21 = vpop.eup %11840  ;;  %v7588_v30 = vmax.f32 %v7494_v60, 0.0  ;;  %9139 = vmatmul.mubr.bf16.gmra.mrb[152].mxu0 %v8734_v51  ;;  %v8510_v8 = vadd.f32 %v8509_v5, %v15093_v19  ;;  %v7497_v61 = vpop.xlane.xlu1 %7496 }
 0x897   : > { %v8511_v58 = vpop.f32.mrb[223].mxu1  ;;  %v11843_v63 = vpop.eup %11842  ;;  %v7968_v15 = vsub.f32 1.0, %v11841_v21  ;;  %v7589_v55 = vmax.f32 %v7497_v61, 0.0 }
 0x898   : > { %v8512_v37 = vadd.f32 %v8511_v58, %v15104_v23  ;;  %v7969_v18 = vsub.f32 1.0, %v11843_v63  ;;  %v7780_v31 = vmul.f32 %v7716_v13, %v7588_v30  ;;  %v8736_v62 = vpack.c.bf16 %v8510_v8, %v8506_v12 }
 0x899   : > { %8033 = vst.msk [vmem:[%s14999_s22 + $0x160] sm:$0xff] %vm7988_vm3, %v7968_v15  ;;  %v7781_v52 = vmul.f32 %v7717_v32, %v7589_v55  ;;  %v7658_v15 = vld [vmem:[%s14964_s17 + $0x1b0] sm:$0xff] }
 0x89a   : > { %v8737_v33 = vpack.c.bf16 %v8512_v37, %v8508_v29  ;;  %8034 = vst.msk [vmem:[%s14999_s22 + $0x168] sm:$0xff] %vm7988_vm3, %v7969_v18  ;;  %v7892_v4 = vmul.f32 1.442695, %v7780_v31  ;;  %v7659_v29 = vld [vmem:[%s14964_s17 + $0x1b8] sm:$0xff]  ;;  %v7722_v31 = vsub.f32 0.0, %v7658_v15 }
 0x89b   : > { %v7894_v27 = vmul.f32 1.442695, %v7781_v52  ;;  %v8515_v35 = vpop.f32.mrb[224].mxu1  ;;  %v7723_v52 = vsub.f32 0.0, %v7659_v29 }
 0x89c   : > { %9146 = vmatprep.mubr.bf16.mxu0 %v8737_v33  ;;  %11848 = vpow2.f32 %v7892_v4  ;;  %v8517_v53 = vpop.f32.mrb[225].mxu1  ;;  %v8516_v22 = vadd.f32 %v8515_v35, %v15093_v19 }
 0x89d   : > { %11850 = vpow2.f32 %v7894_v27  ;;  %v7500_v47 = vpop.xlane.xlu0 %7499  ;;  %v8519_v40 = vpop.f32.mrb[226].mxu1  ;;  %v8518_v26 = vadd.f32 %v8517_v53, %v15104_v23 }
 0x89e   : > { %v11845_v45 = vpop.eup %11844  ;;  %v7590_v25 = vmax.f32 %v7500_v47, 0.0  ;;  %9147 = vmatmul.mubr.bf16.gmra.mrb[156].mxu0 %v8736_v62  ;;  %v8520_v20 = vadd.f32 %v8519_v40, %v15093_v19  ;;  %v7503_v42 = vpop.xlane.xlu1 %7502 }
 0x89f   : > { %v8521_v46 = vpop.f32.mrb[227].mxu1  ;;  %v11847_v48 = vpop.eup %11846  ;;  %v7970_v44 = vsub.f32 1.0, %v11845_v45  ;;  %v7591_v24 = vmax.f32 %v7503_v42, 0.0 }
 0x8a0   : > { %v8522_v49 = vadd.f32 %v8521_v46, %v15104_v23  ;;  %v7971_v7 = vsub.f32 1.0, %v11847_v48  ;;  %v7782_v9 = vmul.f32 %v7718_v36, %v7590_v25  ;;  %v8738_v17 = vpack.c.bf16 %v8520_v20, %v8516_v22 }
 0x8a1   : > { %8035 = vst.msk [vmem:[%s14999_s22 + $0x170] sm:$0xff] %vm7988_vm3, %v7970_v44  ;;  %v7783_v43 = vmul.f32 %v7719_v3, %v7591_v24 }
 0x8a2   : > { %v8739_v39 = vpack.c.bf16 %v8522_v49, %v8518_v26  ;;  %8036 = vst.msk [vmem:[%s14999_s22 + $0x178] sm:$0xff] %vm7988_vm3, %v7971_v7  ;;  %v7896_v2 = vmul.f32 1.442695, %v7782_v9  ;;  %v7660_v49 = vld [vmem:[%s14964_s17 + $0x1c0] sm:$0xff] }
 0x8a3   : > { %v7898_v6 = vmul.f32 1.442695, %v7783_v43  ;;  %v8525_v11 = vpop.f32.mrb[228].mxu1 }
 0x8a4   : > { %9154 = vmatprep.mubr.bf16.mxu0 %v8739_v39  ;;  %11852 = vpow2.f32 %v7896_v2  ;;  %v8527_v38 = vpop.f32.mrb[229].mxu1  ;;  %v8526_v54 = vadd.f32 %v8525_v11, %v15093_v19 }
 0x8a5   : > { %11854 = vpow2.f32 %v7898_v6  ;;  %v7506_v51 = vpop.xlane.xlu0 %7505  ;;  %v8529_v59 = vpop.f32.mrb[230].mxu1  ;;  %v8528_v5 = vadd.f32 %v8527_v38, %v15104_v23  ;;  %v7661_v6 = vld [vmem:[%s14964_s17 + $0x1c8] sm:$0xff] }
 0x8a6   : > { %v11849_v56 = vpop.eup %11848  ;;  %v7592_v10 = vmax.f32 %v7506_v51, 0.0  ;;  %9155 = vmatmul.mubr.bf16.gmra.mrb[160].mxu0 %v8738_v17  ;;  %v8530_v41 = vadd.f32 %v8529_v59, %v15093_v19  ;;  %v7509_v34 = vpop.xlane.xlu1 %7508 }
 0x8a7   : > { %v8531_v16 = vpop.f32.mrb[231].mxu1  ;;  %v11851_v13 = vpop.eup %11850  ;;  %v7972_v60 = vsub.f32 1.0, %v11849_v56  ;;  %v7593_v32 = vmax.f32 %v7509_v34, 0.0  ;;  %v7662_v56 = vld [vmem:[%s14964_s17 + $0x1d0] sm:$0xff] }
 0x8a8   : > { %v8532_v21 = vadd.f32 %v8531_v16, %v15104_v23  ;;  %v7973_v12 = vsub.f32 1.0, %v11851_v13  ;;  %v7784_v30 = vmul.f32 %v7720_v1, %v7592_v10  ;;  %v8740_v8 = vpack.c.bf16 %v8530_v41, %v8526_v54 }
 0x8a9   : > { %8037 = vst.msk [vmem:[%s14999_s22 + $0x180] sm:$0xff] %vm7988_vm3, %v7972_v60  ;;  %v7785_v61 = vmul.f32 %v7721_v28, %v7593_v32  ;;  %v7724_v1 = vsub.f32 0.0, %v7660_v49  ;;  %v7725_v10 = vsub.f32 0.0, %v7661_v6  ;;  %v7663_v32 = vld [vmem:[%s14964_s17 + $0x1d8] sm:$0xff] }
 0x8aa   : > { %v8741_v58 = vpack.c.bf16 %v8532_v21, %v8528_v5  ;;  %8038 = vst.msk [vmem:[%s14999_s22 + $0x188] sm:$0xff] %vm7988_vm3, %v7973_v12  ;;  %v7900_v63 = vmul.f32 1.442695, %v7784_v30  ;;  %v7726_v5 = vsub.f32 0.0, %v7662_v56 }
 0x8ab   : > { %v7902_v55 = vmul.f32 1.442695, %v7785_v61  ;;  %v8535_v37 = vpop.f32.mrb[232].mxu1 }
 0x8ac   : > { %9162 = vmatprep.mubr.bf16.mxu0 %v8741_v58  ;;  %11856 = vpow2.f32 %v7900_v63  ;;  %v8537_v18 = vpop.f32.mrb[233].mxu1  ;;  %v8536_v50 = vadd.f32 %v8535_v37, %v15093_v19  ;;  %v7727_v37 = vsub.f32 0.0, %v7663_v32 }
 0x8ad   : > { %11858 = vpow2.f32 %v7902_v55  ;;  %v8539_v62 = vpop.f32.mrb[234].mxu1  ;;  %v7512_v4 = vpop.xlane.xlu0 %7511  ;;  %v8538_v45 = vadd.f32 %v8537_v18, %v15104_v23 }
 0x8ae   : > { %v11853_v33 = vpop.eup %11852  ;;  %9163 = vmatmul.mubr.bf16.gmra.mrb[164].mxu0 %v8740_v8  ;;  %v8540_v14 = vadd.f32 %v8539_v62, %v15093_v19  ;;  %v7515_v27 = vpop.xlane.xlu1 %7514  ;;  %v7594_v36 = vmax.f32 %v7512_v4, 0.0 }
 0x8af   : > { %v11855_v35 = vpop.eup %11854  ;;  %v7974_v53 = vsub.f32 1.0, %v11853_v33  ;;  %v7595_v47 = vmax.f32 %v7515_v27, 0.0  ;;  %v8541_v40 = vpop.f32.mrb[235].mxu1 }
 0x8b0   : > { %v7975_v3 = vsub.f32 1.0, %v11855_v35  ;;  %v8742_v22 = vpack.c.bf16 %v8540_v14, %v8536_v50  ;;  %v8542_v25 = vadd.f32 %v8541_v40, %v15104_v23  ;;  %v7786_v20 = vmul.f32 %v7722_v31, %v7594_v36 }
 0x8b1   : > { %8039 = vst.msk [vmem:[%s14999_s22 + $0x190] sm:$0xff] %vm7988_vm3, %v7974_v53  ;;  %v7787_v42 = vmul.f32 %v7723_v52, %v7595_v47 }
 0x8b2   : > { %8040 = vst.msk [vmem:[%s14999_s22 + $0x198] sm:$0xff] %vm7988_vm3, %v7975_v3  ;;  %v8743_v46 = vpack.c.bf16 %v8542_v25, %v8538_v45  ;;  %v7904_v48 = vmul.f32 1.442695, %v7786_v20  ;;  %v7664_v3 = vld [vmem:[%s14964_s17 + $0x1e0] sm:$0xff] }
 0x8b3   : > { %v7906_v44 = vmul.f32 1.442695, %v7787_v42  ;;  %v8545_v26 = vpop.f32.mrb[236].mxu1  ;;  %v7665_v42 = vld [vmem:[%s14964_s17 + $0x1e8] sm:$0xff] }
 0x8b4   : > { %9170 = vmatprep.mubr.bf16.mxu0 %v8743_v46  ;;  %v8547_v24 = vpop.f32.mrb[237].mxu1  ;;  %11860 = vpow2.f32 %v7904_v48  ;;  %v8546_v17 = vadd.f32 %v8545_v26, %v15093_v19 }
 0x8b5   : > { %v8549_v7 = vpop.f32.mrb[238].mxu1  ;;  %11862 = vpow2.f32 %v7906_v44  ;;  %v8548_v0 = vadd.f32 %v8547_v24, %v15104_v23  ;;  %v7728_v44 = vsub.f32 0.0, %v7664_v3 }
 0x8b6   : > { %v11857_v9 = vpop.eup %11856  ;;  %9171 = vmatmul.mubr.bf16.gmra.mrb[168].mxu0 %v8742_v22  ;;  %v8550_v43 = vadd.f32 %v8549_v7, %v15093_v19  ;;  %v8551_v39 = vpop.f32.mrb[239].mxu1 }
 0x8b7   : > { %v11859_v57 = vpop.eup %11858  ;;  %v7976_v2 = vsub.f32 1.0, %v11857_v9  ;;  %v8552_v11 = vadd.f32 %v8551_v39, %v15104_v23  ;;  %v7518_v59 = vpop.xlane.xlu0 %7517  ;;  %v7729_v9 = vsub.f32 0.0, %v7665_v42 }
 0x8b8   : > { %v7977_v38 = vsub.f32 1.0, %v11859_v57  ;;  %v8744_v51 = vpack.c.bf16 %v8550_v43, %v8546_v17  ;;  %v7596_v54 = vmax.f32 %v7518_v59, 0.0  ;;  %v7666_v43 = vld [vmem:[%s14964_s17 + $0x1f0] sm:$0xff] }
 0x8b9   : > { %8041 = vst.msk [vmem:[%s14999_s22 + $0x1a0] sm:$0xff] %vm7988_vm3, %v7976_v2  ;;  %v8745_v28 = vpack.c.bf16 %v8552_v11, %v8548_v0  ;;  %v7667_v2 = vld [vmem:[%s14964_s17 + $0x1f8] sm:$0xff]  ;;  %v7730_v59 = vsub.f32 0.0, %v7666_v43  ;;  %s10310_s17 = sshll.u32 %s15766_s18, 2 }
 0x8ba   : > { %8042 = vst.msk [vmem:[%s14999_s22 + $0x1a8] sm:$0xff] %vm7988_vm3, %v7977_v38  ;;  %v7788_v16 = vmul.f32 %v7724_v1, %v7596_v54  ;;  %s15481_s26 = scalar_lea.vmem %s15747_s1, %s10310_s17 }
 0x8bb   : > { %v7521_v41 = vpop.xlane.xlu1 %7520  ;;  %v8555_v34 = vpop.f32.mrb[240].mxu1  ;;  %9178 = vmatprep.mubr.bf16.mxu0 %v8745_v28 }
 0x8bc   : > { %v7597_v13 = vmax.f32 %v7521_v41, 0.0  ;;  %v8557_v60 = vpop.f32.mrb[241].mxu1  ;;  %v7908_v30 = vmul.f32 1.442695, %v7788_v16  ;;  %v8556_v29 = vadd.f32 %v8555_v34, %v15093_v19  ;;  %v7731_v34 = vsub.f32 0.0, %v7667_v2 }
 0x8bd   : > { %v8559_v12 = vpop.f32.mrb[242].mxu1  ;;  %v8558_v55 = vadd.f32 %v8557_v60, %v15104_v23 }
 0x8be   : > { %v7524_v21 = vpop.xlane.xlu0 %7523  ;;  %v7789_v8 = vmul.f32 %v7725_v10, %v7597_v13  ;;  %9179 = vmatmul.mubr.bf16.gmra.mrb[172].mxu0 %v8744_v51  ;;  %v8560_v58 = vadd.f32 %v8559_v12, %v15093_v19  ;;  %v8561_v63 = vpop.f32.mrb[243].mxu1  ;;  %11864 = vpow2.f32 %v7908_v30 }
 0x8bf   : > { %v7598_v61 = vmax.f32 %v7524_v21, 0.0  ;;  %v11861_v15 = vpop.eup %11860  ;;  %v8562_v18 = vadd.f32 %v8561_v63, %v15104_v23 }
 0x8c0   : > { %v11863_v31 = vpop.eup %11862  ;;  %v7978_v62 = vsub.f32 1.0, %v11861_v15  ;;  %v7910_v52 = vmul.f32 1.442695, %v7789_v8  ;;  %v8746_v4 = vpack.c.bf16 %v8560_v58, %v8556_v29 }
 0x8c1   : > { %v7790_v33 = vmul.f32 %v7726_v5, %v7598_v61  ;;  %v7979_v50 = vsub.f32 1.0, %v11863_v31  ;;  %v7527_v14 = vpop.xlane.xlu1 %7526  ;;  %v8747_v27 = vpack.c.bf16 %v8562_v18, %v8558_v55 }
 0x8c2   : > { %8043 = vst.msk [vmem:[%s14999_s22 + $0x1b0] sm:$0xff] %vm7988_vm3, %v7978_v62  ;;  %11866 = vpow2.f32 %v7910_v52  ;;  %v7599_v53 = vmax.f32 %v7527_v14, 0.0 }
 0x8c3   : > { %v7912_v35 = vmul.f32 1.442695, %v7790_v33  ;;  %8044 = vst.msk [vmem:[%s14999_s22 + $0x1b8] sm:$0xff] %vm7988_vm3, %v7979_v50  ;;  %v8565_v36 = vpop.f32.mrb[244].mxu1  ;;  %9186 = vmatprep.mubr.bf16.mxu0 %v8747_v27 }
 0x8c4   : > { %v7791_v47 = vmul.f32 %v7727_v37, %v7599_v53  ;;  %v8567_v40 = vpop.f32.mrb[245].mxu1  ;;  %v8566_v25 = vadd.f32 %v8565_v36, %v15093_v19 }
 0x8c5   : > { %11868 = vpow2.f32 %v7912_v35  ;;  %v8569_v45 = vpop.f32.mrb[246].mxu1  ;;  %v8568_v48 = vadd.f32 %v8567_v40, %v15104_v23 }
 0x8c6   : > { %v7914_v22 = vmul.f32 1.442695, %v7791_v47  ;;  %9187 = vmatmul.mubr.bf16.gmra.mrb[176].mxu0 %v8746_v4  ;;  %v8570_v20 = vadd.f32 %v8569_v45, %v15093_v19  ;;  %v8571_v46 = vpop.f32.mrb[247].mxu1 }
 0x8c7   : > { %v8572_v26 = vadd.f32 %v8571_v46, %v15104_v23 }
 0x8c8   : > { %11870 = vpow2.f32 %v7914_v22  ;;  %v7530_v24 = vpop.xlane.xlu0 %7529  ;;  %v8748_v49 = vpack.c.bf16 %v8570_v20, %v8566_v25  ;;  %v11865_v39 = vpop.eup %11864 }
 0x8c9   : > { %v7600_v7 = vmax.f32 %v7530_v24, 0.0  ;;  %v8749_v17 = vpack.c.bf16 %v8572_v26, %v8568_v48  ;;  %v7980_v0 = vsub.f32 1.0, %v11865_v39 }
 0x8cb   : > { %v7533_v57 = vpop.xlane.xlu1 %7532  ;;  %v7792_v6 = vmul.f32 %v7728_v44, %v7600_v7  ;;  %v8575_v38 = vpop.f32.mrb[248].mxu1  ;;  %9194 = vmatprep.mubr.bf16.mxu0 %v8749_v17  ;;  %8045 = vst.msk [vmem:[%s14999_s22 + $0x1c0] sm:$0xff] %vm7988_vm3, %v7980_v0 }
 0x8cc   : > { %v7601_v11 = vmax.f32 %v7533_v57, 0.0  ;;  %v11867_v1 = vpop.eup %11866  ;;  %v8577_v51 = vpop.f32.mrb[249].mxu1  ;;  %v8576_v13 = vadd.f32 %v8575_v38, %v15093_v19 }
 0x8cd   : > { %v7981_v28 = vsub.f32 1.0, %v11867_v1  ;;  %v7916_v56 = vmul.f32 1.442695, %v7792_v6  ;;  %v7536_v10 = vpop.xlane.xlu0 %7535  ;;  %v8579_v41 = vpop.f32.mrb[250].mxu1  ;;  %v8578_v60 = vadd.f32 %v8577_v51, %v15104_v23 }
 0x8ce   : > { %v7793_v54 = vmul.f32 %v7729_v9, %v7601_v11  ;;  %9195 = vmatmul.mubr.bf16.gmra.mrb[180].mxu0 %v8748_v49  ;;  %v7602_v5 = vmax.f32 %v7536_v10, 0.0  ;;  %v8580_v32 = vadd.f32 %v8579_v41, %v15093_v19  ;;  %v8581_v21 = vpop.f32.mrb[251].mxu1 }
 0x8cf   : > { %v11869_v16 = vpop.eup %11868  ;;  %8046 = vst.msk [vmem:[%s14999_s22 + $0x1c8] sm:$0xff] %vm7988_vm3, %v7981_v28  ;;  %11872 = vpow2.f32 %v7916_v56  ;;  %v8582_v8 = vadd.f32 %v8581_v21, %v15104_v23 }
 0x8d0   : > { %v7982_v12 = vsub.f32 1.0, %v11869_v16  ;;  %v7918_v30 = vmul.f32 1.442695, %v7793_v54  ;;  %v7794_v61 = vmul.f32 %v7730_v59, %v7602_v5  ;;  %v8750_v58 = vpack.c.bf16 %v8580_v32, %v8576_v13  ;;  %v7539_v63 = vpop.xlane.xlu1 %7538 }
 0x8d1   : > { %v8751_v15 = vpack.c.bf16 %v8582_v8, %v8578_v60  ;;  %v7603_v29 = vmax.f32 %v7539_v63, 0.0 }
 0x8d2   : > { %8047 = vst.msk [vmem:[%s14999_s22 + $0x1d0] sm:$0xff] %vm7988_vm3, %v7982_v12  ;;  %11874 = vpow2.f32 %v7918_v30  ;;  %v11871_v55 = vpop.eup %11870  ;;  %v7920_v37 = vmul.f32 1.442695, %v7794_v61  ;;  %v10906_v12 = vld [vmem:[%s15481_s26] sm:$0xff]  }
 0x8d3   : > { %v7983_v18 = vsub.f32 1.0, %v11871_v55  ;;  %v7795_v31 = vmul.f32 %v7731_v34, %v7603_v29  ;;  %v8585_v62 = vpop.f32.mrb[252].mxu1  ;;  %9202 = vmatprep.mubr.bf16.mxu0 %v8751_v15  ;;  %v10907_v15 = vunpack.c.l.bf16 %v10906_v12 }
 0x8d4   : > { %11876 = vpow2.f32 %v7920_v37  ;;  %v8587_v52 = vpop.f32.mrb[253].mxu1  ;;  %v8586_v4 = vadd.f32 %v8585_v62, %v15093_v19 }
 0x8d5   : > { %8048 = vst.msk [vmem:[%s14999_s22 + $0x1d8] sm:$0xff] %vm7988_vm3, %v7983_v18  ;;  %v7922_v33 = vmul.f32 1.442695, %v7795_v31  ;;  %v8589_v50 = vpop.f32.mrb[254].mxu1  ;;  %v8588_v35 = vadd.f32 %v8587_v52, %v15104_v23  ;;  %v10908_v18 = vunpack.c.h.bf16 %v10906_v12 }
 0x8d6   : > { %9203 = vmatmul.mubr.bf16.gmra.mrb[184].mxu0 %v8750_v58  ;;  %v8590_v14 = vadd.f32 %v8589_v50, %v15093_v19  ;;  %v8591_v27 = vpop.f32.mrb[255].mxu1 }
 0x8d7   : > { %11878 = vpow2.f32 %v7922_v33  ;;  %v8592_v53 = vadd.f32 %v8591_v27, %v15104_v23 }
 0x8d8   : > { %v8752_v36 = vpack.c.bf16 %v8590_v14, %v8586_v4  ;;  %v11033_v4 = vld [vmem:[%s15481_s26 + $0x8] sm:$0xff]  }
 0x8d9   : > { %v11873_v47 = vpop.eup %11872  ;;  %v8753_v40 = vpack.c.bf16 %v8592_v53, %v8588_v35 }
 0x8da   : > { %v7984_v3 = vsub.f32 1.0, %v11873_v47 }
 0x8db   : > { %v8595_v22 = vpop.f32.mrb[0].mxu1  ;;  %9210 = vmatprep.mubr.bf16.mxu0 %v8753_v40 }
 0x8dc   : > { %v11875_v45 = vpop.eup %11874  ;;  %8049 = vst.msk [vmem:[%s14999_s22 + $0x1e0] sm:$0xff] %vm7988_vm3, %v7984_v3  ;;  %v8597_v20 = vpop.f32.mrb[1].mxu1  ;;  %v8596_v48 = vadd.f32 %v8595_v22, %v15093_v19  ;;  %v10911_v3 = vunpack.c.l.bf16 %v11033_v4 }
 0x8dd   : > { %v7985_v25 = vsub.f32 1.0, %v11875_v45  ;;  %v8599_v42 = vpop.f32.mrb[2].mxu1  ;;  %v8598_v49 = vadd.f32 %v8597_v20, %v15104_v23 }
 0x8de   : > { %v11877_v46 = vpop.eup %11876  ;;  %9211 = vmatmul.mubr.bf16.gmra.mrb[188].mxu0 %v8752_v36  ;;  %v8600_v44 = vadd.f32 %v8599_v42, %v15093_v19  ;;  %v8601_v26 = vpop.f32.mrb[3].mxu1 }
 0x8df   : > { %8050 = vst.msk [vmem:[%s14999_s22 + $0x1e8] sm:$0xff] %vm7988_vm3, %v7985_v25  ;;  %v7986_v24 = vsub.f32 1.0, %v11877_v46  ;;  %v8602_v7 = vadd.f32 %v8601_v26, %v15104_v23 }
 0x8e0   : > { %v8754_v9 = vpack.c.bf16 %v8600_v44, %v8596_v48  ;;  %v10912_v48 = vunpack.c.h.bf16 %v11033_v4 }
 0x8e1   : > { %v11879_v17 = vpop.eup %11878  ;;  %8051 = vst.msk [vmem:[%s14999_s22 + $0x1f0] sm:$0xff] %vm7988_vm3, %v7986_v24  ;;  %v8755_v43 = vpack.c.bf16 %v8602_v7, %v8598_v49 }
 0x8e2   : > { %v7987_v39 = vsub.f32 1.0, %v11879_v17  ;;  %v11034_v17 = vld [vmem:[%s15481_s26 + $0x10] sm:$0xff]  }
 0x8e3   : > { %v8605_v57 = vpop.f32.mrb[4].mxu1  ;;  %9218 = vmatprep.mubr.bf16.mxu0 %v8755_v43 }
 0x8e4   : > { %8052 = vst.msk [vmem:[%s14999_s22 + $0x1f8] sm:$0xff] %vm7988_vm3, %v7987_v39  ;;  %v8607_v2 = vpop.f32.mrb[5].mxu1  ;;  %v8606_v6 = vadd.f32 %v8605_v57, %v15093_v19 }
 0x8e5   : > { %v8609_v0 = vpop.f32.mrb[6].mxu1  ;;  %v8608_v1 = vadd.f32 %v8607_v2, %v15104_v23 }
 0x8e6   : > { %9219 = vmatmul.mubr.bf16.gmra.mrb[192].mxu0 %v8754_v9  ;;  %v8610_v11 = vadd.f32 %v8609_v0, %v15093_v19  ;;  %v8611_v38 = vpop.f32.mrb[7].mxu1 }
 0x8e7   : > { %v8612_v51 = vadd.f32 %v8611_v38, %v15104_v23 }
 0x8e8   : > { %v8756_v59 = vpack.c.bf16 %v8610_v11, %v8606_v6  ;;  %v10915_v11 = vunpack.c.l.bf16 %v11034_v17 }
 0x8e9   : > { %v8757_v28 = vpack.c.bf16 %v8612_v51, %v8608_v1 }
 0x8eb   : > { %v8615_v56 = vpop.f32.mrb[8].mxu1  ;;  %9226 = vmatprep.mubr.bf16.mxu0 %v8757_v28 }
 0x8ec   : > { %v8617_v54 = vpop.f32.mrb[9].mxu1  ;;  %v8616_v41 = vadd.f32 %v8615_v56, %v15093_v19  ;;  %v10916_v56 = vunpack.c.h.bf16 %v11034_v17 }
 0x8ed   : > { %v8619_v10 = vpop.f32.mrb[10].mxu1  ;;  %v8618_v13 = vadd.f32 %v8617_v54, %v15104_v23 }
 0x8ee   : > { %9227 = vmatmul.mubr.bf16.gmra.mrb[196].mxu0 %v8756_v59  ;;  %v8620_v34 = vadd.f32 %v8619_v10, %v15093_v19  ;;  %v8621_v16 = vpop.f32.mrb[11].mxu1 }
 0x8ef   : > { %v8622_v60 = vadd.f32 %v8621_v16, %v15104_v23 }
 0x8f0   : > { %v8758_v5 = vpack.c.bf16 %v8620_v34, %v8616_v41 }
 0x8f1   : > { %v8759_v32 = vpack.c.bf16 %v8622_v60, %v8618_v13 }
 0x8f3   : > { %v8625_v21 = vpop.f32.mrb[12].mxu1  ;;  %9234 = vmatprep.mubr.bf16.mxu0 %v8759_v32  ;;  %v11035_v32 = vld [vmem:[%s15481_s26 + $0x18] sm:$0xff]  }
 0x8f4   : > { %v8627_v30 = vpop.f32.mrb[13].mxu1  ;;  %v8626_v61 = vadd.f32 %v8625_v21, %v15093_v19 }
 0x8f5   : > { %v8629_v8 = vpop.f32.mrb[14].mxu1  ;;  %v8628_v29 = vadd.f32 %v8627_v30, %v15104_v23 }
 0x8f6   : > { %9235 = vmatmul.mubr.bf16.gmra.mrb[200].mxu0 %v8758_v5  ;;  %v8630_v58 = vadd.f32 %v8629_v8, %v15093_v19  ;;  %v8631_v63 = vpop.f32.mrb[15].mxu1 }
 0x8f7   : > { %v8632_v55 = vadd.f32 %v8631_v63, %v15104_v23  ;;  %v10919_v63 = vunpack.c.l.bf16 %v11035_v32 }
 0x8f8   : > { %v8760_v37 = vpack.c.bf16 %v8630_v58, %v8626_v61 }
 0x8f9   : > { %v8761_v31 = vpack.c.bf16 %v8632_v55, %v8628_v29  ;;  %v9028_v62 = vpop.f32.mrb[96].mxu0 }
 0x8fa   : > { %v9029_v52 = vadd.f32 %v10907_v15, %v9028_v62  ;;  %v9030_v33 = vpop.f32.mrb[97].mxu0 }
 0x8fb   : > { %v9031_v50 = vpop.f32.mrb[98].mxu0  ;;  %9242 = vmatprep.mubr.bf16.mxu0 %v8761_v31  ;;  %v10920_v31 = vunpack.c.h.bf16 %v11035_v32 }
 0x8fc   : > { %v9032_v14 = vadd.f32 %v10908_v18, %v9031_v50  ;;  %v9033_v27 = vpop.f32.mrb[99].mxu0  ;;  %v8635_v35 = vpop.f32.mrb[16].mxu1  ;;  %v9283_v36 = vmax.f32 %v9029_v52, 0.0 }
 0x8fd   : > { %v8637_v53 = vpop.f32.mrb[17].mxu1  ;;  %v8636_v45 = vadd.f32 %v8635_v35, %v15093_v19 }
 0x8fe   : > { %v9284_v47 = vmax.f32 %v9032_v14, 0.0  ;;  %9243 = vmatmul.mubr.bf16.gmra.mrb[204].mxu0 %v8760_v37  ;;  %v8639_v40 = vpop.f32.mrb[18].mxu1  ;;  %v8638_v42 = vadd.f32 %v8637_v53, %v15104_v23  ;;  %v11036_v53 = vld [vmem:[%s15481_s26 + $0x20] sm:$0xff]  }
 0x8ff   : > { %v8640_v22 = vadd.f32 %v8639_v40, %v15093_v19  ;;  %v8641_v25 = vpop.f32.mrb[19].mxu1 }
 0x900   : > { %v9363_v20 = vpack.c.bf16 %v9284_v47, %v9283_v36  ;;  %v8642_v46 = vadd.f32 %v8641_v25, %v15104_v23  ;;  %v10923_v25 = vunpack.c.l.bf16 %v11036_v53 }
 0x901   : > { %v8762_v44 = vpack.c.bf16 %v8640_v22, %v8636_v45  ;;  %v9036_v26 = vpop.f32.mrb[100].mxu0 }
 0x902   : > { %v8763_v24 = vpack.c.bf16 %v8642_v46, %v8638_v42  ;;  %v9037_v49 = vadd.f32 %v10911_v3, %v9036_v26  ;;  %v9038_v7 = vpop.f32.mrb[101].mxu0  ;;  %11120 = vmatprep.mubr.bf16.mxu1 %v9363_v20  ;;  %v10924_v26 = vunpack.c.h.bf16 %v11036_v53 }
 0x903   : > { %v9039_v9 = vpop.f32.mrb[102].mxu0 }
 0x904   : > { %v9040_v43 = vadd.f32 %v10912_v48, %v9039_v9  ;;  %v9041_v39 = vpop.f32.mrb[103].mxu0  ;;  %9250 = vmatprep.mubr.bf16.mxu0 %v8763_v24  ;;  %v9285_v2 = vmax.f32 %v9037_v49, 0.0 }
 0x905   : > { %v8645_v57 = vpop.f32.mrb[20].mxu1 }
 0x906   : > { %v9286_v0 = vmax.f32 %v9040_v43, 0.0  ;;  %v8647_v6 = vpop.f32.mrb[21].mxu1  ;;  %9251 = vmatmul.mubr.bf16.gmra.mrb[208].mxu0 %v8762_v44  ;;  %v8646_v51 = vadd.f32 %v8645_v57, %v15093_v19 }
 0x907   : > { %v8649_v38 = vpop.f32.mrb[22].mxu1  ;;  %v8648_v54 = vadd.f32 %v8647_v6, %v15104_v23 }
 0x908   : > { %v9364_v1 = vpack.c.bf16 %v9286_v0, %v9285_v2  ;;  %v8650_v59 = vadd.f32 %v8649_v38, %v15093_v19  ;;  %v8651_v28 = vpop.f32.mrb[23].mxu1  ;;  %v11037_v2 = vld [vmem:[%s15481_s26 + $0x28] sm:$0xff]  }
 0x909   : > { %v8652_v10 = vadd.f32 %v8651_v28, %v15104_v23  ;;  %v9044_v41 = vpop.f32.mrb[104].mxu0  ;;  %v10927_v38 = vunpack.c.l.bf16 %v11037_v2 }
 0x90a   : > { %v8764_v34 = vpack.c.bf16 %v8650_v59, %v8646_v51  ;;  %v9045_v16 = vadd.f32 %v10915_v11, %v9044_v41  ;;  %v9046_v13 = vpop.f32.mrb[105].mxu0  ;;  %11121 = vmatmul.mubr.bf16.vlgmr.msra.gmra.mrb[32].mxu1 %v9364_v1  ;;  %v10928_v51 = vunpack.c.h.bf16 %v11037_v2 }
 0x90b   : > { %v8765_v60 = vpack.c.bf16 %v8652_v10, %v8648_v54  ;;  %v9047_v5 = vpop.f32.mrb[106].mxu0  ;;  %v11038_v54 = vld [vmem:[%s15481_s26 + $0x30] sm:$0xff]  }
 0x90c   : > { %v9048_v21 = vadd.f32 %v10916_v56, %v9047_v5  ;;  %v9049_v12 = vpop.f32.mrb[107].mxu0  ;;  %v9287_v8 = vmax.f32 %v9045_v16, 0.0  ;;  %v10931_v13 = vunpack.c.l.bf16 %v11038_v54  ;;  %v10932_v5 = vunpack.c.h.bf16 %v11038_v54 }
 0x90d   : > { %v8655_v30 = vpop.f32.mrb[24].mxu1  ;;  %9258 = vmatprep.mubr.bf16.mxu0 %v8765_v60 }
 0x90e   : > { %v9288_v61 = vmax.f32 %v9048_v21, 0.0  ;;  %v8657_v58 = vpop.f32.mrb[25].mxu1  ;;  %9259 = vmatmul.mubr.bf16.gmra.mrb[212].mxu0 %v8764_v34  ;;  %v8656_v55 = vadd.f32 %v8655_v30, %v15093_v19 }
 0x90f   : > { %v8659_v15 = vpop.f32.mrb[26].mxu1  ;;  %v8658_v62 = vadd.f32 %v8657_v58, %v15104_v23 }
 0x910   : > { %v9365_v29 = vpack.c.bf16 %v9288_v61, %v9287_v8  ;;  %v8660_v37 = vadd.f32 %v8659_v15, %v15093_v19  ;;  %v8661_v18 = vpop.f32.mrb[27].mxu1  ;;  %v11039_v8 = vld [vmem:[%s15481_s26 + $0x38] sm:$0xff]  }
 0x911   : > { %v8662_v52 = vadd.f32 %v8661_v18, %v15104_v23  ;;  %v9052_v33 = vpop.f32.mrb[108].mxu0 }
 0x912   : > { %v8766_v50 = vpack.c.bf16 %v8660_v37, %v8656_v55  ;;  %v9053_v4 = vadd.f32 %v10919_v63, %v9052_v33  ;;  %v9054_v14 = vpop.f32.mrb[109].mxu0  ;;  %11124 = vmatprep.mubr.bf16.mxu1 %v9365_v29  ;;  %v10935_v29 = vunpack.c.l.bf16 %v11039_v8  ;;  %v10936_v37 = vunpack.c.h.bf16 %v11039_v8  ;;  %v11040_v33 = vld [vmem:[%s15481_s26 + $0x40] sm:$0xff]  }
 0x913   : > { %v8767_v27 = vpack.c.bf16 %v8662_v52, %v8658_v62  ;;  %v9055_v35 = vpop.f32.mrb[110].mxu0 }
 0x914   : > { %v9056_v36 = vadd.f32 %v10920_v31, %v9055_v35  ;;  %v9057_v47 = vpop.f32.mrb[111].mxu0  ;;  %v9289_v3 = vmax.f32 %v9053_v4, 0.0  ;;  %v10939_v35 = vunpack.c.l.bf16 %v11040_v33 }
 0x915   : > { %9266 = vmatprep.mubr.bf16.mxu0 %v8767_v27 }
 0x916   : > { %v8665_v40 = vpop.f32.mrb[28].mxu1  ;;  %v9290_v45 = vmax.f32 %v9056_v36, 0.0  ;;  %9267 = vmatmul.mubr.bf16.gmra.mrb[216].mxu0 %v8766_v50  ;;  %v10940_v36 = vunpack.c.h.bf16 %v11040_v33 }
 0x917   : > { %v8667_v22 = vpop.f32.mrb[29].mxu1  ;;  %v8666_v46 = vadd.f32 %v8665_v40, %v15093_v19 }
 0x918   : > { %v8669_v20 = vpop.f32.mrb[30].mxu1  ;;  %v9366_v42 = vpack.c.bf16 %v9290_v45, %v9289_v3  ;;  %v8668_v24 = vadd.f32 %v8667_v22, %v15104_v23  ;;  %v11041_v22 = vld [vmem:[%s15481_s26 + $0x48] sm:$0xff]  }
 0x919   : > { %v8670_v48 = vadd.f32 %v8669_v20, %v15093_v19  ;;  %v8671_v44 = vpop.f32.mrb[31].mxu1  ;;  %v9060_v7 = vpop.f32.mrb[112].mxu0 }
 0x91a   : > { %v8672_v49 = vadd.f32 %v8671_v44, %v15104_v23  ;;  %v9061_v17 = vadd.f32 %v10923_v25, %v9060_v7  ;;  %v9062_v43 = vpop.f32.mrb[113].mxu0  ;;  %11125 = vmatmul.mubr.bf16.gmra.mrb[36].mxu1 %v9366_v42 }
 0x91b   : > { %v8768_v9 = vpack.c.bf16 %v8670_v48, %v8666_v46  ;;  %v9063_v57 = vpop.f32.mrb[114].mxu0  ;;  %v10943_v48 = vunpack.c.l.bf16 %v11041_v22 }
 0x91c   : > { %v8769_v39 = vpack.c.bf16 %v8672_v49, %v8668_v24  ;;  %v9064_v0 = vadd.f32 %v10924_v26, %v9063_v57  ;;  %v9065_v6 = vpop.f32.mrb[115].mxu0  ;;  %v9291_v11 = vmax.f32 %v9061_v17, 0.0  ;;  %v10944_v26 = vunpack.c.h.bf16 %v11041_v22  ;;  %v11042_v17 = vld [vmem:[%s15481_s26 + $0x50] sm:$0xff]  }
 0x91e   : > { %9274 = vmatprep.mubr.bf16.mxu0 %v8769_v39  ;;  %v9292_v19 = vmax.f32 %v9064_v0, 0.0  ;;  %v10947_v0 = vunpack.c.l.bf16 %v11042_v17 }
 0x91f   : > { %9275 = vmatmul.mubr.bf16.gmra.mrb[220].mxu0 %v8768_v9 }
 0x920   : > { %v9367_v1 = vpack.c.bf16 %v9292_v19, %v9291_v11  ;;  %v10948_v11 = vunpack.c.h.bf16 %v11042_v17 }
 0x921   : > { %v9068_v59 = vpop.f32.mrb[116].mxu0 }
 0x922   : > { %v9069_v23 = vadd.f32 %v10927_v38, %v9068_v59  ;;  %v9070_v28 = vpop.f32.mrb[117].mxu0  ;;  %11128 = vmatprep.mubr.bf16.mxu1 %v9367_v1  ;;  %v11043_v59 = vld [vmem:[%s15481_s26 + $0x58] sm:$0xff]  }
 0x923   : > { %v9071_v56 = vpop.f32.mrb[118].mxu0 }
 0x924   : > { %v9072_v10 = vadd.f32 %v10928_v51, %v9071_v56  ;;  %v9073_v41 = vpop.f32.mrb[119].mxu0  ;;  %v9293_v34 = vmax.f32 %v9069_v23, 0.0 }
 0x926   : > { %v9294_v16 = vmax.f32 %v9072_v10, 0.0  ;;  %v10951_v10 = vunpack.c.l.bf16 %v11043_v59 }
 0x928   : > { %v9368_v60 = vpack.c.bf16 %v9294_v16, %v9293_v34  ;;  %v10952_v34 = vunpack.c.h.bf16 %v11043_v59 }
 0x929   : > { %v9076_v32 = vpop.f32.mrb[120].mxu0 }
 0x92a   : > { %v9077_v21 = vadd.f32 %v10931_v13, %v9076_v32  ;;  %v9078_v12 = vpop.f32.mrb[121].mxu0  ;;  %11129 = vmatmul.mubr.bf16.gmra.mrb[40].mxu1 %v9368_v60  ;;  %v11044_v32 = vld [vmem:[%s15481_s26 + $0x60] sm:$0xff]  }
 0x92b   : > { %v9079_v30 = vpop.f32.mrb[122].mxu0 }
 0x92c   : > { %v9080_v61 = vadd.f32 %v10932_v5, %v9079_v30  ;;  %v9081_v58 = vpop.f32.mrb[123].mxu0  ;;  %v9295_v63 = vmax.f32 %v9077_v21, 0.0 }
 0x92e   : > { %v9296_v15 = vmax.f32 %v9080_v61, 0.0  ;;  %v10955_v61 = vunpack.c.l.bf16 %v11044_v32 }
 0x930   : > { %v9369_v55 = vpack.c.bf16 %v9296_v15, %v9295_v63  ;;  %v10956_v63 = vunpack.c.h.bf16 %v11044_v32 }
 0x931   : > { %v9084_v18 = vpop.f32.mrb[124].mxu0 }
 0x932   : > { %v9085_v31 = vadd.f32 %v10935_v29, %v9084_v18  ;;  %v9086_v62 = vpop.f32.mrb[125].mxu0  ;;  %11132 = vmatprep.mubr.bf16.mxu1 %v9369_v55  ;;  %v11045_v18 = vld [vmem:[%s15481_s26 + $0x68] sm:$0xff]  }
 0x933   : > { %v9087_v52 = vpop.f32.mrb[126].mxu0 }
 0x934   : > { %v9088_v50 = vadd.f32 %v10936_v37, %v9087_v52  ;;  %v9089_v4 = vpop.f32.mrb[127].mxu0  ;;  %v9297_v14 = vmax.f32 %v9085_v31, 0.0 }
 0x936   : > { %v9298_v27 = vmax.f32 %v9088_v50, 0.0  ;;  %v10959_v50 = vunpack.c.l.bf16 %v11045_v18 }
 0x938   : > { %v9370_v53 = vpack.c.bf16 %v9298_v27, %v9297_v14  ;;  %v10960_v14 = vunpack.c.h.bf16 %v11045_v18 }
 0x939   : > { %v9092_v47 = vpop.f32.mrb[128].mxu0 }
 0x93a   : > { %v9093_v40 = vadd.f32 %v10939_v35, %v9092_v47  ;;  %v9094_v3 = vpop.f32.mrb[129].mxu0  ;;  %11133 = vmatmul.mubr.bf16.gmra.mrb[44].mxu1 %v9370_v53  ;;  %v11046_v47 = vld [vmem:[%s15481_s26 + $0x70] sm:$0xff]  }
 0x93b   : > { %v9095_v45 = vpop.f32.mrb[130].mxu0 }
 0x93c   : > { %v9096_v25 = vadd.f32 %v10940_v36, %v9095_v45  ;;  %v9097_v20 = vpop.f32.mrb[131].mxu0  ;;  %v9299_v42 = vmax.f32 %v9093_v40, 0.0 }
 0x93e   : > { %v9300_v46 = vmax.f32 %v9096_v25, 0.0  ;;  %v10963_v25 = vunpack.c.l.bf16 %v11046_v47 }
 0x940   : > { %v9371_v44 = vpack.c.bf16 %v9300_v46, %v9299_v42  ;;  %v10964_v42 = vunpack.c.h.bf16 %v11046_v47 }
 0x941   : > { %v9100_v24 = vpop.f32.mrb[132].mxu0 }
 0x942   : > { %v9101_v49 = vadd.f32 %v10943_v48, %v9100_v24  ;;  %v9102_v7 = vpop.f32.mrb[133].mxu0  ;;  %11136 = vmatprep.mubr.bf16.mxu1 %v9371_v44  ;;  %v11047_v24 = vld [vmem:[%s15481_s26 + $0x78] sm:$0xff]  }
 0x943   : > { %v9103_v9 = vpop.f32.mrb[134].mxu0 }
 0x944   : > { %v9104_v43 = vadd.f32 %v10944_v26, %v9103_v9  ;;  %v9105_v39 = vpop.f32.mrb[135].mxu0  ;;  %v9301_v57 = vmax.f32 %v9101_v49, 0.0 }
 0x946   : > { %v9302_v2 = vmax.f32 %v9104_v43, 0.0  ;;  %v10967_v43 = vunpack.c.l.bf16 %v11047_v24 }
 0x948   : > { %v9372_v6 = vpack.c.bf16 %v9302_v2, %v9301_v57  ;;  %v10968_v57 = vunpack.c.h.bf16 %v11047_v24 }
 0x949   : > { %v9108_v19 = vpop.f32.mrb[136].mxu0 }
 0x94a   : > { %v9109_v38 = vadd.f32 %v10947_v0, %v9108_v19  ;;  %v9110_v1 = vpop.f32.mrb[137].mxu0  ;;  %11137 = vmatmul.mubr.bf16.gmra.mrb[48].mxu1 %v9372_v6  ;;  %v11048_v19 = vld [vmem:[%s15481_s26 + $0x80] sm:$0xff]  }
 0x94b   : > { %v9111_v51 = vpop.f32.mrb[138].mxu0 }
 0x94c   : > { %v9112_v23 = vadd.f32 %v10948_v11, %v9111_v51  ;;  %v9113_v28 = vpop.f32.mrb[139].mxu0  ;;  %v9303_v56 = vmax.f32 %v9109_v38, 0.0 }
 0x94e   : > { %v9304_v54 = vmax.f32 %v9112_v23, 0.0  ;;  %v10971_v23 = vunpack.c.l.bf16 %v11048_v19 }
 0x950   : > { %v9373_v41 = vpack.c.bf16 %v9304_v54, %v9303_v56  ;;  %v10972_v56 = vunpack.c.h.bf16 %v11048_v19 }
 0x951   : > { %v9116_v16 = vpop.f32.mrb[140].mxu0 }
 0x952   : > { %v9117_v13 = vadd.f32 %v10951_v10, %v9116_v16  ;;  %v9118_v60 = vpop.f32.mrb[141].mxu0  ;;  %11140 = vmatprep.mubr.bf16.mxu1 %v9373_v41  ;;  %v11049_v16 = vld [vmem:[%s15481_s26 + $0x88] sm:$0xff]  }
 0x953   : > { %v9119_v5 = vpop.f32.mrb[142].mxu0 }
 0x954   : > { %v9120_v21 = vadd.f32 %v10952_v34, %v9119_v5  ;;  %v9121_v12 = vpop.f32.mrb[143].mxu0  ;;  %v9305_v30 = vmax.f32 %v9117_v13, 0.0 }
 0x956   : > { %v9306_v8 = vmax.f32 %v9120_v21, 0.0  ;;  %v10975_v21 = vunpack.c.l.bf16 %v11049_v16 }
 0x958   : > { %v9374_v58 = vpack.c.bf16 %v9306_v8, %v9305_v30  ;;  %v10976_v30 = vunpack.c.h.bf16 %v11049_v16 }
 0x959   : > { %v9124_v15 = vpop.f32.mrb[144].mxu0 }
 0x95a   : > { %v9125_v29 = vadd.f32 %v10955_v61, %v9124_v15  ;;  %v9126_v55 = vpop.f32.mrb[145].mxu0  ;;  %11141 = vmatmul.mubr.bf16.gmra.mrb[52].mxu1 %v9374_v58  ;;  %v11050_v15 = vld [vmem:[%s15481_s26 + $0x90] sm:$0xff]  }
 0x95b   : > { %v9127_v37 = vpop.f32.mrb[146].mxu0 }
 0x95c   : > { %v9128_v31 = vadd.f32 %v10956_v63, %v9127_v37  ;;  %v9129_v62 = vpop.f32.mrb[147].mxu0  ;;  %v9307_v52 = vmax.f32 %v9125_v29, 0.0 }
 0x95e   : > { %v9308_v33 = vmax.f32 %v9128_v31, 0.0  ;;  %v10979_v31 = vunpack.c.l.bf16 %v11050_v15 }
 0x960   : > { %v9375_v4 = vpack.c.bf16 %v9308_v33, %v9307_v52  ;;  %v10980_v52 = vunpack.c.h.bf16 %v11050_v15 }
 0x961   : > { %v9132_v27 = vpop.f32.mrb[148].mxu0 }
 0x962   : > { %v9133_v35 = vadd.f32 %v10959_v50, %v9132_v27  ;;  %v9134_v53 = vpop.f32.mrb[149].mxu0  ;;  %11144 = vmatprep.mubr.bf16.mxu1 %v9375_v4  ;;  %v11051_v27 = vld [vmem:[%s15481_s26 + $0x98] sm:$0xff]  }
 0x963   : > { %v9135_v36 = vpop.f32.mrb[150].mxu0 }
 0x964   : > { %v9136_v40 = vadd.f32 %v10960_v14, %v9135_v36  ;;  %v9137_v3 = vpop.f32.mrb[151].mxu0  ;;  %v9309_v45 = vmax.f32 %v9133_v35, 0.0 }
 0x966   : > { %v9310_v22 = vmax.f32 %v9136_v40, 0.0  ;;  %v10983_v40 = vunpack.c.l.bf16 %v11051_v27 }
 0x968   : > { %v9376_v20 = vpack.c.bf16 %v9310_v22, %v9309_v45  ;;  %v10984_v45 = vunpack.c.h.bf16 %v11051_v27 }
 0x969   : > { %v9140_v46 = vpop.f32.mrb[152].mxu0 }
 0x96a   : > { %v9141_v48 = vadd.f32 %v10963_v25, %v9140_v46  ;;  %v9142_v44 = vpop.f32.mrb[153].mxu0  ;;  %11145 = vmatmul.mubr.bf16.gmra.mrb[56].mxu1 %v9376_v20  ;;  %v11052_v46 = vld [vmem:[%s15481_s26 + $0xa0] sm:$0xff]  }
 0x96b   : > { %v9143_v26 = vpop.f32.mrb[154].mxu0 }
 0x96c   : > { %v9144_v49 = vadd.f32 %v10964_v42, %v9143_v26  ;;  %v9145_v7 = vpop.f32.mrb[155].mxu0  ;;  %v9311_v9 = vmax.f32 %v9141_v48, 0.0 }
 0x96e   : > { %v9312_v17 = vmax.f32 %v9144_v49, 0.0  ;;  %v10987_v49 = vunpack.c.l.bf16 %v11052_v46 }
 0x970   : > { %v9377_v39 = vpack.c.bf16 %v9312_v17, %v9311_v9  ;;  %v10988_v9 = vunpack.c.h.bf16 %v11052_v46 }
 0x971   : > { %v9148_v2 = vpop.f32.mrb[156].mxu0 }
 0x972   : > { %v9149_v0 = vadd.f32 %v10967_v43, %v9148_v2  ;;  %v9150_v6 = vpop.f32.mrb[157].mxu0  ;;  %11148 = vmatprep.mubr.bf16.mxu1 %v9377_v39  ;;  %v11053_v2 = vld [vmem:[%s15481_s26 + $0xa8] sm:$0xff]  }
 0x973   : > { %v9151_v11 = vpop.f32.mrb[158].mxu0 }
 0x974   : > { %v9152_v38 = vadd.f32 %v10968_v57, %v9151_v11  ;;  %v9153_v1 = vpop.f32.mrb[159].mxu0  ;;  %v9313_v51 = vmax.f32 %v9149_v0, 0.0 }
 0x976   : > { %v9314_v59 = vmax.f32 %v9152_v38, 0.0  ;;  %v10991_v38 = vunpack.c.l.bf16 %v11053_v2 }
 0x978   : > { %v9378_v28 = vpack.c.bf16 %v9314_v59, %v9313_v51  ;;  %v10992_v51 = vunpack.c.h.bf16 %v11053_v2 }
 0x979   : > { %v9156_v54 = vpop.f32.mrb[160].mxu0 }
 0x97a   : > { %v9157_v10 = vadd.f32 %v10971_v23, %v9156_v54  ;;  %v9158_v41 = vpop.f32.mrb[161].mxu0  ;;  %11149 = vmatmul.mubr.bf16.gmra.mrb[60].mxu1 %v9378_v28  ;;  %v11054_v54 = vld [vmem:[%s15481_s26 + $0xb0] sm:$0xff]  }
 0x97b   : > { %v9159_v34 = vpop.f32.mrb[162].mxu0 }
 0x97c   : > { %v9160_v13 = vadd.f32 %v10972_v56, %v9159_v34  ;;  %v9161_v60 = vpop.f32.mrb[163].mxu0  ;;  %v9315_v5 = vmax.f32 %v9157_v10, 0.0 }
 0x97e   : > { %v9316_v32 = vmax.f32 %v9160_v13, 0.0  ;;  %v10995_v13 = vunpack.c.l.bf16 %v11054_v54 }
 0x980   : > { %v9379_v12 = vpack.c.bf16 %v9316_v32, %v9315_v5  ;;  %v10996_v5 = vunpack.c.h.bf16 %v11054_v54 }
 0x981   : > { %v9164_v8 = vpop.f32.mrb[164].mxu0 }
 0x982   : > { %v9165_v61 = vadd.f32 %v10975_v21, %v9164_v8  ;;  %v9166_v58 = vpop.f32.mrb[165].mxu0  ;;  %11152 = vmatprep.mubr.bf16.mxu1 %v9379_v12  ;;  %v11055_v8 = vld [vmem:[%s15481_s26 + $0xb8] sm:$0xff]  }
 0x983   : > { %v9167_v63 = vpop.f32.mrb[166].mxu0 }
 0x984   : > { %v9168_v29 = vadd.f32 %v10976_v30, %v9167_v63  ;;  %v9169_v55 = vpop.f32.mrb[167].mxu0  ;;  %v9317_v37 = vmax.f32 %v9165_v61, 0.0 }
 0x986   : > { %v9318_v18 = vmax.f32 %v9168_v29, 0.0  ;;  %v10999_v29 = vunpack.c.l.bf16 %v11055_v8 }
 0x988   : > { %v9380_v62 = vpack.c.bf16 %v9318_v18, %v9317_v37  ;;  %v11000_v37 = vunpack.c.h.bf16 %v11055_v8 }
 0x989   : > { %v9172_v33 = vpop.f32.mrb[168].mxu0 }
 0x98a   : > { %v9173_v50 = vadd.f32 %v10979_v31, %v9172_v33  ;;  %v9174_v4 = vpop.f32.mrb[169].mxu0  ;;  %11153 = vmatmul.mubr.bf16.gmra.mrb[64].mxu1 %v9380_v62  ;;  %v11056_v33 = vld [vmem:[%s15481_s26 + $0xc0] sm:$0xff]  }
 0x98b   : > { %v9175_v14 = vpop.f32.mrb[170].mxu0 }
 0x98c   : > { %v9176_v35 = vadd.f32 %v10980_v52, %v9175_v14  ;;  %v9177_v53 = vpop.f32.mrb[171].mxu0  ;;  %v9319_v36 = vmax.f32 %v9173_v50, 0.0 }
 0x98e   : > { %v9320_v47 = vmax.f32 %v9176_v35, 0.0  ;;  %v11003_v35 = vunpack.c.l.bf16 %v11056_v33 }
 0x990   : > { %v9381_v3 = vpack.c.bf16 %v9320_v47, %v9319_v36  ;;  %v11004_v36 = vunpack.c.h.bf16 %v11056_v33 }
 0x991   : > { %v9180_v22 = vpop.f32.mrb[172].mxu0 }
 0x992   : > { %v9181_v25 = vadd.f32 %v10983_v40, %v9180_v22  ;;  %v9182_v20 = vpop.f32.mrb[173].mxu0  ;;  %11156 = vmatprep.mubr.bf16.mxu1 %v9381_v3  ;;  %v11057_v22 = vld [vmem:[%s15481_s26 + $0xc8] sm:$0xff]  }
 0x993   : > { %v9183_v42 = vpop.f32.mrb[174].mxu0 }
 0x994   : > { %v9184_v48 = vadd.f32 %v10984_v45, %v9183_v42  ;;  %v9185_v44 = vpop.f32.mrb[175].mxu0  ;;  %v9321_v26 = vmax.f32 %v9181_v25, 0.0 }
 0x996   : > { %v9322_v24 = vmax.f32 %v9184_v48, 0.0  ;;  %v11007_v48 = vunpack.c.l.bf16 %v11057_v22 }
 0x998   : > { %v9382_v7 = vpack.c.bf16 %v9322_v24, %v9321_v26  ;;  %v11008_v26 = vunpack.c.h.bf16 %v11057_v22 }
 0x999   : > { %v9188_v17 = vpop.f32.mrb[176].mxu0 }
 0x99a   : > { %v9189_v43 = vadd.f32 %v10987_v49, %v9188_v17  ;;  %v9190_v39 = vpop.f32.mrb[177].mxu0  ;;  %11157 = vmatmul.mubr.bf16.gmra.mrb[68].mxu1 %v9382_v7  ;;  %v11058_v17 = vld [vmem:[%s15481_s26 + $0xd0] sm:$0xff]  }
 0x99b   : > { %v9191_v57 = vpop.f32.mrb[178].mxu0 }
 0x99c   : > { %v9192_v0 = vadd.f32 %v10988_v9, %v9191_v57  ;;  %v9193_v6 = vpop.f32.mrb[179].mxu0  ;;  %v9323_v11 = vmax.f32 %v9189_v43, 0.0 }
 0x99e   : > { %v9324_v19 = vmax.f32 %v9192_v0, 0.0  ;;  %v11011_v0 = vunpack.c.l.bf16 %v11058_v17 }
 0x9a0   : > { %v9383_v1 = vpack.c.bf16 %v9324_v19, %v9323_v11  ;;  %v11012_v11 = vunpack.c.h.bf16 %v11058_v17 }
 0x9a1   : > { %v9196_v59 = vpop.f32.mrb[180].mxu0 }
 0x9a2   : > { %v9197_v23 = vadd.f32 %v10991_v38, %v9196_v59  ;;  %v9198_v28 = vpop.f32.mrb[181].mxu0  ;;  %11160 = vmatprep.mubr.bf16.mxu1 %v9383_v1  ;;  %v11059_v59 = vld [vmem:[%s15481_s26 + $0xd8] sm:$0xff]  }
 0x9a3   : > { %v9199_v56 = vpop.f32.mrb[182].mxu0 }
 0x9a4   : > { %v9200_v10 = vadd.f32 %v10992_v51, %v9199_v56  ;;  %v9201_v41 = vpop.f32.mrb[183].mxu0  ;;  %v9325_v34 = vmax.f32 %v9197_v23, 0.0 }
 0x9a6   : > { %v9326_v16 = vmax.f32 %v9200_v10, 0.0  ;;  %v11015_v10 = vunpack.c.l.bf16 %v11059_v59 }
 0x9a8   : > { %v9384_v60 = vpack.c.bf16 %v9326_v16, %v9325_v34  ;;  %v11016_v34 = vunpack.c.h.bf16 %v11059_v59 }
 0x9a9   : > { %v9204_v32 = vpop.f32.mrb[184].mxu0 }
 0x9aa   : > { %v9205_v21 = vadd.f32 %v10995_v13, %v9204_v32  ;;  %v9206_v12 = vpop.f32.mrb[185].mxu0  ;;  %11161 = vmatmul.mubr.bf16.gmra.mrb[72].mxu1 %v9384_v60  ;;  %v11060_v32 = vld [vmem:[%s15481_s26 + $0xe0] sm:$0xff]  }
 0x9ab   : > { %v9207_v30 = vpop.f32.mrb[186].mxu0 }
 0x9ac   : > { %v9208_v61 = vadd.f32 %v10996_v5, %v9207_v30  ;;  %v9209_v58 = vpop.f32.mrb[187].mxu0  ;;  %v9327_v63 = vmax.f32 %v9205_v21, 0.0 }
 0x9ae   : > { %v9328_v15 = vmax.f32 %v9208_v61, 0.0  ;;  %v11019_v61 = vunpack.c.l.bf16 %v11060_v32 }
 0x9b0   : > { %v9385_v55 = vpack.c.bf16 %v9328_v15, %v9327_v63  ;;  %v11020_v63 = vunpack.c.h.bf16 %v11060_v32 }
 0x9b1   : > { %v9212_v18 = vpop.f32.mrb[188].mxu0 }
 0x9b2   : > { %v9213_v31 = vadd.f32 %v10999_v29, %v9212_v18  ;;  %v9214_v62 = vpop.f32.mrb[189].mxu0  ;;  %11164 = vmatprep.mubr.bf16.mxu1 %v9385_v55  ;;  %v15535_v18 = vld [vmem:[%s15760_s14] ss:$0 sm:$0xff] }
 0x9b3   : > { %v9215_v52 = vpop.f32.mrb[190].mxu0 }
 0x9b4   : > { %v9216_v50 = vadd.f32 %v11000_v37, %v9215_v52  ;;  %v9217_v4 = vpop.f32.mrb[191].mxu0  ;;  %v9329_v14 = vmax.f32 %v9213_v31, 0.0  ;;  %v11061_v31 = vld [vmem:[%s15481_s26 + $0xe8] sm:$0xff]  }
 0x9b5   : > { %v11024_v22 = vunpack.c.h.bf16 %v11061_v31 }
 0x9b6   : > { %v9330_v27 = vmax.f32 %v9216_v50, 0.0 }
 0x9b8   : > { %v9386_v53 = vpack.c.bf16 %v9330_v27, %v9329_v14 }
 0x9b9   : > { %v9220_v47 = vpop.f32.mrb[192].mxu0 }
 0x9ba   : > { %v9221_v40 = vadd.f32 %v11003_v35, %v9220_v47  ;;  %v9222_v3 = vpop.f32.mrb[193].mxu0  ;;  %11165 = vmatmul.mubr.bf16.gmra.mrb[76].mxu1 %v9386_v53  ;;  %v11023_v35 = vunpack.c.l.bf16 %v11061_v31 }
 0x9bb   : > { %v9223_v45 = vpop.f32.mrb[194].mxu0 }
 0x9bc   : > { %v9224_v25 = vadd.f32 %v11004_v36, %v9223_v45  ;;  %v9225_v20 = vpop.f32.mrb[195].mxu0  ;;  %v9331_v42 = vmax.f32 %v9221_v40, 0.0 }
 0x9be   : > { %v9332_v46 = vmax.f32 %v9224_v25, 0.0 }
 0x9c0   : > { %v9387_v44 = vpack.c.bf16 %v9332_v46, %v9331_v42 }
 0x9c1   : > { %v9228_v24 = vpop.f32.mrb[196].mxu0 }
 0x9c2   : > { %v9229_v49 = vadd.f32 %v11007_v48, %v9228_v24  ;;  %v9230_v7 = vpop.f32.mrb[197].mxu0  ;;  %11168 = vmatprep.mubr.bf16.mxu1 %v9387_v44 }
 0x9c3   : > { %v9231_v9 = vpop.f32.mrb[198].mxu0 }
 0x9c4   : > { %v9232_v43 = vadd.f32 %v11008_v26, %v9231_v9  ;;  %v9233_v39 = vpop.f32.mrb[199].mxu0  ;;  %v9333_v57 = vmax.f32 %v9229_v49, 0.0  ;;  %v11062_v49 = vld [vmem:[%s15481_s26 + $0xf0] sm:$0xff]  }
 0x9c5   : > { %v11027_v39 = vunpack.c.l.bf16 %v11062_v49 }
 0x9c6   : > { %v9334_v2 = vmax.f32 %v9232_v43, 0.0 }
 0x9c8   : > { %v9388_v6 = vpack.c.bf16 %v9334_v2, %v9333_v57  ;;  %v11028_v2 = vunpack.c.h.bf16 %v11062_v49 }
 0x9c9   : > { %v9236_v19 = vpop.f32.mrb[200].mxu0 }
 0x9ca   : > { %v9237_v38 = vadd.f32 %v11011_v0, %v9236_v19  ;;  %v9238_v1 = vpop.f32.mrb[201].mxu0  ;;  %11169 = vmatmul.mubr.bf16.gmra.mrb[80].mxu1 %v9388_v6  ;;  %v11063_v19 = vld [vmem:[%s15481_s26 + $0xf8] sm:$0xff]  }
 0x9cb   : > { %v9239_v51 = vpop.f32.mrb[202].mxu0 }
 0x9cc   : > { %v9240_v23 = vadd.f32 %v11012_v11, %v9239_v51  ;;  %v9241_v28 = vpop.f32.mrb[203].mxu0  ;;  %v9335_v56 = vmax.f32 %v9237_v38, 0.0 }
 0x9ce   : > { %v9336_v54 = vmax.f32 %v9240_v23, 0.0 }
 0x9d0   : > { %v9389_v41 = vpack.c.bf16 %v9336_v54, %v9335_v56  ;;  %v11031_v54 = vunpack.c.l.bf16 %v11063_v19 }
 0x9d1   : > { %v9244_v16 = vpop.f32.mrb[204].mxu0 }
 0x9d2   : > { %v9245_v13 = vadd.f32 %v11015_v10, %v9244_v16  ;;  %v9246_v60 = vpop.f32.mrb[205].mxu0  ;;  %11172 = vmatprep.mubr.bf16.mxu1 %v9389_v41 }
 0x9d3   : > { %v9247_v5 = vpop.f32.mrb[206].mxu0 }
 0x9d4   : > { %v9248_v21 = vadd.f32 %v11016_v34, %v9247_v5  ;;  %v9249_v12 = vpop.f32.mrb[207].mxu0  ;;  %v9337_v30 = vmax.f32 %v9245_v13, 0.0 }
 0x9d6   : > { %v9338_v8 = vmax.f32 %v9248_v21, 0.0 }
 0x9d8   : > { %v9390_v58 = vpack.c.bf16 %v9338_v8, %v9337_v30  ;;  %v11032_v30 = vunpack.c.h.bf16 %v11063_v19 }
 0x9d9   : > { %v9252_v15 = vpop.f32.mrb[208].mxu0 }
 0x9da   : > { %v9253_v29 = vadd.f32 %v11019_v61, %v9252_v15  ;;  %v9254_v55 = vpop.f32.mrb[209].mxu0  ;;  %11173 = vmatmul.mubr.bf16.gmra.mrb[84].mxu1 %v9390_v58 }
 0x9db   : > { %v9255_v37 = vpop.f32.mrb[210].mxu0 }
 0x9dc   : > { %v9256_v62 = vadd.f32 %v11020_v63, %v9255_v37  ;;  %v9257_v52 = vpop.f32.mrb[211].mxu0  ;;  %v9339_v50 = vmax.f32 %v9253_v29, 0.0 }
 0x9dd   : > { %v11122_v33 = vpop.f32.mrb[32].mxu1 }
 0x9de   : > { %v9340_v4 = vmax.f32 %v9256_v62, 0.0  ;;  %v9493_v14 = vadd.f32 %v11122_v33, %v15535_v18  ;;  %v9484_v27 = vpop.f32.mrb[33].mxu1 }
 0x9df   : > { %v9485_v53 = vadd.f32 %v15535_v18, %v9484_v27  ;;  %v11123_v36 = vpop.f32.mrb[34].mxu1 }
 0x9e0   : > { %v9391_v47 = vpack.c.bf16 %v9340_v4, %v9339_v50  ;;  %v10841_v40 = vmul.f32 -1.442695, %v9493_v14  ;;  %v9496_v3 = vadd.f32 %v11123_v36, %v15535_v18  ;;  %v9487_v45 = vpop.f32.mrb[35].mxu1 }
 0x9e1   : > { %v10839_v25 = vmul.f32 -1.442695, %v9485_v53  ;;  %v9488_v20 = vadd.f32 %v15535_v18, %v9487_v45  ;;  %v9260_v42 = vpop.f32.mrb[212].mxu0 }
 0x9e2   : > { %11880 = vpow2.f32 %v10841_v40  ;;  %v10842_v46 = vmul.f32 -1.442695, %v9496_v3  ;;  %v9261_v48 = vadd.f32 %v11023_v35, %v9260_v42  ;;  %v9262_v44 = vpop.f32.mrb[213].mxu0  ;;  %11176 = vmatprep.mubr.bf16.mxu1 %v9391_v47 }
 0x9e3   : > { %11882 = vpow2.f32 %v10839_v25  ;;  %v10840_v26 = vmul.f32 -1.442695, %v9488_v20  ;;  %v9263_v24 = vpop.f32.mrb[214].mxu0 }
 0x9e4   : > { %11884 = vpow2.f32 %v10842_v46  ;;  %v9264_v7 = vadd.f32 %v11024_v22, %v9263_v24  ;;  %v9265_v9 = vpop.f32.mrb[215].mxu0  ;;  %v9341_v17 = vmax.f32 %v9261_v48, 0.0 }
 0x9e5   : > { %11886 = vpow2.f32 %v10840_v26 }
 0x9e6   : > { %v9342_v43 = vmax.f32 %v9264_v7, 0.0 }
 0x9e8   : > { %v9392_v57 = vpack.c.bf16 %v9342_v43, %v9341_v17 }
 0x9e9   : > { %v9268_v0 = vpop.f32.mrb[216].mxu0 }
 0x9ea   : > { %v9269_v6 = vadd.f32 %v11027_v39, %v9268_v0  ;;  %v9270_v11 = vpop.f32.mrb[217].mxu0  ;;  %11177 = vmatmul.mubr.bf16.gmra.mrb[88].mxu1 %v9392_v57 }
 0x9eb   : > { %v9271_v38 = vpop.f32.mrb[218].mxu0 }
 0x9ec   : > { %v11881_v1 = vpop.eup %11880  ;;  %v9272_v51 = vadd.f32 %v11028_v2, %v9271_v38  ;;  %v9273_v59 = vpop.f32.mrb[219].mxu0  ;;  %v9343_v34 = vmax.f32 %v9269_v6, 0.0 }
 0x9ed   : > { %v11883_v23 = vpop.eup %11882  ;;  %v9933_v28 = vadd.f32 1.0, %v11881_v1  ;;  %v11126_v56 = vpop.f32.mrb[36].mxu1 }
 0x9ee   : > { %v11885_v10 = vpop.eup %11884  ;;  %v9931_v41 = vadd.f32 1.0, %v11883_v23  ;;  %v9344_v16 = vmax.f32 %v9272_v51, 0.0  ;;  %v9509_v13 = vadd.f32 %v11126_v56, %v15535_v18  ;;  %v9500_v60 = vpop.f32.mrb[37].mxu1 }
 0x9ef   : > { %v11887_v5 = vpop.eup %11886  ;;  %11888 = vrcp.f32 %v9933_v28  ;;  %v9934_v32 = vadd.f32 1.0, %v11885_v10  ;;  %v9501_v21 = vadd.f32 %v15535_v18, %v9500_v60  ;;  %v11127_v12 = vpop.f32.mrb[38].mxu1 }
 0x9f0   : > { %11890 = vrcp.f32 %v9931_v41  ;;  %v9932_v8 = vadd.f32 1.0, %v11887_v5  ;;  %v9393_v61 = vpack.c.bf16 %v9344_v16, %v9343_v34  ;;  %v10845_v58 = vmul.f32 -1.442695, %v9509_v13  ;;  %v9503_v63 = vpop.f32.mrb[39].mxu1 }
 0x9f1   : > { %11892 = vrcp.f32 %v9934_v32  ;;  %v10843_v15 = vmul.f32 -1.442695, %v9501_v21  ;;  %v9512_v29 = vadd.f32 %v11127_v12, %v15535_v18  ;;  %v9504_v55 = vadd.f32 %v15535_v18, %v9503_v63 }
 0x9f2   : > { %v9276_v37 = vpop.f32.mrb[220].mxu0  ;;  %11894 = vrcp.f32 %v9932_v8  ;;  %11180 = vmatprep.mubr.bf16.mxu1 %v9393_v61 }
 0x9f3   : > { %v9277_v31 = vadd.f32 %v11031_v54, %v9276_v37  ;;  %v9278_v62 = vpop.f32.mrb[221].mxu0  ;;  %11896 = vpow2.f32 %v10845_v58  ;;  %v10846_v52 = vmul.f32 -1.442695, %v9512_v29  ;;  %v10844_v33 = vmul.f32 -1.442695, %v9504_v55 }
 0x9f4   : > { %v9279_v50 = vpop.f32.mrb[222].mxu0  ;;  %11898 = vpow2.f32 %v10843_v15 }
 0x9f5   : > { %v9280_v4 = vadd.f32 %v11032_v30, %v9279_v50  ;;  %v9281_v14 = vpop.f32.mrb[223].mxu0  ;;  %11900 = vpow2.f32 %v10846_v52  ;;  %v9345_v27 = vmax.f32 %v9277_v31, 0.0 }
 0x9f6   : > { %11902 = vpow2.f32 %v10844_v33 }
 0x9f7   : > { %v9346_v35 = vmax.f32 %v9280_v4, 0.0 }
 0x9f9   : > { %v9394_v53 = vpack.c.bf16 %v9346_v35, %v9345_v27  ;;  %v11889_v36 = vpop.eup %11888 }
 0x9fa   : > { %v11891_v47 = vpop.eup %11890  ;;  %10126 = vst.msk [vmem:[%s15552_s27 + $0x10] sm:$0xff] %vm10123_vm4, %v11889_v36 }
 0x9fb   : > { %11181 = vmatmul.mubr.bf16.gmra.mrb[92].mxu1 %v9394_v53  ;;  %v11893_v40 = vpop.eup %11892  ;;  %10124 = vst.msk [vmem:[%s15552_s27] sm:$0xff] %vm10123_vm4, %v11891_v47 }
 0x9fc   : > { %v11895_v3 = vpop.eup %11894  ;;  %10127 = vst.msk [vmem:[%s15552_s27 + $0x18] sm:$0xff] %vm10123_vm4, %v11893_v40 }
 0x9fd   : > { %v11897_v45 = vpop.eup %11896  ;;  %10125 = vst.msk [vmem:[%s15552_s27 + $0x8] sm:$0xff] %vm10123_vm4, %v11895_v3  ;;  %v11130_v22 = vpop.f32.mrb[40].mxu1 }
 0x9fe   : > { %v11899_v25 = vpop.eup %11898  ;;  %v9937_v20 = vadd.f32 1.0, %v11897_v45  ;;  %v9525_v42 = vadd.f32 %v11130_v22, %v15535_v18  ;;  %v9516_v46 = vpop.f32.mrb[41].mxu1 }
 0x9ff   : > { %v11901_v48 = vpop.eup %11900  ;;  %v9935_v44 = vadd.f32 1.0, %v11899_v25  ;;  %v9517_v26 = vadd.f32 %v15535_v18, %v9516_v46  ;;  %v11131_v24 = vpop.f32.mrb[42].mxu1 }
 0xa00   : > { %v11903_v49 = vpop.eup %11902  ;;  %11904 = vrcp.f32 %v9937_v20  ;;  %v9938_v7 = vadd.f32 1.0, %v11901_v48  ;;  %v10849_v9 = vmul.f32 -1.442695, %v9525_v42  ;;  %v9528_v17 = vadd.f32 %v11131_v24, %v15535_v18  ;;  %v9519_v43 = vpop.f32.mrb[43].mxu1 }
 0xa01   : > { %11906 = vrcp.f32 %v9935_v44  ;;  %v9936_v39 = vadd.f32 1.0, %v11903_v49  ;;  %v10847_v57 = vmul.f32 -1.442695, %v9517_v26  ;;  %v9520_v2 = vadd.f32 %v15535_v18, %v9519_v43 }
 0xa02   : > { %11908 = vrcp.f32 %v9938_v7  ;;  %v10850_v0 = vmul.f32 -1.442695, %v9528_v17 }
 0xa03   : > { %11910 = vrcp.f32 %v9936_v39  ;;  %v10848_v6 = vmul.f32 -1.442695, %v9520_v2 }
 0xa04   : > { %11912 = vpow2.f32 %v10849_v9 }
 0xa05   : > { %11914 = vpow2.f32 %v10847_v57 }
 0xa06   : > { %11916 = vpow2.f32 %v10850_v0 }
 0xa07   : > { %11918 = vpow2.f32 %v10848_v6 }
 0xa0a   : > { %v11905_v11 = vpop.eup %11904 }
 0xa0b   : > { %v11907_v19 = vpop.eup %11906  ;;  %10130 = vst.msk [vmem:[%s15552_s27 + $0x30] sm:$0xff] %vm10123_vm4, %v11905_v11 }
 0xa0c   : > { %v11909_v38 = vpop.eup %11908  ;;  %10128 = vst.msk [vmem:[%s15552_s27 + $0x20] sm:$0xff] %vm10123_vm4, %v11907_v19 }
 0xa0d   : > { %v11911_v1 = vpop.eup %11910  ;;  %10131 = vst.msk [vmem:[%s15552_s27 + $0x38] sm:$0xff] %vm10123_vm4, %v11909_v38  ;;  %v11134_v51 = vpop.f32.mrb[44].mxu1 }
 0xa0e   : > { %v11913_v59 = vpop.eup %11912  ;;  %10129 = vst.msk [vmem:[%s15552_s27 + $0x28] sm:$0xff] %vm10123_vm4, %v11911_v1  ;;  %v9541_v23 = vadd.f32 %v11134_v51, %v15535_v18  ;;  %v9532_v28 = vpop.f32.mrb[45].mxu1 }
 0xa0f   : > { %v11915_v56 = vpop.eup %11914  ;;  %v9941_v54 = vadd.f32 1.0, %v11913_v59  ;;  %v9533_v10 = vadd.f32 %v15535_v18, %v9532_v28  ;;  %v11135_v41 = vpop.f32.mrb[46].mxu1 }
 0xa10   : > { %v11917_v34 = vpop.eup %11916  ;;  %v9939_v16 = vadd.f32 1.0, %v11915_v56  ;;  %v9544_v13 = vadd.f32 %v11135_v41, %v15535_v18  ;;  %v9535_v60 = vpop.f32.mrb[47].mxu1  ;;  %v10853_v21 = vmul.f32 -1.442695, %v9541_v23 }
 0xa11   : > { %v11919_v5 = vpop.eup %11918  ;;  %11920 = vrcp.f32 %v9941_v54  ;;  %v9942_v32 = vadd.f32 1.0, %v11917_v34  ;;  %v9536_v12 = vadd.f32 %v15535_v18, %v9535_v60  ;;  %v10851_v8 = vmul.f32 -1.442695, %v9533_v10 }
 0xa12   : > { %11922 = vrcp.f32 %v9939_v16  ;;  %v9940_v30 = vadd.f32 1.0, %v11919_v5  ;;  %v10854_v61 = vmul.f32 -1.442695, %v9544_v13 }
 0xa13   : > { %11924 = vrcp.f32 %v9942_v32  ;;  %v10852_v58 = vmul.f32 -1.442695, %v9536_v12 }
 0xa14   : > { %11926 = vrcp.f32 %v9940_v30 }
 0xa15   : > { %11928 = vpow2.f32 %v10853_v21 }
 0xa16   : > { %11930 = vpow2.f32 %v10851_v8 }
 0xa17   : > { %11932 = vpow2.f32 %v10854_v61 }
 0xa18   : > { %11934 = vpow2.f32 %v10852_v58 }
 0xa1b   : > { %v11921_v63 = vpop.eup %11920 }
 0xa1c   : > { %v11923_v15 = vpop.eup %11922  ;;  %10134 = vst.msk [vmem:[%s15552_s27 + $0x50] sm:$0xff] %vm10123_vm4, %v11921_v63 }
 0xa1d   : > { %v11925_v29 = vpop.eup %11924  ;;  %10132 = vst.msk [vmem:[%s15552_s27 + $0x40] sm:$0xff] %vm10123_vm4, %v11923_v15  ;;  %v11138_v55 = vpop.f32.mrb[48].mxu1 }
 0xa1e   : > { %v11927_v37 = vpop.eup %11926  ;;  %10135 = vst.msk [vmem:[%s15552_s27 + $0x58] sm:$0xff] %vm10123_vm4, %v11925_v29  ;;  %v9557_v31 = vadd.f32 %v11138_v55, %v15535_v18  ;;  %v9548_v62 = vpop.f32.mrb[49].mxu1 }
 0xa1f   : > { %v11929_v52 = vpop.eup %11928  ;;  %10133 = vst.msk [vmem:[%s15552_s27 + $0x48] sm:$0xff] %vm10123_vm4, %v11927_v37  ;;  %v9549_v33 = vadd.f32 %v15535_v18, %v9548_v62  ;;  %v11139_v50 = vpop.f32.mrb[50].mxu1 }
 0xa20   : > { %v11931_v4 = vpop.eup %11930  ;;  %v9945_v14 = vadd.f32 1.0, %v11929_v52  ;;  %v9560_v27 = vadd.f32 %v11139_v50, %v15535_v18  ;;  %v9551_v35 = vpop.f32.mrb[51].mxu1  ;;  %v10857_v45 = vmul.f32 -1.442695, %v9557_v31 }
 0xa21   : > { %v11933_v53 = vpop.eup %11932  ;;  %v9943_v36 = vadd.f32 1.0, %v11931_v4  ;;  %v9552_v47 = vadd.f32 %v15535_v18, %v9551_v35  ;;  %v10855_v25 = vmul.f32 -1.442695, %v9549_v33 }
 0xa22   : > { %v11935_v40 = vpop.eup %11934  ;;  %11936 = vrcp.f32 %v9945_v14  ;;  %v9946_v3 = vadd.f32 1.0, %v11933_v53  ;;  %v10858_v20 = vmul.f32 -1.442695, %v9560_v27 }
 0xa23   : > { %11938 = vrcp.f32 %v9943_v36  ;;  %v9944_v22 = vadd.f32 1.0, %v11935_v40  ;;  %v10856_v42 = vmul.f32 -1.442695, %v9552_v47 }
 0xa24   : > { %11940 = vrcp.f32 %v9946_v3 }
 0xa25   : > { %11942 = vrcp.f32 %v9944_v22 }
 0xa26   : > { %11944 = vpow2.f32 %v10857_v45 }
 0xa27   : > { %11946 = vpow2.f32 %v10855_v25 }
 0xa28   : > { %11948 = vpow2.f32 %v10858_v20 }
 0xa29   : > { %11950 = vpow2.f32 %v10856_v42 }
 0xa2c   : > { %v11937_v46 = vpop.eup %11936 }
 0xa2d   : > { %v11939_v48 = vpop.eup %11938  ;;  %10138 = vst.msk [vmem:[%s15552_s27 + $0x70] sm:$0xff] %vm10123_vm4, %v11937_v46  ;;  %v11142_v44 = vpop.f32.mrb[52].mxu1 }
 0xa2e   : > { %v11941_v26 = vpop.eup %11940  ;;  %10136 = vst.msk [vmem:[%s15552_s27 + $0x60] sm:$0xff] %vm10123_vm4, %v11939_v48  ;;  %v9573_v24 = vadd.f32 %v11142_v44, %v15535_v18  ;;  %v9564_v49 = vpop.f32.mrb[53].mxu1 }
 0xa2f   : > { %v11943_v7 = vpop.eup %11942  ;;  %10139 = vst.msk [vmem:[%s15552_s27 + $0x78] sm:$0xff] %vm10123_vm4, %v11941_v26  ;;  %v9565_v9 = vadd.f32 %v15535_v18, %v9564_v49  ;;  %v11143_v17 = vpop.f32.mrb[54].mxu1 }
 0xa30   : > { %v11945_v43 = vpop.eup %11944  ;;  %10137 = vst.msk [vmem:[%s15552_s27 + $0x68] sm:$0xff] %vm10123_vm4, %v11943_v7  ;;  %v10861_v39 = vmul.f32 -1.442695, %v9573_v24  ;;  %v9576_v57 = vadd.f32 %v11143_v17, %v15535_v18  ;;  %v9567_v2 = vpop.f32.mrb[55].mxu1 }
 0xa31   : > { %v11947_v0 = vpop.eup %11946  ;;  %v9949_v6 = vadd.f32 1.0, %v11945_v43  ;;  %v9568_v11 = vadd.f32 %v15535_v18, %v9567_v2  ;;  %v10859_v59 = vmul.f32 -1.442695, %v9565_v9 }
 0xa32   : > { %v11949_v19 = vpop.eup %11948  ;;  %v9947_v38 = vadd.f32 1.0, %v11947_v0  ;;  %11952 = vpow2.f32 %v10861_v39  ;;  %v10862_v28 = vmul.f32 -1.442695, %v9576_v57 }
 0xa33   : > { %v11951_v1 = vpop.eup %11950  ;;  %11954 = vrcp.f32 %v9949_v6  ;;  %v9950_v51 = vadd.f32 1.0, %v11949_v19  ;;  %v10860_v56 = vmul.f32 -1.442695, %v9568_v11 }
 0xa34   : > { %11956 = vrcp.f32 %v9947_v38  ;;  %v9948_v23 = vadd.f32 1.0, %v11951_v1 }
 0xa35   : > { %11958 = vrcp.f32 %v9950_v51 }
 0xa36   : > { %11960 = vrcp.f32 %v9948_v23 }
 0xa37   : > { %11962 = vpow2.f32 %v10859_v59 }
 0xa38   : > { %11964 = vpow2.f32 %v10862_v28 }
 0xa39   : > { %11966 = vpow2.f32 %v10860_v56 }
 0xa3c   : > { %v11953_v54 = vpop.eup %11952 }
 0xa3d   : > { %v11955_v10 = vpop.eup %11954  ;;  %v9953_v41 = vadd.f32 1.0, %v11953_v54  ;;  %v11146_v34 = vpop.f32.mrb[56].mxu1 }
 0xa3e   : > { %v11957_v16 = vpop.eup %11956  ;;  %10142 = vst.msk [vmem:[%s15552_s27 + $0x90] sm:$0xff] %vm10123_vm4, %v11955_v10  ;;  %v9589_v13 = vadd.f32 %v11146_v34, %v15535_v18  ;;  %v9580_v60 = vpop.f32.mrb[57].mxu1 }
 0xa3f   : > { %v11959_v5 = vpop.eup %11958  ;;  %10140 = vst.msk [vmem:[%s15552_s27 + $0x80] sm:$0xff] %vm10123_vm4, %v11957_v16  ;;  %11968 = vrcp.f32 %v9953_v41  ;;  %v9581_v32 = vadd.f32 %v15535_v18, %v9580_v60  ;;  %v11147_v21 = vpop.f32.mrb[58].mxu1 }
 0xa40   : > { %v11961_v12 = vpop.eup %11960  ;;  %10143 = vst.msk [vmem:[%s15552_s27 + $0x98] sm:$0xff] %vm10123_vm4, %v11959_v5  ;;  %v10865_v30 = vmul.f32 -1.442695, %v9589_v13  ;;  %v9592_v8 = vadd.f32 %v11147_v21, %v15535_v18  ;;  %v9583_v61 = vpop.f32.mrb[59].mxu1 }
 0xa41   : > { %v11963_v58 = vpop.eup %11962  ;;  %10141 = vst.msk [vmem:[%s15552_s27 + $0x88] sm:$0xff] %vm10123_vm4, %v11961_v12  ;;  %v10863_v63 = vmul.f32 -1.442695, %v9581_v32  ;;  %v9584_v15 = vadd.f32 %v15535_v18, %v9583_v61 }
 0xa42   : > { %v11965_v29 = vpop.eup %11964  ;;  %v9951_v55 = vadd.f32 1.0, %v11963_v58  ;;  %11970 = vpow2.f32 %v10865_v30  ;;  %v10866_v62 = vmul.f32 -1.442695, %v9592_v8 }
 0xa43   : > { %v11967_v37 = vpop.eup %11966  ;;  %v9954_v31 = vadd.f32 1.0, %v11965_v29  ;;  %11972 = vpow2.f32 %v10863_v63  ;;  %v10864_v33 = vmul.f32 -1.442695, %v9584_v15 }
 0xa44   : > { %11974 = vrcp.f32 %v9951_v55  ;;  %v9952_v52 = vadd.f32 1.0, %v11967_v37 }
 0xa45   : > { %11976 = vrcp.f32 %v9954_v31 }
 0xa46   : > { %11978 = vrcp.f32 %v9952_v52 }
 0xa47   : > { %11980 = vpow2.f32 %v10866_v62 }
 0xa48   : > { %11982 = vpow2.f32 %v10864_v33 }
 0xa49   : > { %v11969_v50 = vpop.eup %11968 }
 0xa4a   : > { %10146 = vst.msk [vmem:[%s15552_s27 + $0xb0] sm:$0xff] %vm10123_vm4, %v11969_v50 }
 0xa4c   : > { %v11971_v4 = vpop.eup %11970 }
 0xa4d   : > { %v11973_v14 = vpop.eup %11972  ;;  %v9957_v27 = vadd.f32 1.0, %v11971_v4  ;;  %v11150_v35 = vpop.f32.mrb[60].mxu1 }
 0xa4e   : > { %v11975_v53 = vpop.eup %11974  ;;  %v9955_v36 = vadd.f32 1.0, %v11973_v14  ;;  %v9605_v47 = vadd.f32 %v11150_v35, %v15535_v18  ;;  %v9596_v40 = vpop.f32.mrb[61].mxu1 }
 0xa4f   : > { %v11977_v3 = vpop.eup %11976  ;;  %10144 = vst.msk [vmem:[%s15552_s27 + $0xa0] sm:$0xff] %vm10123_vm4, %v11975_v53  ;;  %11984 = vrcp.f32 %v9957_v27  ;;  %v9597_v45 = vadd.f32 %v15535_v18, %v9596_v40  ;;  %v11151_v22 = vpop.f32.mrb[62].mxu1 }
 0xa50   : > { %v11979_v25 = vpop.eup %11978  ;;  %10147 = vst.msk [vmem:[%s15552_s27 + $0xb8] sm:$0xff] %vm10123_vm4, %v11977_v3  ;;  %11986 = vrcp.f32 %v9955_v36  ;;  %v10869_v20 = vmul.f32 -1.442695, %v9605_v47  ;;  %v9608_v42 = vadd.f32 %v11151_v22, %v15535_v18  ;;  %v9599_v46 = vpop.f32.mrb[63].mxu1 }
 0xa51   : > { %v11981_v48 = vpop.eup %11980  ;;  %10145 = vst.msk [vmem:[%s15552_s27 + $0xa8] sm:$0xff] %vm10123_vm4, %v11979_v25  ;;  %v10867_v44 = vmul.f32 -1.442695, %v9597_v45  ;;  %v9600_v26 = vadd.f32 %v15535_v18, %v9599_v46 }
 0xa52   : > { %v11983_v24 = vpop.eup %11982  ;;  %v9958_v49 = vadd.f32 1.0, %v11981_v48  ;;  %11988 = vpow2.f32 %v10869_v20  ;;  %v10870_v7 = vmul.f32 -1.442695, %v9608_v42 }
 0xa53   : > { %v9956_v9 = vadd.f32 1.0, %v11983_v24  ;;  %11990 = vpow2.f32 %v10867_v44  ;;  %v10868_v17 = vmul.f32 -1.442695, %v9600_v26 }
 0xa54   : > { %11992 = vrcp.f32 %v9958_v49 }
 0xa55   : > { %11994 = vrcp.f32 %v9956_v9 }
 0xa56   : > { %11996 = vpow2.f32 %v10870_v7 }
 0xa57   : > { %11998 = vpow2.f32 %v10868_v17 }
 0xa59   : > { %v11985_v43 = vpop.eup %11984 }
 0xa5a   : > { %v11987_v39 = vpop.eup %11986  ;;  %10150 = vst.msk [vmem:[%s15552_s27 + $0xd0] sm:$0xff] %vm10123_vm4, %v11985_v43 }
 0xa5b   : > { %10148 = vst.msk [vmem:[%s15552_s27 + $0xc0] sm:$0xff] %vm10123_vm4, %v11987_v39 }
 0xa5c   : > { %v11989_v57 = vpop.eup %11988 }
 0xa5d   : > { %v11991_v2 = vpop.eup %11990  ;;  %v9961_v0 = vadd.f32 1.0, %v11989_v57  ;;  %v11154_v6 = vpop.f32.mrb[64].mxu1 }
 0xa5e   : > { %v11993_v11 = vpop.eup %11992  ;;  %v9959_v19 = vadd.f32 1.0, %v11991_v2  ;;  %v9621_v38 = vadd.f32 %v11154_v6, %v15535_v18  ;;  %v9612_v1 = vpop.f32.mrb[65].mxu1 }
 0xa5f   : > { %v11995_v51 = vpop.eup %11994  ;;  %10151 = vst.msk [vmem:[%s15552_s27 + $0xd8] sm:$0xff] %vm10123_vm4, %v11993_v11  ;;  %12000 = vrcp.f32 %v9961_v0  ;;  %v9613_v59 = vadd.f32 %v15535_v18, %v9612_v1  ;;  %v11155_v23 = vpop.f32.mrb[66].mxu1 }
 0xa60   : > { %v11997_v28 = vpop.eup %11996  ;;  %10149 = vst.msk [vmem:[%s15552_s27 + $0xc8] sm:$0xff] %vm10123_vm4, %v11995_v51  ;;  %12002 = vrcp.f32 %v9959_v19  ;;  %v10873_v56 = vmul.f32 -1.442695, %v9621_v38  ;;  %v9624_v54 = vadd.f32 %v11155_v23, %v15535_v18  ;;  %v9615_v10 = vpop.f32.mrb[67].mxu1 }
 0xa61   : > { %v11999_v41 = vpop.eup %11998  ;;  %v9962_v34 = vadd.f32 1.0, %v11997_v28  ;;  %v10871_v16 = vmul.f32 -1.442695, %v9613_v59  ;;  %v9616_v13 = vadd.f32 %v15535_v18, %v9615_v10 }
 0xa62   : > { %v9960_v60 = vadd.f32 1.0, %v11999_v41  ;;  %12004 = vpow2.f32 %v10873_v56  ;;  %v10874_v5 = vmul.f32 -1.442695, %v9624_v54 }
 0xa63   : > { %12006 = vrcp.f32 %v9962_v34  ;;  %v10872_v32 = vmul.f32 -1.442695, %v9616_v13 }
 0xa64   : > { %12008 = vrcp.f32 %v9960_v60 }
 0xa65   : > { %12010 = vpow2.f32 %v10871_v16 }
 0xa66   : > { %12012 = vpow2.f32 %v10874_v5 }
 0xa67   : > { %12014 = vpow2.f32 %v10872_v32 }
 0xa69   : > { %v12001_v21 = vpop.eup %12000 }
 0xa6a   : > { %v12003_v12 = vpop.eup %12002  ;;  %10154 = vst.msk [vmem:[%s15552_s27 + $0xf0] sm:$0xff] %vm10123_vm4, %v12001_v21 }
 0xa6b   : > { %10152 = vst.msk [vmem:[%s15552_s27 + $0xe0] sm:$0xff] %vm10123_vm4, %v12003_v12 }
 0xa6c   : > { %v12005_v30 = vpop.eup %12004 }
 0xa6d   : > { %v12007_v8 = vpop.eup %12006  ;;  %v9965_v61 = vadd.f32 1.0, %v12005_v30  ;;  %v11158_v58 = vpop.f32.mrb[68].mxu1 }
 0xa6e   : > { %v12009_v63 = vpop.eup %12008  ;;  %10155 = vst.msk [vmem:[%s15552_s27 + $0xf8] sm:$0xff] %vm10123_vm4, %v12007_v8  ;;  %v9637_v15 = vadd.f32 %v11158_v58, %v15535_v18  ;;  %v9628_v29 = vpop.f32.mrb[69].mxu1 }
 0xa6f   : > { %v12011_v55 = vpop.eup %12010  ;;  %10153 = vst.msk [vmem:[%s15552_s27 + $0xe8] sm:$0xff] %vm10123_vm4, %v12009_v63  ;;  %12016 = vrcp.f32 %v9965_v61  ;;  %v9629_v37 = vadd.f32 %v15535_v18, %v9628_v29  ;;  %v11159_v31 = vpop.f32.mrb[70].mxu1 }
 0xa70   : > { %v12013_v62 = vpop.eup %12012  ;;  %v9963_v52 = vadd.f32 1.0, %v12011_v55  ;;  %v9640_v33 = vadd.f32 %v11159_v31, %v15535_v18  ;;  %v9631_v50 = vpop.f32.mrb[71].mxu1  ;;  %v10877_v27 = vmul.f32 -1.442695, %v9637_v15 }
 0xa71   : > { %v12015_v4 = vpop.eup %12014  ;;  %v9966_v14 = vadd.f32 1.0, %v12013_v62  ;;  %v9632_v35 = vadd.f32 %v15535_v18, %v9631_v50  ;;  %v10875_v36 = vmul.f32 -1.442695, %v9629_v37 }
 0xa72   : > { %12018 = vrcp.f32 %v9963_v52  ;;  %v9964_v53 = vadd.f32 1.0, %v12015_v4  ;;  %v10878_v47 = vmul.f32 -1.442695, %v9640_v33 }
 0xa73   : > { %12020 = vrcp.f32 %v9966_v14  ;;  %v10876_v40 = vmul.f32 -1.442695, %v9632_v35 }
 0xa74   : > { %12022 = vrcp.f32 %v9964_v53 }
 0xa75   : > { %12024 = vpow2.f32 %v10877_v27 }
 0xa76   : > { %12026 = vpow2.f32 %v10875_v36 }
 0xa77   : > { %12028 = vpow2.f32 %v10878_v47 }
 0xa78   : > { %12030 = vpow2.f32 %v10876_v40 }
 0xa79   : > { %v12017_v3 = vpop.eup %12016 }
 0xa7a   : > { %10158 = vst.msk [vmem:[%s15552_s27 + $0x110] sm:$0xff] %vm10123_vm4, %v12017_v3 }
 0xa7c   : > { %v12019_v45 = vpop.eup %12018 }
 0xa7d   : > { %v12021_v22 = vpop.eup %12020  ;;  %10156 = vst.msk [vmem:[%s15552_s27 + $0x100] sm:$0xff] %vm10123_vm4, %v12019_v45  ;;  %v11162_v25 = vpop.f32.mrb[72].mxu1 }
 0xa7e   : > { %v12023_v20 = vpop.eup %12022  ;;  %10159 = vst.msk [vmem:[%s15552_s27 + $0x118] sm:$0xff] %vm10123_vm4, %v12021_v22  ;;  %v9653_v42 = vadd.f32 %v11162_v25, %v15535_v18  ;;  %v9644_v46 = vpop.f32.mrb[73].mxu1 }
 0xa7f   : > { %v12025_v48 = vpop.eup %12024  ;;  %10157 = vst.msk [vmem:[%s15552_s27 + $0x108] sm:$0xff] %vm10123_vm4, %v12023_v20  ;;  %v9645_v44 = vadd.f32 %v15535_v18, %v9644_v46  ;;  %v11163_v26 = vpop.f32.mrb[74].mxu1 }
 0xa80   : > { %v12027_v24 = vpop.eup %12026  ;;  %v9969_v49 = vadd.f32 1.0, %v12025_v48  ;;  %v9656_v7 = vadd.f32 %v11163_v26, %v15535_v18  ;;  %v9647_v9 = vpop.f32.mrb[75].mxu1  ;;  %v10881_v0 = vmul.f32 -1.442695, %v9653_v42 }
 0xa81   : > { %v12029_v17 = vpop.eup %12028  ;;  %v9967_v43 = vadd.f32 1.0, %v12027_v24  ;;  %v9648_v39 = vadd.f32 %v15535_v18, %v9647_v9  ;;  %v10879_v11 = vmul.f32 -1.442695, %v9645_v44 }
 0xa82   : > { %v12031_v57 = vpop.eup %12030  ;;  %12032 = vrcp.f32 %v9969_v49  ;;  %v9970_v2 = vadd.f32 1.0, %v12029_v17  ;;  %v10882_v19 = vmul.f32 -1.442695, %v9656_v7 }
 0xa83   : > { %12034 = vrcp.f32 %v9967_v43  ;;  %v9968_v6 = vadd.f32 1.0, %v12031_v57  ;;  %v10880_v38 = vmul.f32 -1.442695, %v9648_v39 }
 0xa84   : > { %12036 = vrcp.f32 %v9970_v2 }
 0xa85   : > { %12038 = vrcp.f32 %v9968_v6 }
 0xa86   : > { %12040 = vpow2.f32 %v10881_v0 }
 0xa87   : > { %12042 = vpow2.f32 %v10879_v11 }
 0xa88   : > { %12044 = vpow2.f32 %v10882_v19 }
 0xa89   : > { %12046 = vpow2.f32 %v10880_v38 }
 0xa8c   : > { %v12033_v1 = vpop.eup %12032 }
 0xa8d   : > { %v12035_v51 = vpop.eup %12034  ;;  %10162 = vst.msk [vmem:[%s15552_s27 + $0x130] sm:$0xff] %vm10123_vm4, %v12033_v1  ;;  %v11166_v59 = vpop.f32.mrb[76].mxu1 }
 0xa8e   : > { %v12037_v23 = vpop.eup %12036  ;;  %10160 = vst.msk [vmem:[%s15552_s27 + $0x120] sm:$0xff] %vm10123_vm4, %v12035_v51  ;;  %v9669_v28 = vadd.f32 %v11166_v59, %v15535_v18  ;;  %v9660_v56 = vpop.f32.mrb[77].mxu1 }
 0xa8f   : > { %v12039_v54 = vpop.eup %12038  ;;  %10163 = vst.msk [vmem:[%s15552_s27 + $0x138] sm:$0xff] %vm10123_vm4, %v12037_v23  ;;  %v9661_v10 = vadd.f32 %v15535_v18, %v9660_v56  ;;  %v11167_v41 = vpop.f32.mrb[78].mxu1  ;;  %v15700_v23 = vld [vmem:[%s15760_s14] ss:$0 sm:$0xff] }
 0xa90   : > { %v12041_v34 = vpop.eup %12040  ;;  %10161 = vst.msk [vmem:[%s15552_s27 + $0x128] sm:$0xff] %vm10123_vm4, %v12039_v54  ;;  %v10885_v16 = vmul.f32 -1.442695, %v9669_v28  ;;  %v9672_v13 = vadd.f32 %v11167_v41, %v15535_v18  ;;  %v9663_v60 = vpop.f32.mrb[79].mxu1 }
 0xa91   : > { %v12043_v5 = vpop.eup %12042  ;;  %v9973_v32 = vadd.f32 1.0, %v12041_v34  ;;  %v9664_v21 = vadd.f32 %v15535_v18, %v9663_v60  ;;  %v10883_v58 = vmul.f32 -1.442695, %v9661_v10 }
 0xa92   : > { %v12045_v12 = vpop.eup %12044  ;;  %v9971_v30 = vadd.f32 1.0, %v12043_v5  ;;  %12048 = vpow2.f32 %v10885_v16  ;;  %v10886_v15 = vmul.f32 -1.442695, %v9672_v13 }
 0xa93   : > { %v12047_v8 = vpop.eup %12046  ;;  %12050 = vrcp.f32 %v9973_v32  ;;  %v9974_v61 = vadd.f32 1.0, %v12045_v12  ;;  %v10884_v29 = vmul.f32 -1.442695, %v9664_v21 }
 0xa94   : > { %12052 = vrcp.f32 %v9971_v30  ;;  %v9972_v63 = vadd.f32 1.0, %v12047_v8 }
 0xa95   : > { %12054 = vrcp.f32 %v9974_v61 }
 0xa96   : > { %12056 = vrcp.f32 %v9972_v63 }
 0xa97   : > { %12058 = vpow2.f32 %v10883_v58 }
 0xa98   : > { %12060 = vpow2.f32 %v10886_v15 }
 0xa99   : > { %12062 = vpow2.f32 %v10884_v29 }
 0xa9c   : > { %v12049_v55 = vpop.eup %12048 }
 0xa9d   : > { %v12051_v37 = vpop.eup %12050  ;;  %v9977_v31 = vadd.f32 1.0, %v12049_v55  ;;  %v11170_v62 = vpop.f32.mrb[80].mxu1 }
 0xa9e   : > { %v12053_v52 = vpop.eup %12052  ;;  %10166 = vst.msk [vmem:[%s15552_s27 + $0x150] sm:$0xff] %vm10123_vm4, %v12051_v37  ;;  %v9685_v33 = vadd.f32 %v11170_v62, %v15535_v18  ;;  %v9676_v50 = vpop.f32.mrb[81].mxu1 }
 0xa9f   : > { %v12055_v4 = vpop.eup %12054  ;;  %10164 = vst.msk [vmem:[%s15552_s27 + $0x140] sm:$0xff] %vm10123_vm4, %v12053_v52  ;;  %12064 = vrcp.f32 %v9977_v31  ;;  %v9677_v14 = vadd.f32 %v15535_v18, %v9676_v50  ;;  %v11171_v27 = vpop.f32.mrb[82].mxu1 }
 0xaa0   : > { %v12057_v35 = vpop.eup %12056  ;;  %10167 = vst.msk [vmem:[%s15552_s27 + $0x158] sm:$0xff] %vm10123_vm4, %v12055_v4  ;;  %v10889_v53 = vmul.f32 -1.442695, %v9685_v33  ;;  %v9688_v36 = vadd.f32 %v11171_v27, %v15535_v18  ;;  %v9679_v47 = vpop.f32.mrb[83].mxu1 }
 0xaa1   : > { %v12059_v40 = vpop.eup %12058  ;;  %10165 = vst.msk [vmem:[%s15552_s27 + $0x148] sm:$0xff] %vm10123_vm4, %v12057_v35  ;;  %v10887_v3 = vmul.f32 -1.442695, %v9677_v14  ;;  %v9680_v45 = vadd.f32 %v15535_v18, %v9679_v47 }
 0xaa2   : > { %v12061_v22 = vpop.eup %12060  ;;  %v9975_v25 = vadd.f32 1.0, %v12059_v40  ;;  %12066 = vpow2.f32 %v10889_v53  ;;  %v10890_v46 = vmul.f32 -1.442695, %v9688_v36 }
 0xaa3   : > { %v12063_v20 = vpop.eup %12062  ;;  %v9978_v42 = vadd.f32 1.0, %v12061_v22  ;;  %12068 = vpow2.f32 %v10887_v3  ;;  %v10888_v44 = vmul.f32 -1.442695, %v9680_v45 }
 0xaa4   : > { %12070 = vrcp.f32 %v9975_v25  ;;  %v9976_v48 = vadd.f32 1.0, %v12063_v20 }
 0xaa5   : > { %12072 = vrcp.f32 %v9978_v42 }
 0xaa6   : > { %12074 = vrcp.f32 %v9976_v48 }
 0xaa7   : > { %12076 = vpow2.f32 %v10890_v46 }
 0xaa8   : > { %12078 = vpow2.f32 %v10888_v44 }
 0xaa9   : > { %v12065_v26 = vpop.eup %12064 }
 0xaaa   : > { %10170 = vst.msk [vmem:[%s15552_s27 + $0x170] sm:$0xff] %vm10123_vm4, %v12065_v26 }
 0xaac   : > { %v12067_v24 = vpop.eup %12066 }
 0xaad   : > { %v12069_v49 = vpop.eup %12068  ;;  %v9981_v7 = vadd.f32 1.0, %v12067_v24  ;;  %v11174_v9 = vpop.f32.mrb[84].mxu1 }
 0xaae   : > { %v12071_v17 = vpop.eup %12070  ;;  %v9979_v43 = vadd.f32 1.0, %v12069_v49  ;;  %v9701_v39 = vadd.f32 %v11174_v9, %v15535_v18  ;;  %v9692_v57 = vpop.f32.mrb[85].mxu1 }
 0xaaf   : > { %v12073_v2 = vpop.eup %12072  ;;  %10168 = vst.msk [vmem:[%s15552_s27 + $0x160] sm:$0xff] %vm10123_vm4, %v12071_v17  ;;  %12080 = vrcp.f32 %v9981_v7  ;;  %v9693_v0 = vadd.f32 %v15535_v18, %v9692_v57  ;;  %v11175_v6 = vpop.f32.mrb[86].mxu1 }
 0xab0   : > { %v12075_v11 = vpop.eup %12074  ;;  %10171 = vst.msk [vmem:[%s15552_s27 + $0x178] sm:$0xff] %vm10123_vm4, %v12073_v2  ;;  %12082 = vrcp.f32 %v9979_v43  ;;  %v10893_v19 = vmul.f32 -1.442695, %v9701_v39  ;;  %v9704_v38 = vadd.f32 %v11175_v6, %v15535_v18  ;;  %v9695_v1 = vpop.f32.mrb[87].mxu1 }
 0xab1   : > { %v12077_v51 = vpop.eup %12076  ;;  %10169 = vst.msk [vmem:[%s15552_s27 + $0x168] sm:$0xff] %vm10123_vm4, %v12075_v11  ;;  %v10891_v59 = vmul.f32 -1.442695, %v9693_v0  ;;  %v9696_v28 = vadd.f32 %v15700_v23, %v9695_v1 }
 0xab2   : > { %v12079_v56 = vpop.eup %12078  ;;  %v9982_v54 = vadd.f32 1.0, %v12077_v51  ;;  %12084 = vpow2.f32 %v10893_v19  ;;  %v10894_v10 = vmul.f32 -1.442695, %v9704_v38 }
 0xab3   : > { %v9980_v41 = vadd.f32 1.0, %v12079_v56  ;;  %12086 = vpow2.f32 %v10891_v59  ;;  %v10892_v18 = vmul.f32 -1.442695, %v9696_v28 }
 0xab4   : > { %12088 = vrcp.f32 %v9982_v54 }
 0xab5   : > { %12090 = vrcp.f32 %v9980_v41 }
 0xab6   : > { %12092 = vpow2.f32 %v10894_v10 }
 0xab7   : > { %12094 = vpow2.f32 %v10892_v18 }
 0xab9   : > { %v12081_v34 = vpop.eup %12080 }
 0xaba   : > { %v12083_v16 = vpop.eup %12082  ;;  %10174 = vst.msk [vmem:[%s15552_s27 + $0x190] sm:$0xff] %vm10123_vm4, %v12081_v34 }
 0xabb   : > { %10172 = vst.msk [vmem:[%s15552_s27 + $0x180] sm:$0xff] %vm10123_vm4, %v12083_v16 }
 0xabc   : > { %v12085_v13 = vpop.eup %12084 }
 0xabd   : > { %v12087_v60 = vpop.eup %12086  ;;  %v9985_v5 = vadd.f32 1.0, %v12085_v13  ;;  %v11178_v32 = vpop.f32.mrb[88].mxu1 }
 0xabe   : > { %v12089_v21 = vpop.eup %12088  ;;  %v9983_v12 = vadd.f32 1.0, %v12087_v60  ;;  %v9717_v30 = vadd.f32 %v15700_v23, %v11178_v32  ;;  %v9708_v8 = vpop.f32.mrb[89].mxu1 }
 0xabf   : > { %v12091_v61 = vpop.eup %12090  ;;  %10175 = vst.msk [vmem:[%s15552_s27 + $0x198] sm:$0xff] %vm10123_vm4, %v12089_v21  ;;  %12096 = vrcp.f32 %v9985_v5  ;;  %v9709_v58 = vadd.f32 %v15700_v23, %v9708_v8  ;;  %v11179_v63 = vpop.f32.mrb[90].mxu1 }
 0xac0   : > { %v12093_v15 = vpop.eup %12092  ;;  %10173 = vst.msk [vmem:[%s15552_s27 + $0x188] sm:$0xff] %vm10123_vm4, %v12091_v61  ;;  %12098 = vrcp.f32 %v9983_v12  ;;  %v10897_v29 = vmul.f32 -1.442695, %v9717_v30  ;;  %v9720_v55 = vadd.f32 %v15700_v23, %v11179_v63  ;;  %v9711_v37 = vpop.f32.mrb[91].mxu1 }
 0xac1   : > { %v12095_v31 = vpop.eup %12094  ;;  %v9986_v62 = vadd.f32 1.0, %v12093_v15  ;;  %v10895_v52 = vmul.f32 -1.442695, %v9709_v58  ;;  %v9712_v33 = vadd.f32 %v15700_v23, %v9711_v37 }
 0xac2   : > { %v9984_v50 = vadd.f32 1.0, %v12095_v31  ;;  %12100 = vpow2.f32 %v10897_v29  ;;  %v10898_v4 = vmul.f32 -1.442695, %v9720_v55 }
 0xac3   : > { %12102 = vrcp.f32 %v9986_v62  ;;  %v10896_v14 = vmul.f32 -1.442695, %v9712_v33 }
 0xac4   : > { %12104 = vrcp.f32 %v9984_v50 }
 0xac5   : > { %12106 = vpow2.f32 %v10895_v52 }
 0xac6   : > { %12108 = vpow2.f32 %v10898_v4 }
 0xac7   : > { %12110 = vpow2.f32 %v10896_v14 }
 0xac9   : > { %v12097_v27 = vpop.eup %12096 }
 0xaca   : > { %v12099_v35 = vpop.eup %12098  ;;  %10178 = vst.msk [vmem:[%s15552_s27 + $0x1b0] sm:$0xff] %vm10123_vm4, %v12097_v27 }
 0xacb   : > { %10176 = vst.msk [vmem:[%s15552_s27 + $0x1a0] sm:$0xff] %vm10123_vm4, %v12099_v35 }
 0xacc   : > { %v12101_v53 = vpop.eup %12100 }
 0xacd   : > { %v12103_v36 = vpop.eup %12102  ;;  %v9989_v47 = vadd.f32 1.0, %v12101_v53 }
 0xace   : > { %v11182_v40 = vpop.f32.mrb[92].mxu1  ;;  %v12105_v3 = vpop.eup %12104  ;;  %10179 = vst.msk [vmem:[%s15552_s27 + $0x1b8] sm:$0xff] %vm10123_vm4, %v12103_v36 }
 0xacf   : > { %v9733_v45 = vadd.f32 %v15700_v23, %v11182_v40  ;;  %v9724_v22 = vpop.f32.mrb[93].mxu1  ;;  %v12107_v25 = vpop.eup %12106  ;;  %10177 = vst.msk [vmem:[%s15552_s27 + $0x1a8] sm:$0xff] %vm10123_vm4, %v12105_v3  ;;  %12112 = vrcp.f32 %v9989_v47 }
 0xad0   : > { %v9725_v20 = vadd.f32 %v15700_v23, %v9724_v22  ;;  %v11183_v42 = vpop.f32.mrb[94].mxu1  ;;  %v12109_v46 = vpop.eup %12108  ;;  %v9987_v48 = vadd.f32 1.0, %v12107_v25 }
 0xad1   : > { %v9736_v44 = vadd.f32 %v15700_v23, %v11183_v42  ;;  %v9727_v26 = vpop.f32.mrb[95].mxu1  ;;  %v12111_v24 = vpop.eup %12110  ;;  %v9990_v49 = vadd.f32 1.0, %v12109_v46  ;;  %v10901_v7 = vmul.f32 -1.442695, %v9733_v45 }
 0xad2   : > { %v9728_v9 = vadd.f32 %v15700_v23, %v9727_v26  ;;  %12114 = vrcp.f32 %v9987_v48  ;;  %v9988_v17 = vadd.f32 1.0, %v12111_v24  ;;  %v10899_v43 = vmul.f32 -1.442695, %v9725_v20 }
 0xad3   : > { %12116 = vrcp.f32 %v9990_v49  ;;  %v10902_v39 = vmul.f32 -1.442695, %v9736_v44 }
 0xad4   : > { %12118 = vrcp.f32 %v9988_v17  ;;  %v10900_v57 = vmul.f32 -1.442695, %v9728_v9 }
 0xad5   : > { %12120 = vpow2.f32 %v10901_v7 }
 0xad6   : > { %12122 = vpow2.f32 %v10899_v43 }
 0xad7   : > { %12124 = vpow2.f32 %v10902_v39 }
 0xad8   : > { %12126 = vpow2.f32 %v10900_v57 }
 0xad9   : > { %v12113_v2 = vpop.eup %12112 }
 0xada   : > { %10182 = vst.msk [vmem:[%s15552_s27 + $0x1d0] sm:$0xff] %vm10123_vm4, %v12113_v2 }
 0xadc   : > { %v12115_v0 = vpop.eup %12114 }
 0xadd   : > { %v12117_v6 = vpop.eup %12116  ;;  %10180 = vst.msk [vmem:[%s15552_s27 + $0x1c0] sm:$0xff] %vm10123_vm4, %v12115_v0 }
 0xade   : > { %v12119_v11 = vpop.eup %12118  ;;  %10183 = vst.msk [vmem:[%s15552_s27 + $0x1d8] sm:$0xff] %vm10123_vm4, %v12117_v6 }
 0xadf   : > { %v12121_v19 = vpop.eup %12120  ;;  %10181 = vst.msk [vmem:[%s15552_s27 + $0x1c8] sm:$0xff] %vm10123_vm4, %v12119_v11 }
 0xae0   : > { %v12123_v38 = vpop.eup %12122  ;;  %v9993_v1 = vadd.f32 1.0, %v12121_v19 }
 0xae1   : > { %v12125_v51 = vpop.eup %12124  ;;  %v9991_v59 = vadd.f32 1.0, %v12123_v38 }
 0xae2   : > { %v12127_v23 = vpop.eup %12126  ;;  %12128 = vrcp.f32 %v9993_v1  ;;  %v9994_v28 = vadd.f32 1.0, %v12125_v51 }
 0xae3   : > { %12130 = vrcp.f32 %v9991_v59  ;;  %v9992_v56 = vadd.f32 1.0, %v12127_v23 }
 0xae4   : > { %12132 = vrcp.f32 %v9994_v28 }
 0xae5   : > { %12134 = vrcp.f32 %v9992_v56 }
 0xaec   : > { %v12129_v54 = vpop.eup %12128 }
 0xaed   : > { %v12131_v10 = vpop.eup %12130  ;;  %10186 = vst.msk [vmem:[%s15552_s27 + $0x1f0] sm:$0xff] %vm10123_vm4, %v12129_v54 }
 0xaee   : > { %v12133_v41 = vpop.eup %12132  ;;  %10184 = vst.msk [vmem:[%s15552_s27 + $0x1e0] sm:$0xff] %vm10123_vm4, %v12131_v10 }
 0xaef   : > { %v12135_v18 = vpop.eup %12134  ;;  %10187 = vst.msk [vmem:[%s15552_s27 + $0x1f8] sm:$0xff] %vm10123_vm4, %v12133_v41 }
 0xaf0   : > { %10185 = vst.msk [vmem:[%s15552_s27 + $0x1e8] sm:$0xff] %vm10123_vm4, %v12135_v18 }
 0xaf1 PF: > { %s27_s21 = sadd.s32 1, %s12143_s21  }
 0xaf2   : > { %p24_p4 = scmp.ge.s32.totalorder %s27_s21, 6  }
 0xaf4   :  { %26 = sbr.rel (!%p24_p4) target bundleno = 2 (0x2), region = 138 }

</bundles_post_ra>
